<compile_context>
chip_gen: v7x
topology: tpu7x:2x2x1
jax: 0.10.0
libtpu: 0.0.40
codegen_flags: <defaults>
</compile_context>

<pallas_src>
import jax
import jax.numpy as jnp
from jax import lax
from jax.experimental import pallas as pl
from jax.experimental.pallas import tpu as pltpu  # noqa: F401

# ---------------- configuration (small synthetic sizes) ----------------
B = 2          # batch_size
IN = 8         # inputDim
H = 32         # hiddenDim (num_layers = 1)
O = 8          # outputDim
N = 8          # memory rows
W = 8          # memory word width
R = 2          # number of read heads
T = 8          # fused timesteps per pallas_call
CTRL_IN = IN + R * W
# interface vector size, in the exact order of DNC.dimensions
XI = (W * R) + R + W + 1 + W + W + R + 1 + 1 + 3 * R   # 53
EPS = 1e-6
F32 = jnp.float32


def _align(x, a=8):
    return ((x + a - 1) // a) * a


# Padded / permuted controller-output layout used inside the kernel
# (grouped by activation, 8-lane-aligned groups, read_keys stored R-major).
OUT_VU = 0
OUT_RK = _align(O)                      # read keys, R-major (R*W)
OUT_WK = _align(OUT_RK + R * W)         # write key (W)
OUT_WV = _align(OUT_WK + W)             # write vector (W)
OUT_SIG = _align(OUT_WV + W)            # sigmoid group
SIG_LEN = W + R + 2                     # erase | free_gates | alloc_gate | write_gate
OUT_SP = _align(OUT_SIG + SIG_LEN)      # softplus group
SP_LEN = R + 1                          # read_strengths | write_strength
OUT_RM = _align(OUT_SP + SP_LEN)        # read modes (3*R), mode-major
OUT_W = _align(OUT_RM + 3 * R, 128)     # pad to a full 128-lane MXU tile width


def _softplus(x):
    # numerically stable log(1 + exp(x)); oneplus(x) = 1 + softplus(x)
    return jnp.maximum(x, 0.0) + jnp.log1p(jnp.exp(-jnp.abs(x)))


def dnc_seq_kernel(
    # resident inputs
    x_ref,
    h0_ref, c0_ref, rv0_ref, M0_ref, u0_ref, L0_ref, p0_ref, ww0_ref, wr0_ref,
    wlstm_ref, blstm_ref, wout_ref, bout_ref, wread_ref, L0T_ref,
    # resident outputs
    y_ref, h_ref, c_ref, rv_ref, M_ref, u_ref, L_ref, p_ref, ww_ref, wr_ref,
):
    n_steps = x_ref.shape[0]

    # ---- load parameters / hoist constants once (outside the time loop) ----
    w_lstm = wlstm_ref[...]
    b_lstm = blstm_ref[...]
    w_out = wout_ref[...]
    b_out = bout_ref[...]
    w_read = wread_ref[...]

    iota_i = lax.broadcasted_iota(jnp.int32, (N, N), 0)
    iota_j = lax.broadcasted_iota(jnp.int32, (N, N), 1)
    tie_before = (iota_j < iota_i)[None, :, :]              # (1, N, N)
    not_diag = (iota_i != iota_j).astype(F32)[None, :, :]   # (1, N, N)

    carry = (h0_ref[...], c0_ref[...], rv0_ref[...], M0_ref[...], u0_ref[...],
             L0_ref[...], L0T_ref[...], p0_ref[...], ww0_ref[...], wr0_ref[...])

    def step(t, carry):
        (h_prev, c_prev, rv_prev, M_prev, u_prev,
         L_prev, LT_prev, p_prev, ww_prev, wr_prev) = carry

        x_t = x_ref[t]                                      # (B, IN)

        # ---------- controller (single-layer LSTM, fused matmul) ----------
        rv_flat = rv_prev.reshape(B, R * W)
        ctrl_in = jnp.concatenate([x_t, rv_flat, h_prev], axis=1)
        gates = jnp.dot(ctrl_in, w_lstm, preferred_element_type=F32) + b_lstm
        sig3 = jax.nn.sigmoid(gates[:, :3 * H])             # columns [i|f|o]
        i_g = sig3[:, 0:H]
        f_g = sig3[:, H:2 * H]
        o_g = sig3[:, 2 * H:3 * H]
        g_g = jnp.tanh(gates[:, 3 * H:4 * H])
        c_new = f_g * c_prev + i_g * g_g
        h_new = o_g * jnp.tanh(c_new)

        out = jnp.dot(h_new, w_out, preferred_element_type=F32) + b_out  # (B, OUT_W)

        # ---------- interface decomposition (pre-permuted / aligned) ----------
        vu = out[:, OUT_VU:OUT_VU + O]
        read_keys = out[:, OUT_RK:OUT_RK + R * W].reshape(B, R, W)
        write_key = out[:, OUT_WK:OUT_WK + W]
        write_vec = out[:, OUT_WV:OUT_WV + W]
        sig = jax.nn.sigmoid(out[:, OUT_SIG:OUT_SIG + SIG_LEN])
        erase = sig[:, 0:W]
        free_g = sig[:, W:W + R]
        alloc_g = sig[:, W + R:W + R + 1]
        write_g = sig[:, W + R + 1:W + R + 2]
        sp = _softplus(out[:, OUT_SP:OUT_SP + SP_LEN])
        read_str = 1.0 + sp[:, 0:R]
        write_str = 1.0 + sp[:, R:R + 1]
        # read modes (B,3,R), softmax over the mode axis
        m0 = out[:, OUT_RM + 0 * R:OUT_RM + 1 * R]
        m1 = out[:, OUT_RM + 1 * R:OUT_RM + 2 * R]
        m2 = out[:, OUT_RM + 2 * R:OUT_RM + 3 * R]
        mx = jnp.maximum(jnp.maximum(m0, m1), m2)
        e0 = jnp.exp(m0 - mx); e1 = jnp.exp(m1 - mx); e2 = jnp.exp(m2 - mx)
        inv_es = pl.reciprocal(e0 + e1 + e2, approx=True)
        pi_back = e0 * inv_es     # backward mode   (B, R)
        pi_cont = e1 * inv_es     # content mode
        pi_fwd = e2 * inv_es      # forward mode

        # ---------- retention / usage ----------
        retention = 1.0 - free_g[:, :, None] * wr_prev      # (B, R, N)
        psi = retention[:, 0, :]
        for r in range(1, R):
            psi = psi * retention[:, r, :]
        usage = (u_prev + ww_prev - u_prev * ww_prev) * psi  # (B, N)

        # ---------- allocation weighting (rank product, VPU + lane reduce) ----------
        u_i = usage[:, :, None]
        u_j = usage[:, None, :]
        before_f = ((u_j < u_i) | ((u_j == u_i) & tie_before)).astype(F32)
        log_u = jnp.log(jnp.maximum(usage, 1e-30))
        prod_smaller = jnp.exp(jnp.sum(before_f * log_u[:, None, :], axis=-1))
        alloc_w = (1.0 - usage) * prod_smaller               # (B, N)

        # ---------- write content weighting (cosine, rsqrt) ----------
        num_w = jnp.sum(write_key[:, None, :] * M_prev, axis=2)          # (B, N)
        M_sq_prev = jnp.sum(M_prev * M_prev, axis=2)                     # (B, N)
        k_sq_w = jnp.sum(write_key * write_key, axis=1, keepdims=True)   # (B, 1)
        sim_w = num_w * lax.rsqrt(M_sq_prev * k_sq_w + EPS)
        cw_logits = write_str * sim_w
        cw_e = jnp.exp(cw_logits - jnp.max(cw_logits, axis=1, keepdims=True))
        cw = cw_e * pl.reciprocal(jnp.sum(cw_e, axis=1, keepdims=True), approx=True)

        # ---------- write weighting & memory write ----------
        ww = write_g * (alloc_g * alloc_w + (1.0 - alloc_g) * cw)        # (B, N)
        ww_col = ww[:, :, None]
        M_new = (M_prev * (1.0 - ww_col * erase[:, None, :])
                 + ww_col * write_vec[:, None, :])                       # (B, N, W)

        # ---------- temporal linkage (carry L and L^T) ----------
        one_minus = 1.0 - ww[:, :, None] - ww[:, None, :]                # symmetric
        L_new = (one_minus * L_prev + ww[:, :, None] * p_prev[:, None, :]) * not_diag
        LT_new = (one_minus * LT_prev + ww[:, None, :] * p_prev[:, :, None]) * not_diag
        p_new = (1.0 - jnp.sum(ww, axis=1, keepdims=True)) * p_prev + ww

        # ---------- read weighting: fused forward/backward contraction ----------
        LL = jnp.concatenate([LT_new, L_new], axis=2)                    # (B, N, 2N)
        fb = jnp.einsum('brn,bnk->brk', wr_prev, LL, preferred_element_type=F32)
        fwd_w = fb[:, :, :N]                                             # wr @ L^T
        bwd_w = fb[:, :, N:]                                             # wr @ L

        num_r = jnp.einsum('brw,bnw->brn', read_keys, M_new,
                           preferred_element_type=F32)                   # (B, R, N)
        M_sq = jnp.sum(M_new * M_new, axis=2)                            # (B, N)
        k_sq_r = jnp.sum(read_keys * read_keys, axis=2)                  # (B, R)
        sim_r = num_r * lax.rsqrt(M_sq[:, None, :] * k_sq_r[:, :, None] + EPS)
        cr_logits = read_str[:, :, None] * sim_r
        cr_e = jnp.exp(cr_logits - jnp.max(cr_logits, axis=2, keepdims=True))
        cr = cr_e * pl.reciprocal(jnp.sum(cr_e, axis=2, keepdims=True), approx=True)

        wr_new = (pi_back[:, :, None] * bwd_w
                  + pi_cont[:, :, None] * cr
                  + pi_fwd[:, :, None] * fwd_w)                          # (B, R, N)

        # ---------- read vectors & output ----------
        rv_new = jnp.einsum('brn,bnw->brw', wr_new, M_new,
                            preferred_element_type=F32)                  # (B, R, W)
        read_adaptive = jnp.dot(rv_new.reshape(B, R * W), w_read,
                                preferred_element_type=F32)
        y_ref[t] = vu + read_adaptive

        return (h_new, c_new, rv_new, M_new, usage,
                L_new, LT_new, p_new, ww, wr_new)

    # fully-unrolled time loop (state stays in vregs; no per-step VMEM round trips)
    for t in range(n_steps):
        carry = step(t, carry)

    (h_f, c_f, rv_f, M_f, u_f, L_f, _LT_f, p_f, ww_f, wr_f) = carry
    h_ref[...] = h_f
    c_ref[...] = c_f
    rv_ref[...] = rv_f
    M_ref[...] = M_f
    u_ref[...] = u_f
    L_ref[...] = L_f
    p_ref[...] = p_f
    ww_ref[...] = ww_f
    wr_ref[...] = wr_f


def _build_out_permutation():
    """Map original [vu | xi] columns (order of DNC.dimensions) to the padded,
    activation-grouped, aligned layout used inside the kernel."""
    new_cols, old_cols = [], []
    for k in range(O):                                   # vu
        new_cols.append(OUT_VU + k); old_cols.append(k)
    xi0 = O
    o_rk = xi0                    # read keys (W*R), module layout (B, W, R)
    o_rs = o_rk + W * R           # read strengths (R)
    o_wk = o_rs + R               # write key (W)
    o_ws = o_wk + W               # write strength (1)
    o_ev = o_ws + 1               # erase vector (W)
    o_wv = o_ev + W               # write vector (W)
    o_fg = o_wv + W               # free gates (R)
    o_ag = o_fg + R               # allocation gate (1)
    o_wg = o_ag + 1               # write gate (1)
    o_rm = o_wg + 1               # read modes (3*R)
    # read keys: (B, W, R) column order -> kernel R-major (B, R, W)
    for r in range(R):
        for w in range(W):
            new_cols.append(OUT_RK + r * W + w); old_cols.append(o_rk + w * R + r)
    for k in range(W):
        new_cols.append(OUT_WK + k); old_cols.append(o_wk + k)
    for k in range(W):
        new_cols.append(OUT_WV + k); old_cols.append(o_wv + k)
    # sigmoid group: erase | free_gates | allocation_gate | write_gate
    for k in range(W):
        new_cols.append(OUT_SIG + k); old_cols.append(o_ev + k)
    for k in range(R):
        new_cols.append(OUT_SIG + W + k); old_cols.append(o_fg + k)
    new_cols.append(OUT_SIG + W + R); old_cols.append(o_ag)
    new_cols.append(OUT_SIG + W + R + 1); old_cols.append(o_wg)
    # softplus group: read_strengths | write_strength
    for k in range(R):
        new_cols.append(OUT_SP + k); old_cols.append(o_rs + k)
    new_cols.append(OUT_SP + R); old_cols.append(o_ws)
    # read modes, kept mode-major (3, R)
    for k in range(3 * R):
        new_cols.append(OUT_RM + k); old_cols.append(o_rm + k)
    return new_cols, old_cols


def make_params(key):
    ks = jax.random.split(key, 8)
    s = 0.1
    Wih = jax.random.normal(ks[0], (CTRL_IN, 4 * H), F32) * s   # gate order [i,f,g,o]
    Whh = jax.random.normal(ks[1], (H, 4 * H), F32) * s
    b_lstm = jax.random.normal(ks[2], (1, 4 * H), F32) * s
    Wy = jax.random.normal(ks[3], (H, O), F32) * s
    by = jax.random.normal(ks[4], (1, O), F32) * s
    Wxi = jax.random.normal(ks[5], (H, XI), F32) * s
    bxi = jax.random.normal(ks[6], (1, XI), F32) * s
    Wread = jax.random.normal(ks[7], (R * W, O), F32) * s       # read_l (no bias)
    return (Wih, Whh, b_lstm, Wy, by, Wxi, bxi, Wread)


@jax.jit
def dnc_forward_seq(x_seq, hidden_state, memory_state, params):
    """Runs T DNC timesteps (equivalent to T sequential DNC.forward calls)."""
    n_steps = x_seq.shape[0]
    h0, c0 = hidden_state
    rv0, M0, u0, L0, p0, ww0, wr0 = memory_state
    Wih, Whh, b_lstm, Wy, by, Wxi, bxi, Wread = params

    # ---- one-time parameter layout plumbing (outside the kernel) ----
    # LSTM gate columns: PyTorch [i,f,g,o] -> kernel [i,f,o,g] (sigmoid on 3H block)
    gate_perm = jnp.concatenate([jnp.arange(0, 2 * H),
                                 jnp.arange(3 * H, 4 * H),
                                 jnp.arange(2 * H, 3 * H)])
    W_lstm = jnp.concatenate([Wih, Whh], axis=0)[:, gate_perm]   # (CTRL_IN+H, 4H)
    b_lstm_p = b_lstm[:, gate_perm]

    new_cols, old_cols = _build_out_permutation()
    new_idx = jnp.asarray(new_cols, jnp.int32)
    old_idx = jnp.asarray(old_cols, jnp.int32)
    W_out_raw = jnp.concatenate([Wy, Wxi], axis=1)               # (H, O+XI)
    b_out_raw = jnp.concatenate([by, bxi], axis=1)               # (1, O+XI)
    W_out = jnp.zeros((H, OUT_W), F32).at[:, new_idx].set(W_out_raw[:, old_idx])
    b_out = jnp.zeros((1, OUT_W), F32).at[:, new_idx].set(b_out_raw[:, old_idx])

    # kernel-internal layouts avoid per-step transposes
    rv0_rw = jnp.transpose(rv0, (0, 2, 1))                       # (B, R, W)
    wr0_rn = jnp.transpose(wr0, (0, 2, 1))                       # (B, R, N)
    L0_T = jnp.transpose(L0, (0, 2, 1))                          # (B, N, N)

    def full(shape):
        nd = len(shape)
        return pl.BlockSpec(shape, lambda *_, nd=nd: (0,) * nd)

    in_specs = [
        full((n_steps, B, IN)),                                  # x, resident
        full((B, H)), full((B, H)), full((B, R, W)), full((B, N, W)),
        full((B, N)), full((B, N, N)), full((B, N)), full((B, N)), full((B, R, N)),
        full((CTRL_IN + H, 4 * H)), full((1, 4 * H)),
        full((H, OUT_W)), full((1, OUT_W)), full((R * W, O)),
        full((B, N, N)),                                         # L0^T
    ]
    out_specs = (
        full((n_steps, B, O)),                                   # y, resident
        full((B, H)), full((B, H)), full((B, R, W)), full((B, N, W)),
        full((B, N)), full((B, N, N)), full((B, N)), full((B, N)), full((B, R, N)),
    )
    out_shapes = (
        jax.ShapeDtypeStruct((n_steps, B, O), F32),     # y for all timesteps
        jax.ShapeDtypeStruct((B, H), F32),              # h
        jax.ShapeDtypeStruct((B, H), F32),              # c
        jax.ShapeDtypeStruct((B, R, W), F32),           # read vectors (internal layout)
        jax.ShapeDtypeStruct((B, N, W), F32),           # memory matrix
        jax.ShapeDtypeStruct((B, N), F32),              # usage
        jax.ShapeDtypeStruct((B, N, N), F32),           # link matrix
        jax.ShapeDtypeStruct((B, N), F32),              # precedence
        jax.ShapeDtypeStruct((B, N), F32),              # write weights
        jax.ShapeDtypeStruct((B, R, N), F32),           # read weights (internal layout)
    )

    outs = pl.pallas_call(
        dnc_seq_kernel,
        out_shape=out_shapes,
        in_specs=in_specs,
        out_specs=out_specs,
        input_output_aliases={i: i for i in range(1, 10)},       # state updated in place
    )(x_seq, h0, c0, rv0_rw, M0, u0, L0, p0, ww0, wr0_rn,
      W_lstm, b_lstm_p, W_out, b_out, Wread, L0_T)

    (y_seq, h_new, c_new, rv_rw, M_new, u_new,
     L_new, p_new, ww_new, wr_rn) = outs
    rv_new = jnp.transpose(rv_rw, (0, 2, 1))     # back to module layout (B, W, R)
    wr_new = jnp.transpose(wr_rn, (0, 2, 1))     # (B, N, R)
    new_hidden = (h_new, c_new)
    new_memory = [rv_new, M_new, u_new, L_new, p_new, ww_new, wr_new]
    return y_seq, new_hidden, new_memory


if __name__ == "__main__":
    key = jax.random.PRNGKey(0)
    k_param, k_x, k_h, k_c, k_mem = jax.random.split(key, 5)

    params = make_params(k_param)
    x_seq = jax.random.normal(k_x, (T, B, IN), F32)
    h0 = jax.random.normal(k_h, (B, H), F32) * 0.1
    c0 = jax.random.normal(k_c, (B, H), F32) * 0.1

    km = jax.random.split(k_mem, 6)
    rv0 = jax.random.normal(km[0], (B, W, R), F32) * 0.1
    M0 = jax.random.normal(km[1], (B, N, W), F32) * 0.1
    u0 = jax.nn.sigmoid(jax.random.normal(km[2], (B, N), F32))
    wr0 = jax.nn.softmax(jax.random.normal(km[3], (B, N, R), F32), axis=1)
    ww0 = jax.nn.softmax(jax.random.normal(km[4], (B, N), F32), axis=1)
    p0 = jax.nn.softmax(jax.random.normal(km[5], (B, N), F32), axis=1)
    L0 = jnp.zeros((B, N, N), F32)
    memory_state = [rv0, M0, u0, L0, p0, ww0, wr0]

    y_seq, hidden_state, memory_state = dnc_forward_seq(
        x_seq, (h0, c0), memory_state, params)
    jax.block_until_ready((y_seq, hidden_state, memory_state))

    assert y_seq.shape == (T, B, O)
    assert hidden_state[0].shape == (B, H) and hidden_state[1].shape == (B, H)
    assert memory_state[0].shape == (B, W, R)
    assert memory_state[1].shape == (B, N, W)
    assert memory_state[6].shape == (B, N, R)
    assert bool(jnp.all(jnp.isfinite(y_seq)))
    print("KERNEL_OK")
</pallas_src>

<mosaic_0001>
module attributes {stable_mosaic.version = 11 : i64} {
  func.func @dnc_seq_kernel(%arg0: memref<8x2x8xf32, #tpu.memory_space<vmem>>, %arg1: memref<2x32xf32, #tpu.memory_space<vmem>>, %arg2: memref<2x32xf32, #tpu.memory_space<vmem>>, %arg3: memref<2x2x8xf32, #tpu.memory_space<vmem>>, %arg4: memref<2x8x8xf32, #tpu.memory_space<vmem>>, %arg5: memref<2x8xf32, #tpu.memory_space<vmem>>, %arg6: memref<2x8x8xf32, #tpu.memory_space<vmem>>, %arg7: memref<2x8xf32, #tpu.memory_space<vmem>>, %arg8: memref<2x8xf32, #tpu.memory_space<vmem>>, %arg9: memref<2x2x8xf32, #tpu.memory_space<vmem>>, %arg10: memref<56x128xf32, #tpu.memory_space<vmem>>, %arg11: memref<1x128xf32, #tpu.memory_space<vmem>>, %arg12: memref<32x128xf32, #tpu.memory_space<vmem>>, %arg13: memref<1x128xf32, #tpu.memory_space<vmem>>, %arg14: memref<16x8xf32, #tpu.memory_space<vmem>>, %arg15: memref<2x8x8xf32, #tpu.memory_space<vmem>>, %arg16: memref<8x2x8xf32, #tpu.memory_space<vmem>>, %arg17: memref<2x32xf32, #tpu.memory_space<vmem>>, %arg18: memref<2x32xf32, #tpu.memory_space<vmem>>, %arg19: memref<2x2x8xf32, #tpu.memory_space<vmem>>, %arg20: memref<2x8x8xf32, #tpu.memory_space<vmem>>, %arg21: memref<2x8xf32, #tpu.memory_space<vmem>>, %arg22: memref<2x8x8xf32, #tpu.memory_space<vmem>>, %arg23: memref<2x8xf32, #tpu.memory_space<vmem>>, %arg24: memref<2x8xf32, #tpu.memory_space<vmem>>, %arg25: memref<2x2x8xf32, #tpu.memory_space<vmem>>) attributes {dimension_semantics = [], scalar_prefetch = 0 : i64, scratch_operands = 0 : i64, tpu.core_type = #tpu.core_type<tc>} {
    %c0 = arith.constant 0 : index
    %c0_0 = arith.constant 0 : index
    %0 = vector.load %arg10[%c0, %c0_0] : memref<56x128xf32, #tpu.memory_space<vmem>>, vector<56x128xf32>
    %c0_1 = arith.constant 0 : index
    %c0_2 = arith.constant 0 : index
    %1 = vector.load %arg11[%c0_1, %c0_2] : memref<1x128xf32, #tpu.memory_space<vmem>>, vector<1x128xf32>
    %c0_3 = arith.constant 0 : index
    %c0_4 = arith.constant 0 : index
    %2 = vector.load %arg12[%c0_3, %c0_4] : memref<32x128xf32, #tpu.memory_space<vmem>>, vector<32x128xf32>
    %c0_5 = arith.constant 0 : index
    %c0_6 = arith.constant 0 : index
    %3 = vector.load %arg13[%c0_5, %c0_6] : memref<1x128xf32, #tpu.memory_space<vmem>>, vector<1x128xf32>
    %c0_7 = arith.constant 0 : index
    %c0_8 = arith.constant 0 : index
    %4 = vector.load %arg14[%c0_7, %c0_8] : memref<16x8xf32, #tpu.memory_space<vmem>>, vector<16x8xf32>
    %5 = tpu.iota {dimensions = array<i32: 0>} : vector<8x8xi32>
    %6 = tpu.iota {dimensions = array<i32: 1>} : vector<8x8xi32>
    %7 = arith.cmpi slt, %6, %5 : vector<8x8xi32>
    %8 = vector.shape_cast %7 : vector<8x8xi1> to vector<1x8x8xi1>
    %9 = arith.cmpi ne, %5, %6 : vector<8x8xi32>
    %10 = arith.extui %9 : vector<8x8xi1> to vector<8x8xi32>
    %11 = arith.sitofp %10 : vector<8x8xi32> to vector<8x8xf32>
    %12 = vector.shape_cast %11 : vector<8x8xf32> to vector<1x8x8xf32>
    %c0_9 = arith.constant 0 : index
    %c0_10 = arith.constant 0 : index
    %13 = vector.load %arg1[%c0_9, %c0_10] : memref<2x32xf32, #tpu.memory_space<vmem>>, vector<2x32xf32>
    %c0_11 = arith.constant 0 : index
    %c0_12 = arith.constant 0 : index
    %14 = vector.load %arg2[%c0_11, %c0_12] : memref<2x32xf32, #tpu.memory_space<vmem>>, vector<2x32xf32>
    %c0_13 = arith.constant 0 : index
    %c0_14 = arith.constant 0 : index
    %c0_15 = arith.constant 0 : index
    %15 = vector.load %arg3[%c0_13, %c0_14, %c0_15] : memref<2x2x8xf32, #tpu.memory_space<vmem>>, vector<2x2x8xf32>
    %c0_16 = arith.constant 0 : index
    %c0_17 = arith.constant 0 : index
    %c0_18 = arith.constant 0 : index
    %16 = vector.load %arg4[%c0_16, %c0_17, %c0_18] : memref<2x8x8xf32, #tpu.memory_space<vmem>>, vector<2x8x8xf32>
    %c0_19 = arith.constant 0 : index
    %c0_20 = arith.constant 0 : index
    %17 = vector.load %arg5[%c0_19, %c0_20] : memref<2x8xf32, #tpu.memory_space<vmem>>, vector<2x8xf32>
    %c0_21 = arith.constant 0 : index
    %c0_22 = arith.constant 0 : index
    %c0_23 = arith.constant 0 : index
    %18 = vector.load %arg6[%c0_21, %c0_22, %c0_23] : memref<2x8x8xf32, #tpu.memory_space<vmem>>, vector<2x8x8xf32>
    %c0_24 = arith.constant 0 : index
    %c0_25 = arith.constant 0 : index
    %c0_26 = arith.constant 0 : index
    %19 = vector.load %arg15[%c0_24, %c0_25, %c0_26] : memref<2x8x8xf32, #tpu.memory_space<vmem>>, vector<2x8x8xf32>
    %c0_27 = arith.constant 0 : index
    %c0_28 = arith.constant 0 : index
    %20 = vector.load %arg7[%c0_27, %c0_28] : memref<2x8xf32, #tpu.memory_space<vmem>>, vector<2x8xf32>
    %c0_29 = arith.constant 0 : index
    %c0_30 = arith.constant 0 : index
    %21 = vector.load %arg8[%c0_29, %c0_30] : memref<2x8xf32, #tpu.memory_space<vmem>>, vector<2x8xf32>
    %c0_31 = arith.constant 0 : index
    %c0_32 = arith.constant 0 : index
    %c0_33 = arith.constant 0 : index
    %22 = vector.load %arg9[%c0_31, %c0_32, %c0_33] : memref<2x2x8xf32, #tpu.memory_space<vmem>>, vector<2x2x8xf32>
    %c0_34 = arith.constant 0 : index
    %c0_35 = arith.constant 0 : index
    %c0_36 = arith.constant 0 : index
    %23 = vector.load %arg0[%c0_34, %c0_35, %c0_36] : memref<8x2x8xf32, #tpu.memory_space<vmem>>, vector<1x2x8xf32>
    %24 = vector.shape_cast %23 : vector<1x2x8xf32> to vector<2x8xf32>
    %25 = vector.shape_cast %15 : vector<2x2x8xf32> to vector<2x16xf32>
    %26 = tpu.concatenate %24, %25, %13 in 1 : vector<2x8xf32>, vector<2x16xf32>, vector<2x32xf32> -> vector<2x56xf32>
    %cst = arith.constant dense<0.000000e+00> : vector<2x128xf32>
    %27 = tpu.matmul %26, %0, %cst {dimension_numbers = #tpu.dot_dimension_numbers<[1], [0], [0], [1], [0, 0, 1, 1], [], []>} : vector<2x56xf32>, vector<56x128xf32>, vector<2x128xf32> -> vector<2x128xf32>
    %28 = vector.broadcast %1 : vector<1x128xf32> to vector<2x128xf32>
    %29 = arith.addf %27, %28 : vector<2x128xf32>
    %30 = vector.extract_strided_slice %29 {offsets = [0, 0], sizes = [2, 96], strides = [1, 1]} : vector<2x128xf32> to vector<2x96xf32>
    %31 = arith.negf %30 : vector<2x96xf32>
    %32 = math.exp %31 : vector<2x96xf32>
    %cst_37 = arith.constant 1.000000e+00 : f32
    %33 = vector.broadcast %cst_37 : f32 to vector<2x96xf32>
    %34 = arith.addf %33, %32 : vector<2x96xf32>
    %35 = arith.divf %33, %34 : vector<2x96xf32>
    %36 = vector.extract_strided_slice %35 {offsets = [0, 0], sizes = [2, 32], strides = [1, 1]} : vector<2x96xf32> to vector<2x32xf32>
    %37 = vector.extract_strided_slice %35 {offsets = [0, 32], sizes = [2, 32], strides = [1, 1]} : vector<2x96xf32> to vector<2x32xf32>
    %38 = vector.extract_strided_slice %35 {offsets = [0, 64], sizes = [2, 32], strides = [1, 1]} : vector<2x96xf32> to vector<2x32xf32>
    %39 = vector.extract_strided_slice %29 {offsets = [0, 96], sizes = [2, 32], strides = [1, 1]} : vector<2x128xf32> to vector<2x32xf32>
    %40 = math.tanh %39 : vector<2x32xf32>
    %41 = arith.mulf %37, %14 : vector<2x32xf32>
    %42 = arith.mulf %36, %40 : vector<2x32xf32>
    %43 = arith.addf %41, %42 : vector<2x32xf32>
    %44 = math.tanh %43 : vector<2x32xf32>
    %45 = arith.mulf %38, %44 : vector<2x32xf32>
    %cst_38 = arith.constant dense<0.000000e+00> : vector<2x128xf32>
    %46 = tpu.matmul %45, %2, %cst_38 {dimension_numbers = #tpu.dot_dimension_numbers<[1], [0], [0], [1], [0, 0, 1, 1], [], []>} : vector<2x32xf32>, vector<32x128xf32>, vector<2x128xf32> -> vector<2x128xf32>
    %47 = vector.broadcast %3 : vector<1x128xf32> to vector<2x128xf32>
    %48 = arith.addf %46, %47 : vector<2x128xf32>
    %49 = vector.extract_strided_slice %48 {offsets = [0, 0], sizes = [2, 8], strides = [1, 1]} : vector<2x128xf32> to vector<2x8xf32>
    %50 = vector.extract_strided_slice %48 {offsets = [0, 8], sizes = [2, 16], strides = [1, 1]} : vector<2x128xf32> to vector<2x16xf32>
    %51 = vector.shape_cast %50 : vector<2x16xf32> to vector<2x2x8xf32>
    %52 = vector.extract_strided_slice %48 {offsets = [0, 24], sizes = [2, 8], strides = [1, 1]} : vector<2x128xf32> to vector<2x8xf32>
    %53 = vector.extract_strided_slice %48 {offsets = [0, 32], sizes = [2, 8], strides = [1, 1]} : vector<2x128xf32> to vector<2x8xf32>
    %54 = vector.extract_strided_slice %48 {offsets = [0, 40], sizes = [2, 12], strides = [1, 1]} : vector<2x128xf32> to vector<2x12xf32>
    %55 = arith.negf %54 : vector<2x12xf32>
    %56 = math.exp %55 : vector<2x12xf32>
    %cst_39 = arith.constant 1.000000e+00 : f32
    %57 = vector.broadcast %cst_39 : f32 to vector<2x12xf32>
    %58 = arith.addf %57, %56 : vector<2x12xf32>
    %59 = arith.divf %57, %58 : vector<2x12xf32>
    %60 = vector.extract_strided_slice %59 {offsets = [0, 0], sizes = [2, 8], strides = [1, 1]} : vector<2x12xf32> to vector<2x8xf32>
    %61 = vector.extract_strided_slice %59 {offsets = [0, 8], sizes = [2, 2], strides = [1, 1]} : vector<2x12xf32> to vector<2x2xf32>
    %62 = vector.extract_strided_slice %59 {offsets = [0, 10], sizes = [2, 1], strides = [1, 1]} : vector<2x12xf32> to vector<2x1xf32>
    %63 = vector.extract_strided_slice %59 {offsets = [0, 11], sizes = [2, 1], strides = [1, 1]} : vector<2x12xf32> to vector<2x1xf32>
    %64 = vector.extract_strided_slice %48 {offsets = [0, 56], sizes = [2, 3], strides = [1, 1]} : vector<2x128xf32> to vector<2x3xf32>
    %cst_40 = arith.constant 0.000000e+00 : f32
    %65 = vector.broadcast %cst_40 : f32 to vector<2x3xf32>
    %66 = arith.maximumf %64, %65 : vector<2x3xf32>
    %67 = math.absf %64 : vector<2x3xf32>
    %cst_41 = arith.constant 0.000000e+00 : f32
    %68 = vector.broadcast %cst_41 : f32 to vector<2x3xf32>
    %69 = arith.subf %68, %67 : vector<2x3xf32>
    %70 = math.exp %69 : vector<2x3xf32>
    %71 = math.log1p %70 : vector<2x3xf32>
    %72 = arith.addf %66, %71 : vector<2x3xf32>
    %73 = vector.extract_strided_slice %72 {offsets = [0, 0], sizes = [2, 2], strides = [1, 1]} : vector<2x3xf32> to vector<2x2xf32>
    %cst_42 = arith.constant 1.000000e+00 : f32
    %74 = vector.broadcast %cst_42 : f32 to vector<2x2xf32>
    %75 = arith.addf %74, %73 : vector<2x2xf32>
    %76 = vector.extract_strided_slice %72 {offsets = [0, 2], sizes = [2, 1], strides = [1, 1]} : vector<2x3xf32> to vector<2x1xf32>
    %cst_43 = arith.constant 1.000000e+00 : f32
    %77 = vector.broadcast %cst_43 : f32 to vector<2x1xf32>
    %78 = arith.addf %77, %76 : vector<2x1xf32>
    %79 = vector.extract_strided_slice %48 {offsets = [0, 64], sizes = [2, 2], strides = [1, 1]} : vector<2x128xf32> to vector<2x2xf32>
    %80 = vector.extract_strided_slice %48 {offsets = [0, 66], sizes = [2, 2], strides = [1, 1]} : vector<2x128xf32> to vector<2x2xf32>
    %81 = vector.extract_strided_slice %48 {offsets = [0, 68], sizes = [2, 2], strides = [1, 1]} : vector<2x128xf32> to vector<2x2xf32>
    %82 = arith.maximumf %79, %80 : vector<2x2xf32>
    %83 = arith.maximumf %82, %81 : vector<2x2xf32>
    %84 = arith.subf %79, %83 : vector<2x2xf32>
    %85 = math.exp %84 : vector<2x2xf32>
    %86 = arith.subf %80, %83 : vector<2x2xf32>
    %87 = math.exp %86 : vector<2x2xf32>
    %88 = arith.subf %81, %83 : vector<2x2xf32>
    %89 = math.exp %88 : vector<2x2xf32>
    %90 = arith.addf %85, %87 : vector<2x2xf32>
    %91 = arith.addf %90, %89 : vector<2x2xf32>
    %92 = tpu.reciprocal %91 {approx = true} : vector<2x2xf32> -> vector<2x2xf32>
    %93 = arith.mulf %85, %92 : vector<2x2xf32>
    %94 = arith.mulf %87, %92 : vector<2x2xf32>
    %95 = arith.mulf %89, %92 : vector<2x2xf32>
    %96 = vector.shape_cast %61 : vector<2x2xf32> to vector<2x2x1xf32>
    %97 = vector.broadcast %96 : vector<2x2x1xf32> to vector<2x2x8xf32>
    %98 = arith.mulf %97, %22 : vector<2x2x8xf32>
    %cst_44 = arith.constant 1.000000e+00 : f32
    %99 = vector.broadcast %cst_44 : f32 to vector<2x2x8xf32>
    %100 = arith.subf %99, %98 : vector<2x2x8xf32>
    %101 = vector.extract_strided_slice %100 {offsets = [0, 0, 0], sizes = [2, 1, 8], strides = [1, 1, 1]} : vector<2x2x8xf32> to vector<2x1x8xf32>
    %102 = vector.shape_cast %101 : vector<2x1x8xf32> to vector<2x8xf32>
    %103 = vector.extract_strided_slice %100 {offsets = [0, 1, 0], sizes = [2, 1, 8], strides = [1, 1, 1]} : vector<2x2x8xf32> to vector<2x1x8xf32>
    %104 = vector.shape_cast %103 : vector<2x1x8xf32> to vector<2x8xf32>
    %105 = arith.mulf %102, %104 : vector<2x8xf32>
    %106 = arith.addf %17, %21 : vector<2x8xf32>
    %107 = arith.mulf %17, %21 : vector<2x8xf32>
    %108 = arith.subf %106, %107 : vector<2x8xf32>
    %109 = arith.mulf %108, %105 : vector<2x8xf32>
    %110 = vector.shape_cast %109 : vector<2x8xf32> to vector<2x8x1xf32>
    %111 = vector.shape_cast %109 : vector<2x8xf32> to vector<2x1x8xf32>
    %112 = vector.broadcast %111 : vector<2x1x8xf32> to vector<2x8x8xf32>
    %113 = vector.broadcast %110 : vector<2x8x1xf32> to vector<2x8x8xf32>
    %114 = arith.cmpf olt, %112, %113 : vector<2x8x8xf32>
    %115 = vector.broadcast %111 : vector<2x1x8xf32> to vector<2x8x8xf32>
    %116 = vector.broadcast %110 : vector<2x8x1xf32> to vector<2x8x8xf32>
    %117 = arith.cmpf oeq, %115, %116 : vector<2x8x8xf32>
    %118 = vector.broadcast %8 : vector<1x8x8xi1> to vector<2x8x8xi1>
    %119 = arith.andi %117, %118 : vector<2x8x8xi1>
    %120 = arith.ori %114, %119 : vector<2x8x8xi1>
    %121 = arith.extui %120 : vector<2x8x8xi1> to vector<2x8x8xi32>
    %122 = arith.sitofp %121 : vector<2x8x8xi32> to vector<2x8x8xf32>
    %cst_45 = arith.constant 1.000000e-30 : f32
    %123 = vector.broadcast %cst_45 : f32 to vector<2x8xf32>
    %124 = arith.maximumf %109, %123 : vector<2x8xf32>
    %125 = math.log %124 : vector<2x8xf32>
    %126 = vector.shape_cast %125 : vector<2x8xf32> to vector<2x1x8xf32>
    %127 = vector.broadcast %126 : vector<2x1x8xf32> to vector<2x8x8xf32>
    %128 = arith.mulf %122, %127 : vector<2x8x8xf32>
    %cst_46 = arith.constant dense<0.000000e+00> : vector<2x8xf32>
    %129 = vector.multi_reduction <add>, %128, %cst_46 [2] : vector<2x8x8xf32> to vector<2x8xf32>
    %130 = math.exp %129 : vector<2x8xf32>
    %cst_47 = arith.constant 1.000000e+00 : f32
    %131 = vector.broadcast %cst_47 : f32 to vector<2x8xf32>
    %132 = arith.subf %131, %109 : vector<2x8xf32>
    %133 = arith.mulf %132, %130 : vector<2x8xf32>
    %134 = vector.shape_cast %52 : vector<2x8xf32> to vector<2x1x8xf32>
    %135 = vector.broadcast %134 : vector<2x1x8xf32> to vector<2x8x8xf32>
    %136 = arith.mulf %135, %16 : vector<2x8x8xf32>
    %cst_48 = arith.constant dense<0.000000e+00> : vector<2x8xf32>
    %137 = vector.multi_reduction <add>, %136, %cst_48 [2] : vector<2x8x8xf32> to vector<2x8xf32>
    %138 = arith.mulf %16, %16 : vector<2x8x8xf32>
    %cst_49 = arith.constant dense<0.000000e+00> : vector<2x8xf32>
    %139 = vector.multi_reduction <add>, %138, %cst_49 [2] : vector<2x8x8xf32> to vector<2x8xf32>
    %140 = arith.mulf %52, %52 : vector<2x8xf32>
    %cst_50 = arith.constant dense<0.000000e+00> : vector<2xf32>
    %141 = vector.multi_reduction <add>, %140, %cst_50 [1] : vector<2x8xf32> to vector<2xf32>
    %142 = vector.shape_cast %141 : vector<2xf32> to vector<2x1xf32>
    %143 = vector.broadcast %142 : vector<2x1xf32> to vector<2x8xf32>
    %144 = arith.mulf %139, %143 : vector<2x8xf32>
    %cst_51 = arith.constant 9.99999997E-7 : f32
    %145 = vector.broadcast %cst_51 : f32 to vector<2x8xf32>
    %146 = arith.addf %144, %145 : vector<2x8xf32>
    %147 = math.rsqrt %146 : vector<2x8xf32>
    %148 = arith.mulf %137, %147 : vector<2x8xf32>
    %149 = vector.broadcast %78 : vector<2x1xf32> to vector<2x8xf32>
    %150 = arith.mulf %149, %148 : vector<2x8xf32>
    %cst_52 = arith.constant dense<0xFF800000> : vector<2xf32>
    %151 = vector.multi_reduction <maximumf>, %150, %cst_52 [1] : vector<2x8xf32> to vector<2xf32>
    %152 = vector.shape_cast %151 : vector<2xf32> to vector<2x1xf32>
    %153 = vector.broadcast %152 : vector<2x1xf32> to vector<2x8xf32>
    %154 = arith.subf %150, %153 : vector<2x8xf32>
    %155 = math.exp %154 : vector<2x8xf32>
    %cst_53 = arith.constant dense<0.000000e+00> : vector<2xf32>
    %156 = vector.multi_reduction <add>, %155, %cst_53 [1] : vector<2x8xf32> to vector<2xf32>
    %157 = vector.shape_cast %156 : vector<2xf32> to vector<2x1xf32>
    %158 = tpu.reciprocal %157 {approx = true} : vector<2x1xf32> -> vector<2x1xf32>
    %159 = vector.broadcast %158 : vector<2x1xf32> to vector<2x8xf32>
    %160 = arith.mulf %155, %159 : vector<2x8xf32>
    %161 = vector.broadcast %62 : vector<2x1xf32> to vector<2x8xf32>
    %162 = arith.mulf %161, %133 : vector<2x8xf32>
    %cst_54 = arith.constant 1.000000e+00 : f32
    %163 = vector.broadcast %cst_54 : f32 to vector<2x1xf32>
    %164 = arith.subf %163, %62 : vector<2x1xf32>
    %165 = vector.broadcast %164 : vector<2x1xf32> to vector<2x8xf32>
    %166 = arith.mulf %165, %160 : vector<2x8xf32>
    %167 = arith.addf %162, %166 : vector<2x8xf32>
    %168 = vector.broadcast %63 : vector<2x1xf32> to vector<2x8xf32>
    %169 = arith.mulf %168, %167 : vector<2x8xf32>
    %170 = vector.shape_cast %169 : vector<2x8xf32> to vector<2x8x1xf32>
    %171 = vector.shape_cast %60 : vector<2x8xf32> to vector<2x1x8xf32>
    %172 = vector.broadcast %170 : vector<2x8x1xf32> to vector<2x8x8xf32>
    %173 = vector.broadcast %171 : vector<2x1x8xf32> to vector<2x8x8xf32>
    %174 = arith.mulf %172, %173 : vector<2x8x8xf32>
    %cst_55 = arith.constant 1.000000e+00 : f32
    %175 = vector.broadcast %cst_55 : f32 to vector<2x8x8xf32>
    %176 = arith.subf %175, %174 : vector<2x8x8xf32>
    %177 = arith.mulf %16, %176 : vector<2x8x8xf32>
    %178 = vector.shape_cast %53 : vector<2x8xf32> to vector<2x1x8xf32>
    %179 = vector.broadcast %170 : vector<2x8x1xf32> to vector<2x8x8xf32>
    %180 = vector.broadcast %178 : vector<2x1x8xf32> to vector<2x8x8xf32>
    %181 = arith.mulf %179, %180 : vector<2x8x8xf32>
    %182 = arith.addf %177, %181 : vector<2x8x8xf32>
    %183 = vector.shape_cast %169 : vector<2x8xf32> to vector<2x8x1xf32>
    %cst_56 = arith.constant 1.000000e+00 : f32
    %184 = vector.broadcast %cst_56 : f32 to vector<2x8x1xf32>
    %185 = arith.subf %184, %183 : vector<2x8x1xf32>
    %186 = vector.shape_cast %169 : vector<2x8xf32> to vector<2x1x8xf32>
    %187 = vector.broadcast %185 : vector<2x8x1xf32> to vector<2x8x8xf32>
    %188 = vector.broadcast %186 : vector<2x1x8xf32> to vector<2x8x8xf32>
    %189 = arith.subf %187, %188 : vector<2x8x8xf32>
    %190 = arith.mulf %189, %18 : vector<2x8x8xf32>
    %191 = vector.shape_cast %169 : vector<2x8xf32> to vector<2x8x1xf32>
    %192 = vector.shape_cast %20 : vector<2x8xf32> to vector<2x1x8xf32>
    %193 = vector.broadcast %191 : vector<2x8x1xf32> to vector<2x8x8xf32>
    %194 = vector.broadcast %192 : vector<2x1x8xf32> to vector<2x8x8xf32>
    %195 = arith.mulf %193, %194 : vector<2x8x8xf32>
    %196 = arith.addf %190, %195 : vector<2x8x8xf32>
    %197 = vector.broadcast %12 : vector<1x8x8xf32> to vector<2x8x8xf32>
    %198 = arith.mulf %196, %197 : vector<2x8x8xf32>
    %199 = arith.mulf %189, %19 : vector<2x8x8xf32>
    %200 = vector.shape_cast %169 : vector<2x8xf32> to vector<2x1x8xf32>
    %201 = vector.shape_cast %20 : vector<2x8xf32> to vector<2x8x1xf32>
    %202 = vector.broadcast %200 : vector<2x1x8xf32> to vector<2x8x8xf32>
    %203 = vector.broadcast %201 : vector<2x8x1xf32> to vector<2x8x8xf32>
    %204 = arith.mulf %202, %203 : vector<2x8x8xf32>
    %205 = arith.addf %199, %204 : vector<2x8x8xf32>
    %206 = vector.broadcast %12 : vector<1x8x8xf32> to vector<2x8x8xf32>
    %207 = arith.mulf %205, %206 : vector<2x8x8xf32>
    %cst_57 = arith.constant dense<0.000000e+00> : vector<2xf32>
    %208 = vector.multi_reduction <add>, %169, %cst_57 [1] : vector<2x8xf32> to vector<2xf32>
    %209 = vector.shape_cast %208 : vector<2xf32> to vector<2x1xf32>
    %cst_58 = arith.constant 1.000000e+00 : f32
    %210 = vector.broadcast %cst_58 : f32 to vector<2x1xf32>
    %211 = arith.subf %210, %209 : vector<2x1xf32>
    %212 = vector.broadcast %211 : vector<2x1xf32> to vector<2x8xf32>
    %213 = arith.mulf %212, %20 : vector<2x8xf32>
    %214 = arith.addf %213, %169 : vector<2x8xf32>
    %215 = tpu.concatenate %207, %198 in 2 : vector<2x8x8xf32>, vector<2x8x8xf32> -> vector<2x8x16xf32>
    "tpu.trace_start"() <{level = 10 : i32, message = "brn,bnk->brk"}> : () -> ()
    %cst_59 = arith.constant dense<0.000000e+00> : vector<2x2x16xf32>
    %216 = tpu.matmul %22, %215, %cst_59 {dimension_numbers = #tpu.dot_dimension_numbers<[2], [1], [1], [2], [0, 0, 0, 1, 1, 2], [0], [0]>} : vector<2x2x8xf32>, vector<2x8x16xf32>, vector<2x2x16xf32> -> vector<2x2x16xf32>
    "tpu.trace_stop"() : () -> ()
    %217 = vector.extract_strided_slice %216 {offsets = [0, 0, 0], sizes = [2, 2, 8], strides = [1, 1, 1]} : vector<2x2x16xf32> to vector<2x2x8xf32>
    %218 = vector.extract_strided_slice %216 {offsets = [0, 0, 8], sizes = [2, 2, 8], strides = [1, 1, 1]} : vector<2x2x16xf32> to vector<2x2x8xf32>
    "tpu.trace_start"() <{level = 10 : i32, message = "brw,bnw->brn"}> : () -> ()
    %cst_60 = arith.constant dense<0.000000e+00> : vector<2x2x8xf32>
    %219 = tpu.matmul %51, %182, %cst_60 {dimension_numbers = #tpu.dot_dimension_numbers<[2], [2], [1], [1], [0, 0, 0, 1, 1, 1], [0], [0]>} : vector<2x2x8xf32>, vector<2x8x8xf32>, vector<2x2x8xf32> -> vector<2x2x8xf32>
    "tpu.trace_stop"() : () -> ()
    %220 = arith.mulf %182, %182 : vector<2x8x8xf32>
    %cst_61 = arith.constant dense<0.000000e+00> : vector<2x8xf32>
    %221 = vector.multi_reduction <add>, %220, %cst_61 [2] : vector<2x8x8xf32> to vector<2x8xf32>
    %222 = arith.mulf %51, %51 : vector<2x2x8xf32>
    %cst_62 = arith.constant dense<0.000000e+00> : vector<2x2xf32>
    %223 = vector.multi_reduction <add>, %222, %cst_62 [2] : vector<2x2x8xf32> to vector<2x2xf32>
    %224 = vector.shape_cast %221 : vector<2x8xf32> to vector<2x1x8xf32>
    %225 = vector.shape_cast %223 : vector<2x2xf32> to vector<2x2x1xf32>
    %226 = vector.broadcast %224 : vector<2x1x8xf32> to vector<2x2x8xf32>
    %227 = vector.broadcast %225 : vector<2x2x1xf32> to vector<2x2x8xf32>
    %228 = arith.mulf %226, %227 : vector<2x2x8xf32>
    %cst_63 = arith.constant 9.99999997E-7 : f32
    %229 = vector.broadcast %cst_63 : f32 to vector<2x2x8xf32>
    %230 = arith.addf %228, %229 : vector<2x2x8xf32>
    %231 = math.rsqrt %230 : vector<2x2x8xf32>
    %232 = arith.mulf %219, %231 : vector<2x2x8xf32>
    %233 = vector.shape_cast %75 : vector<2x2xf32> to vector<2x2x1xf32>
    %234 = vector.broadcast %233 : vector<2x2x1xf32> to vector<2x2x8xf32>
    %235 = arith.mulf %234, %232 : vector<2x2x8xf32>
    %cst_64 = arith.constant dense<0xFF800000> : vector<2x2xf32>
    %236 = vector.multi_reduction <maximumf>, %235, %cst_64 [2] : vector<2x2x8xf32> to vector<2x2xf32>
    %237 = vector.shape_cast %236 : vector<2x2xf32> to vector<2x2x1xf32>
    %238 = vector.broadcast %237 : vector<2x2x1xf32> to vector<2x2x8xf32>
    %239 = arith.subf %235, %238 : vector<2x2x8xf32>
    %240 = math.exp %239 : vector<2x2x8xf32>
    %cst_65 = arith.constant dense<0.000000e+00> : vector<2x2xf32>
    %241 = vector.multi_reduction <add>, %240, %cst_65 [2] : vector<2x2x8xf32> to vector<2x2xf32>
    %242 = vector.shape_cast %241 : vector<2x2xf32> to vector<2x2x1xf32>
    %243 = tpu.reciprocal %242 {approx = true} : vector<2x2x1xf32> -> vector<2x2x1xf32>
    %244 = vector.broadcast %243 : vector<2x2x1xf32> to vector<2x2x8xf32>
    %245 = arith.mulf %240, %244 : vector<2x2x8xf32>
    %246 = vector.shape_cast %93 : vector<2x2xf32> to vector<2x2x1xf32>
    %247 = vector.broadcast %246 : vector<2x2x1xf32> to vector<2x2x8xf32>
    %248 = arith.mulf %247, %218 : vector<2x2x8xf32>
    %249 = vector.shape_cast %94 : vector<2x2xf32> to vector<2x2x1xf32>
    %250 = vector.broadcast %249 : vector<2x2x1xf32> to vector<2x2x8xf32>
    %251 = arith.mulf %250, %245 : vector<2x2x8xf32>
    %252 = arith.addf %248, %251 : vector<2x2x8xf32>
    %253 = vector.shape_cast %95 : vector<2x2xf32> to vector<2x2x1xf32>
    %254 = vector.broadcast %253 : vector<2x2x1xf32> to vector<2x2x8xf32>
    %255 = arith.mulf %254, %217 : vector<2x2x8xf32>
    %256 = arith.addf %252, %255 : vector<2x2x8xf32>
    "tpu.trace_start"() <{level = 10 : i32, message = "brn,bnw->brw"}> : () -> ()
    %cst_66 = arith.constant dense<0.000000e+00> : vector<2x2x8xf32>
    %257 = tpu.matmul %256, %182, %cst_66 {dimension_numbers = #tpu.dot_dimension_numbers<[2], [1], [1], [2], [0, 0, 0, 1, 1, 2], [0], [0]>} : vector<2x2x8xf32>, vector<2x8x8xf32>, vector<2x2x8xf32> -> vector<2x2x8xf32>
    "tpu.trace_stop"() : () -> ()
    %258 = vector.shape_cast %257 : vector<2x2x8xf32> to vector<2x16xf32>
    %cst_67 = arith.constant dense<0.000000e+00> : vector<2x8xf32>
    %259 = tpu.matmul %258, %4, %cst_67 {dimension_numbers = #tpu.dot_dimension_numbers<[1], [0], [0], [1], [0, 0, 1, 1], [], []>} : vector<2x16xf32>, vector<16x8xf32>, vector<2x8xf32> -> vector<2x8xf32>
    %260 = arith.addf %49, %259 : vector<2x8xf32>
    %c0_68 = arith.constant 0 : index
    %c0_69 = arith.constant 0 : index
    %c0_70 = arith.constant 0 : index
    %261 = vector.load %arg16[%c0_68, %c0_69, %c0_70] : memref<8x2x8xf32, #tpu.memory_space<vmem>>, vector<1x2x8xf32>
    %262 = vector.shape_cast %261 : vector<1x2x8xf32> to vector<2x8xf32>
    %263 = vector.shape_cast %260 : vector<2x8xf32> to vector<1x2x8xf32>
    tpu.vector_store %arg16[%c0_68, %c0_69, %c0_70], %263 {strides = array<i32>} : memref<8x2x8xf32, #tpu.memory_space<vmem>>, vector<1x2x8xf32>,
    %c1 = arith.constant 1 : index
    %c0_71 = arith.constant 0 : index
    %c0_72 = arith.constant 0 : index
    %264 = vector.load %arg0[%c1, %c0_71, %c0_72] : memref<8x2x8xf32, #tpu.memory_space<vmem>>, vector<1x2x8xf32>
    %265 = vector.shape_cast %264 : vector<1x2x8xf32> to vector<2x8xf32>
    %266 = vector.shape_cast %257 : vector<2x2x8xf32> to vector<2x16xf32>
    %267 = tpu.concatenate %265, %266, %45 in 1 : vector<2x8xf32>, vector<2x16xf32>, vector<2x32xf32> -> vector<2x56xf32>
    %cst_73 = arith.constant dense<0.000000e+00> : vector<2x128xf32>
    %268 = tpu.matmul %267, %0, %cst_73 {dimension_numbers = #tpu.dot_dimension_numbers<[1], [0], [0], [1], [0, 0, 1, 1], [], []>} : vector<2x56xf32>, vector<56x128xf32>, vector<2x128xf32> -> vector<2x128xf32>
    %269 = vector.broadcast %1 : vector<1x128xf32> to vector<2x128xf32>
    %270 = arith.addf %268, %269 : vector<2x128xf32>
    %271 = vector.extract_strided_slice %270 {offsets = [0, 0], sizes = [2, 96], strides = [1, 1]} : vector<2x128xf32> to vector<2x96xf32>
    %272 = arith.negf %271 : vector<2x96xf32>
    %273 = math.exp %272 : vector<2x96xf32>
    %cst_74 = arith.constant 1.000000e+00 : f32
    %274 = vector.broadcast %cst_74 : f32 to vector<2x96xf32>
    %275 = arith.addf %274, %273 : vector<2x96xf32>
    %276 = arith.divf %274, %275 : vector<2x96xf32>
    %277 = vector.extract_strided_slice %276 {offsets = [0, 0], sizes = [2, 32], strides = [1, 1]} : vector<2x96xf32> to vector<2x32xf32>
    %278 = vector.extract_strided_slice %276 {offsets = [0, 32], sizes = [2, 32], strides = [1, 1]} : vector<2x96xf32> to vector<2x32xf32>
    %279 = vector.extract_strided_slice %276 {offsets = [0, 64], sizes = [2, 32], strides = [1, 1]} : vector<2x96xf32> to vector<2x32xf32>
    %280 = vector.extract_strided_slice %270 {offsets = [0, 96], sizes = [2, 32], strides = [1, 1]} : vector<2x128xf32> to vector<2x32xf32>
    %281 = math.tanh %280 : vector<2x32xf32>
    %282 = arith.mulf %278, %43 : vector<2x32xf32>
    %283 = arith.mulf %277, %281 : vector<2x32xf32>
    %284 = arith.addf %282, %283 : vector<2x32xf32>
    %285 = math.tanh %284 : vector<2x32xf32>
    %286 = arith.mulf %279, %285 : vector<2x32xf32>
    %cst_75 = arith.constant dense<0.000000e+00> : vector<2x128xf32>
    %287 = tpu.matmul %286, %2, %cst_75 {dimension_numbers = #tpu.dot_dimension_numbers<[1], [0], [0], [1], [0, 0, 1, 1], [], []>} : vector<2x32xf32>, vector<32x128xf32>, vector<2x128xf32> -> vector<2x128xf32>
    %288 = vector.broadcast %3 : vector<1x128xf32> to vector<2x128xf32>
    %289 = arith.addf %287, %288 : vector<2x128xf32>
    %290 = vector.extract_strided_slice %289 {offsets = [0, 0], sizes = [2, 8], strides = [1, 1]} : vector<2x128xf32> to vector<2x8xf32>
    %291 = vector.extract_strided_slice %289 {offsets = [0, 8], sizes = [2, 16], strides = [1, 1]} : vector<2x128xf32> to vector<2x16xf32>
    %292 = vector.shape_cast %291 : vector<2x16xf32> to vector<2x2x8xf32>
    %293 = vector.extract_strided_slice %289 {offsets = [0, 24], sizes = [2, 8], strides = [1, 1]} : vector<2x128xf32> to vector<2x8xf32>
    %294 = vector.extract_strided_slice %289 {offsets = [0, 32], sizes = [2, 8], strides = [1, 1]} : vector<2x128xf32> to vector<2x8xf32>
    %295 = vector.extract_strided_slice %289 {offsets = [0, 40], sizes = [2, 12], strides = [1, 1]} : vector<2x128xf32> to vector<2x12xf32>
    %296 = arith.negf %295 : vector<2x12xf32>
    %297 = math.exp %296 : vector<2x12xf32>
    %cst_76 = arith.constant 1.000000e+00 : f32
    %298 = vector.broadcast %cst_76 : f32 to vector<2x12xf32>
    %299 = arith.addf %298, %297 : vector<2x12xf32>
    %300 = arith.divf %298, %299 : vector<2x12xf32>
    %301 = vector.extract_strided_slice %300 {offsets = [0, 0], sizes = [2, 8], strides = [1, 1]} : vector<2x12xf32> to vector<2x8xf32>
    %302 = vector.extract_strided_slice %300 {offsets = [0, 8], sizes = [2, 2], strides = [1, 1]} : vector<2x12xf32> to vector<2x2xf32>
    %303 = vector.extract_strided_slice %300 {offsets = [0, 10], sizes = [2, 1], strides = [1, 1]} : vector<2x12xf32> to vector<2x1xf32>
    %304 = vector.extract_strided_slice %300 {offsets = [0, 11], sizes = [2, 1], strides = [1, 1]} : vector<2x12xf32> to vector<2x1xf32>
    %305 = vector.extract_strided_slice %289 {offsets = [0, 56], sizes = [2, 3], strides = [1, 1]} : vector<2x128xf32> to vector<2x3xf32>
    %cst_77 = arith.constant 0.000000e+00 : f32
    %306 = vector.broadcast %cst_77 : f32 to vector<2x3xf32>
    %307 = arith.maximumf %305, %306 : vector<2x3xf32>
    %308 = math.absf %305 : vector<2x3xf32>
    %cst_78 = arith.constant 0.000000e+00 : f32
    %309 = vector.broadcast %cst_78 : f32 to vector<2x3xf32>
    %310 = arith.subf %309, %308 : vector<2x3xf32>
    %311 = math.exp %310 : vector<2x3xf32>
    %312 = math.log1p %311 : vector<2x3xf32>
    %313 = arith.addf %307, %312 : vector<2x3xf32>
    %314 = vector.extract_strided_slice %313 {offsets = [0, 0], sizes = [2, 2], strides = [1, 1]} : vector<2x3xf32> to vector<2x2xf32>
    %cst_79 = arith.constant 1.000000e+00 : f32
    %315 = vector.broadcast %cst_79 : f32 to vector<2x2xf32>
    %316 = arith.addf %315, %314 : vector<2x2xf32>
    %317 = vector.extract_strided_slice %313 {offsets = [0, 2], sizes = [2, 1], strides = [1, 1]} : vector<2x3xf32> to vector<2x1xf32>
    %cst_80 = arith.constant 1.000000e+00 : f32
    %318 = vector.broadcast %cst_80 : f32 to vector<2x1xf32>
    %319 = arith.addf %318, %317 : vector<2x1xf32>
    %320 = vector.extract_strided_slice %289 {offsets = [0, 64], sizes = [2, 2], strides = [1, 1]} : vector<2x128xf32> to vector<2x2xf32>
    %321 = vector.extract_strided_slice %289 {offsets = [0, 66], sizes = [2, 2], strides = [1, 1]} : vector<2x128xf32> to vector<2x2xf32>
    %322 = vector.extract_strided_slice %289 {offsets = [0, 68], sizes = [2, 2], strides = [1, 1]} : vector<2x128xf32> to vector<2x2xf32>
    %323 = arith.maximumf %320, %321 : vector<2x2xf32>
    %324 = arith.maximumf %323, %322 : vector<2x2xf32>
    %325 = arith.subf %320, %324 : vector<2x2xf32>
    %326 = math.exp %325 : vector<2x2xf32>
    %327 = arith.subf %321, %324 : vector<2x2xf32>
    %328 = math.exp %327 : vector<2x2xf32>
    %329 = arith.subf %322, %324 : vector<2x2xf32>
    %330 = math.exp %329 : vector<2x2xf32>
    %331 = arith.addf %326, %328 : vector<2x2xf32>
    %332 = arith.addf %331, %330 : vector<2x2xf32>
    %333 = tpu.reciprocal %332 {approx = true} : vector<2x2xf32> -> vector<2x2xf32>
    %334 = arith.mulf %326, %333 : vector<2x2xf32>
    %335 = arith.mulf %328, %333 : vector<2x2xf32>
    %336 = arith.mulf %330, %333 : vector<2x2xf32>
    %337 = vector.shape_cast %302 : vector<2x2xf32> to vector<2x2x1xf32>
    %338 = vector.broadcast %337 : vector<2x2x1xf32> to vector<2x2x8xf32>
    %339 = arith.mulf %338, %256 : vector<2x2x8xf32>
    %cst_81 = arith.constant 1.000000e+00 : f32
    %340 = vector.broadcast %cst_81 : f32 to vector<2x2x8xf32>
    %341 = arith.subf %340, %339 : vector<2x2x8xf32>
    %342 = vector.extract_strided_slice %341 {offsets = [0, 0, 0], sizes = [2, 1, 8], strides = [1, 1, 1]} : vector<2x2x8xf32> to vector<2x1x8xf32>
    %343 = vector.shape_cast %342 : vector<2x1x8xf32> to vector<2x8xf32>
    %344 = vector.extract_strided_slice %341 {offsets = [0, 1, 0], sizes = [2, 1, 8], strides = [1, 1, 1]} : vector<2x2x8xf32> to vector<2x1x8xf32>
    %345 = vector.shape_cast %344 : vector<2x1x8xf32> to vector<2x8xf32>
    %346 = arith.mulf %343, %345 : vector<2x8xf32>
    %347 = arith.addf %109, %169 : vector<2x8xf32>
    %348 = arith.mulf %109, %169 : vector<2x8xf32>
    %349 = arith.subf %347, %348 : vector<2x8xf32>
    %350 = arith.mulf %349, %346 : vector<2x8xf32>
    %351 = vector.shape_cast %350 : vector<2x8xf32> to vector<2x8x1xf32>
    %352 = vector.shape_cast %350 : vector<2x8xf32> to vector<2x1x8xf32>
    %353 = vector.broadcast %352 : vector<2x1x8xf32> to vector<2x8x8xf32>
    %354 = vector.broadcast %351 : vector<2x8x1xf32> to vector<2x8x8xf32>
    %355 = arith.cmpf olt, %353, %354 : vector<2x8x8xf32>
    %356 = vector.broadcast %352 : vector<2x1x8xf32> to vector<2x8x8xf32>
    %357 = vector.broadcast %351 : vector<2x8x1xf32> to vector<2x8x8xf32>
    %358 = arith.cmpf oeq, %356, %357 : vector<2x8x8xf32>
    %359 = vector.broadcast %8 : vector<1x8x8xi1> to vector<2x8x8xi1>
    %360 = arith.andi %358, %359 : vector<2x8x8xi1>
    %361 = arith.ori %355, %360 : vector<2x8x8xi1>
    %362 = arith.extui %361 : vector<2x8x8xi1> to vector<2x8x8xi32>
    %363 = arith.sitofp %362 : vector<2x8x8xi32> to vector<2x8x8xf32>
    %cst_82 = arith.constant 1.000000e-30 : f32
    %364 = vector.broadcast %cst_82 : f32 to vector<2x8xf32>
    %365 = arith.maximumf %350, %364 : vector<2x8xf32>
    %366 = math.log %365 : vector<2x8xf32>
    %367 = vector.shape_cast %366 : vector<2x8xf32> to vector<2x1x8xf32>
    %368 = vector.broadcast %367 : vector<2x1x8xf32> to vector<2x8x8xf32>
    %369 = arith.mulf %363, %368 : vector<2x8x8xf32>
    %cst_83 = arith.constant dense<0.000000e+00> : vector<2x8xf32>
    %370 = vector.multi_reduction <add>, %369, %cst_83 [2] : vector<2x8x8xf32> to vector<2x8xf32>
    %371 = math.exp %370 : vector<2x8xf32>
    %cst_84 = arith.constant 1.000000e+00 : f32
    %372 = vector.broadcast %cst_84 : f32 to vector<2x8xf32>
    %373 = arith.subf %372, %350 : vector<2x8xf32>
    %374 = arith.mulf %373, %371 : vector<2x8xf32>
    %375 = vector.shape_cast %293 : vector<2x8xf32> to vector<2x1x8xf32>
    %376 = vector.broadcast %375 : vector<2x1x8xf32> to vector<2x8x8xf32>
    %377 = arith.mulf %376, %182 : vector<2x8x8xf32>
    %cst_85 = arith.constant dense<0.000000e+00> : vector<2x8xf32>
    %378 = vector.multi_reduction <add>, %377, %cst_85 [2] : vector<2x8x8xf32> to vector<2x8xf32>
    %379 = arith.mulf %182, %182 : vector<2x8x8xf32>
    %cst_86 = arith.constant dense<0.000000e+00> : vector<2x8xf32>
    %380 = vector.multi_reduction <add>, %379, %cst_86 [2] : vector<2x8x8xf32> to vector<2x8xf32>
    %381 = arith.mulf %293, %293 : vector<2x8xf32>
    %cst_87 = arith.constant dense<0.000000e+00> : vector<2xf32>
    %382 = vector.multi_reduction <add>, %381, %cst_87 [1] : vector<2x8xf32> to vector<2xf32>
    %383 = vector.shape_cast %382 : vector<2xf32> to vector<2x1xf32>
    %384 = vector.broadcast %383 : vector<2x1xf32> to vector<2x8xf32>
    %385 = arith.mulf %380, %384 : vector<2x8xf32>
    %cst_88 = arith.constant 9.99999997E-7 : f32
    %386 = vector.broadcast %cst_88 : f32 to vector<2x8xf32>
    %387 = arith.addf %385, %386 : vector<2x8xf32>
    %388 = math.rsqrt %387 : vector<2x8xf32>
    %389 = arith.mulf %378, %388 : vector<2x8xf32>
    %390 = vector.broadcast %319 : vector<2x1xf32> to vector<2x8xf32>
    %391 = arith.mulf %390, %389 : vector<2x8xf32>
    %cst_89 = arith.constant dense<0xFF800000> : vector<2xf32>
    %392 = vector.multi_reduction <maximumf>, %391, %cst_89 [1] : vector<2x8xf32> to vector<2xf32>
    %393 = vector.shape_cast %392 : vector<2xf32> to vector<2x1xf32>
    %394 = vector.broadcast %393 : vector<2x1xf32> to vector<2x8xf32>
    %395 = arith.subf %391, %394 : vector<2x8xf32>
    %396 = math.exp %395 : vector<2x8xf32>
    %cst_90 = arith.constant dense<0.000000e+00> : vector<2xf32>
    %397 = vector.multi_reduction <add>, %396, %cst_90 [1] : vector<2x8xf32> to vector<2xf32>
    %398 = vector.shape_cast %397 : vector<2xf32> to vector<2x1xf32>
    %399 = tpu.reciprocal %398 {approx = true} : vector<2x1xf32> -> vector<2x1xf32>
    %400 = vector.broadcast %399 : vector<2x1xf32> to vector<2x8xf32>
    %401 = arith.mulf %396, %400 : vector<2x8xf32>
    %402 = vector.broadcast %303 : vector<2x1xf32> to vector<2x8xf32>
    %403 = arith.mulf %402, %374 : vector<2x8xf32>
    %cst_91 = arith.constant 1.000000e+00 : f32
    %404 = vector.broadcast %cst_91 : f32 to vector<2x1xf32>
    %405 = arith.subf %404, %303 : vector<2x1xf32>
    %406 = vector.broadcast %405 : vector<2x1xf32> to vector<2x8xf32>
    %407 = arith.mulf %406, %401 : vector<2x8xf32>
    %408 = arith.addf %403, %407 : vector<2x8xf32>
    %409 = vector.broadcast %304 : vector<2x1xf32> to vector<2x8xf32>
    %410 = arith.mulf %409, %408 : vector<2x8xf32>
    %411 = vector.shape_cast %410 : vector<2x8xf32> to vector<2x8x1xf32>
    %412 = vector.shape_cast %301 : vector<2x8xf32> to vector<2x1x8xf32>
    %413 = vector.broadcast %411 : vector<2x8x1xf32> to vector<2x8x8xf32>
    %414 = vector.broadcast %412 : vector<2x1x8xf32> to vector<2x8x8xf32>
    %415 = arith.mulf %413, %414 : vector<2x8x8xf32>
    %cst_92 = arith.constant 1.000000e+00 : f32
    %416 = vector.broadcast %cst_92 : f32 to vector<2x8x8xf32>
    %417 = arith.subf %416, %415 : vector<2x8x8xf32>
    %418 = arith.mulf %182, %417 : vector<2x8x8xf32>
    %419 = vector.shape_cast %294 : vector<2x8xf32> to vector<2x1x8xf32>
    %420 = vector.broadcast %411 : vector<2x8x1xf32> to vector<2x8x8xf32>
    %421 = vector.broadcast %419 : vector<2x1x8xf32> to vector<2x8x8xf32>
    %422 = arith.mulf %420, %421 : vector<2x8x8xf32>
    %423 = arith.addf %418, %422 : vector<2x8x8xf32>
    %424 = vector.shape_cast %410 : vector<2x8xf32> to vector<2x8x1xf32>
    %cst_93 = arith.constant 1.000000e+00 : f32
    %425 = vector.broadcast %cst_93 : f32 to vector<2x8x1xf32>
    %426 = arith.subf %425, %424 : vector<2x8x1xf32>
    %427 = vector.shape_cast %410 : vector<2x8xf32> to vector<2x1x8xf32>
    %428 = vector.broadcast %426 : vector<2x8x1xf32> to vector<2x8x8xf32>
    %429 = vector.broadcast %427 : vector<2x1x8xf32> to vector<2x8x8xf32>
    %430 = arith.subf %428, %429 : vector<2x8x8xf32>
    %431 = arith.mulf %430, %198 : vector<2x8x8xf32>
    %432 = vector.shape_cast %410 : vector<2x8xf32> to vector<2x8x1xf32>
    %433 = vector.shape_cast %214 : vector<2x8xf32> to vector<2x1x8xf32>
    %434 = vector.broadcast %432 : vector<2x8x1xf32> to vector<2x8x8xf32>
    %435 = vector.broadcast %433 : vector<2x1x8xf32> to vector<2x8x8xf32>
    %436 = arith.mulf %434, %435 : vector<2x8x8xf32>
    %437 = arith.addf %431, %436 : vector<2x8x8xf32>
    %438 = vector.broadcast %12 : vector<1x8x8xf32> to vector<2x8x8xf32>
    %439 = arith.mulf %437, %438 : vector<2x8x8xf32>
    %440 = arith.mulf %430, %207 : vector<2x8x8xf32>
    %441 = vector.shape_cast %410 : vector<2x8xf32> to vector<2x1x8xf32>
    %442 = vector.shape_cast %214 : vector<2x8xf32> to vector<2x8x1xf32>
    %443 = vector.broadcast %441 : vector<2x1x8xf32> to vector<2x8x8xf32>
    %444 = vector.broadcast %442 : vector<2x8x1xf32> to vector<2x8x8xf32>
    %445 = arith.mulf %443, %444 : vector<2x8x8xf32>
    %446 = arith.addf %440, %445 : vector<2x8x8xf32>
    %447 = vector.broadcast %12 : vector<1x8x8xf32> to vector<2x8x8xf32>
    %448 = arith.mulf %446, %447 : vector<2x8x8xf32>
    %cst_94 = arith.constant dense<0.000000e+00> : vector<2xf32>
    %449 = vector.multi_reduction <add>, %410, %cst_94 [1] : vector<2x8xf32> to vector<2xf32>
    %450 = vector.shape_cast %449 : vector<2xf32> to vector<2x1xf32>
    %cst_95 = arith.constant 1.000000e+00 : f32
    %451 = vector.broadcast %cst_95 : f32 to vector<2x1xf32>
    %452 = arith.subf %451, %450 : vector<2x1xf32>
    %453 = vector.broadcast %452 : vector<2x1xf32> to vector<2x8xf32>
    %454 = arith.mulf %453, %214 : vector<2x8xf32>
    %455 = arith.addf %454, %410 : vector<2x8xf32>
    %456 = tpu.concatenate %448, %439 in 2 : vector<2x8x8xf32>, vector<2x8x8xf32> -> vector<2x8x16xf32>
    "tpu.trace_start"() <{level = 10 : i32, message = "brn,bnk->brk"}> : () -> ()
    %cst_96 = arith.constant dense<0.000000e+00> : vector<2x2x16xf32>
    %457 = tpu.matmul %256, %456, %cst_96 {dimension_numbers = #tpu.dot_dimension_numbers<[2], [1], [1], [2], [0, 0, 0, 1, 1, 2], [0], [0]>} : vector<2x2x8xf32>, vector<2x8x16xf32>, vector<2x2x16xf32> -> vector<2x2x16xf32>
    "tpu.trace_stop"() : () -> ()
    %458 = vector.extract_strided_slice %457 {offsets = [0, 0, 0], sizes = [2, 2, 8], strides = [1, 1, 1]} : vector<2x2x16xf32> to vector<2x2x8xf32>
    %459 = vector.extract_strided_slice %457 {offsets = [0, 0, 8], sizes = [2, 2, 8], strides = [1, 1, 1]} : vector<2x2x16xf32> to vector<2x2x8xf32>
    "tpu.trace_start"() <{level = 10 : i32, message = "brw,bnw->brn"}> : () -> ()
    %cst_97 = arith.constant dense<0.000000e+00> : vector<2x2x8xf32>
    %460 = tpu.matmul %292, %423, %cst_97 {dimension_numbers = #tpu.dot_dimension_numbers<[2], [2], [1], [1], [0, 0, 0, 1, 1, 1], [0], [0]>} : vector<2x2x8xf32>, vector<2x8x8xf32>, vector<2x2x8xf32> -> vector<2x2x8xf32>
    "tpu.trace_stop"() : () -> ()
    %461 = arith.mulf %423, %423 : vector<2x8x8xf32>
    %cst_98 = arith.constant dense<0.000000e+00> : vector<2x8xf32>
    %462 = vector.multi_reduction <add>, %461, %cst_98 [2] : vector<2x8x8xf32> to vector<2x8xf32>
    %463 = arith.mulf %292, %292 : vector<2x2x8xf32>
    %cst_99 = arith.constant dense<0.000000e+00> : vector<2x2xf32>
    %464 = vector.multi_reduction <add>, %463, %cst_99 [2] : vector<2x2x8xf32> to vector<2x2xf32>
    %465 = vector.shape_cast %462 : vector<2x8xf32> to vector<2x1x8xf32>
    %466 = vector.shape_cast %464 : vector<2x2xf32> to vector<2x2x1xf32>
    %467 = vector.broadcast %465 : vector<2x1x8xf32> to vector<2x2x8xf32>
    %468 = vector.broadcast %466 : vector<2x2x1xf32> to vector<2x2x8xf32>
    %469 = arith.mulf %467, %468 : vector<2x2x8xf32>
    %cst_100 = arith.constant 9.99999997E-7 : f32
    %470 = vector.broadcast %cst_100 : f32 to vector<2x2x8xf32>
    %471 = arith.addf %469, %470 : vector<2x2x8xf32>
    %472 = math.rsqrt %471 : vector<2x2x8xf32>
    %473 = arith.mulf %460, %472 : vector<2x2x8xf32>
    %474 = vector.shape_cast %316 : vector<2x2xf32> to vector<2x2x1xf32>
    %475 = vector.broadcast %474 : vector<2x2x1xf32> to vector<2x2x8xf32>
    %476 = arith.mulf %475, %473 : vector<2x2x8xf32>
    %cst_101 = arith.constant dense<0xFF800000> : vector<2x2xf32>
    %477 = vector.multi_reduction <maximumf>, %476, %cst_101 [2] : vector<2x2x8xf32> to vector<2x2xf32>
    %478 = vector.shape_cast %477 : vector<2x2xf32> to vector<2x2x1xf32>
    %479 = vector.broadcast %478 : vector<2x2x1xf32> to vector<2x2x8xf32>
    %480 = arith.subf %476, %479 : vector<2x2x8xf32>
    %481 = math.exp %480 : vector<2x2x8xf32>
    %cst_102 = arith.constant dense<0.000000e+00> : vector<2x2xf32>
    %482 = vector.multi_reduction <add>, %481, %cst_102 [2] : vector<2x2x8xf32> to vector<2x2xf32>
    %483 = vector.shape_cast %482 : vector<2x2xf32> to vector<2x2x1xf32>
    %484 = tpu.reciprocal %483 {approx = true} : vector<2x2x1xf32> -> vector<2x2x1xf32>
    %485 = vector.broadcast %484 : vector<2x2x1xf32> to vector<2x2x8xf32>
    %486 = arith.mulf %481, %485 : vector<2x2x8xf32>
    %487 = vector.shape_cast %334 : vector<2x2xf32> to vector<2x2x1xf32>
    %488 = vector.broadcast %487 : vector<2x2x1xf32> to vector<2x2x8xf32>
    %489 = arith.mulf %488, %459 : vector<2x2x8xf32>
    %490 = vector.shape_cast %335 : vector<2x2xf32> to vector<2x2x1xf32>
    %491 = vector.broadcast %490 : vector<2x2x1xf32> to vector<2x2x8xf32>
    %492 = arith.mulf %491, %486 : vector<2x2x8xf32>
    %493 = arith.addf %489, %492 : vector<2x2x8xf32>
    %494 = vector.shape_cast %336 : vector<2x2xf32> to vector<2x2x1xf32>
    %495 = vector.broadcast %494 : vector<2x2x1xf32> to vector<2x2x8xf32>
    %496 = arith.mulf %495, %458 : vector<2x2x8xf32>
    %497 = arith.addf %493, %496 : vector<2x2x8xf32>
    "tpu.trace_start"() <{level = 10 : i32, message = "brn,bnw->brw"}> : () -> ()
    %cst_103 = arith.constant dense<0.000000e+00> : vector<2x2x8xf32>
    %498 = tpu.matmul %497, %423, %cst_103 {dimension_numbers = #tpu.dot_dimension_numbers<[2], [1], [1], [2], [0, 0, 0, 1, 1, 2], [0], [0]>} : vector<2x2x8xf32>, vector<2x8x8xf32>, vector<2x2x8xf32> -> vector<2x2x8xf32>
    "tpu.trace_stop"() : () -> ()
    %499 = vector.shape_cast %498 : vector<2x2x8xf32> to vector<2x16xf32>
    %cst_104 = arith.constant dense<0.000000e+00> : vector<2x8xf32>
    %500 = tpu.matmul %499, %4, %cst_104 {dimension_numbers = #tpu.dot_dimension_numbers<[1], [0], [0], [1], [0, 0, 1, 1], [], []>} : vector<2x16xf32>, vector<16x8xf32>, vector<2x8xf32> -> vector<2x8xf32>
    %501 = arith.addf %290, %500 : vector<2x8xf32>
    %c1_105 = arith.constant 1 : index
    %c0_106 = arith.constant 0 : index
    %c0_107 = arith.constant 0 : index
    %502 = vector.load %arg16[%c1_105, %c0_106, %c0_107] : memref<8x2x8xf32, #tpu.memory_space<vmem>>, vector<1x2x8xf32>
    %503 = vector.shape_cast %502 : vector<1x2x8xf32> to vector<2x8xf32>
    %504 = vector.shape_cast %501 : vector<2x8xf32> to vector<1x2x8xf32>
    tpu.vector_store %arg16[%c1_105, %c0_106, %c0_107], %504 {strides = array<i32>} : memref<8x2x8xf32, #tpu.memory_space<vmem>>, vector<1x2x8xf32>,
    %c2 = arith.constant 2 : index
    %c0_108 = arith.constant 0 : index
    %c0_109 = arith.constant 0 : index
    %505 = vector.load %arg0[%c2, %c0_108, %c0_109] : memref<8x2x8xf32, #tpu.memory_space<vmem>>, vector<1x2x8xf32>
    %506 = vector.shape_cast %505 : vector<1x2x8xf32> to vector<2x8xf32>
    %507 = vector.shape_cast %498 : vector<2x2x8xf32> to vector<2x16xf32>
    %508 = tpu.concatenate %506, %507, %286 in 1 : vector<2x8xf32>, vector<2x16xf32>, vector<2x32xf32> -> vector<2x56xf32>
    %cst_110 = arith.constant dense<0.000000e+00> : vector<2x128xf32>
    %509 = tpu.matmul %508, %0, %cst_110 {dimension_numbers = #tpu.dot_dimension_numbers<[1], [0], [0], [1], [0, 0, 1, 1], [], []>} : vector<2x56xf32>, vector<56x128xf32>, vector<2x128xf32> -> vector<2x128xf32>
    %510 = vector.broadcast %1 : vector<1x128xf32> to vector<2x128xf32>
    %511 = arith.addf %509, %510 : vector<2x128xf32>
    %512 = vector.extract_strided_slice %511 {offsets = [0, 0], sizes = [2, 96], strides = [1, 1]} : vector<2x128xf32> to vector<2x96xf32>
    %513 = arith.negf %512 : vector<2x96xf32>
    %514 = math.exp %513 : vector<2x96xf32>
    %cst_111 = arith.constant 1.000000e+00 : f32
    %515 = vector.broadcast %cst_111 : f32 to vector<2x96xf32>
    %516 = arith.addf %515, %514 : vector<2x96xf32>
    %517 = arith.divf %515, %516 : vector<2x96xf32>
    %518 = vector.extract_strided_slice %517 {offsets = [0, 0], sizes = [2, 32], strides = [1, 1]} : vector<2x96xf32> to vector<2x32xf32>
    %519 = vector.extract_strided_slice %517 {offsets = [0, 32], sizes = [2, 32], strides = [1, 1]} : vector<2x96xf32> to vector<2x32xf32>
    %520 = vector.extract_strided_slice %517 {offsets = [0, 64], sizes = [2, 32], strides = [1, 1]} : vector<2x96xf32> to vector<2x32xf32>
    %521 = vector.extract_strided_slice %511 {offsets = [0, 96], sizes = [2, 32], strides = [1, 1]} : vector<2x128xf32> to vector<2x32xf32>
    %522 = math.tanh %521 : vector<2x32xf32>
    %523 = arith.mulf %519, %284 : vector<2x32xf32>
    %524 = arith.mulf %518, %522 : vector<2x32xf32>
    %525 = arith.addf %523, %524 : vector<2x32xf32>
    %526 = math.tanh %525 : vector<2x32xf32>
    %527 = arith.mulf %520, %526 : vector<2x32xf32>
    %cst_112 = arith.constant dense<0.000000e+00> : vector<2x128xf32>
    %528 = tpu.matmul %527, %2, %cst_112 {dimension_numbers = #tpu.dot_dimension_numbers<[1], [0], [0], [1], [0, 0, 1, 1], [], []>} : vector<2x32xf32>, vector<32x128xf32>, vector<2x128xf32> -> vector<2x128xf32>
    %529 = vector.broadcast %3 : vector<1x128xf32> to vector<2x128xf32>
    %530 = arith.addf %528, %529 : vector<2x128xf32>
    %531 = vector.extract_strided_slice %530 {offsets = [0, 0], sizes = [2, 8], strides = [1, 1]} : vector<2x128xf32> to vector<2x8xf32>
    %532 = vector.extract_strided_slice %530 {offsets = [0, 8], sizes = [2, 16], strides = [1, 1]} : vector<2x128xf32> to vector<2x16xf32>
    %533 = vector.shape_cast %532 : vector<2x16xf32> to vector<2x2x8xf32>
    %534 = vector.extract_strided_slice %530 {offsets = [0, 24], sizes = [2, 8], strides = [1, 1]} : vector<2x128xf32> to vector<2x8xf32>
    %535 = vector.extract_strided_slice %530 {offsets = [0, 32], sizes = [2, 8], strides = [1, 1]} : vector<2x128xf32> to vector<2x8xf32>
    %536 = vector.extract_strided_slice %530 {offsets = [0, 40], sizes = [2, 12], strides = [1, 1]} : vector<2x128xf32> to vector<2x12xf32>
    %537 = arith.negf %536 : vector<2x12xf32>
    %538 = math.exp %537 : vector<2x12xf32>
    %cst_113 = arith.constant 1.000000e+00 : f32
    %539 = vector.broadcast %cst_113 : f32 to vector<2x12xf32>
    %540 = arith.addf %539, %538 : vector<2x12xf32>
    %541 = arith.divf %539, %540 : vector<2x12xf32>
    %542 = vector.extract_strided_slice %541 {offsets = [0, 0], sizes = [2, 8], strides = [1, 1]} : vector<2x12xf32> to vector<2x8xf32>
    %543 = vector.extract_strided_slice %541 {offsets = [0, 8], sizes = [2, 2], strides = [1, 1]} : vector<2x12xf32> to vector<2x2xf32>
    %544 = vector.extract_strided_slice %541 {offsets = [0, 10], sizes = [2, 1], strides = [1, 1]} : vector<2x12xf32> to vector<2x1xf32>
    %545 = vector.extract_strided_slice %541 {offsets = [0, 11], sizes = [2, 1], strides = [1, 1]} : vector<2x12xf32> to vector<2x1xf32>
    %546 = vector.extract_strided_slice %530 {offsets = [0, 56], sizes = [2, 3], strides = [1, 1]} : vector<2x128xf32> to vector<2x3xf32>
    %cst_114 = arith.constant 0.000000e+00 : f32
    %547 = vector.broadcast %cst_114 : f32 to vector<2x3xf32>
    %548 = arith.maximumf %546, %547 : vector<2x3xf32>
    %549 = math.absf %546 : vector<2x3xf32>
    %cst_115 = arith.constant 0.000000e+00 : f32
    %550 = vector.broadcast %cst_115 : f32 to vector<2x3xf32>
    %551 = arith.subf %550, %549 : vector<2x3xf32>
    %552 = math.exp %551 : vector<2x3xf32>
    %553 = math.log1p %552 : vector<2x3xf32>
    %554 = arith.addf %548, %553 : vector<2x3xf32>
    %555 = vector.extract_strided_slice %554 {offsets = [0, 0], sizes = [2, 2], strides = [1, 1]} : vector<2x3xf32> to vector<2x2xf32>
    %cst_116 = arith.constant 1.000000e+00 : f32
    %556 = vector.broadcast %cst_116 : f32 to vector<2x2xf32>
    %557 = arith.addf %556, %555 : vector<2x2xf32>
    %558 = vector.extract_strided_slice %554 {offsets = [0, 2], sizes = [2, 1], strides = [1, 1]} : vector<2x3xf32> to vector<2x1xf32>
    %cst_117 = arith.constant 1.000000e+00 : f32
    %559 = vector.broadcast %cst_117 : f32 to vector<2x1xf32>
    %560 = arith.addf %559, %558 : vector<2x1xf32>
    %561 = vector.extract_strided_slice %530 {offsets = [0, 64], sizes = [2, 2], strides = [1, 1]} : vector<2x128xf32> to vector<2x2xf32>
    %562 = vector.extract_strided_slice %530 {offsets = [0, 66], sizes = [2, 2], strides = [1, 1]} : vector<2x128xf32> to vector<2x2xf32>
    %563 = vector.extract_strided_slice %530 {offsets = [0, 68], sizes = [2, 2], strides = [1, 1]} : vector<2x128xf32> to vector<2x2xf32>
    %564 = arith.maximumf %561, %562 : vector<2x2xf32>
    %565 = arith.maximumf %564, %563 : vector<2x2xf32>
    %566 = arith.subf %561, %565 : vector<2x2xf32>
    %567 = math.exp %566 : vector<2x2xf32>
    %568 = arith.subf %562, %565 : vector<2x2xf32>
    %569 = math.exp %568 : vector<2x2xf32>
    %570 = arith.subf %563, %565 : vector<2x2xf32>
    %571 = math.exp %570 : vector<2x2xf32>
    %572 = arith.addf %567, %569 : vector<2x2xf32>
    %573 = arith.addf %572, %571 : vector<2x2xf32>
    %574 = tpu.reciprocal %573 {approx = true} : vector<2x2xf32> -> vector<2x2xf32>
    %575 = arith.mulf %567, %574 : vector<2x2xf32>
    %576 = arith.mulf %569, %574 : vector<2x2xf32>
    %577 = arith.mulf %571, %574 : vector<2x2xf32>
    %578 = vector.shape_cast %543 : vector<2x2xf32> to vector<2x2x1xf32>
    %579 = vector.broadcast %578 : vector<2x2x1xf32> to vector<2x2x8xf32>
    %580 = arith.mulf %579, %497 : vector<2x2x8xf32>
    %cst_118 = arith.constant 1.000000e+00 : f32
    %581 = vector.broadcast %cst_118 : f32 to vector<2x2x8xf32>
    %582 = arith.subf %581, %580 : vector<2x2x8xf32>
    %583 = vector.extract_strided_slice %582 {offsets = [0, 0, 0], sizes = [2, 1, 8], strides = [1, 1, 1]} : vector<2x2x8xf32> to vector<2x1x8xf32>
    %584 = vector.shape_cast %583 : vector<2x1x8xf32> to vector<2x8xf32>
    %585 = vector.extract_strided_slice %582 {offsets = [0, 1, 0], sizes = [2, 1, 8], strides = [1, 1, 1]} : vector<2x2x8xf32> to vector<2x1x8xf32>
    %586 = vector.shape_cast %585 : vector<2x1x8xf32> to vector<2x8xf32>
    %587 = arith.mulf %584, %586 : vector<2x8xf32>
    %588 = arith.addf %350, %410 : vector<2x8xf32>
    %589 = arith.mulf %350, %410 : vector<2x8xf32>
    %590 = arith.subf %588, %589 : vector<2x8xf32>
    %591 = arith.mulf %590, %587 : vector<2x8xf32>
    %592 = vector.shape_cast %591 : vector<2x8xf32> to vector<2x8x1xf32>
    %593 = vector.shape_cast %591 : vector<2x8xf32> to vector<2x1x8xf32>
    %594 = vector.broadcast %593 : vector<2x1x8xf32> to vector<2x8x8xf32>
    %595 = vector.broadcast %592 : vector<2x8x1xf32> to vector<2x8x8xf32>
    %596 = arith.cmpf olt, %594, %595 : vector<2x8x8xf32>
    %597 = vector.broadcast %593 : vector<2x1x8xf32> to vector<2x8x8xf32>
    %598 = vector.broadcast %592 : vector<2x8x1xf32> to vector<2x8x8xf32>
    %599 = arith.cmpf oeq, %597, %598 : vector<2x8x8xf32>
    %600 = vector.broadcast %8 : vector<1x8x8xi1> to vector<2x8x8xi1>
    %601 = arith.andi %599, %600 : vector<2x8x8xi1>
    %602 = arith.ori %596, %601 : vector<2x8x8xi1>
    %603 = arith.extui %602 : vector<2x8x8xi1> to vector<2x8x8xi32>
    %604 = arith.sitofp %603 : vector<2x8x8xi32> to vector<2x8x8xf32>
    %cst_119 = arith.constant 1.000000e-30 : f32
    %605 = vector.broadcast %cst_119 : f32 to vector<2x8xf32>
    %606 = arith.maximumf %591, %605 : vector<2x8xf32>
    %607 = math.log %606 : vector<2x8xf32>
    %608 = vector.shape_cast %607 : vector<2x8xf32> to vector<2x1x8xf32>
    %609 = vector.broadcast %608 : vector<2x1x8xf32> to vector<2x8x8xf32>
    %610 = arith.mulf %604, %609 : vector<2x8x8xf32>
    %cst_120 = arith.constant dense<0.000000e+00> : vector<2x8xf32>
    %611 = vector.multi_reduction <add>, %610, %cst_120 [2] : vector<2x8x8xf32> to vector<2x8xf32>
    %612 = math.exp %611 : vector<2x8xf32>
    %cst_121 = arith.constant 1.000000e+00 : f32
    %613 = vector.broadcast %cst_121 : f32 to vector<2x8xf32>
    %614 = arith.subf %613, %591 : vector<2x8xf32>
    %615 = arith.mulf %614, %612 : vector<2x8xf32>
    %616 = vector.shape_cast %534 : vector<2x8xf32> to vector<2x1x8xf32>
    %617 = vector.broadcast %616 : vector<2x1x8xf32> to vector<2x8x8xf32>
    %618 = arith.mulf %617, %423 : vector<2x8x8xf32>
    %cst_122 = arith.constant dense<0.000000e+00> : vector<2x8xf32>
    %619 = vector.multi_reduction <add>, %618, %cst_122 [2] : vector<2x8x8xf32> to vector<2x8xf32>
    %620 = arith.mulf %423, %423 : vector<2x8x8xf32>
    %cst_123 = arith.constant dense<0.000000e+00> : vector<2x8xf32>
    %621 = vector.multi_reduction <add>, %620, %cst_123 [2] : vector<2x8x8xf32> to vector<2x8xf32>
    %622 = arith.mulf %534, %534 : vector<2x8xf32>
    %cst_124 = arith.constant dense<0.000000e+00> : vector<2xf32>
    %623 = vector.multi_reduction <add>, %622, %cst_124 [1] : vector<2x8xf32> to vector<2xf32>
    %624 = vector.shape_cast %623 : vector<2xf32> to vector<2x1xf32>
    %625 = vector.broadcast %624 : vector<2x1xf32> to vector<2x8xf32>
    %626 = arith.mulf %621, %625 : vector<2x8xf32>
    %cst_125 = arith.constant 9.99999997E-7 : f32
    %627 = vector.broadcast %cst_125 : f32 to vector<2x8xf32>
    %628 = arith.addf %626, %627 : vector<2x8xf32>
    %629 = math.rsqrt %628 : vector<2x8xf32>
    %630 = arith.mulf %619, %629 : vector<2x8xf32>
    %631 = vector.broadcast %560 : vector<2x1xf32> to vector<2x8xf32>
    %632 = arith.mulf %631, %630 : vector<2x8xf32>
    %cst_126 = arith.constant dense<0xFF800000> : vector<2xf32>
    %633 = vector.multi_reduction <maximumf>, %632, %cst_126 [1] : vector<2x8xf32> to vector<2xf32>
    %634 = vector.shape_cast %633 : vector<2xf32> to vector<2x1xf32>
    %635 = vector.broadcast %634 : vector<2x1xf32> to vector<2x8xf32>
    %636 = arith.subf %632, %635 : vector<2x8xf32>
    %637 = math.exp %636 : vector<2x8xf32>
    %cst_127 = arith.constant dense<0.000000e+00> : vector<2xf32>
    %638 = vector.multi_reduction <add>, %637, %cst_127 [1] : vector<2x8xf32> to vector<2xf32>
    %639 = vector.shape_cast %638 : vector<2xf32> to vector<2x1xf32>
    %640 = tpu.reciprocal %639 {approx = true} : vector<2x1xf32> -> vector<2x1xf32>
    %641 = vector.broadcast %640 : vector<2x1xf32> to vector<2x8xf32>
    %642 = arith.mulf %637, %641 : vector<2x8xf32>
    %643 = vector.broadcast %544 : vector<2x1xf32> to vector<2x8xf32>
    %644 = arith.mulf %643, %615 : vector<2x8xf32>
    %cst_128 = arith.constant 1.000000e+00 : f32
    %645 = vector.broadcast %cst_128 : f32 to vector<2x1xf32>
    %646 = arith.subf %645, %544 : vector<2x1xf32>
    %647 = vector.broadcast %646 : vector<2x1xf32> to vector<2x8xf32>
    %648 = arith.mulf %647, %642 : vector<2x8xf32>
    %649 = arith.addf %644, %648 : vector<2x8xf32>
    %650 = vector.broadcast %545 : vector<2x1xf32> to vector<2x8xf32>
    %651 = arith.mulf %650, %649 : vector<2x8xf32>
    %652 = vector.shape_cast %651 : vector<2x8xf32> to vector<2x8x1xf32>
    %653 = vector.shape_cast %542 : vector<2x8xf32> to vector<2x1x8xf32>
    %654 = vector.broadcast %652 : vector<2x8x1xf32> to vector<2x8x8xf32>
    %655 = vector.broadcast %653 : vector<2x1x8xf32> to vector<2x8x8xf32>
    %656 = arith.mulf %654, %655 : vector<2x8x8xf32>
    %cst_129 = arith.constant 1.000000e+00 : f32
    %657 = vector.broadcast %cst_129 : f32 to vector<2x8x8xf32>
    %658 = arith.subf %657, %656 : vector<2x8x8xf32>
    %659 = arith.mulf %423, %658 : vector<2x8x8xf32>
    %660 = vector.shape_cast %535 : vector<2x8xf32> to vector<2x1x8xf32>
    %661 = vector.broadcast %652 : vector<2x8x1xf32> to vector<2x8x8xf32>
    %662 = vector.broadcast %660 : vector<2x1x8xf32> to vector<2x8x8xf32>
    %663 = arith.mulf %661, %662 : vector<2x8x8xf32>
    %664 = arith.addf %659, %663 : vector<2x8x8xf32>
    %665 = vector.shape_cast %651 : vector<2x8xf32> to vector<2x8x1xf32>
    %cst_130 = arith.constant 1.000000e+00 : f32
    %666 = vector.broadcast %cst_130 : f32 to vector<2x8x1xf32>
    %667 = arith.subf %666, %665 : vector<2x8x1xf32>
    %668 = vector.shape_cast %651 : vector<2x8xf32> to vector<2x1x8xf32>
    %669 = vector.broadcast %667 : vector<2x8x1xf32> to vector<2x8x8xf32>
    %670 = vector.broadcast %668 : vector<2x1x8xf32> to vector<2x8x8xf32>
    %671 = arith.subf %669, %670 : vector<2x8x8xf32>
    %672 = arith.mulf %671, %439 : vector<2x8x8xf32>
    %673 = vector.shape_cast %651 : vector<2x8xf32> to vector<2x8x1xf32>
    %674 = vector.shape_cast %455 : vector<2x8xf32> to vector<2x1x8xf32>
    %675 = vector.broadcast %673 : vector<2x8x1xf32> to vector<2x8x8xf32>
    %676 = vector.broadcast %674 : vector<2x1x8xf32> to vector<2x8x8xf32>
    %677 = arith.mulf %675, %676 : vector<2x8x8xf32>
    %678 = arith.addf %672, %677 : vector<2x8x8xf32>
    %679 = vector.broadcast %12 : vector<1x8x8xf32> to vector<2x8x8xf32>
    %680 = arith.mulf %678, %679 : vector<2x8x8xf32>
    %681 = arith.mulf %671, %448 : vector<2x8x8xf32>
    %682 = vector.shape_cast %651 : vector<2x8xf32> to vector<2x1x8xf32>
    %683 = vector.shape_cast %455 : vector<2x8xf32> to vector<2x8x1xf32>
    %684 = vector.broadcast %682 : vector<2x1x8xf32> to vector<2x8x8xf32>
    %685 = vector.broadcast %683 : vector<2x8x1xf32> to vector<2x8x8xf32>
    %686 = arith.mulf %684, %685 : vector<2x8x8xf32>
    %687 = arith.addf %681, %686 : vector<2x8x8xf32>
    %688 = vector.broadcast %12 : vector<1x8x8xf32> to vector<2x8x8xf32>
    %689 = arith.mulf %687, %688 : vector<2x8x8xf32>
    %cst_131 = arith.constant dense<0.000000e+00> : vector<2xf32>
    %690 = vector.multi_reduction <add>, %651, %cst_131 [1] : vector<2x8xf32> to vector<2xf32>
    %691 = vector.shape_cast %690 : vector<2xf32> to vector<2x1xf32>
    %cst_132 = arith.constant 1.000000e+00 : f32
    %692 = vector.broadcast %cst_132 : f32 to vector<2x1xf32>
    %693 = arith.subf %692, %691 : vector<2x1xf32>
    %694 = vector.broadcast %693 : vector<2x1xf32> to vector<2x8xf32>
    %695 = arith.mulf %694, %455 : vector<2x8xf32>
    %696 = arith.addf %695, %651 : vector<2x8xf32>
    %697 = tpu.concatenate %689, %680 in 2 : vector<2x8x8xf32>, vector<2x8x8xf32> -> vector<2x8x16xf32>
    "tpu.trace_start"() <{level = 10 : i32, message = "brn,bnk->brk"}> : () -> ()
    %cst_133 = arith.constant dense<0.000000e+00> : vector<2x2x16xf32>
    %698 = tpu.matmul %497, %697, %cst_133 {dimension_numbers = #tpu.dot_dimension_numbers<[2], [1], [1], [2], [0, 0, 0, 1, 1, 2], [0], [0]>} : vector<2x2x8xf32>, vector<2x8x16xf32>, vector<2x2x16xf32> -> vector<2x2x16xf32>
    "tpu.trace_stop"() : () -> ()
    %699 = vector.extract_strided_slice %698 {offsets = [0, 0, 0], sizes = [2, 2, 8], strides = [1, 1, 1]} : vector<2x2x16xf32> to vector<2x2x8xf32>
    %700 = vector.extract_strided_slice %698 {offsets = [0, 0, 8], sizes = [2, 2, 8], strides = [1, 1, 1]} : vector<2x2x16xf32> to vector<2x2x8xf32>
    "tpu.trace_start"() <{level = 10 : i32, message = "brw,bnw->brn"}> : () -> ()
    %cst_134 = arith.constant dense<0.000000e+00> : vector<2x2x8xf32>
    %701 = tpu.matmul %533, %664, %cst_134 {dimension_numbers = #tpu.dot_dimension_numbers<[2], [2], [1], [1], [0, 0, 0, 1, 1, 1], [0], [0]>} : vector<2x2x8xf32>, vector<2x8x8xf32>, vector<2x2x8xf32> -> vector<2x2x8xf32>
    "tpu.trace_stop"() : () -> ()
    %702 = arith.mulf %664, %664 : vector<2x8x8xf32>
    %cst_135 = arith.constant dense<0.000000e+00> : vector<2x8xf32>
    %703 = vector.multi_reduction <add>, %702, %cst_135 [2] : vector<2x8x8xf32> to vector<2x8xf32>
    %704 = arith.mulf %533, %533 : vector<2x2x8xf32>
    %cst_136 = arith.constant dense<0.000000e+00> : vector<2x2xf32>
    %705 = vector.multi_reduction <add>, %704, %cst_136 [2] : vector<2x2x8xf32> to vector<2x2xf32>
    %706 = vector.shape_cast %703 : vector<2x8xf32> to vector<2x1x8xf32>
    %707 = vector.shape_cast %705 : vector<2x2xf32> to vector<2x2x1xf32>
    %708 = vector.broadcast %706 : vector<2x1x8xf32> to vector<2x2x8xf32>
    %709 = vector.broadcast %707 : vector<2x2x1xf32> to vector<2x2x8xf32>
    %710 = arith.mulf %708, %709 : vector<2x2x8xf32>
    %cst_137 = arith.constant 9.99999997E-7 : f32
    %711 = vector.broadcast %cst_137 : f32 to vector<2x2x8xf32>
    %712 = arith.addf %710, %711 : vector<2x2x8xf32>
    %713 = math.rsqrt %712 : vector<2x2x8xf32>
    %714 = arith.mulf %701, %713 : vector<2x2x8xf32>
    %715 = vector.shape_cast %557 : vector<2x2xf32> to vector<2x2x1xf32>
    %716 = vector.broadcast %715 : vector<2x2x1xf32> to vector<2x2x8xf32>
    %717 = arith.mulf %716, %714 : vector<2x2x8xf32>
    %cst_138 = arith.constant dense<0xFF800000> : vector<2x2xf32>
    %718 = vector.multi_reduction <maximumf>, %717, %cst_138 [2] : vector<2x2x8xf32> to vector<2x2xf32>
    %719 = vector.shape_cast %718 : vector<2x2xf32> to vector<2x2x1xf32>
    %720 = vector.broadcast %719 : vector<2x2x1xf32> to vector<2x2x8xf32>
    %721 = arith.subf %717, %720 : vector<2x2x8xf32>
    %722 = math.exp %721 : vector<2x2x8xf32>
    %cst_139 = arith.constant dense<0.000000e+00> : vector<2x2xf32>
    %723 = vector.multi_reduction <add>, %722, %cst_139 [2] : vector<2x2x8xf32> to vector<2x2xf32>
    %724 = vector.shape_cast %723 : vector<2x2xf32> to vector<2x2x1xf32>
    %725 = tpu.reciprocal %724 {approx = true} : vector<2x2x1xf32> -> vector<2x2x1xf32>
    %726 = vector.broadcast %725 : vector<2x2x1xf32> to vector<2x2x8xf32>
    %727 = arith.mulf %722, %726 : vector<2x2x8xf32>
    %728 = vector.shape_cast %575 : vector<2x2xf32> to vector<2x2x1xf32>
    %729 = vector.broadcast %728 : vector<2x2x1xf32> to vector<2x2x8xf32>
    %730 = arith.mulf %729, %700 : vector<2x2x8xf32>
    %731 = vector.shape_cast %576 : vector<2x2xf32> to vector<2x2x1xf32>
    %732 = vector.broadcast %731 : vector<2x2x1xf32> to vector<2x2x8xf32>
    %733 = arith.mulf %732, %727 : vector<2x2x8xf32>
    %734 = arith.addf %730, %733 : vector<2x2x8xf32>
    %735 = vector.shape_cast %577 : vector<2x2xf32> to vector<2x2x1xf32>
    %736 = vector.broadcast %735 : vector<2x2x1xf32> to vector<2x2x8xf32>
    %737 = arith.mulf %736, %699 : vector<2x2x8xf32>
    %738 = arith.addf %734, %737 : vector<2x2x8xf32>
    "tpu.trace_start"() <{level = 10 : i32, message = "brn,bnw->brw"}> : () -> ()
    %cst_140 = arith.constant dense<0.000000e+00> : vector<2x2x8xf32>
    %739 = tpu.matmul %738, %664, %cst_140 {dimension_numbers = #tpu.dot_dimension_numbers<[2], [1], [1], [2], [0, 0, 0, 1, 1, 2], [0], [0]>} : vector<2x2x8xf32>, vector<2x8x8xf32>, vector<2x2x8xf32> -> vector<2x2x8xf32>
    "tpu.trace_stop"() : () -> ()
    %740 = vector.shape_cast %739 : vector<2x2x8xf32> to vector<2x16xf32>
    %cst_141 = arith.constant dense<0.000000e+00> : vector<2x8xf32>
    %741 = tpu.matmul %740, %4, %cst_141 {dimension_numbers = #tpu.dot_dimension_numbers<[1], [0], [0], [1], [0, 0, 1, 1], [], []>} : vector<2x16xf32>, vector<16x8xf32>, vector<2x8xf32> -> vector<2x8xf32>
    %742 = arith.addf %531, %741 : vector<2x8xf32>
    %c2_142 = arith.constant 2 : index
    %c0_143 = arith.constant 0 : index
    %c0_144 = arith.constant 0 : index
    %743 = vector.load %arg16[%c2_142, %c0_143, %c0_144] : memref<8x2x8xf32, #tpu.memory_space<vmem>>, vector<1x2x8xf32>
    %744 = vector.shape_cast %743 : vector<1x2x8xf32> to vector<2x8xf32>
    %745 = vector.shape_cast %742 : vector<2x8xf32> to vector<1x2x8xf32>
    tpu.vector_store %arg16[%c2_142, %c0_143, %c0_144], %745 {strides = array<i32>} : memref<8x2x8xf32, #tpu.memory_space<vmem>>, vector<1x2x8xf32>,
    %c3 = arith.constant 3 : index
    %c0_145 = arith.constant 0 : index
    %c0_146 = arith.constant 0 : index
    %746 = vector.load %arg0[%c3, %c0_145, %c0_146] : memref<8x2x8xf32, #tpu.memory_space<vmem>>, vector<1x2x8xf32>
    %747 = vector.shape_cast %746 : vector<1x2x8xf32> to vector<2x8xf32>
    %748 = vector.shape_cast %739 : vector<2x2x8xf32> to vector<2x16xf32>
    %749 = tpu.concatenate %747, %748, %527 in 1 : vector<2x8xf32>, vector<2x16xf32>, vector<2x32xf32> -> vector<2x56xf32>
    %cst_147 = arith.constant dense<0.000000e+00> : vector<2x128xf32>
    %750 = tpu.matmul %749, %0, %cst_147 {dimension_numbers = #tpu.dot_dimension_numbers<[1], [0], [0], [1], [0, 0, 1, 1], [], []>} : vector<2x56xf32>, vector<56x128xf32>, vector<2x128xf32> -> vector<2x128xf32>
    %751 = vector.broadcast %1 : vector<1x128xf32> to vector<2x128xf32>
    %752 = arith.addf %750, %751 : vector<2x128xf32>
    %753 = vector.extract_strided_slice %752 {offsets = [0, 0], sizes = [2, 96], strides = [1, 1]} : vector<2x128xf32> to vector<2x96xf32>
    %754 = arith.negf %753 : vector<2x96xf32>
    %755 = math.exp %754 : vector<2x96xf32>
    %cst_148 = arith.constant 1.000000e+00 : f32
    %756 = vector.broadcast %cst_148 : f32 to vector<2x96xf32>
    %757 = arith.addf %756, %755 : vector<2x96xf32>
    %758 = arith.divf %756, %757 : vector<2x96xf32>
    %759 = vector.extract_strided_slice %758 {offsets = [0, 0], sizes = [2, 32], strides = [1, 1]} : vector<2x96xf32> to vector<2x32xf32>
    %760 = vector.extract_strided_slice %758 {offsets = [0, 32], sizes = [2, 32], strides = [1, 1]} : vector<2x96xf32> to vector<2x32xf32>
    %761 = vector.extract_strided_slice %758 {offsets = [0, 64], sizes = [2, 32], strides = [1, 1]} : vector<2x96xf32> to vector<2x32xf32>
    %762 = vector.extract_strided_slice %752 {offsets = [0, 96], sizes = [2, 32], strides = [1, 1]} : vector<2x128xf32> to vector<2x32xf32>
    %763 = math.tanh %762 : vector<2x32xf32>
    %764 = arith.mulf %760, %525 : vector<2x32xf32>
    %765 = arith.mulf %759, %763 : vector<2x32xf32>
    %766 = arith.addf %764, %765 : vector<2x32xf32>
    %767 = math.tanh %766 : vector<2x32xf32>
    %768 = arith.mulf %761, %767 : vector<2x32xf32>
    %cst_149 = arith.constant dense<0.000000e+00> : vector<2x128xf32>
    %769 = tpu.matmul %768, %2, %cst_149 {dimension_numbers = #tpu.dot_dimension_numbers<[1], [0], [0], [1], [0, 0, 1, 1], [], []>} : vector<2x32xf32>, vector<32x128xf32>, vector<2x128xf32> -> vector<2x128xf32>
    %770 = vector.broadcast %3 : vector<1x128xf32> to vector<2x128xf32>
    %771 = arith.addf %769, %770 : vector<2x128xf32>
    %772 = vector.extract_strided_slice %771 {offsets = [0, 0], sizes = [2, 8], strides = [1, 1]} : vector<2x128xf32> to vector<2x8xf32>
    %773 = vector.extract_strided_slice %771 {offsets = [0, 8], sizes = [2, 16], strides = [1, 1]} : vector<2x128xf32> to vector<2x16xf32>
    %774 = vector.shape_cast %773 : vector<2x16xf32> to vector<2x2x8xf32>
    %775 = vector.extract_strided_slice %771 {offsets = [0, 24], sizes = [2, 8], strides = [1, 1]} : vector<2x128xf32> to vector<2x8xf32>
    %776 = vector.extract_strided_slice %771 {offsets = [0, 32], sizes = [2, 8], strides = [1, 1]} : vector<2x128xf32> to vector<2x8xf32>
    %777 = vector.extract_strided_slice %771 {offsets = [0, 40], sizes = [2, 12], strides = [1, 1]} : vector<2x128xf32> to vector<2x12xf32>
    %778 = arith.negf %777 : vector<2x12xf32>
    %779 = math.exp %778 : vector<2x12xf32>
    %cst_150 = arith.constant 1.000000e+00 : f32
    %780 = vector.broadcast %cst_150 : f32 to vector<2x12xf32>
    %781 = arith.addf %780, %779 : vector<2x12xf32>
    %782 = arith.divf %780, %781 : vector<2x12xf32>
    %783 = vector.extract_strided_slice %782 {offsets = [0, 0], sizes = [2, 8], strides = [1, 1]} : vector<2x12xf32> to vector<2x8xf32>
    %784 = vector.extract_strided_slice %782 {offsets = [0, 8], sizes = [2, 2], strides = [1, 1]} : vector<2x12xf32> to vector<2x2xf32>
    %785 = vector.extract_strided_slice %782 {offsets = [0, 10], sizes = [2, 1], strides = [1, 1]} : vector<2x12xf32> to vector<2x1xf32>
    %786 = vector.extract_strided_slice %782 {offsets = [0, 11], sizes = [2, 1], strides = [1, 1]} : vector<2x12xf32> to vector<2x1xf32>
    %787 = vector.extract_strided_slice %771 {offsets = [0, 56], sizes = [2, 3], strides = [1, 1]} : vector<2x128xf32> to vector<2x3xf32>
    %cst_151 = arith.constant 0.000000e+00 : f32
    %788 = vector.broadcast %cst_151 : f32 to vector<2x3xf32>
    %789 = arith.maximumf %787, %788 : vector<2x3xf32>
    %790 = math.absf %787 : vector<2x3xf32>
    %cst_152 = arith.constant 0.000000e+00 : f32
    %791 = vector.broadcast %cst_152 : f32 to vector<2x3xf32>
    %792 = arith.subf %791, %790 : vector<2x3xf32>
    %793 = math.exp %792 : vector<2x3xf32>
    %794 = math.log1p %793 : vector<2x3xf32>
    %795 = arith.addf %789, %794 : vector<2x3xf32>
    %796 = vector.extract_strided_slice %795 {offsets = [0, 0], sizes = [2, 2], strides = [1, 1]} : vector<2x3xf32> to vector<2x2xf32>
    %cst_153 = arith.constant 1.000000e+00 : f32
    %797 = vector.broadcast %cst_153 : f32 to vector<2x2xf32>
    %798 = arith.addf %797, %796 : vector<2x2xf32>
    %799 = vector.extract_strided_slice %795 {offsets = [0, 2], sizes = [2, 1], strides = [1, 1]} : vector<2x3xf32> to vector<2x1xf32>
    %cst_154 = arith.constant 1.000000e+00 : f32
    %800 = vector.broadcast %cst_154 : f32 to vector<2x1xf32>
    %801 = arith.addf %800, %799 : vector<2x1xf32>
    %802 = vector.extract_strided_slice %771 {offsets = [0, 64], sizes = [2, 2], strides = [1, 1]} : vector<2x128xf32> to vector<2x2xf32>
    %803 = vector.extract_strided_slice %771 {offsets = [0, 66], sizes = [2, 2], strides = [1, 1]} : vector<2x128xf32> to vector<2x2xf32>
    %804 = vector.extract_strided_slice %771 {offsets = [0, 68], sizes = [2, 2], strides = [1, 1]} : vector<2x128xf32> to vector<2x2xf32>
    %805 = arith.maximumf %802, %803 : vector<2x2xf32>
    %806 = arith.maximumf %805, %804 : vector<2x2xf32>
    %807 = arith.subf %802, %806 : vector<2x2xf32>
    %808 = math.exp %807 : vector<2x2xf32>
    %809 = arith.subf %803, %806 : vector<2x2xf32>
    %810 = math.exp %809 : vector<2x2xf32>
    %811 = arith.subf %804, %806 : vector<2x2xf32>
    %812 = math.exp %811 : vector<2x2xf32>
    %813 = arith.addf %808, %810 : vector<2x2xf32>
    %814 = arith.addf %813, %812 : vector<2x2xf32>
    %815 = tpu.reciprocal %814 {approx = true} : vector<2x2xf32> -> vector<2x2xf32>
    %816 = arith.mulf %808, %815 : vector<2x2xf32>
    %817 = arith.mulf %810, %815 : vector<2x2xf32>
    %818 = arith.mulf %812, %815 : vector<2x2xf32>
    %819 = vector.shape_cast %784 : vector<2x2xf32> to vector<2x2x1xf32>
    %820 = vector.broadcast %819 : vector<2x2x1xf32> to vector<2x2x8xf32>
    %821 = arith.mulf %820, %738 : vector<2x2x8xf32>
    %cst_155 = arith.constant 1.000000e+00 : f32
    %822 = vector.broadcast %cst_155 : f32 to vector<2x2x8xf32>
    %823 = arith.subf %822, %821 : vector<2x2x8xf32>
    %824 = vector.extract_strided_slice %823 {offsets = [0, 0, 0], sizes = [2, 1, 8], strides = [1, 1, 1]} : vector<2x2x8xf32> to vector<2x1x8xf32>
    %825 = vector.shape_cast %824 : vector<2x1x8xf32> to vector<2x8xf32>
    %826 = vector.extract_strided_slice %823 {offsets = [0, 1, 0], sizes = [2, 1, 8], strides = [1, 1, 1]} : vector<2x2x8xf32> to vector<2x1x8xf32>
    %827 = vector.shape_cast %826 : vector<2x1x8xf32> to vector<2x8xf32>
    %828 = arith.mulf %825, %827 : vector<2x8xf32>
    %829 = arith.addf %591, %651 : vector<2x8xf32>
    %830 = arith.mulf %591, %651 : vector<2x8xf32>
    %831 = arith.subf %829, %830 : vector<2x8xf32>
    %832 = arith.mulf %831, %828 : vector<2x8xf32>
    %833 = vector.shape_cast %832 : vector<2x8xf32> to vector<2x8x1xf32>
    %834 = vector.shape_cast %832 : vector<2x8xf32> to vector<2x1x8xf32>
    %835 = vector.broadcast %834 : vector<2x1x8xf32> to vector<2x8x8xf32>
    %836 = vector.broadcast %833 : vector<2x8x1xf32> to vector<2x8x8xf32>
    %837 = arith.cmpf olt, %835, %836 : vector<2x8x8xf32>
    %838 = vector.broadcast %834 : vector<2x1x8xf32> to vector<2x8x8xf32>
    %839 = vector.broadcast %833 : vector<2x8x1xf32> to vector<2x8x8xf32>
    %840 = arith.cmpf oeq, %838, %839 : vector<2x8x8xf32>
    %841 = vector.broadcast %8 : vector<1x8x8xi1> to vector<2x8x8xi1>
    %842 = arith.andi %840, %841 : vector<2x8x8xi1>
    %843 = arith.ori %837, %842 : vector<2x8x8xi1>
    %844 = arith.extui %843 : vector<2x8x8xi1> to vector<2x8x8xi32>
    %845 = arith.sitofp %844 : vector<2x8x8xi32> to vector<2x8x8xf32>
    %cst_156 = arith.constant 1.000000e-30 : f32
    %846 = vector.broadcast %cst_156 : f32 to vector<2x8xf32>
    %847 = arith.maximumf %832, %846 : vector<2x8xf32>
    %848 = math.log %847 : vector<2x8xf32>
    %849 = vector.shape_cast %848 : vector<2x8xf32> to vector<2x1x8xf32>
    %850 = vector.broadcast %849 : vector<2x1x8xf32> to vector<2x8x8xf32>
    %851 = arith.mulf %845, %850 : vector<2x8x8xf32>
    %cst_157 = arith.constant dense<0.000000e+00> : vector<2x8xf32>
    %852 = vector.multi_reduction <add>, %851, %cst_157 [2] : vector<2x8x8xf32> to vector<2x8xf32>
    %853 = math.exp %852 : vector<2x8xf32>
    %cst_158 = arith.constant 1.000000e+00 : f32
    %854 = vector.broadcast %cst_158 : f32 to vector<2x8xf32>
    %855 = arith.subf %854, %832 : vector<2x8xf32>
    %856 = arith.mulf %855, %853 : vector<2x8xf32>
    %857 = vector.shape_cast %775 : vector<2x8xf32> to vector<2x1x8xf32>
    %858 = vector.broadcast %857 : vector<2x1x8xf32> to vector<2x8x8xf32>
    %859 = arith.mulf %858, %664 : vector<2x8x8xf32>
    %cst_159 = arith.constant dense<0.000000e+00> : vector<2x8xf32>
    %860 = vector.multi_reduction <add>, %859, %cst_159 [2] : vector<2x8x8xf32> to vector<2x8xf32>
    %861 = arith.mulf %664, %664 : vector<2x8x8xf32>
    %cst_160 = arith.constant dense<0.000000e+00> : vector<2x8xf32>
    %862 = vector.multi_reduction <add>, %861, %cst_160 [2] : vector<2x8x8xf32> to vector<2x8xf32>
    %863 = arith.mulf %775, %775 : vector<2x8xf32>
    %cst_161 = arith.constant dense<0.000000e+00> : vector<2xf32>
    %864 = vector.multi_reduction <add>, %863, %cst_161 [1] : vector<2x8xf32> to vector<2xf32>
    %865 = vector.shape_cast %864 : vector<2xf32> to vector<2x1xf32>
    %866 = vector.broadcast %865 : vector<2x1xf32> to vector<2x8xf32>
    %867 = arith.mulf %862, %866 : vector<2x8xf32>
    %cst_162 = arith.constant 9.99999997E-7 : f32
    %868 = vector.broadcast %cst_162 : f32 to vector<2x8xf32>
    %869 = arith.addf %867, %868 : vector<2x8xf32>
    %870 = math.rsqrt %869 : vector<2x8xf32>
    %871 = arith.mulf %860, %870 : vector<2x8xf32>
    %872 = vector.broadcast %801 : vector<2x1xf32> to vector<2x8xf32>
    %873 = arith.mulf %872, %871 : vector<2x8xf32>
    %cst_163 = arith.constant dense<0xFF800000> : vector<2xf32>
    %874 = vector.multi_reduction <maximumf>, %873, %cst_163 [1] : vector<2x8xf32> to vector<2xf32>
    %875 = vector.shape_cast %874 : vector<2xf32> to vector<2x1xf32>
    %876 = vector.broadcast %875 : vector<2x1xf32> to vector<2x8xf32>
    %877 = arith.subf %873, %876 : vector<2x8xf32>
    %878 = math.exp %877 : vector<2x8xf32>
    %cst_164 = arith.constant dense<0.000000e+00> : vector<2xf32>
    %879 = vector.multi_reduction <add>, %878, %cst_164 [1] : vector<2x8xf32> to vector<2xf32>
    %880 = vector.shape_cast %879 : vector<2xf32> to vector<2x1xf32>
    %881 = tpu.reciprocal %880 {approx = true} : vector<2x1xf32> -> vector<2x1xf32>
    %882 = vector.broadcast %881 : vector<2x1xf32> to vector<2x8xf32>
    %883 = arith.mulf %878, %882 : vector<2x8xf32>
    %884 = vector.broadcast %785 : vector<2x1xf32> to vector<2x8xf32>
    %885 = arith.mulf %884, %856 : vector<2x8xf32>
    %cst_165 = arith.constant 1.000000e+00 : f32
    %886 = vector.broadcast %cst_165 : f32 to vector<2x1xf32>
    %887 = arith.subf %886, %785 : vector<2x1xf32>
    %888 = vector.broadcast %887 : vector<2x1xf32> to vector<2x8xf32>
    %889 = arith.mulf %888, %883 : vector<2x8xf32>
    %890 = arith.addf %885, %889 : vector<2x8xf32>
    %891 = vector.broadcast %786 : vector<2x1xf32> to vector<2x8xf32>
    %892 = arith.mulf %891, %890 : vector<2x8xf32>
    %893 = vector.shape_cast %892 : vector<2x8xf32> to vector<2x8x1xf32>
    %894 = vector.shape_cast %783 : vector<2x8xf32> to vector<2x1x8xf32>
    %895 = vector.broadcast %893 : vector<2x8x1xf32> to vector<2x8x8xf32>
    %896 = vector.broadcast %894 : vector<2x1x8xf32> to vector<2x8x8xf32>
    %897 = arith.mulf %895, %896 : vector<2x8x8xf32>
    %cst_166 = arith.constant 1.000000e+00 : f32
    %898 = vector.broadcast %cst_166 : f32 to vector<2x8x8xf32>
    %899 = arith.subf %898, %897 : vector<2x8x8xf32>
    %900 = arith.mulf %664, %899 : vector<2x8x8xf32>
    %901 = vector.shape_cast %776 : vector<2x8xf32> to vector<2x1x8xf32>
    %902 = vector.broadcast %893 : vector<2x8x1xf32> to vector<2x8x8xf32>
    %903 = vector.broadcast %901 : vector<2x1x8xf32> to vector<2x8x8xf32>
    %904 = arith.mulf %902, %903 : vector<2x8x8xf32>
    %905 = arith.addf %900, %904 : vector<2x8x8xf32>
    %906 = vector.shape_cast %892 : vector<2x8xf32> to vector<2x8x1xf32>
    %cst_167 = arith.constant 1.000000e+00 : f32
    %907 = vector.broadcast %cst_167 : f32 to vector<2x8x1xf32>
    %908 = arith.subf %907, %906 : vector<2x8x1xf32>
    %909 = vector.shape_cast %892 : vector<2x8xf32> to vector<2x1x8xf32>
    %910 = vector.broadcast %908 : vector<2x8x1xf32> to vector<2x8x8xf32>
    %911 = vector.broadcast %909 : vector<2x1x8xf32> to vector<2x8x8xf32>
    %912 = arith.subf %910, %911 : vector<2x8x8xf32>
    %913 = arith.mulf %912, %680 : vector<2x8x8xf32>
    %914 = vector.shape_cast %892 : vector<2x8xf32> to vector<2x8x1xf32>
    %915 = vector.shape_cast %696 : vector<2x8xf32> to vector<2x1x8xf32>
    %916 = vector.broadcast %914 : vector<2x8x1xf32> to vector<2x8x8xf32>
    %917 = vector.broadcast %915 : vector<2x1x8xf32> to vector<2x8x8xf32>
    %918 = arith.mulf %916, %917 : vector<2x8x8xf32>
    %919 = arith.addf %913, %918 : vector<2x8x8xf32>
    %920 = vector.broadcast %12 : vector<1x8x8xf32> to vector<2x8x8xf32>
    %921 = arith.mulf %919, %920 : vector<2x8x8xf32>
    %922 = arith.mulf %912, %689 : vector<2x8x8xf32>
    %923 = vector.shape_cast %892 : vector<2x8xf32> to vector<2x1x8xf32>
    %924 = vector.shape_cast %696 : vector<2x8xf32> to vector<2x8x1xf32>
    %925 = vector.broadcast %923 : vector<2x1x8xf32> to vector<2x8x8xf32>
    %926 = vector.broadcast %924 : vector<2x8x1xf32> to vector<2x8x8xf32>
    %927 = arith.mulf %925, %926 : vector<2x8x8xf32>
    %928 = arith.addf %922, %927 : vector<2x8x8xf32>
    %929 = vector.broadcast %12 : vector<1x8x8xf32> to vector<2x8x8xf32>
    %930 = arith.mulf %928, %929 : vector<2x8x8xf32>
    %cst_168 = arith.constant dense<0.000000e+00> : vector<2xf32>
    %931 = vector.multi_reduction <add>, %892, %cst_168 [1] : vector<2x8xf32> to vector<2xf32>
    %932 = vector.shape_cast %931 : vector<2xf32> to vector<2x1xf32>
    %cst_169 = arith.constant 1.000000e+00 : f32
    %933 = vector.broadcast %cst_169 : f32 to vector<2x1xf32>
    %934 = arith.subf %933, %932 : vector<2x1xf32>
    %935 = vector.broadcast %934 : vector<2x1xf32> to vector<2x8xf32>
    %936 = arith.mulf %935, %696 : vector<2x8xf32>
    %937 = arith.addf %936, %892 : vector<2x8xf32>
    %938 = tpu.concatenate %930, %921 in 2 : vector<2x8x8xf32>, vector<2x8x8xf32> -> vector<2x8x16xf32>
    "tpu.trace_start"() <{level = 10 : i32, message = "brn,bnk->brk"}> : () -> ()
    %cst_170 = arith.constant dense<0.000000e+00> : vector<2x2x16xf32>
    %939 = tpu.matmul %738, %938, %cst_170 {dimension_numbers = #tpu.dot_dimension_numbers<[2], [1], [1], [2], [0, 0, 0, 1, 1, 2], [0], [0]>} : vector<2x2x8xf32>, vector<2x8x16xf32>, vector<2x2x16xf32> -> vector<2x2x16xf32>
    "tpu.trace_stop"() : () -> ()
    %940 = vector.extract_strided_slice %939 {offsets = [0, 0, 0], sizes = [2, 2, 8], strides = [1, 1, 1]} : vector<2x2x16xf32> to vector<2x2x8xf32>
    %941 = vector.extract_strided_slice %939 {offsets = [0, 0, 8], sizes = [2, 2, 8], strides = [1, 1, 1]} : vector<2x2x16xf32> to vector<2x2x8xf32>
    "tpu.trace_start"() <{level = 10 : i32, message = "brw,bnw->brn"}> : () -> ()
    %cst_171 = arith.constant dense<0.000000e+00> : vector<2x2x8xf32>
    %942 = tpu.matmul %774, %905, %cst_171 {dimension_numbers = #tpu.dot_dimension_numbers<[2], [2], [1], [1], [0, 0, 0, 1, 1, 1], [0], [0]>} : vector<2x2x8xf32>, vector<2x8x8xf32>, vector<2x2x8xf32> -> vector<2x2x8xf32>
    "tpu.trace_stop"() : () -> ()
    %943 = arith.mulf %905, %905 : vector<2x8x8xf32>
    %cst_172 = arith.constant dense<0.000000e+00> : vector<2x8xf32>
    %944 = vector.multi_reduction <add>, %943, %cst_172 [2] : vector<2x8x8xf32> to vector<2x8xf32>
    %945 = arith.mulf %774, %774 : vector<2x2x8xf32>
    %cst_173 = arith.constant dense<0.000000e+00> : vector<2x2xf32>
    %946 = vector.multi_reduction <add>, %945, %cst_173 [2] : vector<2x2x8xf32> to vector<2x2xf32>
    %947 = vector.shape_cast %944 : vector<2x8xf32> to vector<2x1x8xf32>
    %948 = vector.shape_cast %946 : vector<2x2xf32> to vector<2x2x1xf32>
    %949 = vector.broadcast %947 : vector<2x1x8xf32> to vector<2x2x8xf32>
    %950 = vector.broadcast %948 : vector<2x2x1xf32> to vector<2x2x8xf32>
    %951 = arith.mulf %949, %950 : vector<2x2x8xf32>
    %cst_174 = arith.constant 9.99999997E-7 : f32
    %952 = vector.broadcast %cst_174 : f32 to vector<2x2x8xf32>
    %953 = arith.addf %951, %952 : vector<2x2x8xf32>
    %954 = math.rsqrt %953 : vector<2x2x8xf32>
    %955 = arith.mulf %942, %954 : vector<2x2x8xf32>
    %956 = vector.shape_cast %798 : vector<2x2xf32> to vector<2x2x1xf32>
    %957 = vector.broadcast %956 : vector<2x2x1xf32> to vector<2x2x8xf32>
    %958 = arith.mulf %957, %955 : vector<2x2x8xf32>
    %cst_175 = arith.constant dense<0xFF800000> : vector<2x2xf32>
    %959 = vector.multi_reduction <maximumf>, %958, %cst_175 [2] : vector<2x2x8xf32> to vector<2x2xf32>
    %960 = vector.shape_cast %959 : vector<2x2xf32> to vector<2x2x1xf32>
    %961 = vector.broadcast %960 : vector<2x2x1xf32> to vector<2x2x8xf32>
    %962 = arith.subf %958, %961 : vector<2x2x8xf32>
    %963 = math.exp %962 : vector<2x2x8xf32>
    %cst_176 = arith.constant dense<0.000000e+00> : vector<2x2xf32>
    %964 = vector.multi_reduction <add>, %963, %cst_176 [2] : vector<2x2x8xf32> to vector<2x2xf32>
    %965 = vector.shape_cast %964 : vector<2x2xf32> to vector<2x2x1xf32>
    %966 = tpu.reciprocal %965 {approx = true} : vector<2x2x1xf32> -> vector<2x2x1xf32>
    %967 = vector.broadcast %966 : vector<2x2x1xf32> to vector<2x2x8xf32>
    %968 = arith.mulf %963, %967 : vector<2x2x8xf32>
    %969 = vector.shape_cast %816 : vector<2x2xf32> to vector<2x2x1xf32>
    %970 = vector.broadcast %969 : vector<2x2x1xf32> to vector<2x2x8xf32>
    %971 = arith.mulf %970, %941 : vector<2x2x8xf32>
    %972 = vector.shape_cast %817 : vector<2x2xf32> to vector<2x2x1xf32>
    %973 = vector.broadcast %972 : vector<2x2x1xf32> to vector<2x2x8xf32>
    %974 = arith.mulf %973, %968 : vector<2x2x8xf32>
    %975 = arith.addf %971, %974 : vector<2x2x8xf32>
    %976 = vector.shape_cast %818 : vector<2x2xf32> to vector<2x2x1xf32>
    %977 = vector.broadcast %976 : vector<2x2x1xf32> to vector<2x2x8xf32>
    %978 = arith.mulf %977, %940 : vector<2x2x8xf32>
    %979 = arith.addf %975, %978 : vector<2x2x8xf32>
    "tpu.trace_start"() <{level = 10 : i32, message = "brn,bnw->brw"}> : () -> ()
    %cst_177 = arith.constant dense<0.000000e+00> : vector<2x2x8xf32>
    %980 = tpu.matmul %979, %905, %cst_177 {dimension_numbers = #tpu.dot_dimension_numbers<[2], [1], [1], [2], [0, 0, 0, 1, 1, 2], [0], [0]>} : vector<2x2x8xf32>, vector<2x8x8xf32>, vector<2x2x8xf32> -> vector<2x2x8xf32>
    "tpu.trace_stop"() : () -> ()
    %981 = vector.shape_cast %980 : vector<2x2x8xf32> to vector<2x16xf32>
    %cst_178 = arith.constant dense<0.000000e+00> : vector<2x8xf32>
    %982 = tpu.matmul %981, %4, %cst_178 {dimension_numbers = #tpu.dot_dimension_numbers<[1], [0], [0], [1], [0, 0, 1, 1], [], []>} : vector<2x16xf32>, vector<16x8xf32>, vector<2x8xf32> -> vector<2x8xf32>
    %983 = arith.addf %772, %982 : vector<2x8xf32>
    %c3_179 = arith.constant 3 : index
    %c0_180 = arith.constant 0 : index
    %c0_181 = arith.constant 0 : index
    %984 = vector.load %arg16[%c3_179, %c0_180, %c0_181] : memref<8x2x8xf32, #tpu.memory_space<vmem>>, vector<1x2x8xf32>
    %985 = vector.shape_cast %984 : vector<1x2x8xf32> to vector<2x8xf32>
    %986 = vector.shape_cast %983 : vector<2x8xf32> to vector<1x2x8xf32>
    tpu.vector_store %arg16[%c3_179, %c0_180, %c0_181], %986 {strides = array<i32>} : memref<8x2x8xf32, #tpu.memory_space<vmem>>, vector<1x2x8xf32>,
    %c4 = arith.constant 4 : index
    %c0_182 = arith.constant 0 : index
    %c0_183 = arith.constant 0 : index
    %987 = vector.load %arg0[%c4, %c0_182, %c0_183] : memref<8x2x8xf32, #tpu.memory_space<vmem>>, vector<1x2x8xf32>
    %988 = vector.shape_cast %987 : vector<1x2x8xf32> to vector<2x8xf32>
    %989 = vector.shape_cast %980 : vector<2x2x8xf32> to vector<2x16xf32>
    %990 = tpu.concatenate %988, %989, %768 in 1 : vector<2x8xf32>, vector<2x16xf32>, vector<2x32xf32> -> vector<2x56xf32>
    %cst_184 = arith.constant dense<0.000000e+00> : vector<2x128xf32>
    %991 = tpu.matmul %990, %0, %cst_184 {dimension_numbers = #tpu.dot_dimension_numbers<[1], [0], [0], [1], [0, 0, 1, 1], [], []>} : vector<2x56xf32>, vector<56x128xf32>, vector<2x128xf32> -> vector<2x128xf32>
    %992 = vector.broadcast %1 : vector<1x128xf32> to vector<2x128xf32>
    %993 = arith.addf %991, %992 : vector<2x128xf32>
    %994 = vector.extract_strided_slice %993 {offsets = [0, 0], sizes = [2, 96], strides = [1, 1]} : vector<2x128xf32> to vector<2x96xf32>
    %995 = arith.negf %994 : vector<2x96xf32>
    %996 = math.exp %995 : vector<2x96xf32>
    %cst_185 = arith.constant 1.000000e+00 : f32
    %997 = vector.broadcast %cst_185 : f32 to vector<2x96xf32>
    %998 = arith.addf %997, %996 : vector<2x96xf32>
    %999 = arith.divf %997, %998 : vector<2x96xf32>
    %1000 = vector.extract_strided_slice %999 {offsets = [0, 0], sizes = [2, 32], strides = [1, 1]} : vector<2x96xf32> to vector<2x32xf32>
    %1001 = vector.extract_strided_slice %999 {offsets = [0, 32], sizes = [2, 32], strides = [1, 1]} : vector<2x96xf32> to vector<2x32xf32>
    %1002 = vector.extract_strided_slice %999 {offsets = [0, 64], sizes = [2, 32], strides = [1, 1]} : vector<2x96xf32> to vector<2x32xf32>
    %1003 = vector.extract_strided_slice %993 {offsets = [0, 96], sizes = [2, 32], strides = [1, 1]} : vector<2x128xf32> to vector<2x32xf32>
    %1004 = math.tanh %1003 : vector<2x32xf32>
    %1005 = arith.mulf %1001, %766 : vector<2x32xf32>
    %1006 = arith.mulf %1000, %1004 : vector<2x32xf32>
    %1007 = arith.addf %1005, %1006 : vector<2x32xf32>
    %1008 = math.tanh %1007 : vector<2x32xf32>
    %1009 = arith.mulf %1002, %1008 : vector<2x32xf32>
    %cst_186 = arith.constant dense<0.000000e+00> : vector<2x128xf32>
    %1010 = tpu.matmul %1009, %2, %cst_186 {dimension_numbers = #tpu.dot_dimension_numbers<[1], [0], [0], [1], [0, 0, 1, 1], [], []>} : vector<2x32xf32>, vector<32x128xf32>, vector<2x128xf32> -> vector<2x128xf32>
    %1011 = vector.broadcast %3 : vector<1x128xf32> to vector<2x128xf32>
    %1012 = arith.addf %1010, %1011 : vector<2x128xf32>
    %1013 = vector.extract_strided_slice %1012 {offsets = [0, 0], sizes = [2, 8], strides = [1, 1]} : vector<2x128xf32> to vector<2x8xf32>
    %1014 = vector.extract_strided_slice %1012 {offsets = [0, 8], sizes = [2, 16], strides = [1, 1]} : vector<2x128xf32> to vector<2x16xf32>
    %1015 = vector.shape_cast %1014 : vector<2x16xf32> to vector<2x2x8xf32>
    %1016 = vector.extract_strided_slice %1012 {offsets = [0, 24], sizes = [2, 8], strides = [1, 1]} : vector<2x128xf32> to vector<2x8xf32>
    %1017 = vector.extract_strided_slice %1012 {offsets = [0, 32], sizes = [2, 8], strides = [1, 1]} : vector<2x128xf32> to vector<2x8xf32>
    %1018 = vector.extract_strided_slice %1012 {offsets = [0, 40], sizes = [2, 12], strides = [1, 1]} : vector<2x128xf32> to vector<2x12xf32>
    %1019 = arith.negf %1018 : vector<2x12xf32>
    %1020 = math.exp %1019 : vector<2x12xf32>
    %cst_187 = arith.constant 1.000000e+00 : f32
    %1021 = vector.broadcast %cst_187 : f32 to vector<2x12xf32>
    %1022 = arith.addf %1021, %1020 : vector<2x12xf32>
    %1023 = arith.divf %1021, %1022 : vector<2x12xf32>
    %1024 = vector.extract_strided_slice %1023 {offsets = [0, 0], sizes = [2, 8], strides = [1, 1]} : vector<2x12xf32> to vector<2x8xf32>
    %1025 = vector.extract_strided_slice %1023 {offsets = [0, 8], sizes = [2, 2], strides = [1, 1]} : vector<2x12xf32> to vector<2x2xf32>
    %1026 = vector.extract_strided_slice %1023 {offsets = [0, 10], sizes = [2, 1], strides = [1, 1]} : vector<2x12xf32> to vector<2x1xf32>
    %1027 = vector.extract_strided_slice %1023 {offsets = [0, 11], sizes = [2, 1], strides = [1, 1]} : vector<2x12xf32> to vector<2x1xf32>
    %1028 = vector.extract_strided_slice %1012 {offsets = [0, 56], sizes = [2, 3], strides = [1, 1]} : vector<2x128xf32> to vector<2x3xf32>
    %cst_188 = arith.constant 0.000000e+00 : f32
    %1029 = vector.broadcast %cst_188 : f32 to vector<2x3xf32>
    %1030 = arith.maximumf %1028, %1029 : vector<2x3xf32>
    %1031 = math.absf %1028 : vector<2x3xf32>
    %cst_189 = arith.constant 0.000000e+00 : f32
    %1032 = vector.broadcast %cst_189 : f32 to vector<2x3xf32>
    %1033 = arith.subf %1032, %1031 : vector<2x3xf32>
    %1034 = math.exp %1033 : vector<2x3xf32>
    %1035 = math.log1p %1034 : vector<2x3xf32>
    %1036 = arith.addf %1030, %1035 : vector<2x3xf32>
    %1037 = vector.extract_strided_slice %1036 {offsets = [0, 0], sizes = [2, 2], strides = [1, 1]} : vector<2x3xf32> to vector<2x2xf32>
    %cst_190 = arith.constant 1.000000e+00 : f32
    %1038 = vector.broadcast %cst_190 : f32 to vector<2x2xf32>
    %1039 = arith.addf %1038, %1037 : vector<2x2xf32>
    %1040 = vector.extract_strided_slice %1036 {offsets = [0, 2], sizes = [2, 1], strides = [1, 1]} : vector<2x3xf32> to vector<2x1xf32>
    %cst_191 = arith.constant 1.000000e+00 : f32
    %1041 = vector.broadcast %cst_191 : f32 to vector<2x1xf32>
    %1042 = arith.addf %1041, %1040 : vector<2x1xf32>
    %1043 = vector.extract_strided_slice %1012 {offsets = [0, 64], sizes = [2, 2], strides = [1, 1]} : vector<2x128xf32> to vector<2x2xf32>
    %1044 = vector.extract_strided_slice %1012 {offsets = [0, 66], sizes = [2, 2], strides = [1, 1]} : vector<2x128xf32> to vector<2x2xf32>
    %1045 = vector.extract_strided_slice %1012 {offsets = [0, 68], sizes = [2, 2], strides = [1, 1]} : vector<2x128xf32> to vector<2x2xf32>
    %1046 = arith.maximumf %1043, %1044 : vector<2x2xf32>
    %1047 = arith.maximumf %1046, %1045 : vector<2x2xf32>
    %1048 = arith.subf %1043, %1047 : vector<2x2xf32>
    %1049 = math.exp %1048 : vector<2x2xf32>
    %1050 = arith.subf %1044, %1047 : vector<2x2xf32>
    %1051 = math.exp %1050 : vector<2x2xf32>
    %1052 = arith.subf %1045, %1047 : vector<2x2xf32>
    %1053 = math.exp %1052 : vector<2x2xf32>
    %1054 = arith.addf %1049, %1051 : vector<2x2xf32>
    %1055 = arith.addf %1054, %1053 : vector<2x2xf32>
    %1056 = tpu.reciprocal %1055 {approx = true} : vector<2x2xf32> -> vector<2x2xf32>
    %1057 = arith.mulf %1049, %1056 : vector<2x2xf32>
    %1058 = arith.mulf %1051, %1056 : vector<2x2xf32>
    %1059 = arith.mulf %1053, %1056 : vector<2x2xf32>
    %1060 = vector.shape_cast %1025 : vector<2x2xf32> to vector<2x2x1xf32>
    %1061 = vector.broadcast %1060 : vector<2x2x1xf32> to vector<2x2x8xf32>
    %1062 = arith.mulf %1061, %979 : vector<2x2x8xf32>
    %cst_192 = arith.constant 1.000000e+00 : f32
    %1063 = vector.broadcast %cst_192 : f32 to vector<2x2x8xf32>
    %1064 = arith.subf %1063, %1062 : vector<2x2x8xf32>
    %1065 = vector.extract_strided_slice %1064 {offsets = [0, 0, 0], sizes = [2, 1, 8], strides = [1, 1, 1]} : vector<2x2x8xf32> to vector<2x1x8xf32>
    %1066 = vector.shape_cast %1065 : vector<2x1x8xf32> to vector<2x8xf32>
    %1067 = vector.extract_strided_slice %1064 {offsets = [0, 1, 0], sizes = [2, 1, 8], strides = [1, 1, 1]} : vector<2x2x8xf32> to vector<2x1x8xf32>
    %1068 = vector.shape_cast %1067 : vector<2x1x8xf32> to vector<2x8xf32>
    %1069 = arith.mulf %1066, %1068 : vector<2x8xf32>
    %1070 = arith.addf %832, %892 : vector<2x8xf32>
    %1071 = arith.mulf %832, %892 : vector<2x8xf32>
    %1072 = arith.subf %1070, %1071 : vector<2x8xf32>
    %1073 = arith.mulf %1072, %1069 : vector<2x8xf32>
    %1074 = vector.shape_cast %1073 : vector<2x8xf32> to vector<2x8x1xf32>
    %1075 = vector.shape_cast %1073 : vector<2x8xf32> to vector<2x1x8xf32>
    %1076 = vector.broadcast %1075 : vector<2x1x8xf32> to vector<2x8x8xf32>
    %1077 = vector.broadcast %1074 : vector<2x8x1xf32> to vector<2x8x8xf32>
    %1078 = arith.cmpf olt, %1076, %1077 : vector<2x8x8xf32>
    %1079 = vector.broadcast %1075 : vector<2x1x8xf32> to vector<2x8x8xf32>
    %1080 = vector.broadcast %1074 : vector<2x8x1xf32> to vector<2x8x8xf32>
    %1081 = arith.cmpf oeq, %1079, %1080 : vector<2x8x8xf32>
    %1082 = vector.broadcast %8 : vector<1x8x8xi1> to vector<2x8x8xi1>
    %1083 = arith.andi %1081, %1082 : vector<2x8x8xi1>
    %1084 = arith.ori %1078, %1083 : vector<2x8x8xi1>
    %1085 = arith.extui %1084 : vector<2x8x8xi1> to vector<2x8x8xi32>
    %1086 = arith.sitofp %1085 : vector<2x8x8xi32> to vector<2x8x8xf32>
    %cst_193 = arith.constant 1.000000e-30 : f32
    %1087 = vector.broadcast %cst_193 : f32 to vector<2x8xf32>
    %1088 = arith.maximumf %1073, %1087 : vector<2x8xf32>
    %1089 = math.log %1088 : vector<2x8xf32>
    %1090 = vector.shape_cast %1089 : vector<2x8xf32> to vector<2x1x8xf32>
    %1091 = vector.broadcast %1090 : vector<2x1x8xf32> to vector<2x8x8xf32>
    %1092 = arith.mulf %1086, %1091 : vector<2x8x8xf32>
    %cst_194 = arith.constant dense<0.000000e+00> : vector<2x8xf32>
    %1093 = vector.multi_reduction <add>, %1092, %cst_194 [2] : vector<2x8x8xf32> to vector<2x8xf32>
    %1094 = math.exp %1093 : vector<2x8xf32>
    %cst_195 = arith.constant 1.000000e+00 : f32
    %1095 = vector.broadcast %cst_195 : f32 to vector<2x8xf32>
    %1096 = arith.subf %1095, %1073 : vector<2x8xf32>
    %1097 = arith.mulf %1096, %1094 : vector<2x8xf32>
    %1098 = vector.shape_cast %1016 : vector<2x8xf32> to vector<2x1x8xf32>
    %1099 = vector.broadcast %1098 : vector<2x1x8xf32> to vector<2x8x8xf32>
    %1100 = arith.mulf %1099, %905 : vector<2x8x8xf32>
    %cst_196 = arith.constant dense<0.000000e+00> : vector<2x8xf32>
    %1101 = vector.multi_reduction <add>, %1100, %cst_196 [2] : vector<2x8x8xf32> to vector<2x8xf32>
    %1102 = arith.mulf %905, %905 : vector<2x8x8xf32>
    %cst_197 = arith.constant dense<0.000000e+00> : vector<2x8xf32>
    %1103 = vector.multi_reduction <add>, %1102, %cst_197 [2] : vector<2x8x8xf32> to vector<2x8xf32>
    %1104 = arith.mulf %1016, %1016 : vector<2x8xf32>
    %cst_198 = arith.constant dense<0.000000e+00> : vector<2xf32>
    %1105 = vector.multi_reduction <add>, %1104, %cst_198 [1] : vector<2x8xf32> to vector<2xf32>
    %1106 = vector.shape_cast %1105 : vector<2xf32> to vector<2x1xf32>
    %1107 = vector.broadcast %1106 : vector<2x1xf32> to vector<2x8xf32>
    %1108 = arith.mulf %1103, %1107 : vector<2x8xf32>
    %cst_199 = arith.constant 9.99999997E-7 : f32
    %1109 = vector.broadcast %cst_199 : f32 to vector<2x8xf32>
    %1110 = arith.addf %1108, %1109 : vector<2x8xf32>
    %1111 = math.rsqrt %1110 : vector<2x8xf32>
    %1112 = arith.mulf %1101, %1111 : vector<2x8xf32>
    %1113 = vector.broadcast %1042 : vector<2x1xf32> to vector<2x8xf32>
    %1114 = arith.mulf %1113, %1112 : vector<2x8xf32>
    %cst_200 = arith.constant dense<0xFF800000> : vector<2xf32>
    %1115 = vector.multi_reduction <maximumf>, %1114, %cst_200 [1] : vector<2x8xf32> to vector<2xf32>
    %1116 = vector.shape_cast %1115 : vector<2xf32> to vector<2x1xf32>
    %1117 = vector.broadcast %1116 : vector<2x1xf32> to vector<2x8xf32>
    %1118 = arith.subf %1114, %1117 : vector<2x8xf32>
    %1119 = math.exp %1118 : vector<2x8xf32>
    %cst_201 = arith.constant dense<0.000000e+00> : vector<2xf32>
    %1120 = vector.multi_reduction <add>, %1119, %cst_201 [1] : vector<2x8xf32> to vector<2xf32>
    %1121 = vector.shape_cast %1120 : vector<2xf32> to vector<2x1xf32>
    %1122 = tpu.reciprocal %1121 {approx = true} : vector<2x1xf32> -> vector<2x1xf32>
    %1123 = vector.broadcast %1122 : vector<2x1xf32> to vector<2x8xf32>
    %1124 = arith.mulf %1119, %1123 : vector<2x8xf32>
    %1125 = vector.broadcast %1026 : vector<2x1xf32> to vector<2x8xf32>
    %1126 = arith.mulf %1125, %1097 : vector<2x8xf32>
    %cst_202 = arith.constant 1.000000e+00 : f32
    %1127 = vector.broadcast %cst_202 : f32 to vector<2x1xf32>
    %1128 = arith.subf %1127, %1026 : vector<2x1xf32>
    %1129 = vector.broadcast %1128 : vector<2x1xf32> to vector<2x8xf32>
    %1130 = arith.mulf %1129, %1124 : vector<2x8xf32>
    %1131 = arith.addf %1126, %1130 : vector<2x8xf32>
    %1132 = vector.broadcast %1027 : vector<2x1xf32> to vector<2x8xf32>
    %1133 = arith.mulf %1132, %1131 : vector<2x8xf32>
    %1134 = vector.shape_cast %1133 : vector<2x8xf32> to vector<2x8x1xf32>
    %1135 = vector.shape_cast %1024 : vector<2x8xf32> to vector<2x1x8xf32>
    %1136 = vector.broadcast %1134 : vector<2x8x1xf32> to vector<2x8x8xf32>
    %1137 = vector.broadcast %1135 : vector<2x1x8xf32> to vector<2x8x8xf32>
    %1138 = arith.mulf %1136, %1137 : vector<2x8x8xf32>
    %cst_203 = arith.constant 1.000000e+00 : f32
    %1139 = vector.broadcast %cst_203 : f32 to vector<2x8x8xf32>
    %1140 = arith.subf %1139, %1138 : vector<2x8x8xf32>
    %1141 = arith.mulf %905, %1140 : vector<2x8x8xf32>
    %1142 = vector.shape_cast %1017 : vector<2x8xf32> to vector<2x1x8xf32>
    %1143 = vector.broadcast %1134 : vector<2x8x1xf32> to vector<2x8x8xf32>
    %1144 = vector.broadcast %1142 : vector<2x1x8xf32> to vector<2x8x8xf32>
    %1145 = arith.mulf %1143, %1144 : vector<2x8x8xf32>
    %1146 = arith.addf %1141, %1145 : vector<2x8x8xf32>
    %1147 = vector.shape_cast %1133 : vector<2x8xf32> to vector<2x8x1xf32>
    %cst_204 = arith.constant 1.000000e+00 : f32
    %1148 = vector.broadcast %cst_204 : f32 to vector<2x8x1xf32>
    %1149 = arith.subf %1148, %1147 : vector<2x8x1xf32>
    %1150 = vector.shape_cast %1133 : vector<2x8xf32> to vector<2x1x8xf32>
    %1151 = vector.broadcast %1149 : vector<2x8x1xf32> to vector<2x8x8xf32>
    %1152 = vector.broadcast %1150 : vector<2x1x8xf32> to vector<2x8x8xf32>
    %1153 = arith.subf %1151, %1152 : vector<2x8x8xf32>
    %1154 = arith.mulf %1153, %921 : vector<2x8x8xf32>
    %1155 = vector.shape_cast %1133 : vector<2x8xf32> to vector<2x8x1xf32>
    %1156 = vector.shape_cast %937 : vector<2x8xf32> to vector<2x1x8xf32>
    %1157 = vector.broadcast %1155 : vector<2x8x1xf32> to vector<2x8x8xf32>
    %1158 = vector.broadcast %1156 : vector<2x1x8xf32> to vector<2x8x8xf32>
    %1159 = arith.mulf %1157, %1158 : vector<2x8x8xf32>
    %1160 = arith.addf %1154, %1159 : vector<2x8x8xf32>
    %1161 = vector.broadcast %12 : vector<1x8x8xf32> to vector<2x8x8xf32>
    %1162 = arith.mulf %1160, %1161 : vector<2x8x8xf32>
    %1163 = arith.mulf %1153, %930 : vector<2x8x8xf32>
    %1164 = vector.shape_cast %1133 : vector<2x8xf32> to vector<2x1x8xf32>
    %1165 = vector.shape_cast %937 : vector<2x8xf32> to vector<2x8x1xf32>
    %1166 = vector.broadcast %1164 : vector<2x1x8xf32> to vector<2x8x8xf32>
    %1167 = vector.broadcast %1165 : vector<2x8x1xf32> to vector<2x8x8xf32>
    %1168 = arith.mulf %1166, %1167 : vector<2x8x8xf32>
    %1169 = arith.addf %1163, %1168 : vector<2x8x8xf32>
    %1170 = vector.broadcast %12 : vector<1x8x8xf32> to vector<2x8x8xf32>
    %1171 = arith.mulf %1169, %1170 : vector<2x8x8xf32>
    %cst_205 = arith.constant dense<0.000000e+00> : vector<2xf32>
    %1172 = vector.multi_reduction <add>, %1133, %cst_205 [1] : vector<2x8xf32> to vector<2xf32>
    %1173 = vector.shape_cast %1172 : vector<2xf32> to vector<2x1xf32>
    %cst_206 = arith.constant 1.000000e+00 : f32
    %1174 = vector.broadcast %cst_206 : f32 to vector<2x1xf32>
    %1175 = arith.subf %1174, %1173 : vector<2x1xf32>
    %1176 = vector.broadcast %1175 : vector<2x1xf32> to vector<2x8xf32>
    %1177 = arith.mulf %1176, %937 : vector<2x8xf32>
    %1178 = arith.addf %1177, %1133 : vector<2x8xf32>
    %1179 = tpu.concatenate %1171, %1162 in 2 : vector<2x8x8xf32>, vector<2x8x8xf32> -> vector<2x8x16xf32>
    "tpu.trace_start"() <{level = 10 : i32, message = "brn,bnk->brk"}> : () -> ()
    %cst_207 = arith.constant dense<0.000000e+00> : vector<2x2x16xf32>
    %1180 = tpu.matmul %979, %1179, %cst_207 {dimension_numbers = #tpu.dot_dimension_numbers<[2], [1], [1], [2], [0, 0, 0, 1, 1, 2], [0], [0]>} : vector<2x2x8xf32>, vector<2x8x16xf32>, vector<2x2x16xf32> -> vector<2x2x16xf32>
    "tpu.trace_stop"() : () -> ()
    %1181 = vector.extract_strided_slice %1180 {offsets = [0, 0, 0], sizes = [2, 2, 8], strides = [1, 1, 1]} : vector<2x2x16xf32> to vector<2x2x8xf32>
    %1182 = vector.extract_strided_slice %1180 {offsets = [0, 0, 8], sizes = [2, 2, 8], strides = [1, 1, 1]} : vector<2x2x16xf32> to vector<2x2x8xf32>
    "tpu.trace_start"() <{level = 10 : i32, message = "brw,bnw->brn"}> : () -> ()
    %cst_208 = arith.constant dense<0.000000e+00> : vector<2x2x8xf32>
    %1183 = tpu.matmul %1015, %1146, %cst_208 {dimension_numbers = #tpu.dot_dimension_numbers<[2], [2], [1], [1], [0, 0, 0, 1, 1, 1], [0], [0]>} : vector<2x2x8xf32>, vector<2x8x8xf32>, vector<2x2x8xf32> -> vector<2x2x8xf32>
    "tpu.trace_stop"() : () -> ()
    %1184 = arith.mulf %1146, %1146 : vector<2x8x8xf32>
    %cst_209 = arith.constant dense<0.000000e+00> : vector<2x8xf32>
    %1185 = vector.multi_reduction <add>, %1184, %cst_209 [2] : vector<2x8x8xf32> to vector<2x8xf32>
    %1186 = arith.mulf %1015, %1015 : vector<2x2x8xf32>
    %cst_210 = arith.constant dense<0.000000e+00> : vector<2x2xf32>
    %1187 = vector.multi_reduction <add>, %1186, %cst_210 [2] : vector<2x2x8xf32> to vector<2x2xf32>
    %1188 = vector.shape_cast %1185 : vector<2x8xf32> to vector<2x1x8xf32>
    %1189 = vector.shape_cast %1187 : vector<2x2xf32> to vector<2x2x1xf32>
    %1190 = vector.broadcast %1188 : vector<2x1x8xf32> to vector<2x2x8xf32>
    %1191 = vector.broadcast %1189 : vector<2x2x1xf32> to vector<2x2x8xf32>
    %1192 = arith.mulf %1190, %1191 : vector<2x2x8xf32>
    %cst_211 = arith.constant 9.99999997E-7 : f32
    %1193 = vector.broadcast %cst_211 : f32 to vector<2x2x8xf32>
    %1194 = arith.addf %1192, %1193 : vector<2x2x8xf32>
    %1195 = math.rsqrt %1194 : vector<2x2x8xf32>
    %1196 = arith.mulf %1183, %1195 : vector<2x2x8xf32>
    %1197 = vector.shape_cast %1039 : vector<2x2xf32> to vector<2x2x1xf32>
    %1198 = vector.broadcast %1197 : vector<2x2x1xf32> to vector<2x2x8xf32>
    %1199 = arith.mulf %1198, %1196 : vector<2x2x8xf32>
    %cst_212 = arith.constant dense<0xFF800000> : vector<2x2xf32>
    %1200 = vector.multi_reduction <maximumf>, %1199, %cst_212 [2] : vector<2x2x8xf32> to vector<2x2xf32>
    %1201 = vector.shape_cast %1200 : vector<2x2xf32> to vector<2x2x1xf32>
    %1202 = vector.broadcast %1201 : vector<2x2x1xf32> to vector<2x2x8xf32>
    %1203 = arith.subf %1199, %1202 : vector<2x2x8xf32>
    %1204 = math.exp %1203 : vector<2x2x8xf32>
    %cst_213 = arith.constant dense<0.000000e+00> : vector<2x2xf32>
    %1205 = vector.multi_reduction <add>, %1204, %cst_213 [2] : vector<2x2x8xf32> to vector<2x2xf32>
    %1206 = vector.shape_cast %1205 : vector<2x2xf32> to vector<2x2x1xf32>
    %1207 = tpu.reciprocal %1206 {approx = true} : vector<2x2x1xf32> -> vector<2x2x1xf32>
    %1208 = vector.broadcast %1207 : vector<2x2x1xf32> to vector<2x2x8xf32>
    %1209 = arith.mulf %1204, %1208 : vector<2x2x8xf32>
    %1210 = vector.shape_cast %1057 : vector<2x2xf32> to vector<2x2x1xf32>
    %1211 = vector.broadcast %1210 : vector<2x2x1xf32> to vector<2x2x8xf32>
    %1212 = arith.mulf %1211, %1182 : vector<2x2x8xf32>
    %1213 = vector.shape_cast %1058 : vector<2x2xf32> to vector<2x2x1xf32>
    %1214 = vector.broadcast %1213 : vector<2x2x1xf32> to vector<2x2x8xf32>
    %1215 = arith.mulf %1214, %1209 : vector<2x2x8xf32>
    %1216 = arith.addf %1212, %1215 : vector<2x2x8xf32>
    %1217 = vector.shape_cast %1059 : vector<2x2xf32> to vector<2x2x1xf32>
    %1218 = vector.broadcast %1217 : vector<2x2x1xf32> to vector<2x2x8xf32>
    %1219 = arith.mulf %1218, %1181 : vector<2x2x8xf32>
    %1220 = arith.addf %1216, %1219 : vector<2x2x8xf32>
    "tpu.trace_start"() <{level = 10 : i32, message = "brn,bnw->brw"}> : () -> ()
    %cst_214 = arith.constant dense<0.000000e+00> : vector<2x2x8xf32>
    %1221 = tpu.matmul %1220, %1146, %cst_214 {dimension_numbers = #tpu.dot_dimension_numbers<[2], [1], [1], [2], [0, 0, 0, 1, 1, 2], [0], [0]>} : vector<2x2x8xf32>, vector<2x8x8xf32>, vector<2x2x8xf32> -> vector<2x2x8xf32>
    "tpu.trace_stop"() : () -> ()
    %1222 = vector.shape_cast %1221 : vector<2x2x8xf32> to vector<2x16xf32>
    %cst_215 = arith.constant dense<0.000000e+00> : vector<2x8xf32>
    %1223 = tpu.matmul %1222, %4, %cst_215 {dimension_numbers = #tpu.dot_dimension_numbers<[1], [0], [0], [1], [0, 0, 1, 1], [], []>} : vector<2x16xf32>, vector<16x8xf32>, vector<2x8xf32> -> vector<2x8xf32>
    %1224 = arith.addf %1013, %1223 : vector<2x8xf32>
    %c4_216 = arith.constant 4 : index
    %c0_217 = arith.constant 0 : index
    %c0_218 = arith.constant 0 : index
    %1225 = vector.load %arg16[%c4_216, %c0_217, %c0_218] : memref<8x2x8xf32, #tpu.memory_space<vmem>>, vector<1x2x8xf32>
    %1226 = vector.shape_cast %1225 : vector<1x2x8xf32> to vector<2x8xf32>
    %1227 = vector.shape_cast %1224 : vector<2x8xf32> to vector<1x2x8xf32>
    tpu.vector_store %arg16[%c4_216, %c0_217, %c0_218], %1227 {strides = array<i32>} : memref<8x2x8xf32, #tpu.memory_space<vmem>>, vector<1x2x8xf32>,
    %c5 = arith.constant 5 : index
    %c0_219 = arith.constant 0 : index
    %c0_220 = arith.constant 0 : index
    %1228 = vector.load %arg0[%c5, %c0_219, %c0_220] : memref<8x2x8xf32, #tpu.memory_space<vmem>>, vector<1x2x8xf32>
    %1229 = vector.shape_cast %1228 : vector<1x2x8xf32> to vector<2x8xf32>
    %1230 = vector.shape_cast %1221 : vector<2x2x8xf32> to vector<2x16xf32>
    %1231 = tpu.concatenate %1229, %1230, %1009 in 1 : vector<2x8xf32>, vector<2x16xf32>, vector<2x32xf32> -> vector<2x56xf32>
    %cst_221 = arith.constant dense<0.000000e+00> : vector<2x128xf32>
    %1232 = tpu.matmul %1231, %0, %cst_221 {dimension_numbers = #tpu.dot_dimension_numbers<[1], [0], [0], [1], [0, 0, 1, 1], [], []>} : vector<2x56xf32>, vector<56x128xf32>, vector<2x128xf32> -> vector<2x128xf32>
    %1233 = vector.broadcast %1 : vector<1x128xf32> to vector<2x128xf32>
    %1234 = arith.addf %1232, %1233 : vector<2x128xf32>
    %1235 = vector.extract_strided_slice %1234 {offsets = [0, 0], sizes = [2, 96], strides = [1, 1]} : vector<2x128xf32> to vector<2x96xf32>
    %1236 = arith.negf %1235 : vector<2x96xf32>
    %1237 = math.exp %1236 : vector<2x96xf32>
    %cst_222 = arith.constant 1.000000e+00 : f32
    %1238 = vector.broadcast %cst_222 : f32 to vector<2x96xf32>
    %1239 = arith.addf %1238, %1237 : vector<2x96xf32>
    %1240 = arith.divf %1238, %1239 : vector<2x96xf32>
    %1241 = vector.extract_strided_slice %1240 {offsets = [0, 0], sizes = [2, 32], strides = [1, 1]} : vector<2x96xf32> to vector<2x32xf32>
    %1242 = vector.extract_strided_slice %1240 {offsets = [0, 32], sizes = [2, 32], strides = [1, 1]} : vector<2x96xf32> to vector<2x32xf32>
    %1243 = vector.extract_strided_slice %1240 {offsets = [0, 64], sizes = [2, 32], strides = [1, 1]} : vector<2x96xf32> to vector<2x32xf32>
    %1244 = vector.extract_strided_slice %1234 {offsets = [0, 96], sizes = [2, 32], strides = [1, 1]} : vector<2x128xf32> to vector<2x32xf32>
    %1245 = math.tanh %1244 : vector<2x32xf32>
    %1246 = arith.mulf %1242, %1007 : vector<2x32xf32>
    %1247 = arith.mulf %1241, %1245 : vector<2x32xf32>
    %1248 = arith.addf %1246, %1247 : vector<2x32xf32>
    %1249 = math.tanh %1248 : vector<2x32xf32>
    %1250 = arith.mulf %1243, %1249 : vector<2x32xf32>
    %cst_223 = arith.constant dense<0.000000e+00> : vector<2x128xf32>
    %1251 = tpu.matmul %1250, %2, %cst_223 {dimension_numbers = #tpu.dot_dimension_numbers<[1], [0], [0], [1], [0, 0, 1, 1], [], []>} : vector<2x32xf32>, vector<32x128xf32>, vector<2x128xf32> -> vector<2x128xf32>
    %1252 = vector.broadcast %3 : vector<1x128xf32> to vector<2x128xf32>
    %1253 = arith.addf %1251, %1252 : vector<2x128xf32>
    %1254 = vector.extract_strided_slice %1253 {offsets = [0, 0], sizes = [2, 8], strides = [1, 1]} : vector<2x128xf32> to vector<2x8xf32>
    %1255 = vector.extract_strided_slice %1253 {offsets = [0, 8], sizes = [2, 16], strides = [1, 1]} : vector<2x128xf32> to vector<2x16xf32>
    %1256 = vector.shape_cast %1255 : vector<2x16xf32> to vector<2x2x8xf32>
    %1257 = vector.extract_strided_slice %1253 {offsets = [0, 24], sizes = [2, 8], strides = [1, 1]} : vector<2x128xf32> to vector<2x8xf32>
    %1258 = vector.extract_strided_slice %1253 {offsets = [0, 32], sizes = [2, 8], strides = [1, 1]} : vector<2x128xf32> to vector<2x8xf32>
    %1259 = vector.extract_strided_slice %1253 {offsets = [0, 40], sizes = [2, 12], strides = [1, 1]} : vector<2x128xf32> to vector<2x12xf32>
    %1260 = arith.negf %1259 : vector<2x12xf32>
    %1261 = math.exp %1260 : vector<2x12xf32>
    %cst_224 = arith.constant 1.000000e+00 : f32
    %1262 = vector.broadcast %cst_224 : f32 to vector<2x12xf32>
    %1263 = arith.addf %1262, %1261 : vector<2x12xf32>
    %1264 = arith.divf %1262, %1263 : vector<2x12xf32>
    %1265 = vector.extract_strided_slice %1264 {offsets = [0, 0], sizes = [2, 8], strides = [1, 1]} : vector<2x12xf32> to vector<2x8xf32>
    %1266 = vector.extract_strided_slice %1264 {offsets = [0, 8], sizes = [2, 2], strides = [1, 1]} : vector<2x12xf32> to vector<2x2xf32>
    %1267 = vector.extract_strided_slice %1264 {offsets = [0, 10], sizes = [2, 1], strides = [1, 1]} : vector<2x12xf32> to vector<2x1xf32>
    %1268 = vector.extract_strided_slice %1264 {offsets = [0, 11], sizes = [2, 1], strides = [1, 1]} : vector<2x12xf32> to vector<2x1xf32>
    %1269 = vector.extract_strided_slice %1253 {offsets = [0, 56], sizes = [2, 3], strides = [1, 1]} : vector<2x128xf32> to vector<2x3xf32>
    %cst_225 = arith.constant 0.000000e+00 : f32
    %1270 = vector.broadcast %cst_225 : f32 to vector<2x3xf32>
    %1271 = arith.maximumf %1269, %1270 : vector<2x3xf32>
    %1272 = math.absf %1269 : vector<2x3xf32>
    %cst_226 = arith.constant 0.000000e+00 : f32
    %1273 = vector.broadcast %cst_226 : f32 to vector<2x3xf32>
    %1274 = arith.subf %1273, %1272 : vector<2x3xf32>
    %1275 = math.exp %1274 : vector<2x3xf32>
    %1276 = math.log1p %1275 : vector<2x3xf32>
    %1277 = arith.addf %1271, %1276 : vector<2x3xf32>
    %1278 = vector.extract_strided_slice %1277 {offsets = [0, 0], sizes = [2, 2], strides = [1, 1]} : vector<2x3xf32> to vector<2x2xf32>
    %cst_227 = arith.constant 1.000000e+00 : f32
    %1279 = vector.broadcast %cst_227 : f32 to vector<2x2xf32>
    %1280 = arith.addf %1279, %1278 : vector<2x2xf32>
    %1281 = vector.extract_strided_slice %1277 {offsets = [0, 2], sizes = [2, 1], strides = [1, 1]} : vector<2x3xf32> to vector<2x1xf32>
    %cst_228 = arith.constant 1.000000e+00 : f32
    %1282 = vector.broadcast %cst_228 : f32 to vector<2x1xf32>
    %1283 = arith.addf %1282, %1281 : vector<2x1xf32>
    %1284 = vector.extract_strided_slice %1253 {offsets = [0, 64], sizes = [2, 2], strides = [1, 1]} : vector<2x128xf32> to vector<2x2xf32>
    %1285 = vector.extract_strided_slice %1253 {offsets = [0, 66], sizes = [2, 2], strides = [1, 1]} : vector<2x128xf32> to vector<2x2xf32>
    %1286 = vector.extract_strided_slice %1253 {offsets = [0, 68], sizes = [2, 2], strides = [1, 1]} : vector<2x128xf32> to vector<2x2xf32>
    %1287 = arith.maximumf %1284, %1285 : vector<2x2xf32>
    %1288 = arith.maximumf %1287, %1286 : vector<2x2xf32>
    %1289 = arith.subf %1284, %1288 : vector<2x2xf32>
    %1290 = math.exp %1289 : vector<2x2xf32>
    %1291 = arith.subf %1285, %1288 : vector<2x2xf32>
    %1292 = math.exp %1291 : vector<2x2xf32>
    %1293 = arith.subf %1286, %1288 : vector<2x2xf32>
    %1294 = math.exp %1293 : vector<2x2xf32>
    %1295 = arith.addf %1290, %1292 : vector<2x2xf32>
    %1296 = arith.addf %1295, %1294 : vector<2x2xf32>
    %1297 = tpu.reciprocal %1296 {approx = true} : vector<2x2xf32> -> vector<2x2xf32>
    %1298 = arith.mulf %1290, %1297 : vector<2x2xf32>
    %1299 = arith.mulf %1292, %1297 : vector<2x2xf32>
    %1300 = arith.mulf %1294, %1297 : vector<2x2xf32>
    %1301 = vector.shape_cast %1266 : vector<2x2xf32> to vector<2x2x1xf32>
    %1302 = vector.broadcast %1301 : vector<2x2x1xf32> to vector<2x2x8xf32>
    %1303 = arith.mulf %1302, %1220 : vector<2x2x8xf32>
    %cst_229 = arith.constant 1.000000e+00 : f32
    %1304 = vector.broadcast %cst_229 : f32 to vector<2x2x8xf32>
    %1305 = arith.subf %1304, %1303 : vector<2x2x8xf32>
    %1306 = vector.extract_strided_slice %1305 {offsets = [0, 0, 0], sizes = [2, 1, 8], strides = [1, 1, 1]} : vector<2x2x8xf32> to vector<2x1x8xf32>
    %1307 = vector.shape_cast %1306 : vector<2x1x8xf32> to vector<2x8xf32>
    %1308 = vector.extract_strided_slice %1305 {offsets = [0, 1, 0], sizes = [2, 1, 8], strides = [1, 1, 1]} : vector<2x2x8xf32> to vector<2x1x8xf32>
    %1309 = vector.shape_cast %1308 : vector<2x1x8xf32> to vector<2x8xf32>
    %1310 = arith.mulf %1307, %1309 : vector<2x8xf32>
    %1311 = arith.addf %1073, %1133 : vector<2x8xf32>
    %1312 = arith.mulf %1073, %1133 : vector<2x8xf32>
    %1313 = arith.subf %1311, %1312 : vector<2x8xf32>
    %1314 = arith.mulf %1313, %1310 : vector<2x8xf32>
    %1315 = vector.shape_cast %1314 : vector<2x8xf32> to vector<2x8x1xf32>
    %1316 = vector.shape_cast %1314 : vector<2x8xf32> to vector<2x1x8xf32>
    %1317 = vector.broadcast %1316 : vector<2x1x8xf32> to vector<2x8x8xf32>
    %1318 = vector.broadcast %1315 : vector<2x8x1xf32> to vector<2x8x8xf32>
    %1319 = arith.cmpf olt, %1317, %1318 : vector<2x8x8xf32>
    %1320 = vector.broadcast %1316 : vector<2x1x8xf32> to vector<2x8x8xf32>
    %1321 = vector.broadcast %1315 : vector<2x8x1xf32> to vector<2x8x8xf32>
    %1322 = arith.cmpf oeq, %1320, %1321 : vector<2x8x8xf32>
    %1323 = vector.broadcast %8 : vector<1x8x8xi1> to vector<2x8x8xi1>
    %1324 = arith.andi %1322, %1323 : vector<2x8x8xi1>
    %1325 = arith.ori %1319, %1324 : vector<2x8x8xi1>
    %1326 = arith.extui %1325 : vector<2x8x8xi1> to vector<2x8x8xi32>
    %1327 = arith.sitofp %1326 : vector<2x8x8xi32> to vector<2x8x8xf32>
    %cst_230 = arith.constant 1.000000e-30 : f32
    %1328 = vector.broadcast %cst_230 : f32 to vector<2x8xf32>
    %1329 = arith.maximumf %1314, %1328 : vector<2x8xf32>
    %1330 = math.log %1329 : vector<2x8xf32>
    %1331 = vector.shape_cast %1330 : vector<2x8xf32> to vector<2x1x8xf32>
    %1332 = vector.broadcast %1331 : vector<2x1x8xf32> to vector<2x8x8xf32>
    %1333 = arith.mulf %1327, %1332 : vector<2x8x8xf32>
    %cst_231 = arith.constant dense<0.000000e+00> : vector<2x8xf32>
    %1334 = vector.multi_reduction <add>, %1333, %cst_231 [2] : vector<2x8x8xf32> to vector<2x8xf32>
    %1335 = math.exp %1334 : vector<2x8xf32>
    %cst_232 = arith.constant 1.000000e+00 : f32
    %1336 = vector.broadcast %cst_232 : f32 to vector<2x8xf32>
    %1337 = arith.subf %1336, %1314 : vector<2x8xf32>
    %1338 = arith.mulf %1337, %1335 : vector<2x8xf32>
    %1339 = vector.shape_cast %1257 : vector<2x8xf32> to vector<2x1x8xf32>
    %1340 = vector.broadcast %1339 : vector<2x1x8xf32> to vector<2x8x8xf32>
    %1341 = arith.mulf %1340, %1146 : vector<2x8x8xf32>
    %cst_233 = arith.constant dense<0.000000e+00> : vector<2x8xf32>
    %1342 = vector.multi_reduction <add>, %1341, %cst_233 [2] : vector<2x8x8xf32> to vector<2x8xf32>
    %1343 = arith.mulf %1146, %1146 : vector<2x8x8xf32>
    %cst_234 = arith.constant dense<0.000000e+00> : vector<2x8xf32>
    %1344 = vector.multi_reduction <add>, %1343, %cst_234 [2] : vector<2x8x8xf32> to vector<2x8xf32>
    %1345 = arith.mulf %1257, %1257 : vector<2x8xf32>
    %cst_235 = arith.constant dense<0.000000e+00> : vector<2xf32>
    %1346 = vector.multi_reduction <add>, %1345, %cst_235 [1] : vector<2x8xf32> to vector<2xf32>
    %1347 = vector.shape_cast %1346 : vector<2xf32> to vector<2x1xf32>
    %1348 = vector.broadcast %1347 : vector<2x1xf32> to vector<2x8xf32>
    %1349 = arith.mulf %1344, %1348 : vector<2x8xf32>
    %cst_236 = arith.constant 9.99999997E-7 : f32
    %1350 = vector.broadcast %cst_236 : f32 to vector<2x8xf32>
    %1351 = arith.addf %1349, %1350 : vector<2x8xf32>
    %1352 = math.rsqrt %1351 : vector<2x8xf32>
    %1353 = arith.mulf %1342, %1352 : vector<2x8xf32>
    %1354 = vector.broadcast %1283 : vector<2x1xf32> to vector<2x8xf32>
    %1355 = arith.mulf %1354, %1353 : vector<2x8xf32>
    %cst_237 = arith.constant dense<0xFF800000> : vector<2xf32>
    %1356 = vector.multi_reduction <maximumf>, %1355, %cst_237 [1] : vector<2x8xf32> to vector<2xf32>
    %1357 = vector.shape_cast %1356 : vector<2xf32> to vector<2x1xf32>
    %1358 = vector.broadcast %1357 : vector<2x1xf32> to vector<2x8xf32>
    %1359 = arith.subf %1355, %1358 : vector<2x8xf32>
    %1360 = math.exp %1359 : vector<2x8xf32>
    %cst_238 = arith.constant dense<0.000000e+00> : vector<2xf32>
    %1361 = vector.multi_reduction <add>, %1360, %cst_238 [1] : vector<2x8xf32> to vector<2xf32>
    %1362 = vector.shape_cast %1361 : vector<2xf32> to vector<2x1xf32>
    %1363 = tpu.reciprocal %1362 {approx = true} : vector<2x1xf32> -> vector<2x1xf32>
    %1364 = vector.broadcast %1363 : vector<2x1xf32> to vector<2x8xf32>
    %1365 = arith.mulf %1360, %1364 : vector<2x8xf32>
    %1366 = vector.broadcast %1267 : vector<2x1xf32> to vector<2x8xf32>
    %1367 = arith.mulf %1366, %1338 : vector<2x8xf32>
    %cst_239 = arith.constant 1.000000e+00 : f32
    %1368 = vector.broadcast %cst_239 : f32 to vector<2x1xf32>
    %1369 = arith.subf %1368, %1267 : vector<2x1xf32>
    %1370 = vector.broadcast %1369 : vector<2x1xf32> to vector<2x8xf32>
    %1371 = arith.mulf %1370, %1365 : vector<2x8xf32>
    %1372 = arith.addf %1367, %1371 : vector<2x8xf32>
    %1373 = vector.broadcast %1268 : vector<2x1xf32> to vector<2x8xf32>
    %1374 = arith.mulf %1373, %1372 : vector<2x8xf32>
    %1375 = vector.shape_cast %1374 : vector<2x8xf32> to vector<2x8x1xf32>
    %1376 = vector.shape_cast %1265 : vector<2x8xf32> to vector<2x1x8xf32>
    %1377 = vector.broadcast %1375 : vector<2x8x1xf32> to vector<2x8x8xf32>
    %1378 = vector.broadcast %1376 : vector<2x1x8xf32> to vector<2x8x8xf32>
    %1379 = arith.mulf %1377, %1378 : vector<2x8x8xf32>
    %cst_240 = arith.constant 1.000000e+00 : f32
    %1380 = vector.broadcast %cst_240 : f32 to vector<2x8x8xf32>
    %1381 = arith.subf %1380, %1379 : vector<2x8x8xf32>
    %1382 = arith.mulf %1146, %1381 : vector<2x8x8xf32>
    %1383 = vector.shape_cast %1258 : vector<2x8xf32> to vector<2x1x8xf32>
    %1384 = vector.broadcast %1375 : vector<2x8x1xf32> to vector<2x8x8xf32>
    %1385 = vector.broadcast %1383 : vector<2x1x8xf32> to vector<2x8x8xf32>
    %1386 = arith.mulf %1384, %1385 : vector<2x8x8xf32>
    %1387 = arith.addf %1382, %1386 : vector<2x8x8xf32>
    %1388 = vector.shape_cast %1374 : vector<2x8xf32> to vector<2x8x1xf32>
    %cst_241 = arith.constant 1.000000e+00 : f32
    %1389 = vector.broadcast %cst_241 : f32 to vector<2x8x1xf32>
    %1390 = arith.subf %1389, %1388 : vector<2x8x1xf32>
    %1391 = vector.shape_cast %1374 : vector<2x8xf32> to vector<2x1x8xf32>
    %1392 = vector.broadcast %1390 : vector<2x8x1xf32> to vector<2x8x8xf32>
    %1393 = vector.broadcast %1391 : vector<2x1x8xf32> to vector<2x8x8xf32>
    %1394 = arith.subf %1392, %1393 : vector<2x8x8xf32>
    %1395 = arith.mulf %1394, %1162 : vector<2x8x8xf32>
    %1396 = vector.shape_cast %1374 : vector<2x8xf32> to vector<2x8x1xf32>
    %1397 = vector.shape_cast %1178 : vector<2x8xf32> to vector<2x1x8xf32>
    %1398 = vector.broadcast %1396 : vector<2x8x1xf32> to vector<2x8x8xf32>
    %1399 = vector.broadcast %1397 : vector<2x1x8xf32> to vector<2x8x8xf32>
    %1400 = arith.mulf %1398, %1399 : vector<2x8x8xf32>
    %1401 = arith.addf %1395, %1400 : vector<2x8x8xf32>
    %1402 = vector.broadcast %12 : vector<1x8x8xf32> to vector<2x8x8xf32>
    %1403 = arith.mulf %1401, %1402 : vector<2x8x8xf32>
    %1404 = arith.mulf %1394, %1171 : vector<2x8x8xf32>
    %1405 = vector.shape_cast %1374 : vector<2x8xf32> to vector<2x1x8xf32>
    %1406 = vector.shape_cast %1178 : vector<2x8xf32> to vector<2x8x1xf32>
    %1407 = vector.broadcast %1405 : vector<2x1x8xf32> to vector<2x8x8xf32>
    %1408 = vector.broadcast %1406 : vector<2x8x1xf32> to vector<2x8x8xf32>
    %1409 = arith.mulf %1407, %1408 : vector<2x8x8xf32>
    %1410 = arith.addf %1404, %1409 : vector<2x8x8xf32>
    %1411 = vector.broadcast %12 : vector<1x8x8xf32> to vector<2x8x8xf32>
    %1412 = arith.mulf %1410, %1411 : vector<2x8x8xf32>
    %cst_242 = arith.constant dense<0.000000e+00> : vector<2xf32>
    %1413 = vector.multi_reduction <add>, %1374, %cst_242 [1] : vector<2x8xf32> to vector<2xf32>
    %1414 = vector.shape_cast %1413 : vector<2xf32> to vector<2x1xf32>
    %cst_243 = arith.constant 1.000000e+00 : f32
    %1415 = vector.broadcast %cst_243 : f32 to vector<2x1xf32>
    %1416 = arith.subf %1415, %1414 : vector<2x1xf32>
    %1417 = vector.broadcast %1416 : vector<2x1xf32> to vector<2x8xf32>
    %1418 = arith.mulf %1417, %1178 : vector<2x8xf32>
    %1419 = arith.addf %1418, %1374 : vector<2x8xf32>
    %1420 = tpu.concatenate %1412, %1403 in 2 : vector<2x8x8xf32>, vector<2x8x8xf32> -> vector<2x8x16xf32>
    "tpu.trace_start"() <{level = 10 : i32, message = "brn,bnk->brk"}> : () -> ()
    %cst_244 = arith.constant dense<0.000000e+00> : vector<2x2x16xf32>
    %1421 = tpu.matmul %1220, %1420, %cst_244 {dimension_numbers = #tpu.dot_dimension_numbers<[2], [1], [1], [2], [0, 0, 0, 1, 1, 2], [0], [0]>} : vector<2x2x8xf32>, vector<2x8x16xf32>, vector<2x2x16xf32> -> vector<2x2x16xf32>
    "tpu.trace_stop"() : () -> ()
    %1422 = vector.extract_strided_slice %1421 {offsets = [0, 0, 0], sizes = [2, 2, 8], strides = [1, 1, 1]} : vector<2x2x16xf32> to vector<2x2x8xf32>
    %1423 = vector.extract_strided_slice %1421 {offsets = [0, 0, 8], sizes = [2, 2, 8], strides = [1, 1, 1]} : vector<2x2x16xf32> to vector<2x2x8xf32>
    "tpu.trace_start"() <{level = 10 : i32, message = "brw,bnw->brn"}> : () -> ()
    %cst_245 = arith.constant dense<0.000000e+00> : vector<2x2x8xf32>
    %1424 = tpu.matmul %1256, %1387, %cst_245 {dimension_numbers = #tpu.dot_dimension_numbers<[2], [2], [1], [1], [0, 0, 0, 1, 1, 1], [0], [0]>} : vector<2x2x8xf32>, vector<2x8x8xf32>, vector<2x2x8xf32> -> vector<2x2x8xf32>
    "tpu.trace_stop"() : () -> ()
    %1425 = arith.mulf %1387, %1387 : vector<2x8x8xf32>
    %cst_246 = arith.constant dense<0.000000e+00> : vector<2x8xf32>
    %1426 = vector.multi_reduction <add>, %1425, %cst_246 [2] : vector<2x8x8xf32> to vector<2x8xf32>
    %1427 = arith.mulf %1256, %1256 : vector<2x2x8xf32>
    %cst_247 = arith.constant dense<0.000000e+00> : vector<2x2xf32>
    %1428 = vector.multi_reduction <add>, %1427, %cst_247 [2] : vector<2x2x8xf32> to vector<2x2xf32>
    %1429 = vector.shape_cast %1426 : vector<2x8xf32> to vector<2x1x8xf32>
    %1430 = vector.shape_cast %1428 : vector<2x2xf32> to vector<2x2x1xf32>
    %1431 = vector.broadcast %1429 : vector<2x1x8xf32> to vector<2x2x8xf32>
    %1432 = vector.broadcast %1430 : vector<2x2x1xf32> to vector<2x2x8xf32>
    %1433 = arith.mulf %1431, %1432 : vector<2x2x8xf32>
    %cst_248 = arith.constant 9.99999997E-7 : f32
    %1434 = vector.broadcast %cst_248 : f32 to vector<2x2x8xf32>
    %1435 = arith.addf %1433, %1434 : vector<2x2x8xf32>
    %1436 = math.rsqrt %1435 : vector<2x2x8xf32>
    %1437 = arith.mulf %1424, %1436 : vector<2x2x8xf32>
    %1438 = vector.shape_cast %1280 : vector<2x2xf32> to vector<2x2x1xf32>
    %1439 = vector.broadcast %1438 : vector<2x2x1xf32> to vector<2x2x8xf32>
    %1440 = arith.mulf %1439, %1437 : vector<2x2x8xf32>
    %cst_249 = arith.constant dense<0xFF800000> : vector<2x2xf32>
    %1441 = vector.multi_reduction <maximumf>, %1440, %cst_249 [2] : vector<2x2x8xf32> to vector<2x2xf32>
    %1442 = vector.shape_cast %1441 : vector<2x2xf32> to vector<2x2x1xf32>
    %1443 = vector.broadcast %1442 : vector<2x2x1xf32> to vector<2x2x8xf32>
    %1444 = arith.subf %1440, %1443 : vector<2x2x8xf32>
    %1445 = math.exp %1444 : vector<2x2x8xf32>
    %cst_250 = arith.constant dense<0.000000e+00> : vector<2x2xf32>
    %1446 = vector.multi_reduction <add>, %1445, %cst_250 [2] : vector<2x2x8xf32> to vector<2x2xf32>
    %1447 = vector.shape_cast %1446 : vector<2x2xf32> to vector<2x2x1xf32>
    %1448 = tpu.reciprocal %1447 {approx = true} : vector<2x2x1xf32> -> vector<2x2x1xf32>
    %1449 = vector.broadcast %1448 : vector<2x2x1xf32> to vector<2x2x8xf32>
    %1450 = arith.mulf %1445, %1449 : vector<2x2x8xf32>
    %1451 = vector.shape_cast %1298 : vector<2x2xf32> to vector<2x2x1xf32>
    %1452 = vector.broadcast %1451 : vector<2x2x1xf32> to vector<2x2x8xf32>
    %1453 = arith.mulf %1452, %1423 : vector<2x2x8xf32>
    %1454 = vector.shape_cast %1299 : vector<2x2xf32> to vector<2x2x1xf32>
    %1455 = vector.broadcast %1454 : vector<2x2x1xf32> to vector<2x2x8xf32>
    %1456 = arith.mulf %1455, %1450 : vector<2x2x8xf32>
    %1457 = arith.addf %1453, %1456 : vector<2x2x8xf32>
    %1458 = vector.shape_cast %1300 : vector<2x2xf32> to vector<2x2x1xf32>
    %1459 = vector.broadcast %1458 : vector<2x2x1xf32> to vector<2x2x8xf32>
    %1460 = arith.mulf %1459, %1422 : vector<2x2x8xf32>
    %1461 = arith.addf %1457, %1460 : vector<2x2x8xf32>
    "tpu.trace_start"() <{level = 10 : i32, message = "brn,bnw->brw"}> : () -> ()
    %cst_251 = arith.constant dense<0.000000e+00> : vector<2x2x8xf32>
    %1462 = tpu.matmul %1461, %1387, %cst_251 {dimension_numbers = #tpu.dot_dimension_numbers<[2], [1], [1], [2], [0, 0, 0, 1, 1, 2], [0], [0]>} : vector<2x2x8xf32>, vector<2x8x8xf32>, vector<2x2x8xf32> -> vector<2x2x8xf32>
    "tpu.trace_stop"() : () -> ()
    %1463 = vector.shape_cast %1462 : vector<2x2x8xf32> to vector<2x16xf32>
    %cst_252 = arith.constant dense<0.000000e+00> : vector<2x8xf32>
    %1464 = tpu.matmul %1463, %4, %cst_252 {dimension_numbers = #tpu.dot_dimension_numbers<[1], [0], [0], [1], [0, 0, 1, 1], [], []>} : vector<2x16xf32>, vector<16x8xf32>, vector<2x8xf32> -> vector<2x8xf32>
    %1465 = arith.addf %1254, %1464 : vector<2x8xf32>
    %c5_253 = arith.constant 5 : index
    %c0_254 = arith.constant 0 : index
    %c0_255 = arith.constant 0 : index
    %1466 = vector.load %arg16[%c5_253, %c0_254, %c0_255] : memref<8x2x8xf32, #tpu.memory_space<vmem>>, vector<1x2x8xf32>
    %1467 = vector.shape_cast %1466 : vector<1x2x8xf32> to vector<2x8xf32>
    %1468 = vector.shape_cast %1465 : vector<2x8xf32> to vector<1x2x8xf32>
    tpu.vector_store %arg16[%c5_253, %c0_254, %c0_255], %1468 {strides = array<i32>} : memref<8x2x8xf32, #tpu.memory_space<vmem>>, vector<1x2x8xf32>,
    %c6 = arith.constant 6 : index
    %c0_256 = arith.constant 0 : index
    %c0_257 = arith.constant 0 : index
    %1469 = vector.load %arg0[%c6, %c0_256, %c0_257] : memref<8x2x8xf32, #tpu.memory_space<vmem>>, vector<1x2x8xf32>
    %1470 = vector.shape_cast %1469 : vector<1x2x8xf32> to vector<2x8xf32>
    %1471 = vector.shape_cast %1462 : vector<2x2x8xf32> to vector<2x16xf32>
    %1472 = tpu.concatenate %1470, %1471, %1250 in 1 : vector<2x8xf32>, vector<2x16xf32>, vector<2x32xf32> -> vector<2x56xf32>
    %cst_258 = arith.constant dense<0.000000e+00> : vector<2x128xf32>
    %1473 = tpu.matmul %1472, %0, %cst_258 {dimension_numbers = #tpu.dot_dimension_numbers<[1], [0], [0], [1], [0, 0, 1, 1], [], []>} : vector<2x56xf32>, vector<56x128xf32>, vector<2x128xf32> -> vector<2x128xf32>
    %1474 = vector.broadcast %1 : vector<1x128xf32> to vector<2x128xf32>
    %1475 = arith.addf %1473, %1474 : vector<2x128xf32>
    %1476 = vector.extract_strided_slice %1475 {offsets = [0, 0], sizes = [2, 96], strides = [1, 1]} : vector<2x128xf32> to vector<2x96xf32>
    %1477 = arith.negf %1476 : vector<2x96xf32>
    %1478 = math.exp %1477 : vector<2x96xf32>
    %cst_259 = arith.constant 1.000000e+00 : f32
    %1479 = vector.broadcast %cst_259 : f32 to vector<2x96xf32>
    %1480 = arith.addf %1479, %1478 : vector<2x96xf32>
    %1481 = arith.divf %1479, %1480 : vector<2x96xf32>
    %1482 = vector.extract_strided_slice %1481 {offsets = [0, 0], sizes = [2, 32], strides = [1, 1]} : vector<2x96xf32> to vector<2x32xf32>
    %1483 = vector.extract_strided_slice %1481 {offsets = [0, 32], sizes = [2, 32], strides = [1, 1]} : vector<2x96xf32> to vector<2x32xf32>
    %1484 = vector.extract_strided_slice %1481 {offsets = [0, 64], sizes = [2, 32], strides = [1, 1]} : vector<2x96xf32> to vector<2x32xf32>
    %1485 = vector.extract_strided_slice %1475 {offsets = [0, 96], sizes = [2, 32], strides = [1, 1]} : vector<2x128xf32> to vector<2x32xf32>
    %1486 = math.tanh %1485 : vector<2x32xf32>
    %1487 = arith.mulf %1483, %1248 : vector<2x32xf32>
    %1488 = arith.mulf %1482, %1486 : vector<2x32xf32>
    %1489 = arith.addf %1487, %1488 : vector<2x32xf32>
    %1490 = math.tanh %1489 : vector<2x32xf32>
    %1491 = arith.mulf %1484, %1490 : vector<2x32xf32>
    %cst_260 = arith.constant dense<0.000000e+00> : vector<2x128xf32>
    %1492 = tpu.matmul %1491, %2, %cst_260 {dimension_numbers = #tpu.dot_dimension_numbers<[1], [0], [0], [1], [0, 0, 1, 1], [], []>} : vector<2x32xf32>, vector<32x128xf32>, vector<2x128xf32> -> vector<2x128xf32>
    %1493 = vector.broadcast %3 : vector<1x128xf32> to vector<2x128xf32>
    %1494 = arith.addf %1492, %1493 : vector<2x128xf32>
    %1495 = vector.extract_strided_slice %1494 {offsets = [0, 0], sizes = [2, 8], strides = [1, 1]} : vector<2x128xf32> to vector<2x8xf32>
    %1496 = vector.extract_strided_slice %1494 {offsets = [0, 8], sizes = [2, 16], strides = [1, 1]} : vector<2x128xf32> to vector<2x16xf32>
    %1497 = vector.shape_cast %1496 : vector<2x16xf32> to vector<2x2x8xf32>
    %1498 = vector.extract_strided_slice %1494 {offsets = [0, 24], sizes = [2, 8], strides = [1, 1]} : vector<2x128xf32> to vector<2x8xf32>
    %1499 = vector.extract_strided_slice %1494 {offsets = [0, 32], sizes = [2, 8], strides = [1, 1]} : vector<2x128xf32> to vector<2x8xf32>
    %1500 = vector.extract_strided_slice %1494 {offsets = [0, 40], sizes = [2, 12], strides = [1, 1]} : vector<2x128xf32> to vector<2x12xf32>
    %1501 = arith.negf %1500 : vector<2x12xf32>
    %1502 = math.exp %1501 : vector<2x12xf32>
    %cst_261 = arith.constant 1.000000e+00 : f32
    %1503 = vector.broadcast %cst_261 : f32 to vector<2x12xf32>
    %1504 = arith.addf %1503, %1502 : vector<2x12xf32>
    %1505 = arith.divf %1503, %1504 : vector<2x12xf32>
    %1506 = vector.extract_strided_slice %1505 {offsets = [0, 0], sizes = [2, 8], strides = [1, 1]} : vector<2x12xf32> to vector<2x8xf32>
    %1507 = vector.extract_strided_slice %1505 {offsets = [0, 8], sizes = [2, 2], strides = [1, 1]} : vector<2x12xf32> to vector<2x2xf32>
    %1508 = vector.extract_strided_slice %1505 {offsets = [0, 10], sizes = [2, 1], strides = [1, 1]} : vector<2x12xf32> to vector<2x1xf32>
    %1509 = vector.extract_strided_slice %1505 {offsets = [0, 11], sizes = [2, 1], strides = [1, 1]} : vector<2x12xf32> to vector<2x1xf32>
    %1510 = vector.extract_strided_slice %1494 {offsets = [0, 56], sizes = [2, 3], strides = [1, 1]} : vector<2x128xf32> to vector<2x3xf32>
    %cst_262 = arith.constant 0.000000e+00 : f32
    %1511 = vector.broadcast %cst_262 : f32 to vector<2x3xf32>
    %1512 = arith.maximumf %1510, %1511 : vector<2x3xf32>
    %1513 = math.absf %1510 : vector<2x3xf32>
    %cst_263 = arith.constant 0.000000e+00 : f32
    %1514 = vector.broadcast %cst_263 : f32 to vector<2x3xf32>
    %1515 = arith.subf %1514, %1513 : vector<2x3xf32>
    %1516 = math.exp %1515 : vector<2x3xf32>
    %1517 = math.log1p %1516 : vector<2x3xf32>
    %1518 = arith.addf %1512, %1517 : vector<2x3xf32>
    %1519 = vector.extract_strided_slice %1518 {offsets = [0, 0], sizes = [2, 2], strides = [1, 1]} : vector<2x3xf32> to vector<2x2xf32>
    %cst_264 = arith.constant 1.000000e+00 : f32
    %1520 = vector.broadcast %cst_264 : f32 to vector<2x2xf32>
    %1521 = arith.addf %1520, %1519 : vector<2x2xf32>
    %1522 = vector.extract_strided_slice %1518 {offsets = [0, 2], sizes = [2, 1], strides = [1, 1]} : vector<2x3xf32> to vector<2x1xf32>
    %cst_265 = arith.constant 1.000000e+00 : f32
    %1523 = vector.broadcast %cst_265 : f32 to vector<2x1xf32>
    %1524 = arith.addf %1523, %1522 : vector<2x1xf32>
    %1525 = vector.extract_strided_slice %1494 {offsets = [0, 64], sizes = [2, 2], strides = [1, 1]} : vector<2x128xf32> to vector<2x2xf32>
    %1526 = vector.extract_strided_slice %1494 {offsets = [0, 66], sizes = [2, 2], strides = [1, 1]} : vector<2x128xf32> to vector<2x2xf32>
    %1527 = vector.extract_strided_slice %1494 {offsets = [0, 68], sizes = [2, 2], strides = [1, 1]} : vector<2x128xf32> to vector<2x2xf32>
    %1528 = arith.maximumf %1525, %1526 : vector<2x2xf32>
    %1529 = arith.maximumf %1528, %1527 : vector<2x2xf32>
    %1530 = arith.subf %1525, %1529 : vector<2x2xf32>
    %1531 = math.exp %1530 : vector<2x2xf32>
    %1532 = arith.subf %1526, %1529 : vector<2x2xf32>
    %1533 = math.exp %1532 : vector<2x2xf32>
    %1534 = arith.subf %1527, %1529 : vector<2x2xf32>
    %1535 = math.exp %1534 : vector<2x2xf32>
    %1536 = arith.addf %1531, %1533 : vector<2x2xf32>
    %1537 = arith.addf %1536, %1535 : vector<2x2xf32>
    %1538 = tpu.reciprocal %1537 {approx = true} : vector<2x2xf32> -> vector<2x2xf32>
    %1539 = arith.mulf %1531, %1538 : vector<2x2xf32>
    %1540 = arith.mulf %1533, %1538 : vector<2x2xf32>
    %1541 = arith.mulf %1535, %1538 : vector<2x2xf32>
    %1542 = vector.shape_cast %1507 : vector<2x2xf32> to vector<2x2x1xf32>
    %1543 = vector.broadcast %1542 : vector<2x2x1xf32> to vector<2x2x8xf32>
    %1544 = arith.mulf %1543, %1461 : vector<2x2x8xf32>
    %cst_266 = arith.constant 1.000000e+00 : f32
    %1545 = vector.broadcast %cst_266 : f32 to vector<2x2x8xf32>
    %1546 = arith.subf %1545, %1544 : vector<2x2x8xf32>
    %1547 = vector.extract_strided_slice %1546 {offsets = [0, 0, 0], sizes = [2, 1, 8], strides = [1, 1, 1]} : vector<2x2x8xf32> to vector<2x1x8xf32>
    %1548 = vector.shape_cast %1547 : vector<2x1x8xf32> to vector<2x8xf32>
    %1549 = vector.extract_strided_slice %1546 {offsets = [0, 1, 0], sizes = [2, 1, 8], strides = [1, 1, 1]} : vector<2x2x8xf32> to vector<2x1x8xf32>
    %1550 = vector.shape_cast %1549 : vector<2x1x8xf32> to vector<2x8xf32>
    %1551 = arith.mulf %1548, %1550 : vector<2x8xf32>
    %1552 = arith.addf %1314, %1374 : vector<2x8xf32>
    %1553 = arith.mulf %1314, %1374 : vector<2x8xf32>
    %1554 = arith.subf %1552, %1553 : vector<2x8xf32>
    %1555 = arith.mulf %1554, %1551 : vector<2x8xf32>
    %1556 = vector.shape_cast %1555 : vector<2x8xf32> to vector<2x8x1xf32>
    %1557 = vector.shape_cast %1555 : vector<2x8xf32> to vector<2x1x8xf32>
    %1558 = vector.broadcast %1557 : vector<2x1x8xf32> to vector<2x8x8xf32>
    %1559 = vector.broadcast %1556 : vector<2x8x1xf32> to vector<2x8x8xf32>
    %1560 = arith.cmpf olt, %1558, %1559 : vector<2x8x8xf32>
    %1561 = vector.broadcast %1557 : vector<2x1x8xf32> to vector<2x8x8xf32>
    %1562 = vector.broadcast %1556 : vector<2x8x1xf32> to vector<2x8x8xf32>
    %1563 = arith.cmpf oeq, %1561, %1562 : vector<2x8x8xf32>
    %1564 = vector.broadcast %8 : vector<1x8x8xi1> to vector<2x8x8xi1>
    %1565 = arith.andi %1563, %1564 : vector<2x8x8xi1>
    %1566 = arith.ori %1560, %1565 : vector<2x8x8xi1>
    %1567 = arith.extui %1566 : vector<2x8x8xi1> to vector<2x8x8xi32>
    %1568 = arith.sitofp %1567 : vector<2x8x8xi32> to vector<2x8x8xf32>
    %cst_267 = arith.constant 1.000000e-30 : f32
    %1569 = vector.broadcast %cst_267 : f32 to vector<2x8xf32>
    %1570 = arith.maximumf %1555, %1569 : vector<2x8xf32>
    %1571 = math.log %1570 : vector<2x8xf32>
    %1572 = vector.shape_cast %1571 : vector<2x8xf32> to vector<2x1x8xf32>
    %1573 = vector.broadcast %1572 : vector<2x1x8xf32> to vector<2x8x8xf32>
    %1574 = arith.mulf %1568, %1573 : vector<2x8x8xf32>
    %cst_268 = arith.constant dense<0.000000e+00> : vector<2x8xf32>
    %1575 = vector.multi_reduction <add>, %1574, %cst_268 [2] : vector<2x8x8xf32> to vector<2x8xf32>
    %1576 = math.exp %1575 : vector<2x8xf32>
    %cst_269 = arith.constant 1.000000e+00 : f32
    %1577 = vector.broadcast %cst_269 : f32 to vector<2x8xf32>
    %1578 = arith.subf %1577, %1555 : vector<2x8xf32>
    %1579 = arith.mulf %1578, %1576 : vector<2x8xf32>
    %1580 = vector.shape_cast %1498 : vector<2x8xf32> to vector<2x1x8xf32>
    %1581 = vector.broadcast %1580 : vector<2x1x8xf32> to vector<2x8x8xf32>
    %1582 = arith.mulf %1581, %1387 : vector<2x8x8xf32>
    %cst_270 = arith.constant dense<0.000000e+00> : vector<2x8xf32>
    %1583 = vector.multi_reduction <add>, %1582, %cst_270 [2] : vector<2x8x8xf32> to vector<2x8xf32>
    %1584 = arith.mulf %1387, %1387 : vector<2x8x8xf32>
    %cst_271 = arith.constant dense<0.000000e+00> : vector<2x8xf32>
    %1585 = vector.multi_reduction <add>, %1584, %cst_271 [2] : vector<2x8x8xf32> to vector<2x8xf32>
    %1586 = arith.mulf %1498, %1498 : vector<2x8xf32>
    %cst_272 = arith.constant dense<0.000000e+00> : vector<2xf32>
    %1587 = vector.multi_reduction <add>, %1586, %cst_272 [1] : vector<2x8xf32> to vector<2xf32>
    %1588 = vector.shape_cast %1587 : vector<2xf32> to vector<2x1xf32>
    %1589 = vector.broadcast %1588 : vector<2x1xf32> to vector<2x8xf32>
    %1590 = arith.mulf %1585, %1589 : vector<2x8xf32>
    %cst_273 = arith.constant 9.99999997E-7 : f32
    %1591 = vector.broadcast %cst_273 : f32 to vector<2x8xf32>
    %1592 = arith.addf %1590, %1591 : vector<2x8xf32>
    %1593 = math.rsqrt %1592 : vector<2x8xf32>
    %1594 = arith.mulf %1583, %1593 : vector<2x8xf32>
    %1595 = vector.broadcast %1524 : vector<2x1xf32> to vector<2x8xf32>
    %1596 = arith.mulf %1595, %1594 : vector<2x8xf32>
    %cst_274 = arith.constant dense<0xFF800000> : vector<2xf32>
    %1597 = vector.multi_reduction <maximumf>, %1596, %cst_274 [1] : vector<2x8xf32> to vector<2xf32>
    %1598 = vector.shape_cast %1597 : vector<2xf32> to vector<2x1xf32>
    %1599 = vector.broadcast %1598 : vector<2x1xf32> to vector<2x8xf32>
    %1600 = arith.subf %1596, %1599 : vector<2x8xf32>
    %1601 = math.exp %1600 : vector<2x8xf32>
    %cst_275 = arith.constant dense<0.000000e+00> : vector<2xf32>
    %1602 = vector.multi_reduction <add>, %1601, %cst_275 [1] : vector<2x8xf32> to vector<2xf32>
    %1603 = vector.shape_cast %1602 : vector<2xf32> to vector<2x1xf32>
    %1604 = tpu.reciprocal %1603 {approx = true} : vector<2x1xf32> -> vector<2x1xf32>
    %1605 = vector.broadcast %1604 : vector<2x1xf32> to vector<2x8xf32>
    %1606 = arith.mulf %1601, %1605 : vector<2x8xf32>
    %1607 = vector.broadcast %1508 : vector<2x1xf32> to vector<2x8xf32>
    %1608 = arith.mulf %1607, %1579 : vector<2x8xf32>
    %cst_276 = arith.constant 1.000000e+00 : f32
    %1609 = vector.broadcast %cst_276 : f32 to vector<2x1xf32>
    %1610 = arith.subf %1609, %1508 : vector<2x1xf32>
    %1611 = vector.broadcast %1610 : vector<2x1xf32> to vector<2x8xf32>
    %1612 = arith.mulf %1611, %1606 : vector<2x8xf32>
    %1613 = arith.addf %1608, %1612 : vector<2x8xf32>
    %1614 = vector.broadcast %1509 : vector<2x1xf32> to vector<2x8xf32>
    %1615 = arith.mulf %1614, %1613 : vector<2x8xf32>
    %1616 = vector.shape_cast %1615 : vector<2x8xf32> to vector<2x8x1xf32>
    %1617 = vector.shape_cast %1506 : vector<2x8xf32> to vector<2x1x8xf32>
    %1618 = vector.broadcast %1616 : vector<2x8x1xf32> to vector<2x8x8xf32>
    %1619 = vector.broadcast %1617 : vector<2x1x8xf32> to vector<2x8x8xf32>
    %1620 = arith.mulf %1618, %1619 : vector<2x8x8xf32>
    %cst_277 = arith.constant 1.000000e+00 : f32
    %1621 = vector.broadcast %cst_277 : f32 to vector<2x8x8xf32>
    %1622 = arith.subf %1621, %1620 : vector<2x8x8xf32>
    %1623 = arith.mulf %1387, %1622 : vector<2x8x8xf32>
    %1624 = vector.shape_cast %1499 : vector<2x8xf32> to vector<2x1x8xf32>
    %1625 = vector.broadcast %1616 : vector<2x8x1xf32> to vector<2x8x8xf32>
    %1626 = vector.broadcast %1624 : vector<2x1x8xf32> to vector<2x8x8xf32>
    %1627 = arith.mulf %1625, %1626 : vector<2x8x8xf32>
    %1628 = arith.addf %1623, %1627 : vector<2x8x8xf32>
    %1629 = vector.shape_cast %1615 : vector<2x8xf32> to vector<2x8x1xf32>
    %cst_278 = arith.constant 1.000000e+00 : f32
    %1630 = vector.broadcast %cst_278 : f32 to vector<2x8x1xf32>
    %1631 = arith.subf %1630, %1629 : vector<2x8x1xf32>
    %1632 = vector.shape_cast %1615 : vector<2x8xf32> to vector<2x1x8xf32>
    %1633 = vector.broadcast %1631 : vector<2x8x1xf32> to vector<2x8x8xf32>
    %1634 = vector.broadcast %1632 : vector<2x1x8xf32> to vector<2x8x8xf32>
    %1635 = arith.subf %1633, %1634 : vector<2x8x8xf32>
    %1636 = arith.mulf %1635, %1403 : vector<2x8x8xf32>
    %1637 = vector.shape_cast %1615 : vector<2x8xf32> to vector<2x8x1xf32>
    %1638 = vector.shape_cast %1419 : vector<2x8xf32> to vector<2x1x8xf32>
    %1639 = vector.broadcast %1637 : vector<2x8x1xf32> to vector<2x8x8xf32>
    %1640 = vector.broadcast %1638 : vector<2x1x8xf32> to vector<2x8x8xf32>
    %1641 = arith.mulf %1639, %1640 : vector<2x8x8xf32>
    %1642 = arith.addf %1636, %1641 : vector<2x8x8xf32>
    %1643 = vector.broadcast %12 : vector<1x8x8xf32> to vector<2x8x8xf32>
    %1644 = arith.mulf %1642, %1643 : vector<2x8x8xf32>
    %1645 = arith.mulf %1635, %1412 : vector<2x8x8xf32>
    %1646 = vector.shape_cast %1615 : vector<2x8xf32> to vector<2x1x8xf32>
    %1647 = vector.shape_cast %1419 : vector<2x8xf32> to vector<2x8x1xf32>
    %1648 = vector.broadcast %1646 : vector<2x1x8xf32> to vector<2x8x8xf32>
    %1649 = vector.broadcast %1647 : vector<2x8x1xf32> to vector<2x8x8xf32>
    %1650 = arith.mulf %1648, %1649 : vector<2x8x8xf32>
    %1651 = arith.addf %1645, %1650 : vector<2x8x8xf32>
    %1652 = vector.broadcast %12 : vector<1x8x8xf32> to vector<2x8x8xf32>
    %1653 = arith.mulf %1651, %1652 : vector<2x8x8xf32>
    %cst_279 = arith.constant dense<0.000000e+00> : vector<2xf32>
    %1654 = vector.multi_reduction <add>, %1615, %cst_279 [1] : vector<2x8xf32> to vector<2xf32>
    %1655 = vector.shape_cast %1654 : vector<2xf32> to vector<2x1xf32>
    %cst_280 = arith.constant 1.000000e+00 : f32
    %1656 = vector.broadcast %cst_280 : f32 to vector<2x1xf32>
    %1657 = arith.subf %1656, %1655 : vector<2x1xf32>
    %1658 = vector.broadcast %1657 : vector<2x1xf32> to vector<2x8xf32>
    %1659 = arith.mulf %1658, %1419 : vector<2x8xf32>
    %1660 = arith.addf %1659, %1615 : vector<2x8xf32>
    %1661 = tpu.concatenate %1653, %1644 in 2 : vector<2x8x8xf32>, vector<2x8x8xf32> -> vector<2x8x16xf32>
    "tpu.trace_start"() <{level = 10 : i32, message = "brn,bnk->brk"}> : () -> ()
    %cst_281 = arith.constant dense<0.000000e+00> : vector<2x2x16xf32>
    %1662 = tpu.matmul %1461, %1661, %cst_281 {dimension_numbers = #tpu.dot_dimension_numbers<[2], [1], [1], [2], [0, 0, 0, 1, 1, 2], [0], [0]>} : vector<2x2x8xf32>, vector<2x8x16xf32>, vector<2x2x16xf32> -> vector<2x2x16xf32>
    "tpu.trace_stop"() : () -> ()
    %1663 = vector.extract_strided_slice %1662 {offsets = [0, 0, 0], sizes = [2, 2, 8], strides = [1, 1, 1]} : vector<2x2x16xf32> to vector<2x2x8xf32>
    %1664 = vector.extract_strided_slice %1662 {offsets = [0, 0, 8], sizes = [2, 2, 8], strides = [1, 1, 1]} : vector<2x2x16xf32> to vector<2x2x8xf32>
    "tpu.trace_start"() <{level = 10 : i32, message = "brw,bnw->brn"}> : () -> ()
    %cst_282 = arith.constant dense<0.000000e+00> : vector<2x2x8xf32>
    %1665 = tpu.matmul %1497, %1628, %cst_282 {dimension_numbers = #tpu.dot_dimension_numbers<[2], [2], [1], [1], [0, 0, 0, 1, 1, 1], [0], [0]>} : vector<2x2x8xf32>, vector<2x8x8xf32>, vector<2x2x8xf32> -> vector<2x2x8xf32>
    "tpu.trace_stop"() : () -> ()
    %1666 = arith.mulf %1628, %1628 : vector<2x8x8xf32>
    %cst_283 = arith.constant dense<0.000000e+00> : vector<2x8xf32>
    %1667 = vector.multi_reduction <add>, %1666, %cst_283 [2] : vector<2x8x8xf32> to vector<2x8xf32>
    %1668 = arith.mulf %1497, %1497 : vector<2x2x8xf32>
    %cst_284 = arith.constant dense<0.000000e+00> : vector<2x2xf32>
    %1669 = vector.multi_reduction <add>, %1668, %cst_284 [2] : vector<2x2x8xf32> to vector<2x2xf32>
    %1670 = vector.shape_cast %1667 : vector<2x8xf32> to vector<2x1x8xf32>
    %1671 = vector.shape_cast %1669 : vector<2x2xf32> to vector<2x2x1xf32>
    %1672 = vector.broadcast %1670 : vector<2x1x8xf32> to vector<2x2x8xf32>
    %1673 = vector.broadcast %1671 : vector<2x2x1xf32> to vector<2x2x8xf32>
    %1674 = arith.mulf %1672, %1673 : vector<2x2x8xf32>
    %cst_285 = arith.constant 9.99999997E-7 : f32
    %1675 = vector.broadcast %cst_285 : f32 to vector<2x2x8xf32>
    %1676 = arith.addf %1674, %1675 : vector<2x2x8xf32>
    %1677 = math.rsqrt %1676 : vector<2x2x8xf32>
    %1678 = arith.mulf %1665, %1677 : vector<2x2x8xf32>
    %1679 = vector.shape_cast %1521 : vector<2x2xf32> to vector<2x2x1xf32>
    %1680 = vector.broadcast %1679 : vector<2x2x1xf32> to vector<2x2x8xf32>
    %1681 = arith.mulf %1680, %1678 : vector<2x2x8xf32>
    %cst_286 = arith.constant dense<0xFF800000> : vector<2x2xf32>
    %1682 = vector.multi_reduction <maximumf>, %1681, %cst_286 [2] : vector<2x2x8xf32> to vector<2x2xf32>
    %1683 = vector.shape_cast %1682 : vector<2x2xf32> to vector<2x2x1xf32>
    %1684 = vector.broadcast %1683 : vector<2x2x1xf32> to vector<2x2x8xf32>
    %1685 = arith.subf %1681, %1684 : vector<2x2x8xf32>
    %1686 = math.exp %1685 : vector<2x2x8xf32>
    %cst_287 = arith.constant dense<0.000000e+00> : vector<2x2xf32>
    %1687 = vector.multi_reduction <add>, %1686, %cst_287 [2] : vector<2x2x8xf32> to vector<2x2xf32>
    %1688 = vector.shape_cast %1687 : vector<2x2xf32> to vector<2x2x1xf32>
    %1689 = tpu.reciprocal %1688 {approx = true} : vector<2x2x1xf32> -> vector<2x2x1xf32>
    %1690 = vector.broadcast %1689 : vector<2x2x1xf32> to vector<2x2x8xf32>
    %1691 = arith.mulf %1686, %1690 : vector<2x2x8xf32>
    %1692 = vector.shape_cast %1539 : vector<2x2xf32> to vector<2x2x1xf32>
    %1693 = vector.broadcast %1692 : vector<2x2x1xf32> to vector<2x2x8xf32>
    %1694 = arith.mulf %1693, %1664 : vector<2x2x8xf32>
    %1695 = vector.shape_cast %1540 : vector<2x2xf32> to vector<2x2x1xf32>
    %1696 = vector.broadcast %1695 : vector<2x2x1xf32> to vector<2x2x8xf32>
    %1697 = arith.mulf %1696, %1691 : vector<2x2x8xf32>
    %1698 = arith.addf %1694, %1697 : vector<2x2x8xf32>
    %1699 = vector.shape_cast %1541 : vector<2x2xf32> to vector<2x2x1xf32>
    %1700 = vector.broadcast %1699 : vector<2x2x1xf32> to vector<2x2x8xf32>
    %1701 = arith.mulf %1700, %1663 : vector<2x2x8xf32>
    %1702 = arith.addf %1698, %1701 : vector<2x2x8xf32>
    "tpu.trace_start"() <{level = 10 : i32, message = "brn,bnw->brw"}> : () -> ()
    %cst_288 = arith.constant dense<0.000000e+00> : vector<2x2x8xf32>
    %1703 = tpu.matmul %1702, %1628, %cst_288 {dimension_numbers = #tpu.dot_dimension_numbers<[2], [1], [1], [2], [0, 0, 0, 1, 1, 2], [0], [0]>} : vector<2x2x8xf32>, vector<2x8x8xf32>, vector<2x2x8xf32> -> vector<2x2x8xf32>
    "tpu.trace_stop"() : () -> ()
    %1704 = vector.shape_cast %1703 : vector<2x2x8xf32> to vector<2x16xf32>
    %cst_289 = arith.constant dense<0.000000e+00> : vector<2x8xf32>
    %1705 = tpu.matmul %1704, %4, %cst_289 {dimension_numbers = #tpu.dot_dimension_numbers<[1], [0], [0], [1], [0, 0, 1, 1], [], []>} : vector<2x16xf32>, vector<16x8xf32>, vector<2x8xf32> -> vector<2x8xf32>
    %1706 = arith.addf %1495, %1705 : vector<2x8xf32>
    %c6_290 = arith.constant 6 : index
    %c0_291 = arith.constant 0 : index
    %c0_292 = arith.constant 0 : index
    %1707 = vector.load %arg16[%c6_290, %c0_291, %c0_292] : memref<8x2x8xf32, #tpu.memory_space<vmem>>, vector<1x2x8xf32>
    %1708 = vector.shape_cast %1707 : vector<1x2x8xf32> to vector<2x8xf32>
    %1709 = vector.shape_cast %1706 : vector<2x8xf32> to vector<1x2x8xf32>
    tpu.vector_store %arg16[%c6_290, %c0_291, %c0_292], %1709 {strides = array<i32>} : memref<8x2x8xf32, #tpu.memory_space<vmem>>, vector<1x2x8xf32>,
    %c7 = arith.constant 7 : index
    %c0_293 = arith.constant 0 : index
    %c0_294 = arith.constant 0 : index
    %1710 = vector.load %arg0[%c7, %c0_293, %c0_294] : memref<8x2x8xf32, #tpu.memory_space<vmem>>, vector<1x2x8xf32>
    %1711 = vector.shape_cast %1710 : vector<1x2x8xf32> to vector<2x8xf32>
    %1712 = vector.shape_cast %1703 : vector<2x2x8xf32> to vector<2x16xf32>
    %1713 = tpu.concatenate %1711, %1712, %1491 in 1 : vector<2x8xf32>, vector<2x16xf32>, vector<2x32xf32> -> vector<2x56xf32>
    %cst_295 = arith.constant dense<0.000000e+00> : vector<2x128xf32>
    %1714 = tpu.matmul %1713, %0, %cst_295 {dimension_numbers = #tpu.dot_dimension_numbers<[1], [0], [0], [1], [0, 0, 1, 1], [], []>} : vector<2x56xf32>, vector<56x128xf32>, vector<2x128xf32> -> vector<2x128xf32>
    %1715 = vector.broadcast %1 : vector<1x128xf32> to vector<2x128xf32>
    %1716 = arith.addf %1714, %1715 : vector<2x128xf32>
    %1717 = vector.extract_strided_slice %1716 {offsets = [0, 0], sizes = [2, 96], strides = [1, 1]} : vector<2x128xf32> to vector<2x96xf32>
    %1718 = arith.negf %1717 : vector<2x96xf32>
    %1719 = math.exp %1718 : vector<2x96xf32>
    %cst_296 = arith.constant 1.000000e+00 : f32
    %1720 = vector.broadcast %cst_296 : f32 to vector<2x96xf32>
    %1721 = arith.addf %1720, %1719 : vector<2x96xf32>
    %1722 = arith.divf %1720, %1721 : vector<2x96xf32>
    %1723 = vector.extract_strided_slice %1722 {offsets = [0, 0], sizes = [2, 32], strides = [1, 1]} : vector<2x96xf32> to vector<2x32xf32>
    %1724 = vector.extract_strided_slice %1722 {offsets = [0, 32], sizes = [2, 32], strides = [1, 1]} : vector<2x96xf32> to vector<2x32xf32>
    %1725 = vector.extract_strided_slice %1722 {offsets = [0, 64], sizes = [2, 32], strides = [1, 1]} : vector<2x96xf32> to vector<2x32xf32>
    %1726 = vector.extract_strided_slice %1716 {offsets = [0, 96], sizes = [2, 32], strides = [1, 1]} : vector<2x128xf32> to vector<2x32xf32>
    %1727 = math.tanh %1726 : vector<2x32xf32>
    %1728 = arith.mulf %1724, %1489 : vector<2x32xf32>
    %1729 = arith.mulf %1723, %1727 : vector<2x32xf32>
    %1730 = arith.addf %1728, %1729 : vector<2x32xf32>
    %1731 = math.tanh %1730 : vector<2x32xf32>
    %1732 = arith.mulf %1725, %1731 : vector<2x32xf32>
    %cst_297 = arith.constant dense<0.000000e+00> : vector<2x128xf32>
    %1733 = tpu.matmul %1732, %2, %cst_297 {dimension_numbers = #tpu.dot_dimension_numbers<[1], [0], [0], [1], [0, 0, 1, 1], [], []>} : vector<2x32xf32>, vector<32x128xf32>, vector<2x128xf32> -> vector<2x128xf32>
    %1734 = vector.broadcast %3 : vector<1x128xf32> to vector<2x128xf32>
    %1735 = arith.addf %1733, %1734 : vector<2x128xf32>
    %1736 = vector.extract_strided_slice %1735 {offsets = [0, 0], sizes = [2, 8], strides = [1, 1]} : vector<2x128xf32> to vector<2x8xf32>
    %1737 = vector.extract_strided_slice %1735 {offsets = [0, 8], sizes = [2, 16], strides = [1, 1]} : vector<2x128xf32> to vector<2x16xf32>
    %1738 = vector.shape_cast %1737 : vector<2x16xf32> to vector<2x2x8xf32>
    %1739 = vector.extract_strided_slice %1735 {offsets = [0, 24], sizes = [2, 8], strides = [1, 1]} : vector<2x128xf32> to vector<2x8xf32>
    %1740 = vector.extract_strided_slice %1735 {offsets = [0, 32], sizes = [2, 8], strides = [1, 1]} : vector<2x128xf32> to vector<2x8xf32>
    %1741 = vector.extract_strided_slice %1735 {offsets = [0, 40], sizes = [2, 12], strides = [1, 1]} : vector<2x128xf32> to vector<2x12xf32>
    %1742 = arith.negf %1741 : vector<2x12xf32>
    %1743 = math.exp %1742 : vector<2x12xf32>
    %cst_298 = arith.constant 1.000000e+00 : f32
    %1744 = vector.broadcast %cst_298 : f32 to vector<2x12xf32>
    %1745 = arith.addf %1744, %1743 : vector<2x12xf32>
    %1746 = arith.divf %1744, %1745 : vector<2x12xf32>
    %1747 = vector.extract_strided_slice %1746 {offsets = [0, 0], sizes = [2, 8], strides = [1, 1]} : vector<2x12xf32> to vector<2x8xf32>
    %1748 = vector.extract_strided_slice %1746 {offsets = [0, 8], sizes = [2, 2], strides = [1, 1]} : vector<2x12xf32> to vector<2x2xf32>
    %1749 = vector.extract_strided_slice %1746 {offsets = [0, 10], sizes = [2, 1], strides = [1, 1]} : vector<2x12xf32> to vector<2x1xf32>
    %1750 = vector.extract_strided_slice %1746 {offsets = [0, 11], sizes = [2, 1], strides = [1, 1]} : vector<2x12xf32> to vector<2x1xf32>
    %1751 = vector.extract_strided_slice %1735 {offsets = [0, 56], sizes = [2, 3], strides = [1, 1]} : vector<2x128xf32> to vector<2x3xf32>
    %cst_299 = arith.constant 0.000000e+00 : f32
    %1752 = vector.broadcast %cst_299 : f32 to vector<2x3xf32>
    %1753 = arith.maximumf %1751, %1752 : vector<2x3xf32>
    %1754 = math.absf %1751 : vector<2x3xf32>
    %cst_300 = arith.constant 0.000000e+00 : f32
    %1755 = vector.broadcast %cst_300 : f32 to vector<2x3xf32>
    %1756 = arith.subf %1755, %1754 : vector<2x3xf32>
    %1757 = math.exp %1756 : vector<2x3xf32>
    %1758 = math.log1p %1757 : vector<2x3xf32>
    %1759 = arith.addf %1753, %1758 : vector<2x3xf32>
    %1760 = vector.extract_strided_slice %1759 {offsets = [0, 0], sizes = [2, 2], strides = [1, 1]} : vector<2x3xf32> to vector<2x2xf32>
    %cst_301 = arith.constant 1.000000e+00 : f32
    %1761 = vector.broadcast %cst_301 : f32 to vector<2x2xf32>
    %1762 = arith.addf %1761, %1760 : vector<2x2xf32>
    %1763 = vector.extract_strided_slice %1759 {offsets = [0, 2], sizes = [2, 1], strides = [1, 1]} : vector<2x3xf32> to vector<2x1xf32>
    %cst_302 = arith.constant 1.000000e+00 : f32
    %1764 = vector.broadcast %cst_302 : f32 to vector<2x1xf32>
    %1765 = arith.addf %1764, %1763 : vector<2x1xf32>
    %1766 = vector.extract_strided_slice %1735 {offsets = [0, 64], sizes = [2, 2], strides = [1, 1]} : vector<2x128xf32> to vector<2x2xf32>
    %1767 = vector.extract_strided_slice %1735 {offsets = [0, 66], sizes = [2, 2], strides = [1, 1]} : vector<2x128xf32> to vector<2x2xf32>
    %1768 = vector.extract_strided_slice %1735 {offsets = [0, 68], sizes = [2, 2], strides = [1, 1]} : vector<2x128xf32> to vector<2x2xf32>
    %1769 = arith.maximumf %1766, %1767 : vector<2x2xf32>
    %1770 = arith.maximumf %1769, %1768 : vector<2x2xf32>
    %1771 = arith.subf %1766, %1770 : vector<2x2xf32>
    %1772 = math.exp %1771 : vector<2x2xf32>
    %1773 = arith.subf %1767, %1770 : vector<2x2xf32>
    %1774 = math.exp %1773 : vector<2x2xf32>
    %1775 = arith.subf %1768, %1770 : vector<2x2xf32>
    %1776 = math.exp %1775 : vector<2x2xf32>
    %1777 = arith.addf %1772, %1774 : vector<2x2xf32>
    %1778 = arith.addf %1777, %1776 : vector<2x2xf32>
    %1779 = tpu.reciprocal %1778 {approx = true} : vector<2x2xf32> -> vector<2x2xf32>
    %1780 = arith.mulf %1772, %1779 : vector<2x2xf32>
    %1781 = arith.mulf %1774, %1779 : vector<2x2xf32>
    %1782 = arith.mulf %1776, %1779 : vector<2x2xf32>
    %1783 = vector.shape_cast %1748 : vector<2x2xf32> to vector<2x2x1xf32>
    %1784 = vector.broadcast %1783 : vector<2x2x1xf32> to vector<2x2x8xf32>
    %1785 = arith.mulf %1784, %1702 : vector<2x2x8xf32>
    %cst_303 = arith.constant 1.000000e+00 : f32
    %1786 = vector.broadcast %cst_303 : f32 to vector<2x2x8xf32>
    %1787 = arith.subf %1786, %1785 : vector<2x2x8xf32>
    %1788 = vector.extract_strided_slice %1787 {offsets = [0, 0, 0], sizes = [2, 1, 8], strides = [1, 1, 1]} : vector<2x2x8xf32> to vector<2x1x8xf32>
    %1789 = vector.shape_cast %1788 : vector<2x1x8xf32> to vector<2x8xf32>
    %1790 = vector.extract_strided_slice %1787 {offsets = [0, 1, 0], sizes = [2, 1, 8], strides = [1, 1, 1]} : vector<2x2x8xf32> to vector<2x1x8xf32>
    %1791 = vector.shape_cast %1790 : vector<2x1x8xf32> to vector<2x8xf32>
    %1792 = arith.mulf %1789, %1791 : vector<2x8xf32>
    %1793 = arith.addf %1555, %1615 : vector<2x8xf32>
    %1794 = arith.mulf %1555, %1615 : vector<2x8xf32>
    %1795 = arith.subf %1793, %1794 : vector<2x8xf32>
    %1796 = arith.mulf %1795, %1792 : vector<2x8xf32>
    %1797 = vector.shape_cast %1796 : vector<2x8xf32> to vector<2x8x1xf32>
    %1798 = vector.shape_cast %1796 : vector<2x8xf32> to vector<2x1x8xf32>
    %1799 = vector.broadcast %1798 : vector<2x1x8xf32> to vector<2x8x8xf32>
    %1800 = vector.broadcast %1797 : vector<2x8x1xf32> to vector<2x8x8xf32>
    %1801 = arith.cmpf olt, %1799, %1800 : vector<2x8x8xf32>
    %1802 = vector.broadcast %1798 : vector<2x1x8xf32> to vector<2x8x8xf32>
    %1803 = vector.broadcast %1797 : vector<2x8x1xf32> to vector<2x8x8xf32>
    %1804 = arith.cmpf oeq, %1802, %1803 : vector<2x8x8xf32>
    %1805 = vector.broadcast %8 : vector<1x8x8xi1> to vector<2x8x8xi1>
    %1806 = arith.andi %1804, %1805 : vector<2x8x8xi1>
    %1807 = arith.ori %1801, %1806 : vector<2x8x8xi1>
    %1808 = arith.extui %1807 : vector<2x8x8xi1> to vector<2x8x8xi32>
    %1809 = arith.sitofp %1808 : vector<2x8x8xi32> to vector<2x8x8xf32>
    %cst_304 = arith.constant 1.000000e-30 : f32
    %1810 = vector.broadcast %cst_304 : f32 to vector<2x8xf32>
    %1811 = arith.maximumf %1796, %1810 : vector<2x8xf32>
    %1812 = math.log %1811 : vector<2x8xf32>
    %1813 = vector.shape_cast %1812 : vector<2x8xf32> to vector<2x1x8xf32>
    %1814 = vector.broadcast %1813 : vector<2x1x8xf32> to vector<2x8x8xf32>
    %1815 = arith.mulf %1809, %1814 : vector<2x8x8xf32>
    %cst_305 = arith.constant dense<0.000000e+00> : vector<2x8xf32>
    %1816 = vector.multi_reduction <add>, %1815, %cst_305 [2] : vector<2x8x8xf32> to vector<2x8xf32>
    %1817 = math.exp %1816 : vector<2x8xf32>
    %cst_306 = arith.constant 1.000000e+00 : f32
    %1818 = vector.broadcast %cst_306 : f32 to vector<2x8xf32>
    %1819 = arith.subf %1818, %1796 : vector<2x8xf32>
    %1820 = arith.mulf %1819, %1817 : vector<2x8xf32>
    %1821 = vector.shape_cast %1739 : vector<2x8xf32> to vector<2x1x8xf32>
    %1822 = vector.broadcast %1821 : vector<2x1x8xf32> to vector<2x8x8xf32>
    %1823 = arith.mulf %1822, %1628 : vector<2x8x8xf32>
    %cst_307 = arith.constant dense<0.000000e+00> : vector<2x8xf32>
    %1824 = vector.multi_reduction <add>, %1823, %cst_307 [2] : vector<2x8x8xf32> to vector<2x8xf32>
    %1825 = arith.mulf %1628, %1628 : vector<2x8x8xf32>
    %cst_308 = arith.constant dense<0.000000e+00> : vector<2x8xf32>
    %1826 = vector.multi_reduction <add>, %1825, %cst_308 [2] : vector<2x8x8xf32> to vector<2x8xf32>
    %1827 = arith.mulf %1739, %1739 : vector<2x8xf32>
    %cst_309 = arith.constant dense<0.000000e+00> : vector<2xf32>
    %1828 = vector.multi_reduction <add>, %1827, %cst_309 [1] : vector<2x8xf32> to vector<2xf32>
    %1829 = vector.shape_cast %1828 : vector<2xf32> to vector<2x1xf32>
    %1830 = vector.broadcast %1829 : vector<2x1xf32> to vector<2x8xf32>
    %1831 = arith.mulf %1826, %1830 : vector<2x8xf32>
    %cst_310 = arith.constant 9.99999997E-7 : f32
    %1832 = vector.broadcast %cst_310 : f32 to vector<2x8xf32>
    %1833 = arith.addf %1831, %1832 : vector<2x8xf32>
    %1834 = math.rsqrt %1833 : vector<2x8xf32>
    %1835 = arith.mulf %1824, %1834 : vector<2x8xf32>
    %1836 = vector.broadcast %1765 : vector<2x1xf32> to vector<2x8xf32>
    %1837 = arith.mulf %1836, %1835 : vector<2x8xf32>
    %cst_311 = arith.constant dense<0xFF800000> : vector<2xf32>
    %1838 = vector.multi_reduction <maximumf>, %1837, %cst_311 [1] : vector<2x8xf32> to vector<2xf32>
    %1839 = vector.shape_cast %1838 : vector<2xf32> to vector<2x1xf32>
    %1840 = vector.broadcast %1839 : vector<2x1xf32> to vector<2x8xf32>
    %1841 = arith.subf %1837, %1840 : vector<2x8xf32>
    %1842 = math.exp %1841 : vector<2x8xf32>
    %cst_312 = arith.constant dense<0.000000e+00> : vector<2xf32>
    %1843 = vector.multi_reduction <add>, %1842, %cst_312 [1] : vector<2x8xf32> to vector<2xf32>
    %1844 = vector.shape_cast %1843 : vector<2xf32> to vector<2x1xf32>
    %1845 = tpu.reciprocal %1844 {approx = true} : vector<2x1xf32> -> vector<2x1xf32>
    %1846 = vector.broadcast %1845 : vector<2x1xf32> to vector<2x8xf32>
    %1847 = arith.mulf %1842, %1846 : vector<2x8xf32>
    %1848 = vector.broadcast %1749 : vector<2x1xf32> to vector<2x8xf32>
    %1849 = arith.mulf %1848, %1820 : vector<2x8xf32>
    %cst_313 = arith.constant 1.000000e+00 : f32
    %1850 = vector.broadcast %cst_313 : f32 to vector<2x1xf32>
    %1851 = arith.subf %1850, %1749 : vector<2x1xf32>
    %1852 = vector.broadcast %1851 : vector<2x1xf32> to vector<2x8xf32>
    %1853 = arith.mulf %1852, %1847 : vector<2x8xf32>
    %1854 = arith.addf %1849, %1853 : vector<2x8xf32>
    %1855 = vector.broadcast %1750 : vector<2x1xf32> to vector<2x8xf32>
    %1856 = arith.mulf %1855, %1854 : vector<2x8xf32>
    %1857 = vector.shape_cast %1856 : vector<2x8xf32> to vector<2x8x1xf32>
    %1858 = vector.shape_cast %1747 : vector<2x8xf32> to vector<2x1x8xf32>
    %1859 = vector.broadcast %1857 : vector<2x8x1xf32> to vector<2x8x8xf32>
    %1860 = vector.broadcast %1858 : vector<2x1x8xf32> to vector<2x8x8xf32>
    %1861 = arith.mulf %1859, %1860 : vector<2x8x8xf32>
    %cst_314 = arith.constant 1.000000e+00 : f32
    %1862 = vector.broadcast %cst_314 : f32 to vector<2x8x8xf32>
    %1863 = arith.subf %1862, %1861 : vector<2x8x8xf32>
    %1864 = arith.mulf %1628, %1863 : vector<2x8x8xf32>
    %1865 = vector.shape_cast %1740 : vector<2x8xf32> to vector<2x1x8xf32>
    %1866 = vector.broadcast %1857 : vector<2x8x1xf32> to vector<2x8x8xf32>
    %1867 = vector.broadcast %1865 : vector<2x1x8xf32> to vector<2x8x8xf32>
    %1868 = arith.mulf %1866, %1867 : vector<2x8x8xf32>
    %1869 = arith.addf %1864, %1868 : vector<2x8x8xf32>
    %1870 = vector.shape_cast %1856 : vector<2x8xf32> to vector<2x8x1xf32>
    %cst_315 = arith.constant 1.000000e+00 : f32
    %1871 = vector.broadcast %cst_315 : f32 to vector<2x8x1xf32>
    %1872 = arith.subf %1871, %1870 : vector<2x8x1xf32>
    %1873 = vector.shape_cast %1856 : vector<2x8xf32> to vector<2x1x8xf32>
    %1874 = vector.broadcast %1872 : vector<2x8x1xf32> to vector<2x8x8xf32>
    %1875 = vector.broadcast %1873 : vector<2x1x8xf32> to vector<2x8x8xf32>
    %1876 = arith.subf %1874, %1875 : vector<2x8x8xf32>
    %1877 = arith.mulf %1876, %1644 : vector<2x8x8xf32>
    %1878 = vector.shape_cast %1856 : vector<2x8xf32> to vector<2x8x1xf32>
    %1879 = vector.shape_cast %1660 : vector<2x8xf32> to vector<2x1x8xf32>
    %1880 = vector.broadcast %1878 : vector<2x8x1xf32> to vector<2x8x8xf32>
    %1881 = vector.broadcast %1879 : vector<2x1x8xf32> to vector<2x8x8xf32>
    %1882 = arith.mulf %1880, %1881 : vector<2x8x8xf32>
    %1883 = arith.addf %1877, %1882 : vector<2x8x8xf32>
    %1884 = vector.broadcast %12 : vector<1x8x8xf32> to vector<2x8x8xf32>
    %1885 = arith.mulf %1883, %1884 : vector<2x8x8xf32>
    %1886 = arith.mulf %1876, %1653 : vector<2x8x8xf32>
    %1887 = vector.shape_cast %1856 : vector<2x8xf32> to vector<2x1x8xf32>
    %1888 = vector.shape_cast %1660 : vector<2x8xf32> to vector<2x8x1xf32>
    %1889 = vector.broadcast %1887 : vector<2x1x8xf32> to vector<2x8x8xf32>
    %1890 = vector.broadcast %1888 : vector<2x8x1xf32> to vector<2x8x8xf32>
    %1891 = arith.mulf %1889, %1890 : vector<2x8x8xf32>
    %1892 = arith.addf %1886, %1891 : vector<2x8x8xf32>
    %1893 = vector.broadcast %12 : vector<1x8x8xf32> to vector<2x8x8xf32>
    %1894 = arith.mulf %1892, %1893 : vector<2x8x8xf32>
    %cst_316 = arith.constant dense<0.000000e+00> : vector<2xf32>
    %1895 = vector.multi_reduction <add>, %1856, %cst_316 [1] : vector<2x8xf32> to vector<2xf32>
    %1896 = vector.shape_cast %1895 : vector<2xf32> to vector<2x1xf32>
    %cst_317 = arith.constant 1.000000e+00 : f32
    %1897 = vector.broadcast %cst_317 : f32 to vector<2x1xf32>
    %1898 = arith.subf %1897, %1896 : vector<2x1xf32>
    %1899 = vector.broadcast %1898 : vector<2x1xf32> to vector<2x8xf32>
    %1900 = arith.mulf %1899, %1660 : vector<2x8xf32>
    %1901 = arith.addf %1900, %1856 : vector<2x8xf32>
    %1902 = tpu.concatenate %1894, %1885 in 2 : vector<2x8x8xf32>, vector<2x8x8xf32> -> vector<2x8x16xf32>
    "tpu.trace_start"() <{level = 10 : i32, message = "brn,bnk->brk"}> : () -> ()
    %cst_318 = arith.constant dense<0.000000e+00> : vector<2x2x16xf32>
    %1903 = tpu.matmul %1702, %1902, %cst_318 {dimension_numbers = #tpu.dot_dimension_numbers<[2], [1], [1], [2], [0, 0, 0, 1, 1, 2], [0], [0]>} : vector<2x2x8xf32>, vector<2x8x16xf32>, vector<2x2x16xf32> -> vector<2x2x16xf32>
    "tpu.trace_stop"() : () -> ()
    %1904 = vector.extract_strided_slice %1903 {offsets = [0, 0, 0], sizes = [2, 2, 8], strides = [1, 1, 1]} : vector<2x2x16xf32> to vector<2x2x8xf32>
    %1905 = vector.extract_strided_slice %1903 {offsets = [0, 0, 8], sizes = [2, 2, 8], strides = [1, 1, 1]} : vector<2x2x16xf32> to vector<2x2x8xf32>
    "tpu.trace_start"() <{level = 10 : i32, message = "brw,bnw->brn"}> : () -> ()
    %cst_319 = arith.constant dense<0.000000e+00> : vector<2x2x8xf32>
    %1906 = tpu.matmul %1738, %1869, %cst_319 {dimension_numbers = #tpu.dot_dimension_numbers<[2], [2], [1], [1], [0, 0, 0, 1, 1, 1], [0], [0]>} : vector<2x2x8xf32>, vector<2x8x8xf32>, vector<2x2x8xf32> -> vector<2x2x8xf32>
    "tpu.trace_stop"() : () -> ()
    %1907 = arith.mulf %1869, %1869 : vector<2x8x8xf32>
    %cst_320 = arith.constant dense<0.000000e+00> : vector<2x8xf32>
    %1908 = vector.multi_reduction <add>, %1907, %cst_320 [2] : vector<2x8x8xf32> to vector<2x8xf32>
    %1909 = arith.mulf %1738, %1738 : vector<2x2x8xf32>
    %cst_321 = arith.constant dense<0.000000e+00> : vector<2x2xf32>
    %1910 = vector.multi_reduction <add>, %1909, %cst_321 [2] : vector<2x2x8xf32> to vector<2x2xf32>
    %1911 = vector.shape_cast %1908 : vector<2x8xf32> to vector<2x1x8xf32>
    %1912 = vector.shape_cast %1910 : vector<2x2xf32> to vector<2x2x1xf32>
    %1913 = vector.broadcast %1911 : vector<2x1x8xf32> to vector<2x2x8xf32>
    %1914 = vector.broadcast %1912 : vector<2x2x1xf32> to vector<2x2x8xf32>
    %1915 = arith.mulf %1913, %1914 : vector<2x2x8xf32>
    %cst_322 = arith.constant 9.99999997E-7 : f32
    %1916 = vector.broadcast %cst_322 : f32 to vector<2x2x8xf32>
    %1917 = arith.addf %1915, %1916 : vector<2x2x8xf32>
    %1918 = math.rsqrt %1917 : vector<2x2x8xf32>
    %1919 = arith.mulf %1906, %1918 : vector<2x2x8xf32>
    %1920 = vector.shape_cast %1762 : vector<2x2xf32> to vector<2x2x1xf32>
    %1921 = vector.broadcast %1920 : vector<2x2x1xf32> to vector<2x2x8xf32>
    %1922 = arith.mulf %1921, %1919 : vector<2x2x8xf32>
    %cst_323 = arith.constant dense<0xFF800000> : vector<2x2xf32>
    %1923 = vector.multi_reduction <maximumf>, %1922, %cst_323 [2] : vector<2x2x8xf32> to vector<2x2xf32>
    %1924 = vector.shape_cast %1923 : vector<2x2xf32> to vector<2x2x1xf32>
    %1925 = vector.broadcast %1924 : vector<2x2x1xf32> to vector<2x2x8xf32>
    %1926 = arith.subf %1922, %1925 : vector<2x2x8xf32>
    %1927 = math.exp %1926 : vector<2x2x8xf32>
    %cst_324 = arith.constant dense<0.000000e+00> : vector<2x2xf32>
    %1928 = vector.multi_reduction <add>, %1927, %cst_324 [2] : vector<2x2x8xf32> to vector<2x2xf32>
    %1929 = vector.shape_cast %1928 : vector<2x2xf32> to vector<2x2x1xf32>
    %1930 = tpu.reciprocal %1929 {approx = true} : vector<2x2x1xf32> -> vector<2x2x1xf32>
    %1931 = vector.broadcast %1930 : vector<2x2x1xf32> to vector<2x2x8xf32>
    %1932 = arith.mulf %1927, %1931 : vector<2x2x8xf32>
    %1933 = vector.shape_cast %1780 : vector<2x2xf32> to vector<2x2x1xf32>
    %1934 = vector.broadcast %1933 : vector<2x2x1xf32> to vector<2x2x8xf32>
    %1935 = arith.mulf %1934, %1905 : vector<2x2x8xf32>
    %1936 = vector.shape_cast %1781 : vector<2x2xf32> to vector<2x2x1xf32>
    %1937 = vector.broadcast %1936 : vector<2x2x1xf32> to vector<2x2x8xf32>
    %1938 = arith.mulf %1937, %1932 : vector<2x2x8xf32>
    %1939 = arith.addf %1935, %1938 : vector<2x2x8xf32>
    %1940 = vector.shape_cast %1782 : vector<2x2xf32> to vector<2x2x1xf32>
    %1941 = vector.broadcast %1940 : vector<2x2x1xf32> to vector<2x2x8xf32>
    %1942 = arith.mulf %1941, %1904 : vector<2x2x8xf32>
    %1943 = arith.addf %1939, %1942 : vector<2x2x8xf32>
    "tpu.trace_start"() <{level = 10 : i32, message = "brn,bnw->brw"}> : () -> ()
    %cst_325 = arith.constant dense<0.000000e+00> : vector<2x2x8xf32>
    %1944 = tpu.matmul %1943, %1869, %cst_325 {dimension_numbers = #tpu.dot_dimension_numbers<[2], [1], [1], [2], [0, 0, 0, 1, 1, 2], [0], [0]>} : vector<2x2x8xf32>, vector<2x8x8xf32>, vector<2x2x8xf32> -> vector<2x2x8xf32>
    "tpu.trace_stop"() : () -> ()
    %1945 = vector.shape_cast %1944 : vector<2x2x8xf32> to vector<2x16xf32>
    %cst_326 = arith.constant dense<0.000000e+00> : vector<2x8xf32>
    %1946 = tpu.matmul %1945, %4, %cst_326 {dimension_numbers = #tpu.dot_dimension_numbers<[1], [0], [0], [1], [0, 0, 1, 1], [], []>} : vector<2x16xf32>, vector<16x8xf32>, vector<2x8xf32> -> vector<2x8xf32>
    %1947 = arith.addf %1736, %1946 : vector<2x8xf32>
    %c7_327 = arith.constant 7 : index
    %c0_328 = arith.constant 0 : index
    %c0_329 = arith.constant 0 : index
    %1948 = vector.load %arg16[%c7_327, %c0_328, %c0_329] : memref<8x2x8xf32, #tpu.memory_space<vmem>>, vector<1x2x8xf32>
    %1949 = vector.shape_cast %1948 : vector<1x2x8xf32> to vector<2x8xf32>
    %1950 = vector.shape_cast %1947 : vector<2x8xf32> to vector<1x2x8xf32>
    tpu.vector_store %arg16[%c7_327, %c0_328, %c0_329], %1950 {strides = array<i32>} : memref<8x2x8xf32, #tpu.memory_space<vmem>>, vector<1x2x8xf32>,
    %c0_330 = arith.constant 0 : index
    %c0_331 = arith.constant 0 : index
    %1951 = vector.load %arg17[%c0_330, %c0_331] : memref<2x32xf32, #tpu.memory_space<vmem>>, vector<2x32xf32>
    tpu.vector_store %arg17[%c0_330, %c0_331], %1732 {strides = array<i32>} : memref<2x32xf32, #tpu.memory_space<vmem>>, vector<2x32xf32>,
    %c0_332 = arith.constant 0 : index
    %c0_333 = arith.constant 0 : index
    %1952 = vector.load %arg18[%c0_332, %c0_333] : memref<2x32xf32, #tpu.memory_space<vmem>>, vector<2x32xf32>
    tpu.vector_store %arg18[%c0_332, %c0_333], %1730 {strides = array<i32>} : memref<2x32xf32, #tpu.memory_space<vmem>>, vector<2x32xf32>,
    %c0_334 = arith.constant 0 : index
    %c0_335 = arith.constant 0 : index
    %c0_336 = arith.constant 0 : index
    %1953 = vector.load %arg19[%c0_334, %c0_335, %c0_336] : memref<2x2x8xf32, #tpu.memory_space<vmem>>, vector<2x2x8xf32>
    tpu.vector_store %arg19[%c0_334, %c0_335, %c0_336], %1944 {strides = array<i32>} : memref<2x2x8xf32, #tpu.memory_space<vmem>>, vector<2x2x8xf32>,
    %c0_337 = arith.constant 0 : index
    %c0_338 = arith.constant 0 : index
    %c0_339 = arith.constant 0 : index
    %1954 = vector.load %arg20[%c0_337, %c0_338, %c0_339] : memref<2x8x8xf32, #tpu.memory_space<vmem>>, vector<2x8x8xf32>
    tpu.vector_store %arg20[%c0_337, %c0_338, %c0_339], %1869 {strides = array<i32>} : memref<2x8x8xf32, #tpu.memory_space<vmem>>, vector<2x8x8xf32>,
    %c0_340 = arith.constant 0 : index
    %c0_341 = arith.constant 0 : index
    %1955 = vector.load %arg21[%c0_340, %c0_341] : memref<2x8xf32, #tpu.memory_space<vmem>>, vector<2x8xf32>
    tpu.vector_store %arg21[%c0_340, %c0_341], %1796 {strides = array<i32>} : memref<2x8xf32, #tpu.memory_space<vmem>>, vector<2x8xf32>,
    %c0_342 = arith.constant 0 : index
    %c0_343 = arith.constant 0 : index
    %c0_344 = arith.constant 0 : index
    %1956 = vector.load %arg22[%c0_342, %c0_343, %c0_344] : memref<2x8x8xf32, #tpu.memory_space<vmem>>, vector<2x8x8xf32>
    tpu.vector_store %arg22[%c0_342, %c0_343, %c0_344], %1885 {strides = array<i32>} : memref<2x8x8xf32, #tpu.memory_space<vmem>>, vector<2x8x8xf32>,
    %c0_345 = arith.constant 0 : index
    %c0_346 = arith.constant 0 : index
    %1957 = vector.load %arg23[%c0_345, %c0_346] : memref<2x8xf32, #tpu.memory_space<vmem>>, vector<2x8xf32>
    tpu.vector_store %arg23[%c0_345, %c0_346], %1901 {strides = array<i32>} : memref<2x8xf32, #tpu.memory_space<vmem>>, vector<2x8xf32>,
    %c0_347 = arith.constant 0 : index
    %c0_348 = arith.constant 0 : index
    %1958 = vector.load %arg24[%c0_347, %c0_348] : memref<2x8xf32, #tpu.memory_space<vmem>>, vector<2x8xf32>
    tpu.vector_store %arg24[%c0_347, %c0_348], %1856 {strides = array<i32>} : memref<2x8xf32, #tpu.memory_space<vmem>>, vector<2x8xf32>,
    %c0_349 = arith.constant 0 : index
    %c0_350 = arith.constant 0 : index
    %c0_351 = arith.constant 0 : index
    %1959 = vector.load %arg25[%c0_349, %c0_350, %c0_351] : memref<2x2x8xf32, #tpu.memory_space<vmem>>, vector<2x2x8xf32>
    tpu.vector_store %arg25[%c0_349, %c0_350, %c0_351], %1943 {strides = array<i32>} : memref<2x2x8xf32, #tpu.memory_space<vmem>>, vector<2x2x8xf32>,
    return
  }
}

</mosaic_0001>

<bundles_post_ra>
// kernel: dnc_forward_seq.1
= control target key start
LH: loop header
LB: loop body
LE: loop exit
PB: predicated region body
PF: predicated region fallthrough
CT: control target
= control target key end

     0   :  { %s16659_s0 = inlined_call_operand.vmem [shape: f32[8,2,8], index: 0, kind: input, shape index: {}]   ;;  %s16660_s1 = inlined_call_operand.vmem [shape: f32[2,32], index: 1, kind: input, shape index: {}, may-alias: {1,17}]   ;;  %s16661_s2 = inlined_call_operand.vmem [shape: f32[2,32], index: 2, kind: input, shape index: {}, may-alias: {2,18}]   ;;  %s16662_s3 = inlined_call_operand.vmem [shape: f32[2,2,8], index: 3, kind: input, shape index: {}, may-alias: {3,19}]   ;;  %s16663_s4 = inlined_call_operand.vmem [shape: f32[2,8,8], index: 4, kind: input, shape index: {}, may-alias: {4,20}]   ;;  %s16664_s5 = inlined_call_operand.vmem [shape: f32[2,8], index: 5, kind: input, shape index: {}, may-alias: {5,21}]   ;;  %s16665_s6 = inlined_call_operand.vmem [shape: f32[2,8,8], index: 6, kind: input, shape index: {}, may-alias: {6,22}]   ;;  %s16666_s7 = inlined_call_operand.vmem [shape: f32[2,8], index: 7, kind: input, shape index: {}, may-alias: {7,23}]   ;;  %s16667_s8 = inlined_call_operand.vmem [shape: f32[2,8], index: 8, kind: input, shape index: {}, may-alias: {8,24}]   ;;  %s16668_s9 = inlined_call_operand.vmem [shape: f32[2,2,8], index: 9, kind: input, shape index: {}, may-alias: {9,25}]   ;;  %s16669_s10 = inlined_call_operand.vmem [shape: f32[56,128], index: 10, kind: input, shape index: {}]   ;;  %s16670_s11 = inlined_call_operand.vmem [shape: f32[1,128], index: 11, kind: input, shape index: {}]   ;;  %s16671_s12 = inlined_call_operand.vmem [shape: f32[32,128], index: 12, kind: input, shape index: {}]   ;;  %s16672_s13 = inlined_call_operand.vmem [shape: f32[1,128], index: 13, kind: input, shape index: {}]   ;;  %s16673_s14 = inlined_call_operand.vmem [shape: f32[16,8], index: 14, kind: input, shape index: {}]   ;;  %s16674_s15 = inlined_call_operand.vmem [shape: f32[2,8,8], index: 15, kind: input, shape index: {}]   ;;  %s16675_s16 = inlined_call_operand.hbm [shape: f32[8,2,8], index: 16, kind: output, shape index: {0}]   ;;  %s16676_s17 = inlined_call_operand.vmem [shape: f32[2,32], index: 17, kind: output, shape index: {1}, may-alias: {1,17}]   ;;  %s16677_s18 = inlined_call_operand.vmem [shape: f32[2,32], index: 18, kind: output, shape index: {2}, may-alias: {2,18}]   ;;  %s16678_s19 = inlined_call_operand.vmem [shape: f32[2,2,8], index: 19, kind: output, shape index: {3}, may-alias: {3,19}]   ;;  %s16679_s20 = inlined_call_operand.vmem [shape: f32[2,8,8], index: 20, kind: output, shape index: {4}, may-alias: {4,20}]   ;;  %s16680_s21 = inlined_call_operand.vmem [shape: f32[2,8], index: 21, kind: output, shape index: {5}, may-alias: {5,21}]   ;;  %s16681_s22 = inlined_call_operand.vmem [shape: f32[2,8,8], index: 22, kind: output, shape index: {6}, may-alias: {6,22}]   ;;  %s16682_s23 = inlined_call_operand.vmem [shape: f32[2,8], index: 23, kind: output, shape index: {7}, may-alias: {7,23}]   ;;  %s16683_s24 = inlined_call_operand.vmem [shape: f32[2,8], index: 24, kind: output, shape index: {8}, may-alias: {8,24}]   ;;  %s16684_s25 = inlined_call_operand.vmem [shape: f32[2,2,8], index: 25, kind: output, shape index: {9}, may-alias: {9,25}]  }
   0x1   :  { %16698 = sst [smem:[#allocation5_spill]] %s16659_s0 }
   0x2   :  { %16699 = sst [smem:[#allocation6_spill]] %s16660_s1 }
   0x3   :  { %16700 = sst [smem:[#allocation7_spill]] %s16661_s2 }
   0x4   :  { %16701 = sst [smem:[#allocation8_spill]] %s16662_s3 }
   0x5   :  { %16702 = sst [smem:[#allocation9_spill]] %s16663_s4 }
   0x6   :  { %16703 = sst [smem:[#allocation10_spill]] %s16664_s5 }
   0x7   :  { %16704 = sst [smem:[#allocation11_spill]] %s16665_s6 }
   0x8   :  { %16705 = sst [smem:[#allocation12_spill]] %s16666_s7 }
   0x9   :  { %16706 = sst [smem:[#allocation13_spill]] %s16667_s8 }
   0xa   :  { %16707 = sst [smem:[#allocation14_spill]] %s16668_s9 }
   0xb   :  { %v79_v0 = vlaneseq  ;;  %s16708_s6 = sld [smem:[#allocation8_spill]]  ;;  %v13652_v4 = vmov 1934713408   ;;  %s16709_s1 = sld [smem:[#allocation6_spill]]  ;;  %v64_v7 = vld [vmem:[%s16669_s10] sm:$0xff]  ;;  %v65_v8 = vld [vmem:[%s16669_s10 + $0x8] sm:$0xff] }
   0xc   :  { %v105_v5 = vunpack.c.l.s4 %v13652_v4  ;;  %s13653_s9 = smov 24   ;;  %v13823_v9 = vpack.c.bf16 %v65_v8, %v64_v7  ;;  %v66_v10 = vld [vmem:[%s16669_s10 + $0x10] sm:$0xff]  ;;  %v67_v11 = vld [vmem:[%s16669_s10 + $0x18] sm:$0xff]  ;;  %v13654_v14 = vmov 0.0|0.0  }
   0xd   :  { %v13811_v3 = vshrl.u32 %v79_v0, 7  ;;  %12958 = vmatprep.subr.bf16.mxu0 %v13654_v14  ;;  %12967 = vmatprep.subr.bf16.mxu1 %v13654_v14  ;;  %v13834_v15 = vpack.c.bf16 %v67_v11, %v66_v10 }
   0xe   :  { %v106_v13 = vunpack.c.0.s8 %v105_v5  ;;  %12960 = vmatpush3.bf16.msra.mxu0 %v13823_v9 }
  0x11   :  { %v101_v1 = vld [vmem:[%s16708_s6] sm:$0x3]  ;;  %v102_v2 = vld [vmem:[%s16708_s6 + $0x2] sm:$0x3] }
  0x12   :  { %v87_v6 = vld [vmem:[%s16709_s1] sm:$0x3]  ;;  %v103_v12 = vcombine.low %v101_v1, %v102_v2 }
  0x13   :  { %123 = vrot.lane.b32.xlu1 %v87_v6, %s13653_s9 }
  0x14   :  { %31 = vsyncpa [#allocation3], 0  ;;  %v13837_v16 = vsub.s32 %v106_v13, %v13811_v3  ;;  %12961 = vmatprep.subr.bf16.mxu0 %v13654_v14  ;;  %v68_v17 = vld [vmem:[%s16669_s10 + $0x20] sm:$0xff]  ;;  %v69_v18 = vld [vmem:[%s16669_s10 + $0x28] sm:$0xff]  ;;  %v13655_v21 = vmov 0.0   ;;  %s13656_s26 = smov 8  }
  0x15   :  { %12963 = vmatpush3.bf16.msra.mxu0 %v13834_v15  ;;  %v13848_v20 = vpack.c.bf16 %v69_v18, %v68_v17  ;;  %v70_v23 = vld [vmem:[%s16669_s10 + $0x30] sm:$0xff]  ;;  %vm13657_vm0 = vmmov 0   ;;  %vm116_vm1 = vcmask 64512   ;;  %s16710_s28 = sld [smem:[#allocation7_spill]]  ;;  %s13658_s5 = smov 32   ;;  %vm127_vm2 = vcmask 195584  }
  0x16   :  { %v110_v19 = vrot.slane %v103_v12, %v13837_v16  ;;  %12964 = vmatprep.subr.bf16.mxu0 %v13654_v14  ;;  %12452 = vmatprep.mubr.msk.f32.mxu0 %vm13657_vm0, %v13655_v21  ;;  %s16711_s2 = sld [smem:[#allocation5_spill]]  ;;  %vm135_vm3 = vcmask 457728   ;;  %v12085_v32 = vld [vmem:[%s16670_s11] ss:$0 sm:$0xff]  ;;  %v73_v48 = vld [vmem:[%s16671_s12 + $0x8] sm:$0xff]  ;;  %v74_v49 = vld [vmem:[%s16671_s12 + $0x10] sm:$0xff] }
  0x17   :  { %12463 = vmatprep.mubr.msk.f32.mxu1 %vm13657_vm0, %v13655_v21  ;;  %v72_v47 = vld [vmem:[%s16671_s12] sm:$0xff]  ;;  %v75_v51 = vld [vmem:[%s16671_s12 + $0x18] sm:$0xff]  ;;  %s16712_s30 = sld [smem:[#allocation9_spill]]  ;;  %s13659_s12 = smov 64   ;;  %vm16697_vm4 = vcmask 261120   ;;  %v13936_v5 = vsub.s32 0, %v13811_v3 }
  0x18   :  { %v111_v22 = vcombine.high %v110_v19, %v13655_v21  ;;  %v13894_v50 = vpack.c.bf16 %v73_v48, %v72_v47  ;;  %v13900_v52 = vpack.c.bf16 %v75_v51, %v74_v49  ;;  %v13660_v59 = vmov 1966171168   ;;  %v12088_v62 = vld [vmem:[%s16672_s13] ss:$0 sm:$0xff]  ;;  %s13661_s27 = smov 104   ;;  %s16713_s0 = sld [smem:[#allocation14_spill]] }
  0x19   :  { %12966 = vmatpush3.bf16.msra.mxu0 %v13848_v20  ;;  %v456_v60 = vunpack.c.l.s4 %v13660_v59  ;;  %vm632_vm5 = vcmask 58368   ;;  %vm436_vm7 = vcmask 1041409   ;;  %s16714_s3 = sld [smem:[#allocation10_spill]]  ;;  %s16715_s4 = sld [smem:[#allocation13_spill]] }
  0x1a   :  { %113 = vrot.lane.b32.xlu0 %v111_v22, %s13656_s26  ;;  %12450 = vmatprep.subr.mxu0 %v13655_v21  ;;  %s16718_s29 = sld [smem:[#allocation12_spill]]  ;;  %s13666_s6 = smov 120  }
  0x1b   :  { %v88_v26 = vld [vmem:[%s16710_s28] sm:$0x3]  ;;  %12969 = vmatpush3.bf16.msra.mxu1 %v13894_v50  ;;  %v457_v61 = vunpack.c.0.s8 %v456_v60  ;;  %s13667_s1 = smov 88   ;;  %s16695_s8 = smov 126  }
  0x1c   :  { %v100_v27 = vld [vmem:[%s16711_s2] sm:$0x3]  ;;  %12970 = vmatprep.subr.bf16.mxu1 %v13654_v14  ;;  %s16693_s28 = smov 2  }
  0x1d   :  { %12451 = vmatpush3.msra.mxu0 %v70_v23  ;;  %v13909_v54 = vld [vmem:[%s16712_s30] sm:$0xff]  ;;  %v13920_v57 = vld [vmem:[%s16712_s30 + $0x8] sm:$0xff]  ;;  %v13931_v63 = vsub.s32 %v457_v61, %v13811_v3  ;;  %s13668_s30 = smov 96  }
  0x1e   :  { %12476 = vmatprep.subr.mxu0 %v13655_v21  ;;  %v619_v23 = vmul.f32 %v13909_v54, %v13909_v54 }
  0x1f   :  { %12972 = vmatpush3.bf16.msra.mxu1 %v13900_v52 }
  0x20   :  { %12466 = vmatprep.subr.mxu1 %v13655_v21 }
  0x85   :  { %v124_v28 = vpop.permute.xlu1 %123 }
  0x8c   :  { %v114_v24 = vpop.permute.xlu0 %113 }
  0x8d   :  { %v117_v25 = vsel %vm116_vm1, %v110_v19, %v114_v24  ;;  %v621_v24 = vsel %vm116_vm1, %v619_v23, 0.0 }
  0x8e   :  { %119 = vrot.lane.b32.xlu0 %v117_v25, %s13656_s26  ;;  %v620_v25 = vmul.f32 %v13920_v57, %v13920_v57 }
  0x92   :  { %217 = vrot.lane.b32.xlu0 %v88_v26, %s13658_s5  ;;  %v624_v26 = vsel %vm116_vm1, %v620_v25, 0.0 }
 0x100   :  { %v120_v29 = vpop.permute.xlu0 %119 }
 0x101   :  { %v126_v30 = vsel %vm116_vm1, %v100_v27, %v120_v29 }
 0x102   :  { %v128_v31 = vsel %vm127_vm2, %v126_v30, %v124_v28 }
 0x103   :  { %12453 = vmatmul.mubr.msk.f32.vlgmr.msra.gmra.mrb[0].mxu0 %vm135_vm3, %v128_v31 }
 0x104   :  { %12478 = vmatprep.mubr.msk.f32.mxu0 %vm13657_vm0, %v13655_v21  ;;  %v218_v43 = vpop.permute.xlu0 %217 }
 0x1d6   :  { %v205_v33 = vpop.f32.mrb[0].mxu0 }
 0x1d7   :  { %v206_v34 = vadd.f32 %v12085_v32, %v205_v33  ;;  %v12454_v35 = vpop.f32.mrb[1].mxu0  ;;  %v13662_v33 = vmov 0  }
 0x1d8   :  { %13125 = vset.pattern.permute.xlu0 %v13662_v33  ;;  %13124 = vset.pattern.permute.xlu1 %v13662_v33 }
 0x1d9   :  { %13174 = vtanh.f32 %v206_v34  ;;  %v12087_v37 = vmul.f32 -1.442695, %v206_v34 }
 0x1db   :  { %13176 = vpow2.f32 %v12087_v37 }
 0x1e3   :  { %v13175_v36 = vpop.eup %13174 }
 0x1e4   :  { %222 = vrot.lane.b32.xlu1 %v13175_v36, %s13658_s5 }
 0x1e5   :  { %v13177_v38 = vpop.eup %13176 }
 0x1e6   :  { %v212_v39 = vadd.f32 1.0, %v13177_v38 }
 0x1e8   :  { %13178 = vrcp.f32 %v212_v39 }
 0x1f2   :  { %v13179_v40 = vpop.eup %13178 }
 0x1f3   :  { %v220_v44 = vmul.f32 %v13179_v40, %v218_v43 }
 0x256   :  { %v223_v41 = vpop.permute.xlu1 %222 }
 0x257   :  { %v225_v42 = vmul.f32 %v13179_v40, %v223_v41  ;;  %v13969_v41 = vsub.s32 1, %v13811_v3 }
 0x259   :  { %227 = vrot.lane.b32.xlu1 %v225_v42, %s13658_s5 }
 0x2cb   :  { %v228_v45 = vpop.permute.xlu1 %227 }
 0x2cc   :  { %v13882_v46 = vadd.f32 %v228_v45, %v220_v44 }
 0x2ce   :  { %13180 = vtanh.f32 %v13882_v46 }
 0x2d8   :  { %v13181_v53 = vpop.eup %13180 }
 0x2d9   :  { %233 = vrot.lane.b32.xlu0 %v13181_v53, %s13658_s5 }
 0x2dd   :  { %597 = vrot.lane.b32.xlu0 %v13909_v54, %s13653_s9 }
 0x34b   :  { %v234_v55 = vpop.permute.xlu0 %233 }
 0x34c   :  { %v13913_v56 = vmul.f32 %v13179_v40, %v234_v55 }
 0x34e   :  { %244 = vrot.lane.b32.xlu1 %v13913_v56, %s13659_s12 }
 0x34f   :  { %v598_v11 = vpop.permute.xlu0 %597 }
 0x352   :  { %599 = vrot.lane.b32.xlu1 %v13920_v57, %s13653_s9 }
 0x3c0   :  { %v245_v58 = vpop.permute.xlu1 %244 }
 0x3c1   :  { %12464 = vmatmul.mubr.msk.f32.vlgmr.msra.gmra.mrb[0].mxu1 %vm16697_vm4, %v245_v58 }
 0x3c2   :  { %12468 = vmatprep.mubr.msk.f32.mxu1 %vm13657_vm0, %v13655_v21 }
 0x3c4   :  { %v600_v17 = vpop.permute.xlu1 %599 }
 0x494   :  { %v315_v1 = vpop.f32.mrb[0].mxu1 }
 0x495   :  { %v13933_v2 = vadd.f32 %v12088_v62, %v315_v1  ;;  %v12465_v4 = vpop.f32.mrb[1].mxu1 }
 0x497   :  { %v627_v6 = vmul.f32 %v13933_v2, %v13933_v2  ;;  %v569_v7 = vrot.slane %v13933_v2, %v13931_v63  ;;  %v342_v34 = vand.u32 2147483647, %v13933_v2  ;;  %v12090_v38 = vmul.f32 -1.442695, %v13933_v2 }
 0x499   :  { %629 = vrot.lane.b32.xlu0 %v627_v6, %s13661_s27  ;;  %v577_v8 = vrot.slane %v569_v7, %v13931_v63  ;;  %v570_v10 = vcombine.high %v569_v7, %v569_v7  ;;  %v343_v35 = vsub.f32 0.0, %v342_v34 }
 0x49b   :  { %v13945_v12 = vrot.slane %v577_v8, %v13936_v5  ;;  %v584_v13 = vrot.slane %v570_v10, %v13931_v63  ;;  %v344_v36 = vmul.f32 1.442695, %v343_v35  ;;  %v341_v8 = vmax.f32 %v13933_v2, 0.0 }
 0x49d   :  { %v603_v18 = vmul.f32 %v598_v11, %v13945_v12  ;;  %v13950_v19 = vrot.slane %v584_v13, %v13936_v5  ;;  %13182 = vpow2.f32 %v344_v36 }
 0x49e   :  { %13184 = vpow2.f32 %v12090_v38 }
 0x49f   :  { %v604_v22 = vmul.f32 %v600_v17, %v13950_v19  ;;  %607 = vrot.lane.b32.xlu1 %v603_v18, %s13661_s27 }
 0x4a1   :  { %609 = vrot.lane.b32.xlu0 %v604_v22, %s13661_s27 }
 0x4a7   :  { %v13183_v37 = vpop.eup %13182 }
 0x4a8   :  { %v346_v40 = vadd.f32 1.0, %v13183_v37  ;;  %v349_v53 = vmul.f32 -0.5, %v13183_v37  ;;  %v13185_v55 = vpop.eup %13184  ;;  %v352_v61 = vand.u32 2147483647, %v13183_v37 }
 0x4a9   :  { %v338_v59 = vadd.f32 1.0, %v13185_v55 }
 0x4aa   :  { %13186 = vlog2.f32 %v346_v40  ;;  %v350_v60 = vadd.f32 1.0, %v349_v53  ;;  %vm353_vm6 = vcmp.lt.f32.partialorder %v352_v61, 0.0004427343  ;;  %v14007_v40 = vld [vmem:[%s16713_s0] sm:$0x3] }
 0x4ac   :  { %v351_v1 = vmul.f32 %v13183_v37, %v350_v60 }
 0x4b4   :  { %v13187_v58 = vpop.eup %13186 }
 0x4b5   :  { %v348_v62 = vmul.f32 0.6931472, %v13187_v58 }
 0x4b7   :  { %v354_v4 = vsel %vm353_vm6, %v351_v1, %v348_v62 }
 0x4b8   :  { %v355_v18 = vadd.f32 %v354_v4, %v341_v8 }
 0x4ba   :  { %v13974_v22 = vadd.f32 1.0, %v355_v18 }
 0x4c0   :  { %622 = vadd.xlane.f32.xlu0 %v621_v24  ;;  %v13663_v24 = vmov 58  }
 0x4c4   :  { %625 = vadd.xlane.f32.xlu0 %v624_v26 }
 0x50b   :  { %v630_v27 = vpop.permute.xlu0 %629 }
 0x50c   :  { %v633_v28 = vsel %vm632_vm5, %v630_v27, 0.0  ;;  %v13985_v27 = vand.u32 127, %v79_v0  ;;  %v13999_v0 = vld [vmem:[%s16713_s0 + $0x2] sm:$0x3] }
 0x50d   :  { %634 = vadd.xlane.f32.xlu1 %v633_v28 }
 0x50e   :  { %v13989_v28 = vsub.s32 %v13985_v27, %v13811_v3  ;;  %vm14032_vm8 = vcmp.lt.s32.totalorder %v13985_v27, %v13811_v3 }
 0x511   :  { %v608_v29 = vpop.permute.xlu1 %607 }
 0x512   :  { %v613_v30 = vsel %vm116_vm1, %v608_v29, 0.0 }
 0x513   :  { %614 = vadd.xlane.f32.xlu1 %v613_v30  ;;  %v610_v31 = vpop.permute.xlu0 %609 }
 0x514   :  { %v616_v32 = vsel %vm116_vm1, %v610_v31, 0.0 }
 0x515   :  { %617 = vadd.xlane.f32.xlu0 %v616_v32 }
 0x54d   :  { %v623_v39 = vpop.xlane.xlu0 %622 }
 0x551   :  { %v626_v43 = vpop.xlane.xlu0 %625 }
 0x59a   :  { %v635_v42 = vpop.xlane.xlu1 %634 }
 0x59b   :  { %v640_v44 = vrot.slane %v635_v42, %v13936_v5  ;;  %v644_v45 = vrot.slane %v635_v42, %v13969_v41 }
 0x59d   :  { %v647_v47 = vmul.f32 %v640_v44, %v623_v39  ;;  %v648_v48 = vmul.f32 %v644_v45, %v626_v43  ;;  %v91_v43 = vld [vmem:[%s16714_s3] sm:$0x3]  ;;  %s16719_s3 = sld [smem:[#allocation11_spill]] }
 0x59e   :  { %v97_v44 = vld [vmem:[%s16715_s4] sm:$0x3]  ;;  %s16691_s4 = smov 4  }
 0x59f   :  { %v649_v49 = vadd.f32 1e-06, %v647_v47  ;;  %v650_v51 = vadd.f32 1e-06, %v648_v48 }
 0x5a0   :  { %v615_v7 = vpop.xlane.xlu1 %614 }
 0x5a1   :  { %13188 = vrsqrt.f32 %v649_v49  ;;  %v430_v49 = vadd.f32 %v97_v44, %v91_v43 }
 0x5a2   :  { %13190 = vrsqrt.f32 %v650_v51  ;;  %v618_v13 = vpop.xlane.xlu0 %617  ;;  %v431_v51 = vmul.f32 %v97_v44, %v91_v43 }
 0x5a3   :  { %13192 = vrcp.f32 %v338_v59 }
 0x5a4   :  { %v432_v59 = vsub.f32 %v430_v49, %v431_v51 }
 0x5ab   :  { %v13189_v6 = vpop.eup %13188 }
 0x5ac   :  { %v13191_v10 = vpop.eup %13190  ;;  %v653_v11 = vmul.f32 %v13189_v6, %v615_v7  ;;  %v13664_v6 = vmov 50  }
 0x5ad   :  { %v654_v17 = vmul.f32 %v13191_v10, %v618_v13  ;;  %v13976_v23 = vpop.eup %13192 }
 0x5ae   :  { %663 = vperm.xlu1 %13124, %v653_v11   ;;  %v413_v25 = vrot.slane %v13976_v23, %v13969_v41  ;;  %v405_v26 = vrot.slane %v13976_v23, %v13936_v5  ;;  %v696_v51 = vsub.f32 1.0, %v13976_v23 }
 0x5af   :  { %666 = vperm.xlu0 %13125, %v654_v17  }
 0x5b2   :  { %13126 = vset.pattern.permute.xlu1 %v13663_v24 }
 0x5b3   :  { %657 = vperm.xlu1 %13126, %v13974_v22   ;;  %13128 = vset.pattern.permute.xlu0 %v13664_v6 }
 0x5b7   :  { %416 = vbcast.lane.b32.xlu1 %v413_v25, 304 }
 0x5b8   :  { %13127 = vset.pattern.permute.xlu1 %v13664_v6 }
 0x5bb   :  { %408 = vbcast.lane.b32.xlu1 %v405_v26, 304 }
 0x62d   :  { %v664_v29 = vpop.permute.xlu1 %663 }
 0x62e   :  { %v671_v30 = vrot.slane %v664_v29, %v13989_v28  ;;  %v667_v31 = vpop.permute.xlu0 %666 }
 0x62f   :  { %v675_v32 = vrot.slane %v667_v31, %v13989_v28 }
 0x631   :  { %v676_v35 = vsel %vm436_vm7, %v675_v32, %v671_v30 }
 0x632   :  { %v658_v34 = vpop.permute.xlu1 %657 }
 0x633   :  { %v13994_v36 = vmul.f32 %v676_v35, %v658_v34 }
 0x635   :  { %v679_v37 = vsel %vm632_vm5, %v13994_v36, -inf }
 0x636   :  { %v417_v38 = vpop.permute.xlu1 %416  ;;  %680 = vmax.xlane.f32.xlu1 %v679_v37 }
 0x637   :  { %v419_v39 = vmul.f32 %v417_v38, %v13999_v0 }
 0x639   :  { %v421_v42 = vsub.f32 1.0, %v419_v39 }
 0x63a   :  { %v409_v45 = vpop.permute.xlu1 %408 }
 0x63b   :  { %v425_v47 = vrot.slane %v421_v42, 1  ;;  %v418_v48 = vmul.f32 %v409_v45, %v14007_v40 }
 0x63d   :  { %v429_v53 = vmul.f32 %v425_v47, %v421_v42  ;;  %v420_v55 = vsub.f32 1.0, %v418_v48 }
 0x63f   :  { %v424_v58 = vrot.slane %v420_v55, 1  ;;  %v435_v60 = vrot.slane %v429_v53, 7  ;;  %v13665_v53 = vmov 51  }
 0x641   :  { %v428_v61 = vmul.f32 %v424_v58, %v420_v55 }
 0x643   :  { %v437_v62 = vsel %vm436_vm7, %v435_v60, %v428_v61 }
 0x644   :  { %v14017_v1 = vmul.f32 %v437_v62, %v432_v59 }
 0x646   :  { %v443_v4 = vrot.slane %v14017_v1, %v13936_v5  ;;  %v450_v7 = vrot.slane %v14017_v1, %v13969_v41  ;;  %v501_v8 = vmax.f32 %v14017_v1, 1e-30  ;;  %v461_v11 = vrot.slane %v14017_v1, %v13931_v63 }
 0x648   :  { %445 = vbcast.lane.b32.xlu0 %v443_v4, 256  ;;  %13194 = vlog2.f32 %v501_v8  ;;  %v469_v17 = vrot.slane %v461_v11, %v13931_v63  ;;  %v462_v18 = vcombine.high %v461_v11, %v461_v11 }
 0x64a   :  { %v480_v29 = vrot.slane %v469_v17, %v13936_v5  ;;  %v476_v30 = vrot.slane %v462_v18, %v13931_v63 }
 0x64c   :  { %452 = vbcast.lane.b32.xlu0 %v450_v7, 256  ;;  %v484_v35 = vrot.slane %v476_v30, %v13936_v5 }
 0x652   :  { %v13195_v10 = vpop.eup %13194 }
 0x653   :  { %v503_v13 = vmul.f32 0.6931472, %v13195_v10 }
 0x655   :  { %v511_v25 = vrot.slane %v503_v13, %v13931_v63 }
 0x657   :  { %v519_v31 = vrot.slane %v511_v25, %v13931_v63  ;;  %v512_v32 = vcombine.high %v511_v25, %v511_v25 }
 0x659   :  { %v530_v37 = vrot.slane %v519_v31, %v13936_v5  ;;  %v526_v38 = vrot.slane %v512_v32, %v13931_v63 }
 0x65b   :  { %v534_v45 = vrot.slane %v526_v38, %v13936_v5 }
 0x6ba   :  { %v446_v34 = vpop.permute.xlu0 %445 }
 0x6bb   :  { %vm487_vm9 = vcmp.lt.f32.partialorder %v480_v29, %v446_v34  ;;  %vm489_vm10 = vcmp.eq.f32.partialorder %v480_v29, %v446_v34  ;;  %v549_v29 = vsub.f32 1.0, %v14017_v1 }
 0x6bc   :  { %vm493_vm11 = vmand %vm489_vm10, %vm14032_vm8  ;;  %vm1561_vm10 = vcmask 130048  }
 0x6bd   :  { %vm495_vm12 = vmor %vm487_vm9, %vm493_vm11  ;;  %vm84_vm9 = vcmp.ne.s32.totalorder %v13811_v3, %v13985_v27  ;;  %v93_v3 = vld [vmem:[%s16719_s3 + $0x8] sm:$0xff] }
 0x6be   :  { %v453_v39 = vpop.permute.xlu0 %452  ;;  %v12091_v42 = vsel %vm495_vm12, 1.0, %v13655_v21 }
 0x6bf   :  { %vm488_vm13 = vcmp.lt.f32.partialorder %v484_v35, %v453_v39  ;;  %vm490_vm14 = vcmp.eq.f32.partialorder %v484_v35, %v453_v39  ;;  %v537_v43 = vmul.f32 %v12091_v42, %v530_v37 }
 0x6c0   :  { %vm494_vm15 = vmand %vm490_vm14, %vm14032_vm8 }
 0x6c1   :  { %v539_v44 = vsel %vm116_vm1, %v537_v43, 0.0  ;;  %vm496_vm6 = vmor %vm488_vm13, %vm494_vm15 }
 0x6c2   :  { %540 = vadd.xlane.f32.xlu0 %v539_v44  ;;  %v12092_v47 = vsel %vm496_vm6, 1.0, %v13655_v21 }
 0x6c3   :  { %v538_v48 = vmul.f32 %v12092_v47, %v534_v45  ;;  %v681_v55 = vpop.xlane.xlu1 %680  ;;  %v96_v45 = vld [vmem:[%s16718_s29] sm:$0x3] }
 0x6c4   :  { %v682_v58 = vsub.f32 %v13994_v36, %v681_v55  ;;  %v864_v47 = vrot.slane %v96_v45, %v13936_v5 }
 0x6c5   :  { %v542_v49 = vsel %vm116_vm1, %v538_v48, 0.0  ;;  %v871_v48 = vrot.slane %v96_v45, %v13969_v41 }
 0x6c6   :  { %543 = vadd.xlane.f32.xlu1 %v542_v49  ;;  %v683_v59 = vmul.f32 1.442695, %v682_v58  ;;  %v729_v49 = vrot.slane %v13976_v23, %v13931_v63 }
 0x6c8   :  { %13196 = vpow2.f32 %v683_v59  ;;  %v737_v58 = vrot.slane %v729_v49, %v13931_v63 }
 0x6d2   :  { %v13197_v60 = vpop.eup %13196 }
 0x6d3   :  { %v685_v61 = vsel %vm632_vm5, %v13197_v60, 0.0 }
 0x6d7   :  { %692 = vperm.xlu1 %13127, %v13976_v23  }
 0x6d8   :  { %699 = vperm.xlu0 %13128, %v696_v51   ;;  %v827_v51 = vrot.slane %v96_v45, %v13931_v63 }
 0x6da   :  { %v835_v59 = vrot.slane %v827_v51, %v13931_v63 }
 0x6db   :  { %13129 = vset.pattern.permute.xlu1 %v13665_v53 }
 0x6dc   :  { %13131 = vset.pattern.permute.xlu0 %v13662_v33 }
 0x6fb   :  { %686 = vadd.xlane.f32.xlu1 %v685_v61 }
 0x70c   :  { %705 = vperm.xlu1 %13129, %v13976_v23  }
 0x710   :  { %13130 = vset.pattern.permute.xlu1 %v13662_v33 }
 0x74f   :  { %v541_v4 = vpop.xlane.xlu0 %540 }
 0x750   :  { %v545_v8 = vmul.f32 1.442695, %v541_v4  ;;  %v748_v4 = vrot.slane %v737_v58, %v13936_v5 }
 0x753   :  { %v544_v62 = vpop.xlane.xlu1 %543 }
 0x754   :  { %v547_v7 = vmul.f32 1.442695, %v544_v62 }
 0x756   :  { %13198 = vpow2.f32 %v547_v7 }
 0x757   :  { %13200 = vpow2.f32 %v545_v8  ;;  %v693_v10 = vpop.permute.xlu1 %692  ;;  %v700_v34 = vpop.permute.xlu0 %699  ;;  %v846_v8 = vrot.slane %v835_v59, %v13936_v5 }
 0x760   :  { %v13199_v11 = vpop.eup %13198 }
 0x761   :  { %v13201_v36 = vpop.eup %13200  ;;  %v559_v17 = vrot.slane %v13199_v11, %v13989_v28 }
 0x762   :  { %v555_v18 = vrot.slane %v13201_v36, %v13989_v28 }
 0x764   :  { %v560_v25 = vsel %vm436_vm7, %v559_v17, %v555_v18  ;;  %v92_v17 = vld [vmem:[%s16719_s3] sm:$0xff] }
 0x765   :  { %v562_v30 = vmul.f32 %v560_v25, %v549_v29  ;;  %v730_v29 = vcombine.high %v729_v49, %v729_v49  ;;  %v94_v49 = vld [vmem:[%s16674_s15] sm:$0xff] }
 0x767   :  { %v695_v35 = vmul.f32 %v693_v10, %v562_v30 }
 0x788   :  { %v687_v13 = vpop.xlane.xlu1 %686 }
 0x789   :  { %13202 = vrcp.f32 %v687_v13 }
 0x78c   :  { %v706_v39 = vpop.permute.xlu1 %705 }
 0x793   :  { %v13203_v31 = vpop.eup %13202 }
 0x794   :  { %v689_v32 = vmul.f32 %v13203_v31, %v13197_v60  ;;  %v828_v60 = vcombine.high %v827_v51, %v827_v51 }
 0x796   :  { %v702_v37 = vmul.f32 %v700_v34, %v689_v32  ;;  %v842_v23 = vrot.slane %v828_v60, %v13931_v63 }
 0x798   :  { %v703_v38 = vadd.f32 %v702_v37, %v695_v35  ;;  %v850_v31 = vrot.slane %v842_v23, %v13936_v5 }
 0x79a   :  { %v14063_v42 = vmul.f32 %v706_v39, %v703_v38  ;;  %v14098_v38 = vsel %vm84_vm9, 1.0, %v13655_v21 }
 0x79c   :  { %v712_v43 = vrot.slane %v14063_v42, %v13936_v5  ;;  %v719_v44 = vrot.slane %v14063_v42, %v13969_v41  ;;  %v790_v55 = vrot.slane %v14063_v42, %v13931_v63 }
 0x79e   :  { %714 = vbcast.lane.b32.xlu1 %v712_v43, 256  ;;  %v798_v61 = vrot.slane %v790_v55, %v13931_v63  ;;  %v791_v62 = vcombine.high %v790_v55, %v790_v55  ;;  %v744_v43 = vrot.slane %v730_v29, %v13931_v63 }
 0x7a0   :  { %v809_v13 = vrot.slane %v798_v61, %v13936_v5  ;;  %v805_v36 = vrot.slane %v791_v62, %v13931_v63  ;;  %v752_v58 = vrot.slane %v744_v43, %v13936_v5 }
 0x7a2   :  { %721 = vbcast.lane.b32.xlu1 %v719_v44, 256  ;;  %v813_v37 = vrot.slane %v805_v36, %v13936_v5 }
 0x7a6   :  { %320 = vrot.lane.b32.xlu1 %v13933_v2, %s13666_s6 }
 0x7aa   :  { %866 = vbcast.lane.b32.xlu1 %v864_v47, 256 }
 0x7ae   :  { %873 = vbcast.lane.b32.xlu1 %v871_v48, 256 }
 0x810   :  { %v715_v7 = vpop.permute.xlu1 %714 }
 0x811   :  { %v781_v10 = vsub.f32 1.0, %v715_v7  ;;  %v755_v11 = vmul.f32 %v748_v4, %v715_v7  ;;  %v853_v35 = vmul.f32 %v846_v8, %v715_v7  ;;  %v95_v8 = vld [vmem:[%s16674_s15 + $0x8] sm:$0xff]  ;;  %s13669_s15 = smov 124  }
 0x813   :  { %v757_v18 = vsub.f32 1.0, %v755_v11  ;;  %v816_v25 = vsub.f32 %v781_v10, %v809_v13 }
 0x814   :  { %v722_v30 = vpop.permute.xlu1 %721 }
 0x815   :  { %v782_v32 = vsub.f32 1.0, %v722_v30  ;;  %761 = vrot.lane.b32.xlu1 %v757_v18, %s13667_s1  ;;  %v818_v34 = vmul.f32 %v816_v25, %v92_v17  ;;  %v854_v48 = vmul.f32 %v850_v31, %v722_v30  ;;  %v770_v51 = vmul.f32 %v722_v30, %v13950_v19 }
 0x816   :  { %v859_v60 = vmul.f32 %v816_v25, %v94_v49  ;;  %v756_v4 = vmul.f32 %v752_v58, %v722_v30  ;;  %v769_v17 = vmul.f32 %v715_v7, %v13945_v12 }
 0x817   :  { %v855_v27 = vadd.f32 %v853_v35, %v818_v34  ;;  %v817_v39 = vsub.f32 %v782_v32, %v813_v37 }
 0x818   :  { %v321_v44 = vpop.permute.xlu1 %320  ;;  %v758_v36 = vsub.f32 1.0, %v756_v4 }
 0x819   :  { %322 = vrot.lane.b32.xlu0 %v321_v44, %s13666_s6  ;;  %v14106_v45 = vmul.f32 %v14098_v38, %v855_v27  ;;  %v819_v47 = vmul.f32 %v817_v39, %v93_v3  ;;  %v860_v10 = vmul.f32 %v817_v39, %v95_v8 }
 0x81b   :  { %889 = vrot.lane.b32.xlu1 %v14106_v45, %s13656_s26  ;;  %v856_v55 = vadd.f32 %v854_v48, %v819_v47 }
 0x81c   :  { %v867_v59 = vpop.permute.xlu1 %866 }
 0x81d   :  { %v875_v61 = vmul.f32 %v867_v59, %v809_v13  ;;  %775 = vrot.lane.b32.xlu0 %v770_v51, %s13668_s30  ;;  %v14117_v62 = vmul.f32 %v14098_v38, %v856_v55 }
 0x81f   :  { %v877_v23 = vadd.f32 %v875_v61, %v859_v60  ;;  %891 = vrot.lane.b32.xlu1 %v14117_v62, %s13656_s26 }
 0x820   :  { %v874_v19 = vpop.permute.xlu1 %873 }
 0x821   :  { %v876_v11 = vmul.f32 %v874_v19, %v813_v37  ;;  %v14128_v29 = vmul.f32 %v14098_v38, %v877_v23 }
 0x823   :  { %v878_v13 = vadd.f32 %v876_v11, %v860_v10  ;;  %763 = vrot.lane.b32.xlu1 %v758_v36, %s13667_s1 }
 0x825   :  { %v14134_v35 = vmul.f32 %v14098_v38, %v878_v13 }
 0x827   :  { %773 = vrot.lane.b32.xlu1 %v769_v17, %s13668_s30 }
 0x887   :  { %v762_v18 = vpop.permute.xlu1 %761 }
 0x888   :  { %v767_v48 = vmul.f32 %v762_v18, %v13909_v54 }
 0x88b   :  { %v323_v25 = vpop.permute.xlu0 %322 }
 0x88c   :  { %v326_v30 = vcombine.low %v321_v44, %v323_v25 }
 0x88d   :  { %v890_v31 = vpop.permute.xlu1 %889 }
 0x88e   :  { %v333_v32 = vrot.slane %v326_v30, %v13837_v16  ;;  %v895_v34 = vsel %vm116_vm1, %v14128_v29, %v890_v31 }
 0x88f   :  { %12467 = vmatpush3.msra.mxu1 %v895_v34  ;;  %v776_v47 = vpop.permute.xlu0 %775 }
 0x890   :  { %12471 = vmatprep.subr.mxu1 %v13655_v21  ;;  %v1203_v12 = vmul.f32 %v333_v32, %v333_v32  ;;  %12469 = vmatmul.mubr.msk.f32.vlgmr.msra.gmra.mrb[2].mxu1 %vm116_vm1, %v14007_v40  ;;  %v334_v7 = vcombine.high %v333_v32, %v13655_v21 }
 0x891   :  { %v892_v37 = vpop.permute.xlu1 %891  ;;  %12473 = vmatprep.mubr.msk.f32.mxu1 %vm13657_vm0, %v13655_v21 }
 0x892   :  { %v896_v3 = vsel %vm116_vm1, %v14134_v35, %v892_v37  ;;  %v1205_v27 = vsel %vm632_vm5, %v1203_v12, 0.0  ;;  %v1204_v39 = vmul.f32 %v334_v7, %v334_v7 }
 0x893   :  { %1206 = vadd.xlane.f32.xlu1 %v1205_v27  ;;  %12472 = vmatpush3.msra.mxu1 %v896_v3 }
 0x894   :  { %v1208_v43 = vsel %vm632_vm5, %v1204_v39, 0.0  ;;  %12474 = vmatmul.mubr.msk.f32.vlgmr.msra.gmra.mrb[4].mxu1 %vm116_vm1, %v13999_v0  ;;  %12481 = vmatprep.subr.mxu1 %v13655_v21  ;;  %v1286_v39 = vrot.slane %v13974_v22, %v13936_v5 }
 0x895   :  { %1209 = vadd.xlane.f32.xlu0 %v1208_v43  ;;  %v764_v40 = vpop.permute.xlu1 %763  ;;  %12483 = vmatprep.mubr.msk.f32.mxu1 %vm13657_vm0, %v13655_v21 }
 0x896   :  { %v768_v44 = vmul.f32 %v764_v40, %v13920_v57  ;;  %v1294_v40 = vrot.slane %v13974_v22, %v13969_v41 }
 0x898   :  { %v14153_v49 = vadd.f32 %v776_v47, %v768_v44 }
 0x899   :  { %v774_v51 = vpop.permute.xlu1 %773 }
 0x89a   :  { %v14155_v55 = vadd.f32 %v774_v51, %v767_v48  ;;  %12482 = vmatpush3.xpose.msk.msra.mxu1 %vm116_vm1, %v14153_v49  ;;  %v1196_v0 = vmul.f32 %v14153_v49, %v14153_v49 }
 0x89b   :  { %12491 = vmatprep.subr.mxu1 %v13655_v21 }
 0x89c   :  { %12477 = vmatpush3.xpose.msk.msra.mxu0 %vm116_vm1, %v14155_v55  ;;  %v1200_v57 = vsel %vm116_vm1, %v1196_v0, 0.0  ;;  %v1195_v54 = vmul.f32 %v14155_v55, %v14155_v55 }
 0x89d   :  { %1201 = vadd.xlane.f32.xlu1 %v1200_v57  ;;  %12484 = vmatmul.mubr.msk.f32.vlgmr.msra.gmra.mrb[6].mxu1 %vm116_vm1, %v334_v7 }
 0x89e   :  { %12492 = vmatpush3.msra.mxu1 %v14153_v49  ;;  %v1197_v58 = vsel %vm116_vm1, %v1195_v54, 0.0  ;;  %12486 = vmatprep.subr.mxu0 %v13655_v21 }
 0x89f   :  { %1198 = vadd.xlane.f32.xlu0 %v1197_v58  ;;  %12479 = vmatmul.mubr.msk.f32.vlgmr.msra.gmra.mrb[2].mxu0 %vm116_vm1, %v333_v32 }
 0x8a0   :  { %12487 = vmatpush3.msra.mxu0 %v14155_v55  ;;  %12488 = vmatprep.mubr.msk.f32.mxu0 %vm13657_vm0, %v13655_v21 }
 0x8a1   :  { %12493 = vmatprep.mubr.msk.f32.mxu1 %vm13657_vm0, %v13655_v21  ;;  %12973 = vmatprep.subr.bf16.mxu0 %v13654_v14 }
 0x8a2   :  { %12976 = vmatprep.subr.bf16.mxu1 %v13654_v14 }
 0x8ae   :  { %361 = vrot.lane.b32.xlu1 %v13933_v2, %s13669_s15 }
 0x8b5   :  { %357 = vrot.lane.b32.xlu0 %v13933_v2, %s16695_s8 }
 0x920   :  { %v1207_v59 = vpop.xlane.xlu1 %1206 }
 0x921   :  { %v1216_v4 = vrot.slane %v1207_v59, %v13936_v5  ;;  %v1220_v8 = vrot.slane %v1207_v59, %v13969_v41 }
 0x922   :  { %v1210_v60 = vpop.xlane.xlu0 %1209 }
 0x923   :  { %v1224_v23 = vrot.slane %v1210_v60, %v13936_v5  ;;  %v1228_v13 = vrot.slane %v1210_v60, %v13969_v41 }
 0x92a   :  { %v14183_v61 = vpop.xlane.xlu1 %1201 }
 0x92b   :  { %v1235_v10 = vmul.f32 %v1224_v23, %v14183_v61  ;;  %v1236_v30 = vmul.f32 %v1228_v13, %v14183_v61 }
 0x92c   :  { %v14188_v19 = vpop.xlane.xlu0 %1198 }
 0x92d   :  { %v1233_v11 = vmul.f32 %v1216_v4, %v14188_v19  ;;  %v1234_v36 = vmul.f32 %v1220_v8, %v14188_v19  ;;  %v1239_v31 = vadd.f32 1e-06, %v1235_v10  ;;  %v1240_v7 = vadd.f32 1e-06, %v1236_v30 }
 0x92e   :  { %v362_v34 = vpop.permute.xlu1 %361 }
 0x92f   :  { %v1237_v17 = vadd.f32 1e-06, %v1233_v11  ;;  %v1238_v18 = vadd.f32 1e-06, %v1234_v36 }
 0x930   :  { %v358_v25 = vpop.permute.xlu0 %357 }
 0x931   :  { %13204 = vrsqrt.f32 %v1237_v17  ;;  %v360_v32 = vmax.f32 %v13933_v2, %v358_v25 }
 0x932   :  { %13206 = vrsqrt.f32 %v1238_v18 }
 0x933   :  { %v364_v12 = vmax.f32 %v360_v32, %v362_v34  ;;  %13208 = vrsqrt.f32 %v1239_v31 }
 0x934   :  { %13210 = vrsqrt.f32 %v1240_v7 }
 0x935   :  { %375 = vrot.lane.b32.xlu0 %v364_v12, %s16691_s4  ;;  %369 = vrot.lane.b32.xlu1 %v364_v12, %s16693_s28 }
 0x93b   :  { %v13205_v37 = vpop.eup %13204 }
 0x93c   :  { %v13207_v3 = vpop.eup %13206  ;;  %1250 = vperm.xlu1 %13130, %v13205_v37  }
 0x93d   :  { %1253 = vperm.xlu0 %13131, %v13207_v3   ;;  %v13209_v27 = vpop.eup %13208 }
 0x93e   :  { %v13211_v43 = vpop.eup %13210 }
 0x940   :  { %1256 = vperm.xlu1 %13130, %v13209_v27  }
 0x941   :  { %1289 = vbcast.lane.b32.xlu0 %v1286_v39, 312 }
 0x944   :  { %1259 = vperm.xlu1 %13130, %v13211_v43  }
 0x948   :  { %1297 = vbcast.lane.b32.xlu1 %v1294_v40, 312 }
 0x963   :  { %v14202_v44 = vpop.f32.mrb[2].mxu1 }
 0x964   :  { %v12470_v47 = vpop.f32.mrb[3].mxu1 }
 0x967   :  { %v14204_v48 = vpop.f32.mrb[4].mxu1 }
 0x968   :  { %v12475_v51 = vpop.f32.mrb[5].mxu1 }
 0x970   :  { %v1191_v0 = vpop.f32.mrb[6].mxu1 }
 0x971   :  { %v12485_v57 = vpop.f32.mrb[7].mxu1 }
 0x972   :  { %v1115_v54 = vpop.f32.mrb[2].mxu0  ;;  %v365_v57 = vsub.f32 %v13933_v2, %v364_v12 }
 0x973   :  { %v12480_v58 = vpop.f32.mrb[3].mxu0 }
 0x974   :  { %v366_v58 = vmul.f32 1.442695, %v365_v57 }
 0x9a7   :  { %v376_v59 = vpop.permute.xlu0 %375  ;;  %v370_v60 = vpop.permute.xlu1 %369 }
 0x9a8   :  { %v378_v4 = vsub.f32 %v13933_v2, %v376_v59  ;;  %v372_v8 = vsub.f32 %v13933_v2, %v370_v60 }
 0x9aa   :  { %v379_v23 = vmul.f32 1.442695, %v378_v4  ;;  %v373_v10 = vmul.f32 1.442695, %v372_v8 }
 0x9ac   :  { %13212 = vpow2.f32 %v379_v23 }
 0x9ad   :  { %13214 = vpow2.f32 %v373_v10 }
 0x9ae   :  { %13216 = vpow2.f32 %v366_v58 }
 0x9b6   :  { %v13213_v22 = vpop.eup %13212 }
 0x9b7   :  { %v13215_v11 = vpop.eup %13214  ;;  %387 = vrot.lane.b32.xlu1 %v13213_v22, %s13669_s15 }
 0x9b8   :  { %382 = vrot.lane.b32.xlu0 %v13215_v11, %s16695_s8  ;;  %v13217_v59 = vpop.eup %13216  ;;  %s16721_s8 = smov 2  }
 0x9bb   :  { %v1251_v36 = vpop.permute.xlu1 %1250 }
 0x9bc   :  { %v1254_v17 = vpop.permute.xlu0 %1253  ;;  %v1264_v25 = vrot.slane %v1251_v36, %v13989_v28 }
 0x9bd   :  { %v1268_v18 = vrot.slane %v1254_v17, %v13989_v28 }
 0x9bf   :  { %v1257_v13 = vpop.permute.xlu1 %1256  ;;  %v1277_v31 = vsel %vm436_vm7, %v1268_v18, %v1264_v25 }
 0x9c0   :  { %v1272_v34 = vrot.slane %v1257_v13, %v13989_v28  ;;  %v1281_v7 = vmul.f32 %v1277_v31, %v1115_v54  ;;  %v1290_v37 = vpop.permute.xlu0 %1289 }
 0x9c2   :  { %v1299_v27 = vmul.f32 %v1290_v37, %v1281_v7 }
 0x9c3   :  { %v1260_v30 = vpop.permute.xlu1 %1259 }
 0x9c4   :  { %v1276_v32 = vrot.slane %v1260_v30, %v13989_v28  ;;  %v1301_v47 = vsel %vm632_vm5, %v1299_v27, -inf }
 0x9c6   :  { %v1278_v3 = vsel %vm436_vm7, %v1276_v32, %v1272_v34 }
 0x9c7   :  { %v1282_v39 = vmul.f32 %v1278_v3, %v1191_v0  ;;  %v1298_v43 = vpop.permute.xlu1 %1297 }
 0x9c9   :  { %v1300_v40 = vmul.f32 %v1298_v43, %v1282_v39 }
 0x9cb   :  { %v1304_v51 = vsel %vm632_vm5, %v1300_v40, -inf }
 0x9d7   :  { %1302 = vmax.xlane.f32.xlu0 %v1301_v47 }
 0x9db   :  { %1305 = vmax.xlane.f32.xlu1 %v1304_v51 }
 0xa29   :  { %v388_v4 = vpop.permute.xlu1 %387 }
 0xa2a   :  { %v383_v60 = vpop.permute.xlu0 %382 }
 0xa2b   :  { %v385_v54 = vadd.f32 %v13217_v59, %v383_v60 }
 0xa2d   :  { %v390_v8 = vadd.f32 %v388_v4, %v385_v54 }
 0xa2f   :  { %13218 = vrcp.f32 %v390_v8 }
 0xa39   :  { %v13219_v23 = vpop.eup %13218 }
 0xa3a   :  { %398 = vrot.lane.b32.xlu1 %v13219_v23, %s16691_s4  ;;  %394 = vrot.lane.b32.xlu0 %v13219_v23, %s16693_s28  ;;  %v392_v0 = vmul.f32 %v13219_v23, %v13217_v59  ;;  %s16722_s4 = smov 4  }
 0xa3c   :  { %v1326_v47 = vrot.slane %v392_v0, %v13936_v5 }
 0xa64   :  { %v1303_v10 = vpop.xlane.xlu0 %1302 }
 0xa65   :  { %v1307_v18 = vsub.f32 %v1299_v27, %v1303_v10 }
 0xa67   :  { %v1309_v30 = vmul.f32 1.442695, %v1307_v18 }
 0xa68   :  { %v1306_v25 = vpop.xlane.xlu1 %1305 }
 0xa69   :  { %v1308_v31 = vsub.f32 %v1300_v40, %v1306_v25  ;;  %13220 = vpow2.f32 %v1309_v30  ;;  %v1334_v40 = vrot.slane %v392_v0, %v13969_v41 }
 0xa6b   :  { %v1311_v32 = vmul.f32 1.442695, %v1308_v31 }
 0xa6d   :  { %13222 = vpow2.f32 %v1311_v32 }
 0xa73   :  { %v13221_v34 = vpop.eup %13220 }
 0xa74   :  { %v1313_v7 = vsel %vm632_vm5, %v13221_v34, 0.0 }
 0xa77   :  { %v13223_v37 = vpop.eup %13222 }
 0xaac   :  { %v395_v36 = vpop.permute.xlu0 %394  ;;  %v399_v3 = vpop.permute.xlu1 %398 }
 0xaad   :  { %v397_v13 = vmul.f32 %v13215_v11, %v395_v36  ;;  %v1316_v11 = vsel %vm632_vm5, %v13223_v37, 0.0  ;;  %v401_v39 = vmul.f32 %v13213_v22, %v399_v3 }
 0xaaf   :  { %v1352_v17 = vrot.slane %v397_v13, %v13969_v41  ;;  %v1344_v12 = vrot.slane %v397_v13, %v13936_v5  ;;  %v1380_v43 = vrot.slane %v401_v39, %v13969_v41  ;;  %v1372_v27 = vrot.slane %v401_v39, %v13936_v5 }
 0xab1   :  { %1355 = vbcast.lane.b32.xlu1 %v1352_v17, 322  ;;  %1347 = vbcast.lane.b32.xlu0 %v1344_v12, 322 }
 0xad0   :  { %1314 = vadd.xlane.f32.xlu0 %v1313_v7 }
 0xad5   :  { %1317 = vadd.xlane.f32.xlu1 %v1316_v11 }
 0xae6   :  { %1383 = vbcast.lane.b32.xlu1 %v1380_v43, 324  ;;  %1375 = vbcast.lane.b32.xlu0 %v1372_v27, 324  ;;  %v77_v43 = vld [vmem:[%s16673_s14] sm:$0xff]  ;;  %v78_v27 = vld [vmem:[%s16673_s14 + $0x8] sm:$0xff] }
 0xaea   :  { %1337 = vbcast.lane.b32.xlu1 %v1334_v40, 320  ;;  %1329 = vbcast.lane.b32.xlu0 %v1326_v47, 320  ;;  %v14273_v40 = vpack.c.bf16 %v78_v27, %v77_v43 }
 0xb23   :  { %v1348_v51 = vpop.permute.xlu0 %1347  ;;  %v1356_v58 = vpop.permute.xlu1 %1355 }
 0xb5d   :  { %v1315_v57 = vpop.xlane.xlu0 %1314 }
 0xb5e   :  { %13224 = vrcp.f32 %v1315_v57 }
 0xb61   :  { %v1376_v4 = vpop.permute.xlu0 %1375 }
 0xb62   :  { %v1318_v59 = vpop.xlane.xlu1 %1317  ;;  %v1385_v10 = vmul.f32 %v1376_v4, %v14202_v44 }
 0xb63   :  { %13226 = vrcp.f32 %v1318_v59 }
 0xb65   :  { %v1330_v17 = vpop.permute.xlu0 %1329 }
 0xb66   :  { %v1384_v0 = vpop.permute.xlu1 %1383  ;;  %v1339_v18 = vmul.f32 %v1330_v17, %v14202_v44 }
 0xb67   :  { %v1386_v13 = vmul.f32 %v1384_v0, %v14204_v48 }
 0xb68   :  { %v13225_v60 = vpop.eup %13224 }
 0xb69   :  { %v1321_v22 = vmul.f32 %v13225_v60, %v13221_v34 }
 0xb6a   :  { %v1338_v25 = vpop.permute.xlu1 %1337 }
 0xb6b   :  { %v1357_v54 = vmul.f32 %v1348_v51, %v1321_v22  ;;  %v1340_v7 = vmul.f32 %v1338_v25, %v14204_v48  ;;  %v13606_v48 = vld [vmem:[%s16669_s10 + $0x30] sm:$0xff] }
 0xb6d   :  { %v13227_v8 = vpop.eup %13226  ;;  %1361 = vrot.lane.b32.xlu0 %v1357_v54, %s13656_s26 }
 0xb6e   :  { %v1322_v23 = vmul.f32 %v13227_v8, %v13223_v37 }
 0xb70   :  { %v1358_v36 = vmul.f32 %v1356_v58, %v1322_v23 }
 0xb71   :  { %1389 = vrot.lane.b32.xlu0 %v1385_v10, %s13656_s26 }
 0xb72   :  { %1363 = vrot.lane.b32.xlu1 %v1358_v36, %s13656_s26 }
 0xb76   :  { %1391 = vrot.lane.b32.xlu1 %v1386_v13, %s13656_s26 }
 0xbdf   :  { %v1362_v12 = vpop.permute.xlu0 %1361 }
 0xbe0   :  { %v1367_v30 = vadd.f32 %v1362_v12, %v1339_v18  ;;  %v13607_v18 = vld [vmem:[%s16670_s11] ss:$0 sm:$0xff] }
 0xbe3   :  { %v1390_v31 = vpop.permute.xlu0 %1389 }
 0xbe4   :  { %v14236_v32 = vadd.f32 %v1390_v31, %v1367_v30  ;;  %v1364_v34 = vpop.permute.xlu1 %1363 }
 0xbe5   :  { %v1368_v37 = vadd.f32 %v1364_v34, %v1340_v7 }
 0xbe6   :  { %1398 = vrot.lane.b32.xlu0 %v14236_v32, %s13666_s6 }
 0xbe8   :  { %v1392_v11 = vpop.permute.xlu1 %1391 }
 0xbe9   :  { %v14241_v3 = vadd.f32 %v1392_v11, %v1368_v37 }
 0xbeb   :  { %1473 = vrot.lane.b32.xlu1 %v14241_v3, %s13666_s6 }
 0xc58   :  { %v14245_v39 = vpop.permute.xlu0 %1398 }
 0xc59   :  { %12489 = vmatmul.mubr.msk.f32.vlgmr.msra.gmra.mrb[4].mxu0 %vm116_vm1, %v14245_v39 }
 0xc5a   :  { %12500 = vmatprep.mubr.msk.f32.mxu0 %vm13657_vm0, %v13655_v21  ;;  %12975 = vmatpush3.bf16.msra.mxu0 %v14273_v40 }
 0xc5b   :  { %12985 = vmatprep.subr.bf16.mxu0 %v13654_v14 }
 0xc5d   :  { %v14251_v44 = vpop.permute.xlu1 %1473 }
 0xc5e   :  { %12494 = vmatmul.mubr.msk.f32.vlgmr.msra.gmra.mrb[8].mxu1 %vm116_vm1, %v14251_v44 }
 0xc5f   :  { %12978 = vmatpush3.bf16.msra.mxu1 %v13823_v9  ;;  %12517 = vmatprep.mubr.msk.f32.mxu1 %vm13657_vm0, %v13655_v21 }
 0xc60   :  { %12979 = vmatprep.subr.bf16.mxu1 %v13654_v14 }
 0xc63   :  { %12981 = vmatpush3.bf16.msra.mxu1 %v13834_v15 }
 0xc64   :  { %12982 = vmatprep.subr.bf16.mxu1 %v13654_v14 }
 0xc67   :  { %12984 = vmatpush3.bf16.msra.mxu1 %v13848_v20 }
 0xc68   :  { %12515 = vmatprep.subr.mxu1 %v13655_v21 }
 0xc6b   :  { %12516 = vmatpush3.msra.mxu1 %v13606_v48 }
 0xc6c   :  { %12541 = vmatprep.subr.mxu1 %v13655_v21 }
 0xd2c   :  { %v1468_v47 = vpop.f32.mrb[4].mxu0 }
 0xd2d   :  { %v12490_v51 = vpop.f32.mrb[5].mxu0 }
 0xd31   :  { %v1543_v57 = vpop.f32.mrb[8].mxu1 }
 0xd32   :  { %v1547_v58 = vcombine.low %v1468_v47, %v1543_v57  ;;  %v12495_v59 = vpop.f32.mrb[9].mxu1 }
 0xd34   :  { %v1554_v60 = vrot.slane %v1547_v58, %v13837_v16 }
 0xd36   :  { %v1555_v22 = vcombine.high %v1554_v60, %v13655_v21 }
 0xd38   :  { %1557 = vrot.lane.b32.xlu0 %v1555_v22, %s13656_s26 }
 0xd3c   :  { %1642 = vrot.lane.b32.xlu0 %v13913_v56, %s13667_s1  ;;  %v12102_v56 = vld [vmem:[%s16711_s2 + $0x2] sm:$0x3] }
 0xdaa   :  { %v1558_v54 = vpop.permute.xlu0 %1557 }
 0xdab   :  { %v1560_v4 = vsel %vm116_vm1, %v1554_v60, %v1558_v54  ;;  %v13608_v60 = vld [vmem:[%s16672_s13] ss:$0 sm:$0xff] }
 0xdac   :  { %1639 = vrot.lane.b32.xlu1 %v1560_v4, %s13656_s26  ;;  %12501 = vmatmul.mubr.msk.f32.vlgmr.msra.gmra.mrb[6].mxu0 %vm1561_vm10, %v1560_v4 }
 0xdad   :  { %12987 = vmatpush3.bf16.msra.mxu0 %v13894_v50  ;;  %12528 = vmatprep.mubr.msk.f32.mxu0 %vm13657_vm0, %v13655_v21 }
 0xdae   :  { %12988 = vmatprep.subr.bf16.mxu0 %v13654_v14  ;;  %v1643_v23 = vpop.permute.xlu0 %1642 }
 0xdb1   :  { %12990 = vmatpush3.bf16.msra.mxu0 %v13900_v52 }
 0xdb2   :  { %12531 = vmatprep.subr.mxu0 %v13655_v21 }
 0xe1e   :  { %v1640_v8 = vpop.permute.xlu1 %1639 }
 0xe1f   :  { %v1645_v10 = vsel %vm116_vm1, %v12102_v56, %v1640_v8 }
 0xe20   :  { %v1646_v36 = vsel %vm127_vm2, %v1645_v10, %v1643_v23 }
 0xe21   :  { %12518 = vmatmul.mubr.msk.f32.vlgmr.msra.gmra.mrb[10].mxu1 %vm135_vm3, %v1646_v36 }
 0xe22   :  { %12543 = vmatprep.mubr.msk.f32.mxu1 %vm13657_vm0, %v13655_v21 }
 0xe7f   :  { %v1631_v0 = vpop.f32.mrb[6].mxu0 }
 0xe80   :  { %v1635_v13 = vadd.f32 %v1631_v0, %v13933_v2  ;;  %v12502_v17 = vpop.f32.mrb[7].mxu0 }
 0xe82   :  { %1636 = vst.msk [vmem:[#allocation2] sm:$0x3] %vm632_vm5, %v1635_v13 }
 0xef4   :  { %v1716_v12 = vpop.f32.mrb[10].mxu1 }
 0xef5   :  { %v1717_v25 = vadd.f32 %v13607_v18, %v1716_v12  ;;  %v12519_v30 = vpop.f32.mrb[11].mxu1 }
 0xef7   :  { %13228 = vtanh.f32 %v1717_v25  ;;  %v12104_v34 = vmul.f32 -1.442695, %v1717_v25 }
 0xef9   :  { %13230 = vpow2.f32 %v12104_v34 }
 0xf01   :  { %v13229_v31 = vpop.eup %13228 }
 0xf02   :  { %1729 = vrot.lane.b32.xlu1 %v13229_v31, %s13658_s5 }
 0xf03   :  { %v13231_v7 = vpop.eup %13230 }
 0xf04   :  { %v1723_v37 = vadd.f32 1.0, %v13231_v7 }
 0xf06   :  { %13232 = vrcp.f32 %v1723_v37 }
 0xf10   :  { %v13233_v2 = vpop.eup %13232 }
 0xf11   :  { %v1727_v43 = vmul.f32 %v13233_v2, %v13882_v46 }
 0xf74   :  { %v1730_v11 = vpop.permute.xlu1 %1729 }
 0xf75   :  { %v1732_v48 = vmul.f32 %v13233_v2, %v1730_v11 }
 0xf77   :  { %1734 = vrot.lane.b32.xlu0 %v1732_v48, %s13658_s5 }
 0xfe9   :  { %v1735_v27 = vpop.permute.xlu0 %1734 }
 0xfea   :  { %v14307_v47 = vadd.f32 %v1735_v27, %v1727_v43 }
 0xfec   :  { %13234 = vtanh.f32 %v14307_v47 }
 0xff6   :  { %v13235_v51 = vpop.eup %13234 }
 0xff7   :  { %1740 = vrot.lane.b32.xlu1 %v13235_v51, %s13658_s5 }
 0xffb   :  { %2094 = vrot.lane.b32.xlu1 %v14155_v55, %s13653_s9 }
0x1069   :  { %v1741_v57 = vpop.permute.xlu1 %1740 }
0x106a   :  { %v14313_v58 = vmul.f32 %v13233_v2, %v1741_v57 }
0x106c   :  { %1745 = vrot.lane.b32.xlu0 %v14313_v58, %s13659_s12 }
0x106d   :  { %v2095_v0 = vpop.permute.xlu1 %2094 }
0x1070   :  { %2096 = vrot.lane.b32.xlu0 %v14153_v49, %s13653_s9 }
0x10de   :  { %v1746_v46 = vpop.permute.xlu0 %1745 }
0x10df   :  { %12529 = vmatmul.mubr.msk.f32.vlgmr.msra.gmra.mrb[8].mxu0 %vm16697_vm4, %v1746_v46 }
0x10e0   :  { %12533 = vmatprep.mubr.msk.f32.mxu0 %vm13657_vm0, %v13655_v21 }
0x10e2   :  { %v2097_v12 = vpop.permute.xlu0 %2096 }
0x11b2   :  { %v1815_v59 = vpop.f32.mrb[8].mxu0 }
0x11b3   :  { %v14325_v22 = vadd.f32 %v13608_v60, %v1815_v59  ;;  %v12530_v54 = vpop.f32.mrb[9].mxu0 }
0x11b5   :  { %v2116_v4 = vmul.f32 %v14325_v22, %v14325_v22  ;;  %v2068_v56 = vrot.slane %v14325_v22, %v13931_v63  ;;  %v12106_v25 = vmul.f32 -1.442695, %v14325_v22  ;;  %v1842_v57 = vand.u32 2147483647, %v14325_v22 }
0x11b7   :  { %2118 = vrot.lane.b32.xlu1 %v2116_v4, %s13661_s27  ;;  %v2076_v8 = vrot.slane %v2068_v56, %v13931_v63  ;;  %v2069_v23 = vcombine.high %v2068_v56, %v2068_v56  ;;  %13236 = vpow2.f32 %v12106_v25  ;;  %v1843_v46 = vsub.f32 0.0, %v1842_v57 }
0x11b9   :  { %v14334_v10 = vrot.slane %v2076_v8, %v13936_v5  ;;  %v2083_v36 = vrot.slane %v2069_v23, %v13931_v63  ;;  %v1844_v59 = vmul.f32 1.442695, %v1843_v46 }
0x11bb   :  { %v2100_v13 = vmul.f32 %v2095_v0, %v14334_v10  ;;  %v14339_v17 = vrot.slane %v2083_v36, %v13936_v5 }
0x11bd   :  { %2104 = vrot.lane.b32.xlu0 %v2100_v13, %s13661_s27  ;;  %v2101_v18 = vmul.f32 %v2097_v12, %v14339_v17 }
0x11bf   :  { %2106 = vrot.lane.b32.xlu1 %v2101_v18, %s13661_s27 }
0x11c1   :  { %v13237_v34 = vpop.eup %13236 }
0x11c2   :  { %v1838_v7 = vadd.f32 1.0, %v13237_v34 }
0x11c4   :  { %13238 = vrcp.f32 %v1838_v7 }
0x11c5   :  { %13240 = vpow2.f32 %v1844_v59 }
0x11ce   :  { %v14348_v43 = vpop.eup %13238 }
0x11cf   :  { %v1905_v27 = vrot.slane %v14348_v43, %v13936_v5  ;;  %v1913_v51 = vrot.slane %v14348_v43, %v13969_v41  ;;  %v13241_v60 = vpop.eup %13240 }
0x11d0   :  { %v1846_v54 = vadd.f32 1.0, %v13241_v60  ;;  %v1849_v18 = vmul.f32 -0.5, %v13241_v60 }
0x11d2   :  { %13242 = vlog2.f32 %v1846_v54  ;;  %v1850_v34 = vadd.f32 1.0, %v1849_v18  ;;  %v1841_v54 = vmax.f32 %v14325_v22, 0.0  ;;  %v1931_v18 = vmul.f32 %v14063_v42, %v14017_v1 }
0x1229   :  { %v2119_v30 = vpop.permute.xlu1 %2118 }
0x122a   :  { %v2121_v31 = vsel %vm632_vm5, %v2119_v30, 0.0  ;;  %v13243_v30 = vpop.eup %13242 }
0x122b   :  { %2122 = vadd.xlane.f32.xlu0 %v2121_v31 }
0x122f   :  { %v2105_v37 = vpop.permute.xlu0 %2104 }
0x1230   :  { %v2110_v2 = vsel %vm116_vm1, %v2105_v37, 0.0  ;;  %v1852_v37 = vand.u32 2147483647, %v13241_v60 }
0x1231   :  { %2111 = vadd.xlane.f32.xlu1 %v2110_v2  ;;  %v2107_v11 = vpop.permute.xlu1 %2106 }
0x1232   :  { %v2113_v48 = vsel %vm116_vm1, %v2107_v11, 0.0  ;;  %v1848_v11 = vmul.f32 0.6931472, %v13243_v30  ;;  %vm1853_vm11 = vcmp.lt.f32.partialorder %v1852_v37, 0.0004427343 }
0x1233   :  { %2114 = vadd.xlane.f32.xlu0 %v2113_v48 }
0x1242   :  { %1908 = vbcast.lane.b32.xlu1 %v1905_v27, 304  ;;  %v1851_v27 = vmul.f32 %v13241_v60, %v1850_v34 }
0x1249   :  { %1916 = vbcast.lane.b32.xlu0 %v1913_v51, 304  ;;  %v1854_v51 = vsel %vm1853_vm11, %v1851_v27, %v1848_v11 }
0x12b8   :  { %v2123_v4 = vpop.xlane.xlu0 %2122 }
0x12b9   :  { %v2128_v56 = vrot.slane %v2123_v4, %v13936_v5  ;;  %v2132_v8 = vrot.slane %v2123_v4, %v13969_v41 }
0x12bb   :  { %v2135_v23 = vmul.f32 %v2128_v56, %v14188_v19  ;;  %v2136_v36 = vmul.f32 %v2132_v8, %v14183_v61 }
0x12bd   :  { %v2137_v0 = vadd.f32 1e-06, %v2135_v23  ;;  %v2138_v13 = vadd.f32 1e-06, %v2136_v36 }
0x12be   :  { %v2112_v12 = vpop.xlane.xlu1 %2111 }
0x12bf   :  { %13244 = vrsqrt.f32 %v2137_v0 }
0x12c0   :  { %13246 = vrsqrt.f32 %v2138_v13  ;;  %v2115_v25 = vpop.xlane.xlu0 %2114 }
0x12c2   :  { %v1909_v31 = vpop.permute.xlu1 %1908 }
0x12c3   :  { %v1918_v7 = vmul.f32 %v1909_v31, %v14236_v32  ;;  %v1855_v32 = vadd.f32 %v1854_v51, %v1841_v54 }
0x12c4   :  { %v1917_v2 = vpop.permute.xlu0 %1916 }
0x12c5   :  { %v1920_v48 = vsub.f32 1.0, %v1918_v7  ;;  %v1919_v19 = vmul.f32 %v1917_v2, %v14241_v3  ;;  %v14363_v60 = vadd.f32 1.0, %v1855_v32 }
0x12c7   :  { %v1921_v61 = vsub.f32 1.0, %v1919_v19  ;;  %v1924_v46 = vrot.slane %v1920_v48, 1 }
0x12c9   :  { %v13245_v57 = vpop.eup %13244  ;;  %v1925_v59 = vrot.slane %v1921_v61, 1  ;;  %v1928_v36 = vmul.f32 %v1924_v46, %v1920_v48 }
0x12ca   :  { %v13247_v4 = vpop.eup %13246  ;;  %v2141_v56 = vmul.f32 %v13245_v57, %v2112_v12  ;;  %v1930_v12 = vadd.f32 %v14063_v42, %v14017_v1 }
0x12cb   :  { %v2142_v8 = vmul.f32 %v13247_v4, %v2115_v25  ;;  %v1929_v23 = vmul.f32 %v1925_v59, %v1921_v61 }
0x12cc   :  { %2151 = vperm.xlu1 %13130, %v2141_v56   ;;  %v1932_v34 = vsub.f32 %v1930_v12, %v1931_v18 }
0x12cd   :  { %v1935_v0 = vrot.slane %v1929_v23, 7  ;;  %2154 = vperm.xlu0 %13131, %v2142_v8  }
0x12cf   :  { %v1936_v3 = vsel %vm436_vm7, %v1935_v0, %v1928_v36 }
0x12d0   :  { %13132 = vset.pattern.permute.xlu1 %v13663_v24 }
0x12d1   :  { %1937 = vrot.lane.b32.xlu0 %v1936_v3, %s13666_s6  ;;  %2145 = vperm.xlu1 %13132, %v14363_v60  }
0x12d2   :  { %13133 = vset.pattern.permute.xlu0 %v13664_v6 }
0x12d5   :  { %13134 = vset.pattern.permute.xlu1 %v13664_v6 }
0x134b   :  { %v2152_v13 = vpop.permute.xlu1 %2151 }
0x134c   :  { %v2155_v25 = vpop.permute.xlu0 %2154  ;;  %v2159_v30 = vrot.slane %v2152_v13, %v13989_v28 }
0x134d   :  { %v2163_v31 = vrot.slane %v2155_v25, %v13989_v28 }
0x134f   :  { %v2164_v37 = vsel %vm436_vm7, %v2163_v31, %v2159_v30 }
0x1350   :  { %v1938_v7 = vpop.permute.xlu0 %1937  ;;  %v2146_v2 = vpop.permute.xlu1 %2145 }
0x1351   :  { %v14377_v11 = vmul.f32 %v1938_v7, %v1932_v34  ;;  %v2166_v48 = vmul.f32 %v2164_v37, %v2146_v2  ;;  %v2184_v2 = vsub.f32 1.0, %v14348_v43 }
0x1353   :  { %v1944_v19 = vrot.slane %v14377_v11, %v13936_v5  ;;  %v2167_v27 = vsel %vm632_vm5, %v2166_v48, -inf  ;;  %v1951_v1 = vrot.slane %v14377_v11, %v13969_v41  ;;  %v2000_v61 = vmax.f32 %v14377_v11, 1e-30 }
0x1354   :  { %2168 = vmax.xlane.f32.xlu1 %v2167_v27  ;;  %v1962_v57 = vrot.slane %v14377_v11, %v13931_v63 }
0x1355   :  { %1946 = vbcast.lane.b32.xlu0 %v1944_v19, 256  ;;  %13248 = vlog2.f32 %v2000_v61 }
0x1356   :  { %v1970_v59 = vrot.slane %v1962_v57, %v13931_v63  ;;  %v1963_v54 = vcombine.high %v1962_v57, %v1962_v57  ;;  %v881_v57 = vsel %vm632_vm5, %v14063_v42, 0.0 }
0x1358   :  { %v1981_v56 = vrot.slane %v1970_v59, %v13936_v5  ;;  %v1977_v8 = vrot.slane %v1963_v54, %v13931_v63 }
0x1359   :  { %1953 = vbcast.lane.b32.xlu0 %v1951_v1, 256 }
0x135a   :  { %v1985_v0 = vrot.slane %v1977_v8, %v13936_v5 }
0x135f   :  { %v13249_v51 = vpop.eup %13248 }
0x1360   :  { %v2002_v46 = vmul.f32 0.6931472, %v13249_v51 }
0x1362   :  { %v2010_v4 = vrot.slane %v2002_v46, %v13931_v63 }
0x1364   :  { %v2018_v23 = vrot.slane %v2010_v4, %v13931_v63  ;;  %v2011_v32 = vcombine.high %v2010_v4, %v2010_v4 }
0x1366   :  { %v2029_v3 = vrot.slane %v2018_v23, %v13936_v5  ;;  %v2025_v13 = vrot.slane %v2011_v32, %v13931_v63 }
0x1368   :  { %v2033_v31 = vrot.slane %v2025_v13, %v13936_v5 }
0x13c7   :  { %v1947_v36 = vpop.permute.xlu0 %1946 }
0x13c8   :  { %vm1988_vm12 = vcmp.lt.f32.partialorder %v1981_v56, %v1947_v36  ;;  %vm1990_vm13 = vcmp.eq.f32.partialorder %v1981_v56, %v1947_v36 }
0x13c9   :  { %vm1992_vm14 = vmand %vm1990_vm13, %vm14032_vm8 }
0x13ca   :  { %vm1994_vm15 = vmor %vm1988_vm12, %vm1992_vm14 }
0x13cb   :  { %v1954_v12 = vpop.permute.xlu0 %1953  ;;  %v12107_v18 = vsel %vm1994_vm15, 1.0, %v13655_v21 }
0x13cc   :  { %vm1989_vm6 = vcmp.lt.f32.partialorder %v1985_v0, %v1954_v12  ;;  %vm1991_vm9 = vcmp.eq.f32.partialorder %v1985_v0, %v1954_v12  ;;  %v2036_v25 = vmul.f32 %v12107_v18, %v2029_v3  ;;  %v2048_v3 = vsub.f32 1.0, %v14377_v11 }
0x13cd   :  { %vm1993_vm11 = vmand %vm1991_vm9, %vm14032_vm8 }
0x13ce   :  { %vm1995_vm4 = vmor %vm1989_vm6, %vm1993_vm11  ;;  %v2038_v30 = vsel %vm116_vm1, %v2036_v25, 0.0 }
0x13cf   :  { %2039 = vadd.xlane.f32.xlu0 %v2038_v30  ;;  %v12108_v34 = vsel %vm1995_vm4, 1.0, %v13655_v21  ;;  %vm16723_vm4 = vcmask 261120  }
0x13d0   :  { %v2037_v7 = vmul.f32 %v12108_v34, %v2033_v31 }
0x13d2   :  { %v2041_v37 = vsel %vm116_vm1, %v2037_v7, 0.0 }
0x13d3   :  { %2042 = vadd.xlane.f32.xlu1 %v2041_v37 }
0x13e1   :  { %v2169_v19 = vpop.xlane.xlu1 %2168 }
0x13e2   :  { %v2170_v27 = vsub.f32 %v2166_v48, %v2169_v19 }
0x13e4   :  { %2187 = vperm.xlu1 %13134, %v2184_v2   ;;  %v2171_v1 = vmul.f32 1.442695, %v2170_v27 }
0x13e5   :  { %2180 = vperm.xlu0 %13133, %v14348_v43  }
0x13e6   :  { %13250 = vpow2.f32 %v2171_v1 }
0x13e8   :  { %13135 = vset.pattern.permute.xlu1 %v13665_v53 }
0x13e9   :  { %13136 = vset.pattern.permute.xlu0 %v13662_v33 }
0x13f0   :  { %v13251_v61 = vpop.eup %13250 }
0x13f1   :  { %v2173_v51 = vsel %vm632_vm5, %v13251_v61, 0.0 }
0x1408   :  { %2174 = vadd.xlane.f32.xlu1 %v2173_v51 }
0x1419   :  { %2193 = vperm.xlu1 %13135, %v14348_v43  }
0x141d   :  { %13137 = vset.pattern.permute.xlu1 %v13662_v33 }
0x143d   :  { %882 = vadd.xlane.f32.xlu1 %v881_v57 }
0x145c   :  { %v2040_v59 = vpop.xlane.xlu0 %2039 }
0x145d   :  { %v2044_v4 = vmul.f32 1.442695, %v2040_v59 }
0x1460   :  { %v2043_v46 = vpop.xlane.xlu1 %2042 }
0x1461   :  { %v2046_v54 = vmul.f32 1.442695, %v2043_v46 }
0x1463   :  { %13252 = vpow2.f32 %v2046_v54  ;;  %v2217_v54 = vrot.slane %v14348_v43, %v13931_v63 }
0x1464   :  { %13254 = vpow2.f32 %v2044_v4  ;;  %v2188_v48 = vpop.permute.xlu1 %2187  ;;  %v2181_v25 = vpop.permute.xlu0 %2180 }
0x146d   :  { %v13253_v56 = vpop.eup %13252 }
0x146e   :  { %v13255_v23 = vpop.eup %13254  ;;  %v2058_v32 = vrot.slane %v13253_v56, %v13989_v28 }
0x146f   :  { %v2054_v36 = vrot.slane %v13255_v23, %v13989_v28 }
0x1471   :  { %v2059_v0 = vsel %vm436_vm7, %v2058_v32, %v2054_v36 }
0x1472   :  { %v2061_v13 = vmul.f32 %v2059_v0, %v2048_v3 }
0x1474   :  { %v2183_v30 = vmul.f32 %v2181_v25, %v2061_v13 }
0x1495   :  { %v2175_v8 = vpop.xlane.xlu1 %2174 }
0x1496   :  { %13256 = vrcp.f32 %v2175_v8 }
0x1499   :  { %v2194_v7 = vpop.permute.xlu1 %2193 }
0x14a0   :  { %v13257_v12 = vpop.eup %13256 }
0x14a1   :  { %v2177_v18 = vmul.f32 %v13257_v12, %v13251_v61  ;;  %v13609_v61 = vld [vmem:[%s16718_s29] sm:$0x3]  ;;  %s16720_s29 = smov 126  }
0x14a3   :  { %v2190_v31 = vmul.f32 %v2188_v48, %v2177_v18  ;;  %v2218_v18 = vcombine.high %v2217_v54, %v2217_v54 }
0x14a5   :  { %v2191_v34 = vadd.f32 %v2190_v31, %v2183_v30 }
0x14a7   :  { %v14417_v37 = vmul.f32 %v2194_v7, %v2191_v34 }
0x14a9   :  { %v2200_v2 = vrot.slane %v14417_v37, %v13936_v5  ;;  %v2207_v19 = vrot.slane %v14417_v37, %v13969_v41  ;;  %v2278_v4 = vrot.slane %v14417_v37, %v13931_v63 }
0x14ab   :  { %2202 = vbcast.lane.b32.xlu0 %v2200_v2, 256  ;;  %v2286_v56 = vrot.slane %v2278_v4, %v13931_v63  ;;  %v2279_v8 = vcombine.high %v2278_v4, %v2278_v4 }
0x14ad   :  { %v2297_v3 = vrot.slane %v2286_v56, %v13936_v5  ;;  %v2293_v13 = vrot.slane %v2279_v8, %v13931_v63 }
0x14af   :  { %2209 = vbcast.lane.b32.xlu0 %v2207_v19, 256  ;;  %v2301_v19 = vrot.slane %v2293_v13, %v13936_v5 }
0x14b3   :  { %1820 = vrot.lane.b32.xlu0 %v14325_v22, %s13666_s6 }
0x14ca   :  { %v883_v27 = vpop.xlane.xlu1 %882 }
0x14cb   :  { %v884_v1 = vsub.f32 1.0, %v883_v27 }
0x14cd   :  { %v885_v51 = vmul.f32 %v13609_v61, %v884_v1 }
0x14cf   :  { %v14429_v57 = vadd.f32 %v885_v51, %v14063_v42  ;;  %v2225_v42 = vrot.slane %v2217_v54, %v13931_v63 }
0x14d1   :  { %v2359_v46 = vrot.slane %v14429_v57, %v13969_v41  ;;  %v2352_v59 = vrot.slane %v14429_v57, %v13936_v5  ;;  %v2315_v48 = vrot.slane %v14429_v57, %v13931_v63  ;;  %v2236_v36 = vrot.slane %v2225_v42, %v13936_v5 }
0x14d3   :  { %2361 = vbcast.lane.b32.xlu1 %v2359_v46, 256  ;;  %2354 = vbcast.lane.b32.xlu0 %v2352_v59, 256  ;;  %v2323_v23 = vrot.slane %v2315_v48, %v13931_v63  ;;  %v2316_v32 = vcombine.high %v2315_v48, %v2315_v48  ;;  %v2232_v59 = vrot.slane %v2218_v18, %v13931_v63 }
0x14d5   :  { %v2334_v30 = vrot.slane %v2323_v23, %v13936_v5  ;;  %v2330_v31 = vrot.slane %v2316_v32, %v13931_v63  ;;  %v2240_v8 = vrot.slane %v2232_v59, %v13936_v5 }
0x14d7   :  { %v2338_v51 = vrot.slane %v2330_v31, %v13936_v5 }
0x151d   :  { %v2203_v0 = vpop.permute.xlu0 %2202 }
0x151e   :  { %v2269_v43 = vsub.f32 1.0, %v2203_v0  ;;  %v2243_v12 = vmul.f32 %v2236_v36, %v2203_v0  ;;  %v2341_v2 = vmul.f32 %v2334_v30, %v2203_v0 }
0x1520   :  { %v2304_v25 = vsub.f32 %v2269_v43, %v2297_v3  ;;  %v2245_v34 = vsub.f32 1.0, %v2243_v12 }
0x1521   :  { %v2210_v7 = vpop.permute.xlu0 %2209 }
0x1522   :  { %v2270_v27 = vsub.f32 1.0, %v2210_v7  ;;  %2249 = vrot.lane.b32.xlu0 %v2245_v34, %s13667_s1  ;;  %v2306_v1 = vmul.f32 %v2304_v25, %v14106_v45  ;;  %v2342_v4 = vmul.f32 %v2338_v51, %v2210_v7  ;;  %v2258_v45 = vmul.f32 %v2210_v7, %v14339_v17 }
0x1523   :  { %v2244_v32 = vmul.f32 %v2240_v8, %v2210_v7  ;;  %v2347_v18 = vmul.f32 %v2304_v25, %v14128_v29 }
0x1524   :  { %v2305_v61 = vsub.f32 %v2270_v27, %v2301_v19  ;;  %v2343_v46 = vadd.f32 %v2341_v2, %v2306_v1 }
0x1525   :  { %v1821_v54 = vpop.permute.xlu0 %1820  ;;  %v2246_v36 = vsub.f32 1.0, %v2244_v32 }
0x1526   :  { %1822 = vrot.lane.b32.xlu1 %v1821_v54, %s13666_s6  ;;  %v14456_v48 = vmul.f32 %v14098_v38, %v2343_v46  ;;  %v2307_v42 = vmul.f32 %v2305_v61, %v14117_v62  ;;  %v2257_v62 = vmul.f32 %v2203_v0, %v14334_v10  ;;  %v2348_v13 = vmul.f32 %v2305_v61, %v14134_v35 }
0x1528   :  { %2377 = vrot.lane.b32.xlu0 %v14456_v48, %s13656_s26  ;;  %v2344_v56 = vadd.f32 %v2342_v4, %v2307_v42 }
0x152a   :  { %2263 = vrot.lane.b32.xlu1 %v2258_v45, %s13668_s30  ;;  %v14465_v23 = vmul.f32 %v14098_v38, %v2344_v56 }
0x152c   :  { %2379 = vrot.lane.b32.xlu0 %v14465_v23, %s13656_s26 }
0x1530   :  { %2251 = vrot.lane.b32.xlu0 %v2246_v36, %s13667_s1 }
0x1534   :  { %2261 = vrot.lane.b32.xlu0 %v2257_v62, %s13668_s30 }
0x1545   :  { %v2362_v17 = vpop.permute.xlu1 %2361  ;;  %v2355_v43 = vpop.permute.xlu0 %2354 }
0x1546   :  { %v2364_v12 = vmul.f32 %v2362_v17, %v2301_v19  ;;  %v2363_v30 = vmul.f32 %v2355_v43, %v2297_v3 }
0x1548   :  { %v2366_v31 = vadd.f32 %v2364_v12, %v2348_v13  ;;  %v2365_v34 = vadd.f32 %v2363_v30, %v2347_v18 }
0x154a   :  { %v14475_v27 = vmul.f32 %v14098_v38, %v2365_v34  ;;  %v14481_v35 = vmul.f32 %v14098_v38, %v2366_v31 }
0x1594   :  { %v2250_v7 = vpop.permute.xlu0 %2249 }
0x1595   :  { %v2255_v42 = vmul.f32 %v2250_v7, %v14155_v55 }
0x1598   :  { %v1823_v2 = vpop.permute.xlu1 %1822 }
0x1599   :  { %v1826_v1 = vcombine.low %v1821_v54, %v1823_v2 }
0x159a   :  { %v2378_v51 = vpop.permute.xlu0 %2377 }
0x159b   :  { %v1833_v10 = vrot.slane %v1826_v1, %v13837_v16  ;;  %v2383_v0 = vsel %vm116_vm1, %v14475_v27, %v2378_v51 }
0x159c   :  { %12532 = vmatpush3.msra.mxu0 %v2383_v0  ;;  %v2264_v4 = vpop.permute.xlu1 %2263 }
0x159d   :  { %12534 = vmatmul.mubr.msk.f32.vlgmr.msra.gmra.mrb[10].mxu0 %vm116_vm1, %v14245_v39  ;;  %12536 = vmatprep.subr.mxu0 %v13655_v21  ;;  %v2685_v29 = vmul.f32 %v1833_v10, %v1833_v10  ;;  %v1834_v3 = vcombine.high %v1833_v10, %v13655_v21 }
0x159e   :  { %v2380_v25 = vpop.permute.xlu0 %2379  ;;  %12538 = vmatprep.mubr.msk.f32.mxu0 %vm13657_vm0, %v13655_v21 }
0x159f   :  { %v2384_v19 = vsel %vm116_vm1, %v14481_v35, %v2380_v25  ;;  %v2687_v61 = vsel %vm632_vm5, %v2685_v29, 0.0  ;;  %v2686_v46 = vmul.f32 %v1834_v3, %v1834_v3 }
0x15a0   :  { %2688 = vadd.xlane.f32.xlu0 %v2687_v61  ;;  %12537 = vmatpush3.msra.mxu0 %v2384_v19 }
0x15a1   :  { %12539 = vmatmul.mubr.msk.f32.vlgmr.msra.gmra.mrb[12].mxu0 %vm116_vm1, %v14251_v44  ;;  %v2690_v39 = vsel %vm632_vm5, %v2686_v46, 0.0  ;;  %12546 = vmatprep.subr.mxu0 %v13655_v21 }
0x15a2   :  { %2691 = vadd.xlane.f32.xlu1 %v2690_v39  ;;  %v2252_v59 = vpop.permute.xlu0 %2251  ;;  %12548 = vmatprep.mubr.msk.f32.mxu0 %vm13657_vm0, %v13655_v21 }
0x15a3   :  { %v2256_v54 = vmul.f32 %v2252_v59, %v14153_v49  ;;  %v2776_v59 = vrot.slane %v14363_v60, %v13969_v41 }
0x15a5   :  { %v14500_v45 = vadd.f32 %v2264_v4, %v2256_v54  ;;  %v2768_v4 = vrot.slane %v14363_v60, %v13936_v5 }
0x15a6   :  { %v2262_v56 = vpop.permute.xlu0 %2261 }
0x15a7   :  { %v14502_v8 = vadd.f32 %v2262_v56, %v2255_v42  ;;  %12547 = vmatpush3.xpose.msk.msra.mxu0 %vm116_vm1, %v14500_v45  ;;  %v2678_v55 = vmul.f32 %v14500_v45, %v14500_v45 }
0x15a8   :  { %12556 = vmatprep.subr.mxu0 %v13655_v21 }
0x15a9   :  { %12542 = vmatpush3.xpose.msk.msra.mxu1 %vm116_vm1, %v14502_v8  ;;  %v2677_v44 = vmul.f32 %v14502_v8, %v14502_v8  ;;  %v2682_v32 = vsel %vm116_vm1, %v2678_v55, 0.0 }
0x15aa   :  { %12549 = vmatmul.mubr.msk.f32.vlgmr.msra.gmra.mrb[14].mxu0 %vm116_vm1, %v1834_v3  ;;  %12551 = vmatprep.subr.mxu1 %v13655_v21 }
0x15ab   :  { %12557 = vmatpush3.msra.mxu0 %v14500_v45  ;;  %v2679_v49 = vsel %vm116_vm1, %v2677_v44, 0.0  ;;  %12558 = vmatprep.mubr.msk.f32.mxu0 %vm13657_vm0, %v13655_v21 }
0x15ac   :  { %2680 = vadd.xlane.f32.xlu0 %v2679_v49  ;;  %12544 = vmatmul.mubr.msk.f32.vlgmr.msra.gmra.mrb[12].mxu1 %vm116_vm1, %v1833_v10 }
0x15ad   :  { %12552 = vmatpush3.msra.mxu1 %v14502_v8  ;;  %12553 = vmatprep.mubr.msk.f32.mxu1 %vm13657_vm0, %v13655_v21 }
0x15ae   :  { %12991 = vmatprep.subr.bf16.mxu1 %v13654_v14  ;;  %12994 = vmatprep.subr.bf16.mxu0 %v13654_v14 }
0x15b0   :  { %2683 = vadd.xlane.f32.xlu0 %v2682_v32 }
0x15b3   :  { %1861 = vrot.lane.b32.xlu1 %v14325_v22, %s13669_s15 }
0x15c6   :  { %1857 = vrot.lane.b32.xlu0 %v14325_v22, %s16720_s29 }
0x162d   :  { %v2689_v36 = vpop.xlane.xlu0 %2688 }
0x162e   :  { %v2698_v62 = vrot.slane %v2689_v36, %v13936_v5  ;;  %v2702_v17 = vrot.slane %v2689_v36, %v13969_v41 }
0x162f   :  { %v2692_v43 = vpop.xlane.xlu1 %2691 }
0x1630   :  { %v2710_v30 = vrot.slane %v2692_v43, %v13969_v41  ;;  %v2706_v34 = vrot.slane %v2692_v43, %v13936_v5 }
0x1633   :  { %v1862_v3 = vpop.permute.xlu1 %1861 }
0x1639   :  { %v14532_v13 = vpop.xlane.xlu0 %2680 }
0x163a   :  { %v2715_v12 = vmul.f32 %v2698_v62, %v14532_v13  ;;  %v2716_v18 = vmul.f32 %v2702_v17, %v14532_v13 }
0x163c   :  { %v2719_v31 = vadd.f32 1e-06, %v2715_v12  ;;  %v2720_v2 = vadd.f32 1e-06, %v2716_v18 }
0x163d   :  { %v14538_v7 = vpop.xlane.xlu0 %2683 }
0x163e   :  { %13258 = vrsqrt.f32 %v2719_v31  ;;  %v2718_v1 = vmul.f32 %v2710_v30, %v14538_v7  ;;  %v2717_v51 = vmul.f32 %v2706_v34, %v14538_v7 }
0x163f   :  { %13260 = vrsqrt.f32 %v2720_v2 }
0x1640   :  { %v2722_v10 = vadd.f32 1e-06, %v2718_v1  ;;  %v2721_v25 = vadd.f32 1e-06, %v2717_v51 }
0x1641   :  { %v1858_v0 = vpop.permute.xlu0 %1857 }
0x1642   :  { %v1860_v29 = vmax.f32 %v14325_v22, %v1858_v0  ;;  %13262 = vrsqrt.f32 %v2722_v10 }
0x1643   :  { %13264 = vrsqrt.f32 %v2721_v25 }
0x1644   :  { %v1864_v19 = vmax.f32 %v1860_v29, %v1862_v3 }
0x1646   :  { %1869 = vrot.lane.b32.xlu1 %v1864_v19, %s16721_s8 }
0x1648   :  { %v13259_v61 = vpop.eup %13258 }
0x1649   :  { %2732 = vperm.xlu0 %13136, %v13259_v61   ;;  %v13261_v46 = vpop.eup %13260 }
0x164a   :  { %1875 = vrot.lane.b32.xlu1 %v1864_v19, %s16722_s4 }
0x164c   :  { %v13263_v39 = vpop.eup %13262 }
0x164d   :  { %2741 = vperm.xlu0 %13136, %v13263_v39   ;;  %v13265_v54 = vpop.eup %13264 }
0x164e   :  { %2735 = vperm.xlu1 %13137, %v13261_v46  }
0x1651   :  { %2779 = vbcast.lane.b32.xlu0 %v2776_v59, 312 }
0x1652   :  { %2738 = vperm.xlu1 %13137, %v13265_v54   ;;  %13138 = vset.pattern.permute.xlu0 %v13663_v24 }
0x1656   :  { %2771 = vbcast.lane.b32.xlu1 %v2768_v4, 312 }
0x1670   :  { %v14550_v42 = vpop.f32.mrb[10].mxu0 }
0x1671   :  { %v12535_v56 = vpop.f32.mrb[11].mxu0 }
0x1674   :  { %v14552_v44 = vpop.f32.mrb[12].mxu0 }
0x1675   :  { %v12540_v49 = vpop.f32.mrb[13].mxu0 }
0x167d   :  { %v2673_v55 = vpop.f32.mrb[14].mxu0 }
0x167e   :  { %v12550_v32 = vpop.f32.mrb[15].mxu0 }
0x167f   :  { %v2597_v36 = vpop.f32.mrb[12].mxu1 }
0x1680   :  { %v12545_v62 = vpop.f32.mrb[13].mxu1 }
0x16b8   :  { %v1870_v17 = vpop.permute.xlu1 %1869 }
0x16b9   :  { %v1872_v43 = vsub.f32 %v14325_v22, %v1870_v17  ;;  %v1865_v17 = vsub.f32 %v14325_v22, %v1864_v19 }
0x16bb   :  { %v1873_v12 = vmul.f32 1.442695, %v1872_v43  ;;  %v1866_v43 = vmul.f32 1.442695, %v1865_v17 }
0x16bc   :  { %v1876_v18 = vpop.permute.xlu1 %1875 }
0x16bd   :  { %13266 = vpow2.f32 %v1873_v12  ;;  %v1878_v30 = vsub.f32 %v14325_v22, %v1876_v18 }
0x16bf   :  { %v1879_v60 = vmul.f32 1.442695, %v1878_v30 }
0x16c1   :  { %13268 = vpow2.f32 %v1879_v60 }
0x16c2   :  { %13270 = vpow2.f32 %v1866_v43 }
0x16c7   :  { %v13267_v31 = vpop.eup %13266 }
0x16c8   :  { %1882 = vrot.lane.b32.xlu1 %v13267_v31, %s16720_s29  ;;  %v2733_v1 = vpop.permute.xlu0 %2732 }
0x16c9   :  { %v2746_v61 = vrot.slane %v2733_v1, %v13989_v28 }
0x16cb   :  { %v13269_v34 = vpop.eup %13268 }
0x16cc   :  { %1887 = vrot.lane.b32.xlu0 %v13269_v34, %s13669_s15  ;;  %v2742_v10 = vpop.permute.xlu0 %2741  ;;  %v13271_v18 = vpop.eup %13270 }
0x16cd   :  { %v2736_v2 = vpop.permute.xlu1 %2735  ;;  %v2758_v29 = vrot.slane %v2742_v10, %v13989_v28 }
0x16ce   :  { %v2750_v3 = vrot.slane %v2736_v2, %v13989_v28 }
0x16d0   :  { %v2759_v46 = vsel %vm436_vm7, %v2750_v3, %v2746_v61  ;;  %v2780_v54 = vpop.permute.xlu0 %2779 }
0x16d1   :  { %v2739_v51 = vpop.permute.xlu1 %2738  ;;  %v2763_v4 = vmul.f32 %v2759_v46, %v2597_v36 }
0x16d2   :  { %v2754_v0 = vrot.slane %v2739_v51, %v13989_v28 }
0x16d4   :  { %v2760_v25 = vsel %vm436_vm7, %v2758_v29, %v2754_v0 }
0x16d5   :  { %v2764_v39 = vmul.f32 %v2760_v25, %v2673_v55  ;;  %v2772_v59 = vpop.permute.xlu1 %2771 }
0x16d6   :  { %v2781_v49 = vmul.f32 %v2772_v59, %v2763_v4 }
0x16d7   :  { %v2782_v56 = vmul.f32 %v2780_v54, %v2764_v39 }
0x16d8   :  { %v2783_v62 = vsel %vm632_vm5, %v2781_v49, -inf }
0x16d9   :  { %v2786_v32 = vsel %vm632_vm5, %v2782_v56, -inf }
0x16eb   :  { %2787 = vmax.xlane.f32.xlu0 %v2786_v32 }
0x16ec   :  { %2784 = vmax.xlane.f32.xlu1 %v2783_v62 }
0x173a   :  { %v1883_v12 = vpop.permute.xlu1 %1882 }
0x173b   :  { %v1885_v30 = vadd.f32 %v13271_v18, %v1883_v12 }
0x173e   :  { %v1888_v60 = vpop.permute.xlu0 %1887 }
0x173f   :  { %v1890_v55 = vadd.f32 %v1888_v60, %v1885_v30 }
0x1741   :  { %13272 = vrcp.f32 %v1890_v55 }
0x174b   :  { %v13273_v2 = vpop.eup %13272 }
0x174c   :  { %1898 = vrot.lane.b32.xlu1 %v13273_v2, %s16722_s4  ;;  %1894 = vrot.lane.b32.xlu0 %v13273_v2, %s16721_s8  ;;  %v1892_v36 = vmul.f32 %v13273_v2, %v13271_v18 }
0x174e   :  { %v2816_v17 = vrot.slane %v1892_v36, %v13969_v41 }
0x1778   :  { %v2788_v1 = vpop.xlane.xlu0 %2787 }
0x1779   :  { %v2790_v29 = vsub.f32 %v2782_v56, %v2788_v1  ;;  %v2785_v3 = vpop.xlane.xlu1 %2784 }
0x177a   :  { %v2789_v61 = vsub.f32 %v2781_v49, %v2785_v3  ;;  %v2808_v49 = vrot.slane %v1892_v36, %v13936_v5 }
0x177b   :  { %v2793_v25 = vmul.f32 1.442695, %v2790_v29 }
0x177c   :  { %v2791_v46 = vmul.f32 1.442695, %v2789_v61 }
0x177d   :  { %13274 = vpow2.f32 %v2793_v25 }
0x177e   :  { %13276 = vpow2.f32 %v2791_v46 }
0x1787   :  { %v13275_v39 = vpop.eup %13274 }
0x1788   :  { %v2798_v59 = vsel %vm632_vm5, %v13275_v39, 0.0  ;;  %v13277_v54 = vpop.eup %13276 }
0x17be   :  { %v1895_v51 = vpop.permute.xlu0 %1894  ;;  %v1899_v4 = vpop.permute.xlu1 %1898 }
0x17bf   :  { %v1897_v10 = vmul.f32 %v13267_v31, %v1895_v51  ;;  %v2795_v31 = vsel %vm632_vm5, %v13277_v54, 0.0  ;;  %v1901_v32 = vmul.f32 %v13269_v34, %v1899_v4 }
0x17c1   :  { %v2826_v0 = vrot.slane %v1897_v10, %v13936_v5  ;;  %v2834_v19 = vrot.slane %v1897_v10, %v13969_v41  ;;  %v2854_v62 = vrot.slane %v1901_v32, %v13936_v5  ;;  %v2862_v56 = vrot.slane %v1901_v32, %v13969_v41 }
0x17c3   :  { %2837 = vbcast.lane.b32.xlu1 %v2834_v19, 322  ;;  %2829 = vbcast.lane.b32.xlu0 %v2826_v0, 322 }
0x17e2   :  { %2799 = vadd.xlane.f32.xlu0 %v2798_v59 }
0x17e7   :  { %2796 = vadd.xlane.f32.xlu1 %v2795_v31 }
0x17f8   :  { %2857 = vbcast.lane.b32.xlu1 %v2854_v62, 324  ;;  %2865 = vbcast.lane.b32.xlu0 %v2862_v56, 324 }
0x17fc   :  { %2811 = vbcast.lane.b32.xlu1 %v2808_v49, 320  ;;  %2819 = vbcast.lane.b32.xlu0 %v2816_v17, 320 }
0x1835   :  { %v2830_v43 = vpop.permute.xlu0 %2829  ;;  %v2838_v18 = vpop.permute.xlu1 %2837 }
0x186f   :  { %v2800_v12 = vpop.xlane.xlu0 %2799 }
0x1870   :  { %13278 = vrcp.f32 %v2800_v12 }
0x1873   :  { %v2866_v2 = vpop.permute.xlu0 %2865 }
0x1874   :  { %v2797_v30 = vpop.xlane.xlu1 %2796  ;;  %v2868_v10 = vmul.f32 %v2866_v2, %v14552_v44 }
0x1875   :  { %13280 = vrcp.f32 %v2797_v30 }
0x1877   :  { %v2820_v29 = vpop.permute.xlu0 %2819 }
0x1878   :  { %v2858_v36 = vpop.permute.xlu1 %2857  ;;  %v2822_v25 = vmul.f32 %v2820_v29, %v14552_v44  ;;  %v13610_v44 = vld [vmem:[%s16669_s10 + $0x30] sm:$0xff] }
0x1879   :  { %v2867_v19 = vmul.f32 %v2858_v36, %v14550_v42 }
0x187a   :  { %v13279_v60 = vpop.eup %13278 }
0x187b   :  { %v2804_v34 = vmul.f32 %v13279_v60, %v13275_v39 }
0x187c   :  { %v2812_v61 = vpop.permute.xlu1 %2811 }
0x187d   :  { %v2840_v55 = vmul.f32 %v2838_v18, %v2804_v34  ;;  %v2821_v31 = vmul.f32 %v2812_v61, %v14550_v42 }
0x187f   :  { %v13281_v1 = vpop.eup %13280  ;;  %2845 = vrot.lane.b32.xlu0 %v2840_v55, %s13656_s26 }
0x1880   :  { %v2803_v51 = vmul.f32 %v13281_v1, %v13277_v54 }
0x1882   :  { %v2839_v0 = vmul.f32 %v2830_v43, %v2803_v51 }
0x1883   :  { %2873 = vrot.lane.b32.xlu0 %v2868_v10, %s13656_s26 }
0x1884   :  { %2843 = vrot.lane.b32.xlu1 %v2839_v0, %s13656_s26 }
0x1888   :  { %2871 = vrot.lane.b32.xlu1 %v2867_v19, %s13656_s26 }
0x18f1   :  { %v2846_v3 = vpop.permute.xlu0 %2845 }
0x18f2   :  { %v2850_v46 = vadd.f32 %v2846_v3, %v2822_v25  ;;  %v13611_v3 = vld [vmem:[%s16670_s11] ss:$0 sm:$0xff] }
0x18f5   :  { %v2874_v39 = vpop.permute.xlu0 %2873 }
0x18f6   :  { %v14584_v59 = vadd.f32 %v2874_v39, %v2850_v46  ;;  %v2844_v54 = vpop.permute.xlu1 %2843 }
0x18f7   :  { %v2849_v4 = vadd.f32 %v2844_v54, %v2821_v31 }
0x18f8   :  { %2955 = vrot.lane.b32.xlu0 %v14584_v59, %s13666_s6 }
0x18fa   :  { %v2872_v32 = vpop.permute.xlu1 %2871 }
0x18fb   :  { %v14589_v62 = vadd.f32 %v2872_v32, %v2849_v4 }
0x18fd   :  { %2880 = vrot.lane.b32.xlu1 %v14589_v62, %s13666_s6 }
0x196a   :  { %v14593_v56 = vpop.permute.xlu0 %2955 }
0x196b   :  { %12559 = vmatmul.mubr.msk.f32.vlgmr.msra.gmra.mrb[16].mxu0 %vm116_vm1, %v14593_v56 }
0x196c   :  { %12996 = vmatpush3.bf16.msra.mxu0 %v13823_v9  ;;  %12582 = vmatprep.mubr.msk.f32.mxu0 %vm13657_vm0, %v13655_v21 }
0x196d   :  { %12997 = vmatprep.subr.bf16.mxu0 %v13654_v14 }
0x196f   :  { %v14601_v42 = vpop.permute.xlu1 %2880 }
0x1970   :  { %12554 = vmatmul.mubr.msk.f32.vlgmr.msra.gmra.mrb[14].mxu1 %vm116_vm1, %v14601_v42  ;;  %12999 = vmatpush3.bf16.msra.mxu0 %v13834_v15 }
0x1971   :  { %12993 = vmatpush3.bf16.msra.mxu1 %v14273_v40  ;;  %12565 = vmatprep.mubr.msk.f32.mxu1 %vm13657_vm0, %v13655_v21 }
0x1972   :  { %13000 = vmatprep.subr.bf16.mxu0 %v13654_v14  ;;  %13003 = vmatprep.subr.bf16.mxu1 %v13654_v14 }
0x1974   :  { %13002 = vmatpush3.bf16.msra.mxu0 %v13848_v20 }
0x1975   :  { %12580 = vmatprep.subr.mxu0 %v13655_v21 }
0x1978   :  { %12581 = vmatpush3.msra.mxu0 %v13610_v44 }
0x1979   :  { %12606 = vmatprep.subr.mxu0 %v13655_v21 }
0x1a3e   :  { %v3025_v49 = vpop.f32.mrb[16].mxu0 }
0x1a3f   :  { %v12560_v17 = vpop.f32.mrb[17].mxu0 }
0x1a43   :  { %v2950_v43 = vpop.f32.mrb[14].mxu1 }
0x1a44   :  { %v3029_v12 = vcombine.low %v2950_v43, %v3025_v49  ;;  %v12555_v18 = vpop.f32.mrb[15].mxu1 }
0x1a46   :  { %v3036_v30 = vrot.slane %v3029_v12, %v13837_v16 }
0x1a48   :  { %v3037_v60 = vcombine.high %v3036_v30, %v13655_v21 }
0x1a4a   :  { %3039 = vrot.lane.b32.xlu1 %v3037_v60, %s13656_s26  ;;  %v13612_v60 = vld [vmem:[%s16672_s13] ss:$0 sm:$0xff] }
0x1a4e   :  { %3124 = vrot.lane.b32.xlu1 %v14313_v58, %s13667_s1  ;;  %v12118_v58 = vld [vmem:[%s16711_s2 + $0x4] sm:$0x3] }
0x1abc   :  { %v3040_v34 = vpop.permute.xlu1 %3039 }
0x1abd   :  { %v3042_v55 = vsel %vm116_vm1, %v3036_v30, %v3040_v34 }
0x1abe   :  { %3121 = vrot.lane.b32.xlu0 %v3042_v55, %s13656_s26  ;;  %12566 = vmatmul.mubr.msk.f32.vlgmr.msra.gmra.mrb[16].mxu1 %vm1561_vm10, %v3042_v55 }
0x1abf   :  { %13005 = vmatpush3.bf16.msra.mxu1 %v13894_v50  ;;  %12593 = vmatprep.mubr.msk.f32.mxu1 %vm13657_vm0, %v13655_v21 }
0x1ac0   :  { %13006 = vmatprep.subr.bf16.mxu1 %v13654_v14  ;;  %v3125_v1 = vpop.permute.xlu1 %3124 }
0x1ac3   :  { %13008 = vmatpush3.bf16.msra.mxu1 %v13900_v52 }
0x1ac4   :  { %12596 = vmatprep.subr.mxu1 %v13655_v21 }
0x1b30   :  { %v3122_v2 = vpop.permute.xlu0 %3121 }
0x1b31   :  { %v3127_v51 = vsel %vm116_vm1, %v12118_v58, %v3122_v2 }
0x1b32   :  { %v3128_v10 = vsel %vm127_vm2, %v3127_v51, %v3125_v1 }
0x1b33   :  { %12583 = vmatmul.mubr.msk.f32.vlgmr.msra.gmra.mrb[18].mxu0 %vm135_vm3, %v3128_v10 }
0x1b34   :  { %12608 = vmatprep.mubr.msk.f32.mxu0 %vm13657_vm0, %v13655_v21 }
0x1b91   :  { %v3112_v0 = vpop.f32.mrb[16].mxu1 }
0x1b92   :  { %v3116_v36 = vadd.f32 %v3112_v0, %v14325_v22  ;;  %v12567_v19 = vpop.f32.mrb[17].mxu1 }
0x1b94   :  { %3118 = vst.msk [vmem:[#allocation2 + $0x2] sm:$0x3] %vm632_vm5, %v3116_v36 }
0x1c06   :  { %v3198_v29 = vpop.f32.mrb[18].mxu0 }
0x1c07   :  { %v3199_v25 = vadd.f32 %v13611_v3, %v3198_v29  ;;  %v12584_v61 = vpop.f32.mrb[19].mxu0 }
0x1c09   :  { %13282 = vtanh.f32 %v3199_v25  ;;  %v12120_v39 = vmul.f32 -1.442695, %v3199_v25 }
0x1c0b   :  { %13284 = vpow2.f32 %v12120_v39 }
0x1c13   :  { %v13283_v46 = vpop.eup %13282 }
0x1c14   :  { %3211 = vrot.lane.b32.xlu0 %v13283_v46, %s13658_s5 }
0x1c15   :  { %v13285_v54 = vpop.eup %13284 }
0x1c16   :  { %v3205_v31 = vadd.f32 1.0, %v13285_v54 }
0x1c18   :  { %13286 = vrcp.f32 %v3205_v31 }
0x1c22   :  { %v13287_v22 = vpop.eup %13286 }
0x1c23   :  { %v3209_v44 = vmul.f32 %v13287_v22, %v14307_v47 }
0x1c86   :  { %v3212_v4 = vpop.permute.xlu0 %3211 }
0x1c87   :  { %v3214_v32 = vmul.f32 %v13287_v22, %v3212_v4 }
0x1c89   :  { %3216 = vrot.lane.b32.xlu1 %v3214_v32, %s13658_s5 }
0x1cfb   :  { %v3217_v49 = vpop.permute.xlu1 %3216 }
0x1cfc   :  { %v14647_v17 = vadd.f32 %v3217_v49, %v3209_v44 }
0x1cfe   :  { %13288 = vtanh.f32 %v14647_v17 }
0x1d08   :  { %v13289_v43 = vpop.eup %13288 }
0x1d09   :  { %3222 = vrot.lane.b32.xlu0 %v13289_v43, %s13658_s5 }
0x1d0d   :  { %3576 = vrot.lane.b32.xlu0 %v14502_v8, %s13653_s9 }
0x1d7b   :  { %v3223_v12 = vpop.permute.xlu0 %3222 }
0x1d7c   :  { %v14653_v18 = vmul.f32 %v13287_v22, %v3223_v12 }
0x1d7e   :  { %3227 = vrot.lane.b32.xlu1 %v14653_v18, %s13659_s12 }
0x1d7f   :  { %v3577_v36 = vpop.permute.xlu0 %3576 }
0x1d82   :  { %3578 = vrot.lane.b32.xlu1 %v14500_v45, %s13653_s9 }
0x1df0   :  { %v3228_v47 = vpop.permute.xlu1 %3227 }
0x1df1   :  { %12594 = vmatmul.mubr.msk.f32.vlgmr.msra.gmra.mrb[18].mxu1 %vm16723_vm4, %v3228_v47 }
0x1df2   :  { %12598 = vmatprep.mubr.msk.f32.mxu1 %vm13657_vm0, %v13655_v21 }
0x1df4   :  { %v3579_v3 = vpop.permute.xlu1 %3578 }
0x1ec4   :  { %v3297_v30 = vpop.f32.mrb[18].mxu1 }
0x1ec5   :  { %v14665_v34 = vadd.f32 %v13612_v60, %v3297_v30  ;;  %v12595_v55 = vpop.f32.mrb[19].mxu1 }
0x1ec7   :  { %v3598_v58 = vmul.f32 %v14665_v34, %v14665_v34  ;;  %v3550_v2 = vrot.slane %v14665_v34, %v13931_v63  ;;  %v12122_v61 = vmul.f32 -1.442695, %v14665_v34  ;;  %v3324_v46 = vand.u32 2147483647, %v14665_v34 }
0x1ec9   :  { %3600 = vrot.lane.b32.xlu0 %v3598_v58, %s13661_s27  ;;  %v3558_v1 = vrot.slane %v3550_v2, %v13931_v63  ;;  %v3551_v51 = vcombine.high %v3550_v2, %v3550_v2  ;;  %13290 = vpow2.f32 %v12122_v61  ;;  %v3325_v39 = vsub.f32 0.0, %v3324_v46 }
0x1ecb   :  { %v14674_v10 = vrot.slane %v3558_v1, %v13936_v5  ;;  %v3565_v0 = vrot.slane %v3551_v51, %v13931_v63  ;;  %v3326_v54 = vmul.f32 1.442695, %v3325_v39 }
0x1ecd   :  { %v3582_v19 = vmul.f32 %v3577_v36, %v14674_v10  ;;  %v14679_v29 = vrot.slane %v3565_v0, %v13936_v5  ;;  %13292 = vpow2.f32 %v3326_v54 }
0x1ecf   :  { %3586 = vrot.lane.b32.xlu1 %v3582_v19, %s13661_s27  ;;  %v3583_v25 = vmul.f32 %v3579_v3, %v14679_v29  ;;  %v3323_v3 = vmax.f32 %v14665_v34, 0.0 }
0x1ed1   :  { %3588 = vrot.lane.b32.xlu0 %v3583_v25, %s13661_s27 }
0x1ed3   :  { %v13291_v31 = vpop.eup %13290 }
0x1ed4   :  { %v3320_v22 = vadd.f32 1.0, %v13291_v31 }
0x1ed6   :  { %13294 = vrcp.f32 %v3320_v22 }
0x1ed7   :  { %v13293_v44 = vpop.eup %13292 }
0x1ed8   :  { %v3328_v47 = vadd.f32 1.0, %v13293_v44  ;;  %v3331_v58 = vmul.f32 -0.5, %v13293_v44  ;;  %v3334_v51 = vand.u32 2147483647, %v13293_v44 }
0x1eda   :  { %13296 = vlog2.f32 %v3328_v47  ;;  %v3332_v1 = vadd.f32 1.0, %v3331_v58  ;;  %vm3335_vm12 = vcmp.lt.f32.partialorder %v3334_v51, 0.0004427343 }
0x1edc   :  { %v3333_v36 = vmul.f32 %v13293_v44, %v3332_v1 }
0x1ee0   :  { %v14689_v60 = vpop.eup %13294 }
0x1ee1   :  { %v3387_v55 = vrot.slane %v14689_v60, %v13936_v5  ;;  %v3395_v25 = vrot.slane %v14689_v60, %v13969_v41 }
0x1ee4   :  { %v13297_v2 = vpop.eup %13296 }
0x1ee5   :  { %v3330_v0 = vmul.f32 0.6931472, %v13297_v2 }
0x1ee7   :  { %v3336_v19 = vsel %vm3335_vm12, %v3333_v36, %v3330_v0 }
0x1ee8   :  { %v3337_v61 = vadd.f32 %v3336_v19, %v3323_v3 }
0x1eea   :  { %v14696_v46 = vadd.f32 1.0, %v3337_v61 }
0x1f3b   :  { %v3601_v4 = vpop.permute.xlu0 %3600 }
0x1f3c   :  { %v3603_v32 = vsel %vm632_vm5, %v3601_v4, 0.0 }
0x1f3d   :  { %3604 = vadd.xlane.f32.xlu1 %v3603_v32 }
0x1f41   :  { %v3587_v49 = vpop.permute.xlu1 %3586 }
0x1f42   :  { %v3592_v43 = vsel %vm116_vm1, %v3587_v49, 0.0 }
0x1f43   :  { %3593 = vadd.xlane.f32.xlu0 %v3592_v43  ;;  %v3589_v12 = vpop.permute.xlu0 %3588 }
0x1f44   :  { %v3595_v30 = vsel %vm116_vm1, %v3589_v12, 0.0 }
0x1f47   :  { %3596 = vadd.xlane.f32.xlu0 %v3595_v30 }
0x1f4e   :  { %3390 = vbcast.lane.b32.xlu1 %v3387_v55, 304 }
0x1f5d   :  { %3398 = vbcast.lane.b32.xlu0 %v3395_v25, 304 }
0x1f61   :  { %3627 = vperm.xlu0 %13138, %v14696_v46  }
0x1f65   :  { %13140 = vset.pattern.permute.xlu0 %v13664_v6 }
0x1fca   :  { %v3605_v39 = vpop.xlane.xlu1 %3604 }
0x1fcb   :  { %v3610_v54 = vrot.slane %v3605_v39, %v13936_v5  ;;  %v3614_v31 = vrot.slane %v3605_v39, %v13969_v41  ;;  %v3413_v39 = vmul.f32 %v14417_v37, %v14377_v11 }
0x1fcd   :  { %v3617_v22 = vmul.f32 %v3610_v54, %v14532_v13  ;;  %v3618_v4 = vmul.f32 %v3614_v31, %v14538_v7 }
0x1fce   :  { %v3391_v43 = vpop.permute.xlu1 %3390 }
0x1fcf   :  { %v3619_v32 = vadd.f32 1e-06, %v3617_v22  ;;  %v3620_v44 = vadd.f32 1e-06, %v3618_v4  ;;  %v3400_v47 = vmul.f32 %v3391_v43, %v14589_v62  ;;  %v3412_v62 = vadd.f32 %v14417_v37, %v14377_v11 }
0x1fd0   :  { %v3594_v49 = vpop.xlane.xlu0 %3593 }
0x1fd1   :  { %13298 = vrsqrt.f32 %v3619_v32  ;;  %v3402_v2 = vsub.f32 1.0, %v3400_v47  ;;  %v3414_v32 = vsub.f32 %v3412_v62, %v3413_v39 }
0x1fd2   :  { %13300 = vrsqrt.f32 %v3620_v44 }
0x1fd3   :  { %v3406_v7 = vrot.slane %v3402_v2, 1 }
0x1fd4   :  { %v3597_v12 = vpop.xlane.xlu0 %3596 }
0x1fd5   :  { %v3410_v25 = vmul.f32 %v3406_v7, %v3402_v2 }
0x1fd8   :  { %v3399_v30 = vpop.permute.xlu0 %3398 }
0x1fd9   :  { %v3401_v55 = vmul.f32 %v3399_v30, %v14584_v59 }
0x1fdb   :  { %v13299_v58 = vpop.eup %13298  ;;  %v3403_v1 = vsub.f32 1.0, %v3401_v55 }
0x1fdc   :  { %v3623_v51 = vmul.f32 %v13299_v58, %v3594_v49  ;;  %v13301_v0 = vpop.eup %13300 }
0x1fdd   :  { %v3407_v13 = vrot.slane %v3403_v1, 1  ;;  %v3624_v19 = vmul.f32 %v13301_v0, %v3597_v12 }
0x1fde   :  { %3633 = vperm.xlu1 %13137, %v3623_v51  }
0x1fdf   :  { %v3411_v36 = vmul.f32 %v3407_v13, %v3403_v1 }
0x1fe0   :  { %v3628_v4 = vpop.permute.xlu0 %3627 }
0x1fe1   :  { %v3417_v3 = vrot.slane %v3411_v36, 7 }
0x1fe2   :  { %3636 = vperm.xlu1 %13137, %v3624_v19  }
0x1fe3   :  { %v3418_v61 = vsel %vm436_vm7, %v3417_v3, %v3410_v25 }
0x1fe6   :  { %3419 = vrot.lane.b32.xlu1 %v3418_v61, %s13666_s6 }
0x1fe7   :  { %13139 = vset.pattern.permute.xlu1 %v13664_v6 }
0x205d   :  { %v3634_v59 = vpop.permute.xlu1 %3633 }
0x205e   :  { %v3641_v31 = vrot.slane %v3634_v59, %v13989_v28 }
0x2061   :  { %v3637_v54 = vpop.permute.xlu1 %3636 }
0x2062   :  { %v3645_v22 = vrot.slane %v3637_v54, %v13989_v28 }
0x2064   :  { %v3646_v44 = vsel %vm436_vm7, %v3645_v22, %v3641_v31 }
0x2065   :  { %v3420_v49 = vpop.permute.xlu1 %3419  ;;  %v3648_v43 = vmul.f32 %v3646_v44, %v3628_v4 }
0x2066   :  { %v14716_v12 = vmul.f32 %v3420_v49, %v3414_v32 }
0x2067   :  { %v3649_v47 = vsel %vm632_vm5, %v3648_v43, -inf }
0x2068   :  { %3650 = vmax.xlane.f32.xlu1 %v3649_v47  ;;  %v3426_v30 = vrot.slane %v14716_v12, %v13936_v5  ;;  %v3433_v11 = vrot.slane %v14716_v12, %v13969_v41  ;;  %v3482_v55 = vmax.f32 %v14716_v12, 1e-30  ;;  %v3444_v2 = vrot.slane %v14716_v12, %v13931_v63 }
0x206a   :  { %3428 = vbcast.lane.b32.xlu0 %v3426_v30, 256  ;;  %13302 = vlog2.f32 %v3482_v55  ;;  %v3452_v51 = vrot.slane %v3444_v2, %v13931_v63  ;;  %v3445_v0 = vcombine.high %v3444_v2, %v3444_v2  ;;  %v3666_v2 = vsub.f32 1.0, %v14689_v60 }
0x206c   :  { %v3463_v7 = vrot.slane %v3452_v51, %v13936_v5  ;;  %v3459_v36 = vrot.slane %v3445_v0, %v13931_v63 }
0x206e   :  { %3435 = vbcast.lane.b32.xlu0 %v3433_v11, 256  ;;  %v3467_v61 = vrot.slane %v3459_v36, %v13936_v5 }
0x2074   :  { %v13303_v58 = vpop.eup %13302 }
0x2075   :  { %v3484_v1 = vmul.f32 0.6931472, %v13303_v58 }
0x2077   :  { %v3492_v13 = vrot.slane %v3484_v1, %v13931_v63 }
0x2079   :  { %v3500_v19 = vrot.slane %v3492_v13, %v13931_v63  ;;  %v3493_v3 = vcombine.high %v3492_v13, %v3492_v13 }
0x207b   :  { %v3511_v59 = vrot.slane %v3500_v19, %v13936_v5  ;;  %v3507_v62 = vrot.slane %v3493_v3, %v13931_v63 }
0x207d   :  { %v3515_v4 = vrot.slane %v3507_v62, %v13936_v5 }
0x20dc   :  { %v3429_v25 = vpop.permute.xlu0 %3428 }
0x20dd   :  { %vm3470_vm13 = vcmp.lt.f32.partialorder %v3463_v7, %v3429_v25  ;;  %vm3472_vm14 = vcmp.eq.f32.partialorder %v3463_v7, %v3429_v25 }
0x20de   :  { %vm3474_vm15 = vmand %vm3472_vm14, %vm14032_vm8 }
0x20df   :  { %vm3476_vm6 = vmor %vm3470_vm13, %vm3474_vm15  ;;  %vm16724_vm13 = vcmask 261120  }
0x20e0   :  { %v3436_v39 = vpop.permute.xlu0 %3435  ;;  %v12123_v54 = vsel %vm3476_vm6, 1.0, %v13655_v21 }
0x20e1   :  { %vm3471_vm9 = vcmp.lt.f32.partialorder %v3467_v61, %v3436_v39  ;;  %vm3473_vm11 = vcmp.eq.f32.partialorder %v3467_v61, %v3436_v39  ;;  %v3518_v31 = vmul.f32 %v12123_v54, %v3511_v59  ;;  %v3530_v59 = vsub.f32 1.0, %v14716_v12 }
0x20e2   :  { %vm3475_vm4 = vmand %vm3473_vm11, %vm14032_vm8 }
0x20e3   :  { %vm3477_vm12 = vmor %vm3471_vm9, %vm3475_vm4  ;;  %v3520_v22 = vsel %vm116_vm1, %v3518_v31, 0.0 }
0x20e4   :  { %3521 = vadd.xlane.f32.xlu0 %v3520_v22  ;;  %v12124_v32 = vsel %vm3477_vm12, 1.0, %v13655_v21 }
0x20e5   :  { %v3519_v44 = vmul.f32 %v12124_v32, %v3515_v4 }
0x20e7   :  { %v3523_v49 = vsel %vm116_vm1, %v3519_v44, 0.0 }
0x20e8   :  { %3524 = vadd.xlane.f32.xlu1 %v3523_v49 }
0x20f5   :  { %v3651_v47 = vpop.xlane.xlu1 %3650 }
0x20f6   :  { %v3652_v30 = vsub.f32 %v3648_v43, %v3651_v47  ;;  %v2369_v43 = vsel %vm632_vm5, %v14417_v37, 0.0 }
0x20f8   :  { %v3653_v11 = vmul.f32 1.442695, %v3652_v30 }
0x20f9   :  { %3662 = vperm.xlu1 %13139, %v14689_v60  }
0x20fa   :  { %13304 = vpow2.f32 %v3653_v11 }
0x20fd   :  { %13141 = vset.pattern.permute.xlu1 %v13665_v53 }
0x20fe   :  { %3675 = vperm.xlu1 %13141, %v14689_v60  }
0x2102   :  { %13142 = vset.pattern.permute.xlu1 %v13662_v33 }
0x2104   :  { %v13305_v55 = vpop.eup %13304 }
0x2105   :  { %v3655_v58 = vsel %vm632_vm5, %v13305_v55, 0.0 }
0x2106   :  { %3656 = vadd.xlane.f32.xlu0 %v3655_v58 }
0x211c   :  { %3669 = vperm.xlu0 %13140, %v3666_v2  }
0x2120   :  { %13143 = vset.pattern.permute.xlu0 %v13662_v33 }
0x2122   :  { %2370 = vadd.xlane.f32.xlu1 %v2369_v43 }
0x2171   :  { %v3522_v51 = vpop.xlane.xlu0 %3521 }
0x2172   :  { %v3526_v13 = vmul.f32 1.442695, %v3522_v51 }
0x2175   :  { %v3525_v1 = vpop.xlane.xlu1 %3524 }
0x2176   :  { %v3528_v0 = vmul.f32 1.442695, %v3525_v1 }
0x2178   :  { %13306 = vpow2.f32 %v3528_v0  ;;  %v3699_v0 = vrot.slane %v14689_v60, %v13931_v63 }
0x2179   :  { %13308 = vpow2.f32 %v3526_v13  ;;  %v3663_v54 = vpop.permute.xlu1 %3662 }
0x217d   :  { %v3676_v49 = vpop.permute.xlu1 %3675 }
0x2182   :  { %v13307_v7 = vpop.eup %13306 }
0x2183   :  { %v13309_v19 = vpop.eup %13308  ;;  %v3540_v3 = vrot.slane %v13307_v7, %v13989_v28  ;;  %v3700_v7 = vcombine.high %v3699_v0, %v3699_v0 }
0x2184   :  { %v3536_v25 = vrot.slane %v13309_v19, %v13989_v28 }
0x2186   :  { %v3541_v61 = vsel %vm436_vm7, %v3540_v3, %v3536_v25  ;;  %v3714_v3 = vrot.slane %v3700_v7, %v13931_v63 }
0x2187   :  { %v3543_v62 = vmul.f32 %v3541_v61, %v3530_v59 }
0x2189   :  { %v3665_v4 = vmul.f32 %v3663_v54, %v3543_v62 }
0x2193   :  { %v3657_v36 = vpop.xlane.xlu0 %3656 }
0x2194   :  { %13310 = vrcp.f32 %v3657_v36 }
0x219b   :  { %v3670_v22 = vpop.permute.xlu0 %3669 }
0x219e   :  { %v13311_v39 = vpop.eup %13310 }
0x219f   :  { %v3659_v31 = vmul.f32 %v13311_v39, %v13305_v55 }
0x21a1   :  { %v3672_v32 = vmul.f32 %v3670_v22, %v3659_v31  ;;  %v3722_v22 = vrot.slane %v3714_v3, %v13936_v5 }
0x21a3   :  { %v3673_v44 = vadd.f32 %v3672_v32, %v3665_v4 }
0x21a5   :  { %v14756_v47 = vmul.f32 %v3676_v49, %v3673_v44 }
0x21a7   :  { %v3682_v30 = vrot.slane %v14756_v47, %v13936_v5  ;;  %v3689_v11 = vrot.slane %v14756_v47, %v13969_v41  ;;  %v3760_v13 = vrot.slane %v14756_v47, %v13931_v63 }
0x21a9   :  { %3684 = vbcast.lane.b32.xlu0 %v3682_v30, 256  ;;  %v3761_v36 = vcombine.high %v3760_v13, %v3760_v13  ;;  %v3768_v19 = vrot.slane %v3760_v13, %v13931_v63 }
0x21ab   :  { %v3775_v62 = vrot.slane %v3761_v36, %v13931_v63  ;;  %v3779_v39 = vrot.slane %v3768_v19, %v13936_v5 }
0x21ad   :  { %3691 = vbcast.lane.b32.xlu0 %v3689_v11, 256  ;;  %v3783_v30 = vrot.slane %v3775_v62, %v13936_v5 }
0x21af   :  { %v2371_v58 = vpop.xlane.xlu1 %2370 }
0x21b0   :  { %v2372_v2 = vsub.f32 1.0, %v2371_v58 }
0x21b1   :  { %3302 = vrot.lane.b32.xlu0 %v14665_v34, %s13666_s6 }
0x21b2   :  { %v2373_v55 = vmul.f32 %v2372_v2, %v14429_v57 }
0x21b4   :  { %v14766_v43 = vadd.f32 %v2373_v55, %v14417_v37  ;;  %v3707_v37 = vrot.slane %v3699_v0, %v13931_v63 }
0x21b6   :  { %v3834_v1 = vrot.slane %v14766_v43, %v13936_v5  ;;  %v3841_v51 = vrot.slane %v14766_v43, %v13969_v41  ;;  %v3797_v57 = vrot.slane %v14766_v43, %v13931_v63  ;;  %v3718_v59 = vrot.slane %v3707_v37, %v13936_v5 }
0x21b8   :  { %3836 = vbcast.lane.b32.xlu1 %v3834_v1, 256  ;;  %3843 = vbcast.lane.b32.xlu0 %v3841_v51, 256  ;;  %v3805_v25 = vrot.slane %v3797_v57, %v13931_v63  ;;  %v3798_v61 = vcombine.high %v3797_v57, %v3797_v57 }
0x21ba   :  { %v3816_v4 = vrot.slane %v3805_v25, %v13936_v5  ;;  %v3812_v44 = vrot.slane %v3798_v61, %v13931_v63 }
0x21bc   :  { %v3820_v51 = vrot.slane %v3812_v44, %v13936_v5 }
0x221b   :  { %v3685_v60 = vpop.permute.xlu0 %3684 }
0x221c   :  { %v3751_v54 = vsub.f32 1.0, %v3685_v60  ;;  %v3725_v31 = vmul.f32 %v3718_v59, %v3685_v60  ;;  %v3823_v58 = vmul.f32 %v3816_v4, %v3685_v60  ;;  %v3739_v3 = vmul.f32 %v3685_v60, %v14674_v10 }
0x221e   :  { %v3786_v32 = vsub.f32 %v3751_v54, %v3779_v39  ;;  %v3727_v49 = vsub.f32 1.0, %v3725_v31 }
0x221f   :  { %v3692_v11 = vpop.permute.xlu0 %3691 }
0x2220   :  { %v3752_v2 = vsub.f32 1.0, %v3692_v11  ;;  %3731 = vrot.lane.b32.xlu0 %v3727_v49, %s13667_s1  ;;  %v3726_v55 = vmul.f32 %v3722_v22, %v3692_v11  ;;  %v3788_v1 = vmul.f32 %v3786_v32, %v14456_v48  ;;  %v3824_v57 = vmul.f32 %v3820_v51, %v3692_v11 }
0x2221   :  { %v3829_v62 = vmul.f32 %v3786_v32, %v14475_v27  ;;  %v3740_v10 = vmul.f32 %v3692_v11, %v14679_v29 }
0x2222   :  { %v3787_v0 = vsub.f32 %v3752_v2, %v3783_v30  ;;  %v3728_v13 = vsub.f32 1.0, %v3726_v55  ;;  %v3825_v7 = vadd.f32 %v3823_v58, %v3788_v1 }
0x2223   :  { %v3303_v19 = vpop.permute.xlu0 %3302 }
0x2224   :  { %3733 = vrot.lane.b32.xlu1 %v3728_v13, %s13667_s1  ;;  %v14794_v37 = vmul.f32 %v14098_v38, %v3825_v7  ;;  %v3789_v36 = vmul.f32 %v3787_v0, %v14465_v23  ;;  %v3830_v54 = vmul.f32 %v3787_v0, %v14481_v35 }
0x2226   :  { %3859 = vrot.lane.b32.xlu0 %v14794_v37, %s13656_s26  ;;  %v3826_v48 = vadd.f32 %v3824_v57, %v3789_v36 }
0x2228   :  { %3743 = vrot.lane.b32.xlu1 %v3739_v3, %s13668_s30  ;;  %v14802_v25 = vmul.f32 %v14098_v38, %v3826_v48 }
0x222a   :  { %v3837_v61 = vpop.permute.xlu1 %3836  ;;  %3861 = vrot.lane.b32.xlu0 %v14802_v25, %s13656_s26  ;;  %v3844_v59 = vpop.permute.xlu0 %3843 }
0x222b   :  { %v3845_v23 = vmul.f32 %v3837_v61, %v3779_v39  ;;  %v3846_v31 = vmul.f32 %v3844_v59, %v3783_v30 }
0x222d   :  { %v3847_v22 = vadd.f32 %v3845_v23, %v3829_v62  ;;  %v3848_v4 = vadd.f32 %v3846_v31, %v3830_v54 }
0x222e   :  { %3304 = vrot.lane.b32.xlu0 %v3303_v19, %s13666_s6 }
0x222f   :  { %v14812_v49 = vmul.f32 %v14098_v38, %v3847_v22  ;;  %v14818_v32 = vmul.f32 %v14098_v38, %v3848_v4 }
0x2232   :  { %3745 = vrot.lane.b32.xlu0 %v3740_v10, %s13668_s30 }
0x2292   :  { %v3732_v60 = vpop.permute.xlu0 %3731 }
0x2293   :  { %v3737_v27 = vmul.f32 %v3732_v60, %v14502_v8 }
0x2296   :  { %v3734_v44 = vpop.permute.xlu1 %3733 }
0x2297   :  { %v3738_v2 = vmul.f32 %v3734_v44, %v14500_v45 }
0x2298   :  { %v3860_v58 = vpop.permute.xlu0 %3859 }
0x2299   :  { %v3865_v35 = vsel %vm116_vm1, %v14812_v49, %v3860_v58 }
0x229a   :  { %v3744_v39 = vpop.permute.xlu1 %3743  ;;  %12597 = vmatpush3.msra.mxu1 %v3865_v35 }
0x229b   :  { %v14820_v30 = vadd.f32 %v3744_v39, %v3737_v27  ;;  %12599 = vmatmul.mubr.msk.f32.vlgmr.msra.gmra.mrb[20].mxu1 %vm116_vm1, %v14601_v42  ;;  %12601 = vmatprep.subr.mxu1 %v13655_v21 }
0x229c   :  { %v3862_v29 = vpop.permute.xlu0 %3861  ;;  %12603 = vmatprep.mubr.msk.f32.mxu1 %vm13657_vm0, %v13655_v21 }
0x229d   :  { %v3866_v8 = vsel %vm116_vm1, %v14818_v32, %v3862_v29  ;;  %12607 = vmatpush3.xpose.msk.msra.mxu0 %vm116_vm1, %v14820_v30  ;;  %v4159_v36 = vmul.f32 %v14820_v30, %v14820_v30 }
0x229e   :  { %12602 = vmatpush3.msra.mxu1 %v3866_v8  ;;  %12616 = vmatprep.subr.mxu0 %v13655_v21 }
0x229f   :  { %12604 = vmatmul.mubr.msk.f32.vlgmr.msra.gmra.mrb[22].mxu1 %vm116_vm1, %v14593_v56  ;;  %12611 = vmatprep.subr.mxu1 %v13655_v21  ;;  %v4161_v3 = vsel %vm116_vm1, %v4159_v36, 0.0 }
0x22a0   :  { %v3305_v42 = vpop.permute.xlu0 %3304  ;;  %12613 = vmatprep.mubr.msk.f32.mxu1 %vm13657_vm0, %v13655_v21 }
0x22a1   :  { %v3308_v11 = vcombine.low %v3303_v19, %v3305_v42 }
0x22a3   :  { %v3315_v55 = vrot.slane %v3308_v11, %v13837_v16 }
0x22a4   :  { %v3746_v1 = vpop.permute.xlu0 %3745 }
0x22a5   :  { %v14839_v51 = vadd.f32 %v3746_v1, %v3738_v2  ;;  %12609 = vmatmul.mubr.msk.f32.vlgmr.msra.gmra.mrb[20].mxu0 %vm116_vm1, %v3315_v55  ;;  %v4167_v0 = vmul.f32 %v3315_v55, %v3315_v55  ;;  %v3316_v13 = vcombine.high %v3315_v55, %v13655_v21 }
0x22a6   :  { %12617 = vmatpush3.msra.mxu0 %v14820_v30  ;;  %12618 = vmatprep.mubr.msk.f32.mxu0 %vm13657_vm0, %v13655_v21 }
0x22a7   :  { %12612 = vmatpush3.xpose.msk.msra.mxu1 %vm116_vm1, %v14839_v51  ;;  %v4169_v45 = vsel %vm632_vm5, %v4167_v0, 0.0  ;;  %v4168_v56 = vmul.f32 %v3316_v13, %v3316_v13  ;;  %v4160_v7 = vmul.f32 %v14839_v51, %v14839_v51  ;;  %13009 = vmatprep.subr.bf16.mxu0 %v13654_v14  ;;  %v4250_v0 = vrot.slane %v14696_v46, %v13936_v5 }
0x22a8   :  { %4170 = vadd.xlane.f32.xlu1 %v4169_v45  ;;  %12621 = vmatprep.subr.mxu1 %v13655_v21  ;;  %v4258_v45 = vrot.slane %v14696_v46, %v13969_v41 }
0x22a9   :  { %v4172_v57 = vsel %vm632_vm5, %v4168_v56, 0.0  ;;  %v4164_v19 = vsel %vm116_vm1, %v4160_v7, 0.0 }
0x22aa   :  { %4173 = vadd.xlane.f32.xlu0 %v4172_v57  ;;  %12614 = vmatmul.mubr.msk.f32.vlgmr.msra.gmra.mrb[24].mxu1 %vm116_vm1, %v3316_v13 }
0x22ab   :  { %12622 = vmatpush3.msra.mxu1 %v14839_v51  ;;  %12623 = vmatprep.mubr.msk.f32.mxu1 %vm13657_vm0, %v13655_v21 }
0x22ac   :  { %4165 = vadd.xlane.f32.xlu1 %v4164_v19  ;;  %13012 = vmatprep.subr.bf16.mxu1 %v13654_v14 }
0x22ae   :  { %4162 = vadd.xlane.f32.xlu0 %v4161_v3 }
0x22bd   :  { %3343 = vrot.lane.b32.xlu1 %v14665_v34, %s13669_s15 }
0x22c4   :  { %3339 = vrot.lane.b32.xlu0 %v14665_v34, %s16720_s29 }
0x2335   :  { %v4171_v48 = vpop.xlane.xlu1 %4170 }
0x2336   :  { %v4180_v23 = vrot.slane %v4171_v48, %v13936_v5  ;;  %v4184_v54 = vrot.slane %v4171_v48, %v13969_v41 }
0x2337   :  { %v4174_v61 = vpop.xlane.xlu0 %4173 }
0x2338   :  { %v4188_v59 = vrot.slane %v4174_v61, %v13936_v5  ;;  %v4192_v22 = vrot.slane %v4174_v61, %v13969_v41 }
0x2339   :  { %v14868_v62 = vpop.xlane.xlu1 %4165 }
0x233a   :  { %v4199_v4 = vmul.f32 %v4188_v59, %v14868_v62  ;;  %v4200_v35 = vmul.f32 %v4192_v22, %v14868_v62 }
0x233b   :  { %v14872_v31 = vpop.xlane.xlu0 %4162 }
0x233c   :  { %v4197_v10 = vmul.f32 %v4180_v23, %v14872_v31  ;;  %v4198_v60 = vmul.f32 %v4184_v54, %v14872_v31  ;;  %v4203_v39 = vadd.f32 1e-06, %v4199_v4  ;;  %v4204_v11 = vadd.f32 1e-06, %v4200_v35 }
0x233d   :  { %v3344_v8 = vpop.permute.xlu1 %3343 }
0x233e   :  { %v4201_v44 = vadd.f32 1e-06, %v4197_v10  ;;  %v4202_v58 = vadd.f32 1e-06, %v4198_v60 }
0x233f   :  { %v3340_v27 = vpop.permute.xlu0 %3339 }
0x2340   :  { %13312 = vrsqrt.f32 %v4201_v44  ;;  %v3342_v29 = vmax.f32 %v14665_v34, %v3340_v27 }
0x2341   :  { %13314 = vrsqrt.f32 %v4202_v58 }
0x2342   :  { %v3346_v42 = vmax.f32 %v3342_v29, %v3344_v8  ;;  %13316 = vrsqrt.f32 %v4203_v39 }
0x2343   :  { %13318 = vrsqrt.f32 %v4204_v11 }
0x2344   :  { %3357 = vrot.lane.b32.xlu0 %v3346_v42, %s16722_s4  ;;  %3351 = vrot.lane.b32.xlu1 %v3346_v42, %s16721_s8 }
0x234a   :  { %v13313_v2 = vpop.eup %13312 }
0x234b   :  { %v13315_v55 = vpop.eup %13314  ;;  %4214 = vperm.xlu1 %13142, %v13313_v2  }
0x234c   :  { %4217 = vperm.xlu0 %13143, %v13315_v55   ;;  %v13317_v1 = vpop.eup %13316 }
0x234d   :  { %v13319_v13 = vpop.eup %13318 }
0x234f   :  { %4220 = vperm.xlu1 %13142, %v13317_v1  }
0x2350   :  { %4253 = vbcast.lane.b32.xlu0 %v4250_v0, 312 }
0x2353   :  { %4223 = vperm.xlu1 %13142, %v13319_v13  }
0x2357   :  { %4261 = vbcast.lane.b32.xlu1 %v4258_v45, 312 }
0x236e   :  { %v14886_v56 = vpop.f32.mrb[20].mxu1 }
0x236f   :  { %v12600_v7 = vpop.f32.mrb[21].mxu1 }
0x2372   :  { %v14888_v57 = vpop.f32.mrb[22].mxu1 }
0x2373   :  { %v12605_v36 = vpop.f32.mrb[23].mxu1 }
0x2378   :  { %v4079_v19 = vpop.f32.mrb[20].mxu0 }
0x2379   :  { %v12610_v3 = vpop.f32.mrb[21].mxu0 }
0x237d   :  { %v4155_v48 = vpop.f32.mrb[24].mxu1 }
0x237e   :  { %v12615_v61 = vpop.f32.mrb[25].mxu1 }
0x23b6   :  { %v3358_v59 = vpop.permute.xlu0 %3357  ;;  %v3352_v23 = vpop.permute.xlu1 %3351 }
0x23b7   :  { %v3360_v54 = vsub.f32 %v14665_v34, %v3358_v59  ;;  %v3354_v22 = vsub.f32 %v14665_v34, %v3352_v23  ;;  %v3347_v59 = vsub.f32 %v14665_v34, %v3346_v42 }
0x23b9   :  { %v3361_v4 = vmul.f32 1.442695, %v3360_v54  ;;  %v3355_v10 = vmul.f32 1.442695, %v3354_v22  ;;  %v3348_v23 = vmul.f32 1.442695, %v3347_v59 }
0x23bb   :  { %13320 = vpow2.f32 %v3361_v4 }
0x23bc   :  { %13322 = vpow2.f32 %v3355_v10 }
0x23bd   :  { %13324 = vpow2.f32 %v3348_v23 }
0x23c5   :  { %v13321_v46 = vpop.eup %13320 }
0x23c6   :  { %v13323_v60 = vpop.eup %13322  ;;  %3369 = vrot.lane.b32.xlu1 %v13321_v46, %s13669_s15 }
0x23c7   :  { %3364 = vrot.lane.b32.xlu0 %v13323_v60, %s16720_s29  ;;  %v13325_v54 = vpop.eup %13324 }
0x23ca   :  { %v4215_v44 = vpop.permute.xlu1 %4214 }
0x23cb   :  { %v4218_v27 = vpop.permute.xlu0 %4217  ;;  %v4228_v39 = vrot.slane %v4215_v44, %v13989_v28 }
0x23cc   :  { %v4232_v35 = vrot.slane %v4218_v27, %v13989_v28 }
0x23ce   :  { %v4221_v58 = vpop.permute.xlu1 %4220  ;;  %v4241_v8 = vsel %vm436_vm7, %v4232_v35, %v4228_v39 }
0x23cf   :  { %v4236_v2 = vrot.slane %v4221_v58, %v13989_v28  ;;  %v4245_v55 = vmul.f32 %v4241_v8, %v4079_v19  ;;  %v4254_v1 = vpop.permute.xlu0 %4253 }
0x23d1   :  { %v4263_v13 = vmul.f32 %v4254_v1, %v4245_v55 }
0x23d2   :  { %v4224_v29 = vpop.permute.xlu1 %4223 }
0x23d3   :  { %v4240_v11 = vrot.slane %v4224_v29, %v13989_v28  ;;  %v4265_v3 = vsel %vm632_vm5, %v4263_v13, -inf }
0x23d5   :  { %v4242_v0 = vsel %vm436_vm7, %v4240_v11, %v4236_v2 }
0x23d6   :  { %v4246_v45 = vmul.f32 %v4242_v0, %v4155_v48  ;;  %v4262_v7 = vpop.permute.xlu1 %4261 }
0x23d8   :  { %v4264_v36 = vmul.f32 %v4262_v7, %v4246_v45 }
0x23da   :  { %v4268_v61 = vsel %vm632_vm5, %v4264_v36, -inf }
0x23e6   :  { %4266 = vmax.xlane.f32.xlu0 %v4265_v3 }
0x23ea   :  { %4269 = vmax.xlane.f32.xlu1 %v4268_v61 }
0x2438   :  { %v3370_v4 = vpop.permute.xlu1 %3369 }
0x2439   :  { %v3365_v22 = vpop.permute.xlu0 %3364 }
0x243a   :  { %v3367_v19 = vadd.f32 %v13325_v54, %v3365_v22 }
0x243c   :  { %v3372_v10 = vadd.f32 %v3370_v4, %v3367_v19 }
0x243e   :  { %13326 = vrcp.f32 %v3372_v10 }
0x2448   :  { %v13327_v44 = vpop.eup %13326 }
0x2449   :  { %3380 = vrot.lane.b32.xlu1 %v13327_v44, %s16722_s4  ;;  %3376 = vrot.lane.b32.xlu0 %v13327_v44, %s16721_s8  ;;  %v3374_v48 = vmul.f32 %v13327_v44, %v13325_v54 }
0x244b   :  { %v4290_v59 = vrot.slane %v3374_v48, %v13936_v5 }
0x2473   :  { %v4267_v58 = vpop.xlane.xlu0 %4266 }
0x2474   :  { %v4271_v29 = vsub.f32 %v4263_v13, %v4267_v58 }
0x2476   :  { %v4273_v11 = vmul.f32 1.442695, %v4271_v29 }
0x2477   :  { %v4270_v8 = vpop.xlane.xlu1 %4269 }
0x2478   :  { %v4272_v2 = vsub.f32 %v4264_v36, %v4270_v8  ;;  %13328 = vpow2.f32 %v4273_v11  ;;  %v4298_v36 = vrot.slane %v3374_v48, %v13969_v41 }
0x247a   :  { %v4275_v55 = vmul.f32 1.442695, %v4272_v2 }
0x247c   :  { %13330 = vpow2.f32 %v4275_v55 }
0x2482   :  { %v13329_v1 = vpop.eup %13328 }
0x2483   :  { %v4277_v0 = vsel %vm632_vm5, %v13329_v1, 0.0 }
0x2486   :  { %v13331_v45 = vpop.eup %13330 }
0x24bb   :  { %v3377_v27 = vpop.permute.xlu0 %3376  ;;  %v3381_v7 = vpop.permute.xlu1 %3380 }
0x24bc   :  { %v3379_v35 = vmul.f32 %v13323_v60, %v3377_v27  ;;  %v4280_v60 = vsel %vm632_vm5, %v13331_v45, 0.0  ;;  %v3383_v3 = vmul.f32 %v13321_v46, %v3381_v7 }
0x24be   :  { %v4308_v39 = vrot.slane %v3379_v35, %v13936_v5  ;;  %v4316_v42 = vrot.slane %v3379_v35, %v13969_v41  ;;  %v4336_v61 = vrot.slane %v3383_v3, %v13936_v5  ;;  %v4344_v13 = vrot.slane %v3383_v3, %v13969_v41 }
0x24c0   :  { %4319 = vbcast.lane.b32.xlu1 %v4316_v42, 322  ;;  %4311 = vbcast.lane.b32.xlu0 %v4308_v39, 322 }
0x24df   :  { %4278 = vadd.xlane.f32.xlu0 %v4277_v0 }
0x24e4   :  { %4281 = vadd.xlane.f32.xlu1 %v4280_v60 }
0x24f5   :  { %4347 = vbcast.lane.b32.xlu1 %v4344_v13, 324  ;;  %4339 = vbcast.lane.b32.xlu0 %v4336_v61, 324 }
0x24f9   :  { %4301 = vbcast.lane.b32.xlu1 %v4298_v36, 320  ;;  %4293 = vbcast.lane.b32.xlu0 %v4290_v59, 320 }
0x2532   :  { %v4312_v23 = vpop.permute.xlu0 %4311  ;;  %v4320_v22 = vpop.permute.xlu1 %4319 }
0x256c   :  { %v4279_v54 = vpop.xlane.xlu0 %4278 }
0x256d   :  { %13332 = vrcp.f32 %v4279_v54 }
0x2570   :  { %v4340_v44 = vpop.permute.xlu0 %4339 }
0x2571   :  { %v4282_v19 = vpop.xlane.xlu1 %4281  ;;  %v4349_v35 = vmul.f32 %v4340_v44, %v14886_v56 }
0x2572   :  { %13334 = vrcp.f32 %v4282_v19 }
0x2574   :  { %v4294_v29 = vpop.permute.xlu0 %4293 }
0x2575   :  { %v4348_v48 = vpop.permute.xlu1 %4347  ;;  %v4303_v11 = vmul.f32 %v4294_v29, %v14886_v56 }
0x2576   :  { %v4350_v42 = vmul.f32 %v4348_v48, %v14888_v57 }
0x2577   :  { %v13333_v4 = vpop.eup %13332 }
0x2578   :  { %v4285_v46 = vmul.f32 %v13333_v4, %v13329_v1 }
0x2579   :  { %v4302_v2 = vpop.permute.xlu1 %4301 }
0x257a   :  { %v4321_v10 = vmul.f32 %v4312_v23, %v4285_v46  ;;  %v4304_v60 = vmul.f32 %v4302_v2, %v14888_v57  ;;  %v13613_v57 = vld [vmem:[%s16669_s10 + $0x30] sm:$0xff] }
0x257c   :  { %v13335_v58 = vpop.eup %13334  ;;  %4325 = vrot.lane.b32.xlu0 %v4321_v10, %s13656_s26 }
0x257d   :  { %v4286_v27 = vmul.f32 %v13335_v58, %v13331_v45 }
0x257f   :  { %v4322_v39 = vmul.f32 %v4320_v22, %v4286_v27 }
0x2580   :  { %4353 = vrot.lane.b32.xlu0 %v4349_v35, %s13656_s26 }
0x2581   :  { %4327 = vrot.lane.b32.xlu1 %v4322_v39, %s13656_s26 }
0x2585   :  { %4355 = vrot.lane.b32.xlu1 %v4350_v42, %s13656_s26 }
0x25ee   :  { %v4326_v8 = vpop.permute.xlu0 %4325 }
0x25ef   :  { %v4331_v55 = vadd.f32 %v4326_v8, %v4303_v11  ;;  %v13614_v8 = vld [vmem:[%s16670_s11] ss:$0 sm:$0xff] }
0x25f2   :  { %v4354_v1 = vpop.permute.xlu0 %4353 }
0x25f3   :  { %v14920_v0 = vadd.f32 %v4354_v1, %v4331_v55  ;;  %v4328_v45 = vpop.permute.xlu1 %4327 }
0x25f4   :  { %v4332_v7 = vadd.f32 %v4328_v45, %v4304_v60 }
0x25f5   :  { %4362 = vrot.lane.b32.xlu0 %v14920_v0, %s13666_s6 }
0x25f7   :  { %v4356_v3 = vpop.permute.xlu1 %4355 }
0x25f8   :  { %v14925_v61 = vadd.f32 %v4356_v3, %v4332_v7 }
0x25fa   :  { %4437 = vrot.lane.b32.xlu1 %v14925_v61, %s13666_s6 }
0x2667   :  { %v14929_v13 = vpop.permute.xlu0 %4362 }
0x2668   :  { %12619 = vmatmul.mubr.msk.f32.vlgmr.msra.gmra.mrb[22].mxu0 %vm116_vm1, %v14929_v13 }
0x2669   :  { %13011 = vmatpush3.bf16.msra.mxu0 %v14273_v40  ;;  %12630 = vmatprep.mubr.msk.f32.mxu0 %vm13657_vm0, %v13655_v21 }
0x266a   :  { %13021 = vmatprep.subr.bf16.mxu0 %v13654_v14 }
0x266c   :  { %v14937_v56 = vpop.permute.xlu1 %4437 }
0x266d   :  { %12624 = vmatmul.mubr.msk.f32.vlgmr.msra.gmra.mrb[26].mxu1 %vm116_vm1, %v14937_v56 }
0x266e   :  { %13014 = vmatpush3.bf16.msra.mxu1 %v13823_v9  ;;  %12647 = vmatprep.mubr.msk.f32.mxu1 %vm13657_vm0, %v13655_v21 }
0x266f   :  { %13015 = vmatprep.subr.bf16.mxu1 %v13654_v14 }
0x2672   :  { %13017 = vmatpush3.bf16.msra.mxu1 %v13834_v15 }
0x2673   :  { %13018 = vmatprep.subr.bf16.mxu1 %v13654_v14 }
0x2676   :  { %13020 = vmatpush3.bf16.msra.mxu1 %v13848_v20 }
0x2677   :  { %12645 = vmatprep.subr.mxu1 %v13655_v21 }
0x267a   :  { %12646 = vmatpush3.msra.mxu1 %v13613_v57 }
0x267b   :  { %12671 = vmatprep.subr.mxu1 %v13655_v21 }
0x273b   :  { %v4432_v36 = vpop.f32.mrb[22].mxu0 }
0x273c   :  { %v12620_v59 = vpop.f32.mrb[23].mxu0 }
0x2740   :  { %v4507_v23 = vpop.f32.mrb[26].mxu1 }
0x2741   :  { %v4511_v54 = vcombine.low %v4432_v36, %v4507_v23  ;;  %v12625_v22 = vpop.f32.mrb[27].mxu1 }
0x2743   :  { %v4518_v19 = vrot.slane %v4511_v54, %v13837_v16 }
0x2745   :  { %v4519_v4 = vcombine.high %v4518_v19, %v13655_v21 }
0x2747   :  { %4521 = vrot.lane.b32.xlu0 %v4519_v4, %s13656_s26  ;;  %v13615_v4 = vld [vmem:[%s16672_s13] ss:$0 sm:$0xff] }
0x274b   :  { %4606 = vrot.lane.b32.xlu0 %v14653_v18, %s13667_s1  ;;  %v12134_v18 = vld [vmem:[%s16711_s2 + $0x6] sm:$0x3] }
0x27b9   :  { %v4522_v46 = vpop.permute.xlu0 %4521 }
0x27ba   :  { %v4524_v10 = vsel %vm116_vm1, %v4518_v19, %v4522_v46 }
0x27bb   :  { %4603 = vrot.lane.b32.xlu1 %v4524_v10, %s13656_s26  ;;  %12631 = vmatmul.mubr.msk.f32.vlgmr.msra.gmra.mrb[24].mxu0 %vm1561_vm10, %v4524_v10 }
0x27bc   :  { %13023 = vmatpush3.bf16.msra.mxu0 %v13894_v50  ;;  %12658 = vmatprep.mubr.msk.f32.mxu0 %vm13657_vm0, %v13655_v21 }
0x27bd   :  { %13024 = vmatprep.subr.bf16.mxu0 %v13654_v14  ;;  %v4607_v58 = vpop.permute.xlu0 %4606 }
0x27c0   :  { %13026 = vmatpush3.bf16.msra.mxu0 %v13900_v52 }
0x27c1   :  { %12661 = vmatprep.subr.mxu0 %v13655_v21 }
0x282d   :  { %v4604_v44 = vpop.permute.xlu1 %4603 }
0x282e   :  { %v4609_v27 = vsel %vm116_vm1, %v12134_v18, %v4604_v44 }
0x282f   :  { %v4610_v35 = vsel %vm127_vm2, %v4609_v27, %v4607_v58 }
0x2830   :  { %12648 = vmatmul.mubr.msk.f32.vlgmr.msra.gmra.mrb[28].mxu1 %vm135_vm3, %v4610_v35 }
0x2831   :  { %12673 = vmatprep.mubr.msk.f32.mxu1 %vm13657_vm0, %v13655_v21 }
0x288e   :  { %v4594_v39 = vpop.f32.mrb[24].mxu0 }
0x288f   :  { %v4598_v48 = vadd.f32 %v4594_v39, %v14665_v34  ;;  %v12632_v42 = vpop.f32.mrb[25].mxu0 }
0x2891   :  { %4600 = vst.msk [vmem:[#allocation2 + $0x4] sm:$0x3] %vm632_vm5, %v4598_v48 }
0x2903   :  { %v4680_v29 = vpop.f32.mrb[28].mxu1 }
0x2904   :  { %v4681_v11 = vadd.f32 %v13614_v8, %v4680_v29  ;;  %v12649_v2 = vpop.f32.mrb[29].mxu1 }
0x2906   :  { %13336 = vtanh.f32 %v4681_v11  ;;  %v12136_v1 = vmul.f32 -1.442695, %v4681_v11 }
0x2908   :  { %13338 = vpow2.f32 %v12136_v1 }
0x2910   :  { %v13337_v55 = vpop.eup %13336 }
0x2911   :  { %4693 = vrot.lane.b32.xlu1 %v13337_v55, %s13658_s5 }
0x2912   :  { %v13339_v45 = vpop.eup %13338 }
0x2913   :  { %v4687_v60 = vadd.f32 1.0, %v13339_v45 }
0x2915   :  { %13340 = vrcp.f32 %v4687_v60 }
0x291f   :  { %v13341_v34 = vpop.eup %13340 }
0x2920   :  { %v4691_v57 = vmul.f32 %v13341_v34, %v14647_v17 }
0x2983   :  { %v4694_v7 = vpop.permute.xlu1 %4693 }
0x2984   :  { %v4696_v3 = vmul.f32 %v13341_v34, %v4694_v7 }
0x2986   :  { %4698 = vrot.lane.b32.xlu0 %v4696_v3, %s13658_s5 }
0x29f8   :  { %v4699_v36 = vpop.permute.xlu0 %4698 }
0x29f9   :  { %v14983_v59 = vadd.f32 %v4699_v36, %v4691_v57 }
0x29fb   :  { %13342 = vtanh.f32 %v14983_v59 }
0x2a05   :  { %v13343_v23 = vpop.eup %13342 }
0x2a06   :  { %4704 = vrot.lane.b32.xlu1 %v13343_v23, %s13658_s5 }
0x2a0a   :  { %5058 = vrot.lane.b32.xlu1 %v14820_v30, %s13653_s9 }
0x2a78   :  { %v4705_v54 = vpop.permute.xlu1 %4704 }
0x2a79   :  { %v14989_v22 = vmul.f32 %v13341_v34, %v4705_v54 }
0x2a7b   :  { %4709 = vrot.lane.b32.xlu0 %v14989_v22, %s13659_s12 }
0x2a7c   :  { %v5059_v48 = vpop.permute.xlu1 %5058 }
0x2a7f   :  { %5060 = vrot.lane.b32.xlu0 %v14839_v51, %s13653_s9 }
0x2aed   :  { %v4710_v17 = vpop.permute.xlu0 %4709 }
0x2aee   :  { %12659 = vmatmul.mubr.msk.f32.vlgmr.msra.gmra.mrb[26].mxu0 %vm16724_vm13, %v4710_v17 }
0x2aef   :  { %12663 = vmatprep.mubr.msk.f32.mxu0 %vm13657_vm0, %v13655_v21 }
0x2af1   :  { %v5061_v8 = vpop.permute.xlu0 %5060 }
0x2bc1   :  { %v4779_v19 = vpop.f32.mrb[26].mxu0 }
0x2bc2   :  { %v15001_v46 = vadd.f32 %v13615_v4, %v4779_v19  ;;  %v12660_v10 = vpop.f32.mrb[27].mxu0 }
0x2bc4   :  { %v5080_v18 = vmul.f32 %v15001_v46, %v15001_v46  ;;  %v5032_v44 = vrot.slane %v15001_v46, %v13931_v63  ;;  %v12138_v2 = vmul.f32 -1.442695, %v15001_v46  ;;  %v4806_v17 = vand.u32 2147483647, %v15001_v46 }
0x2bc6   :  { %5082 = vrot.lane.b32.xlu1 %v5080_v18, %s13661_s27  ;;  %v5040_v58 = vrot.slane %v5032_v44, %v13931_v63  ;;  %v5033_v27 = vcombine.high %v5032_v44, %v5032_v44  ;;  %13344 = vpow2.f32 %v12138_v2  ;;  %v4807_v19 = vsub.f32 0.0, %v4806_v17 }
0x2bc8   :  { %v15010_v35 = vrot.slane %v5040_v58, %v13936_v5  ;;  %v5047_v39 = vrot.slane %v5033_v27, %v13931_v63  ;;  %v4808_v4 = vmul.f32 1.442695, %v4807_v19 }
0x2bca   :  { %v5064_v42 = vmul.f32 %v5059_v48, %v15010_v35  ;;  %v15015_v29 = vrot.slane %v5047_v39, %v13936_v5 }
0x2bcc   :  { %5068 = vrot.lane.b32.xlu0 %v5064_v42, %s13661_s27  ;;  %v5065_v11 = vmul.f32 %v5061_v8, %v15015_v29 }
0x2bce   :  { %5070 = vrot.lane.b32.xlu1 %v5065_v11, %s13661_s27 }
0x2bd0   :  { %v13345_v45 = vpop.eup %13344 }
0x2bd1   :  { %v4802_v60 = vadd.f32 1.0, %v13345_v45 }
0x2bd3   :  { %13346 = vrcp.f32 %v4802_v60 }
0x2bd4   :  { %13348 = vpow2.f32 %v4808_v4 }
0x2bdd   :  { %v15024_v36 = vpop.eup %13346 }
0x2bde   :  { %v4869_v23 = vrot.slane %v15024_v36, %v13936_v5  ;;  %v4877_v54 = vrot.slane %v15024_v36, %v13969_v41  ;;  %v13349_v10 = vpop.eup %13348 }
0x2bdf   :  { %v4810_v18 = vadd.f32 1.0, %v13349_v10  ;;  %v4813_v2 = vmul.f32 -0.5, %v13349_v10 }
0x2be1   :  { %13350 = vlog2.f32 %v4810_v18  ;;  %v4814_v60 = vadd.f32 1.0, %v4813_v2  ;;  %v4894_v2 = vadd.f32 %v14756_v47, %v14716_v12 }
0x2c38   :  { %v5083_v55 = vpop.permute.xlu1 %5082 }
0x2c39   :  { %v5085_v1 = vsel %vm632_vm5, %v5083_v55, 0.0 }
0x2c3a   :  { %5086 = vadd.xlane.f32.xlu0 %v5085_v1  ;;  %v13351_v1 = vpop.eup %13350 }
0x2c3e   :  { %v5069_v34 = vpop.permute.xlu0 %5068 }
0x2c3f   :  { %v5074_v7 = vsel %vm116_vm1, %v5069_v34, 0.0 }
0x2c40   :  { %5075 = vadd.xlane.f32.xlu1 %v5074_v7  ;;  %v5071_v3 = vpop.permute.xlu1 %5070  ;;  %v4816_v7 = vand.u32 2147483647, %v13349_v10 }
0x2c41   :  { %v5077_v57 = vsel %vm116_vm1, %v5071_v3, 0.0 }
0x2c42   :  { %5078 = vadd.xlane.f32.xlu0 %v5077_v57  ;;  %v4812_v57 = vmul.f32 0.6931472, %v13351_v1  ;;  %vm4817_vm14 = vcmp.lt.f32.partialorder %v4816_v7, 0.0004427343 }
0x2c51   :  { %4872 = vbcast.lane.b32.xlu1 %v4869_v23, 304 }
0x2c58   :  { %4880 = vbcast.lane.b32.xlu0 %v4877_v54, 304  ;;  %v4815_v54 = vmul.f32 %v13349_v10, %v4814_v60 }
0x2c5a   :  { %v4818_v17 = vsel %vm4817_vm14, %v4815_v54, %v4812_v57 }
0x2cc7   :  { %v5087_v44 = vpop.xlane.xlu0 %5086 }
0x2cc8   :  { %v5092_v58 = vrot.slane %v5087_v44, %v13936_v5  ;;  %v5096_v27 = vrot.slane %v5087_v44, %v13969_v41  ;;  %v4805_v44 = vmax.f32 %v15001_v46, 0.0 }
0x2cca   :  { %v5099_v39 = vmul.f32 %v5092_v58, %v14872_v31  ;;  %v5100_v48 = vmul.f32 %v5096_v27, %v14868_v62 }
0x2ccc   :  { %v5101_v42 = vadd.f32 1e-06, %v5099_v39  ;;  %v5102_v8 = vadd.f32 1e-06, %v5100_v48 }
0x2ccd   :  { %v5076_v11 = vpop.xlane.xlu1 %5075 }
0x2cce   :  { %13352 = vrsqrt.f32 %v5101_v42 }
0x2ccf   :  { %13354 = vrsqrt.f32 %v5102_v8  ;;  %v5079_v55 = vpop.xlane.xlu0 %5078 }
0x2cd1   :  { %v4873_v45 = vpop.permute.xlu1 %4872 }
0x2cd2   :  { %v4882_v34 = vmul.f32 %v4873_v45, %v14920_v0  ;;  %v4819_v0 = vadd.f32 %v4818_v17, %v4805_v44 }
0x2cd3   :  { %v4881_v3 = vpop.permute.xlu0 %4880 }
0x2cd4   :  { %v4884_v23 = vsub.f32 1.0, %v4882_v34  ;;  %v4883_v31 = vmul.f32 %v4881_v3, %v14925_v61  ;;  %v15039_v10 = vadd.f32 1.0, %v4819_v0 }
0x2cd6   :  { %v4885_v62 = vsub.f32 1.0, %v4883_v31  ;;  %v4888_v4 = vrot.slane %v4884_v23, 1 }
0x2cd8   :  { %v13353_v19 = vpop.eup %13352  ;;  %v4889_v18 = vrot.slane %v4885_v62, 1  ;;  %v4892_v42 = vmul.f32 %v4888_v4, %v4884_v23 }
0x2cd9   :  { %v13355_v58 = vpop.eup %13354  ;;  %v5105_v27 = vmul.f32 %v13353_v19, %v5076_v11 }
0x2cda   :  { %v5106_v39 = vmul.f32 %v13355_v58, %v5079_v55  ;;  %v4893_v48 = vmul.f32 %v4889_v18, %v4885_v62  ;;  %v4895_v55 = vmul.f32 %v14756_v47, %v14716_v12 }
0x2cdb   :  { %5115 = vperm.xlu1 %13142, %v5105_v27  }
0x2cdc   :  { %v4899_v8 = vrot.slane %v4893_v48, 7  ;;  %5118 = vperm.xlu0 %13143, %v5106_v39   ;;  %v4896_v34 = vsub.f32 %v4894_v2, %v4895_v55 }
0x2cde   :  { %v4900_v61 = vsel %vm436_vm7, %v4899_v8, %v4892_v42 }
0x2cdf   :  { %13144 = vset.pattern.permute.xlu1 %v13663_v24 }
0x2ce0   :  { %4901 = vrot.lane.b32.xlu0 %v4900_v61, %s13666_s6  ;;  %5109 = vperm.xlu1 %13144, %v15039_v10  }
0x2ce1   :  { %13145 = vset.pattern.permute.xlu0 %v13664_v6 }
0x2ce4   :  { %13146 = vset.pattern.permute.xlu1 %v13664_v6 }
0x2d5a   :  { %v5116_v11 = vpop.permute.xlu1 %5115 }
0x2d5b   :  { %v5119_v1 = vpop.permute.xlu0 %5118  ;;  %v5123_v45 = vrot.slane %v5116_v11, %v13989_v28 }
0x2d5c   :  { %v5127_v60 = vrot.slane %v5119_v1, %v13989_v28 }
0x2d5e   :  { %v5128_v3 = vsel %vm436_vm7, %v5127_v60, %v5123_v45 }
0x2d5f   :  { %v4902_v7 = vpop.permute.xlu0 %4901  ;;  %v5110_v57 = vpop.permute.xlu1 %5109 }
0x2d60   :  { %v15053_v23 = vmul.f32 %v4902_v7, %v4896_v34  ;;  %v5130_v31 = vmul.f32 %v5128_v3, %v5110_v57 }
0x2d62   :  { %v4908_v54 = vrot.slane %v15053_v23, %v13936_v5  ;;  %v5131_v62 = vsel %vm632_vm5, %v5130_v31, -inf  ;;  %v4915_v12 = vrot.slane %v15053_v23, %v13969_v41  ;;  %v4964_v17 = vmax.f32 %v15053_v23, 1e-30 }
0x2d63   :  { %5132 = vmax.xlane.f32.xlu1 %v5131_v62  ;;  %v4926_v4 = vrot.slane %v15053_v23, %v13931_v63 }
0x2d64   :  { %4910 = vbcast.lane.b32.xlu0 %v4908_v54, 256  ;;  %13356 = vlog2.f32 %v4964_v17  ;;  %v5148_v54 = vsub.f32 1.0, %v15024_v36 }
0x2d65   :  { %v4934_v44 = vrot.slane %v4926_v4, %v13931_v63  ;;  %v4927_v58 = vcombine.high %v4926_v4, %v4926_v4 }
0x2d67   :  { %v4945_v39 = vrot.slane %v4934_v44, %v13936_v5  ;;  %v4941_v48 = vrot.slane %v4927_v58, %v13931_v63 }
0x2d68   :  { %4917 = vbcast.lane.b32.xlu0 %v4915_v12, 256 }
0x2d69   :  { %v4949_v61 = vrot.slane %v4941_v48, %v13936_v5 }
0x2d6e   :  { %v13357_v19 = vpop.eup %13356 }
0x2d6f   :  { %v4966_v18 = vmul.f32 0.6931472, %v13357_v19 }
0x2d71   :  { %v4974_v27 = vrot.slane %v4966_v18, %v13931_v63  ;;  %v3851_v18 = vsel %vm632_vm5, %v14756_v47, 0.0 }
0x2d73   :  { %v4982_v0 = vrot.slane %v4974_v27, %v13931_v63  ;;  %v4975_v42 = vcombine.high %v4974_v27, %v4974_v27 }
0x2d75   :  { %v4993_v11 = vrot.slane %v4982_v0, %v13936_v5  ;;  %v4989_v2 = vrot.slane %v4975_v42, %v13931_v63 }
0x2d77   :  { %v4997_v34 = vrot.slane %v4989_v2, %v13936_v5  ;;  %v5012_v2 = vsub.f32 1.0, %v15053_v23 }
0x2dd6   :  { %v4911_v8 = vpop.permute.xlu0 %4910 }
0x2dd7   :  { %vm4952_vm15 = vcmp.lt.f32.partialorder %v4945_v39, %v4911_v8  ;;  %vm4954_vm6 = vcmp.eq.f32.partialorder %v4945_v39, %v4911_v8 }
0x2dd8   :  { %vm4956_vm9 = vmand %vm4954_vm6, %vm14032_vm8 }
0x2dd9   :  { %vm4958_vm11 = vmor %vm4952_vm15, %vm4956_vm9  ;;  %vm16725_vm15 = vcmask 261120  }
0x2dda   :  { %v4918_v55 = vpop.permute.xlu0 %4917  ;;  %v12139_v1 = vsel %vm4958_vm11, 1.0, %v13655_v21 }
0x2ddb   :  { %vm4953_vm4 = vcmp.lt.f32.partialorder %v4949_v61, %v4918_v55  ;;  %vm4955_vm12 = vcmp.eq.f32.partialorder %v4949_v61, %v4918_v55  ;;  %v5000_v45 = vmul.f32 %v12139_v1, %v4993_v11 }
0x2ddc   :  { %vm4957_vm13 = vmand %vm4955_vm12, %vm14032_vm8 }
0x2ddd   :  { %vm4959_vm14 = vmor %vm4953_vm4, %vm4957_vm13  ;;  %v5002_v60 = vsel %vm116_vm1, %v5000_v45, 0.0 }
0x2dde   :  { %5003 = vadd.xlane.f32.xlu0 %v5002_v60  ;;  %v12140_v7 = vsel %vm4959_vm14, 1.0, %v13655_v21 }
0x2ddf   :  { %v5001_v3 = vmul.f32 %v12140_v7, %v4997_v34 }
0x2de1   :  { %v5005_v57 = vsel %vm116_vm1, %v5001_v3, 0.0 }
0x2de2   :  { %5006 = vadd.xlane.f32.xlu1 %v5005_v57 }
0x2df0   :  { %v5133_v62 = vpop.xlane.xlu1 %5132 }
0x2df1   :  { %v5134_v12 = vsub.f32 %v5130_v31, %v5133_v62 }
0x2df3   :  { %5151 = vperm.xlu1 %13146, %v5148_v54   ;;  %v5135_v17 = vmul.f32 1.442695, %v5134_v12 }
0x2df4   :  { %5144 = vperm.xlu0 %13145, %v15024_v36  }
0x2df5   :  { %13358 = vpow2.f32 %v5135_v17 }
0x2df7   :  { %13147 = vset.pattern.permute.xlu1 %v13665_v53 }
0x2df8   :  { %13149 = vset.pattern.permute.xlu0 %v13662_v33 }
0x2dff   :  { %v13359_v19 = vpop.eup %13358 }
0x2e00   :  { %v5137_v4 = vsel %vm632_vm5, %v13359_v19, 0.0 }
0x2e17   :  { %5138 = vadd.xlane.f32.xlu1 %v5137_v4 }
0x2e28   :  { %5157 = vperm.xlu1 %13147, %v15024_v36  }
0x2e2c   :  { %13148 = vset.pattern.permute.xlu1 %v13662_v33 }
0x2e4c   :  { %3852 = vadd.xlane.f32.xlu1 %v3851_v18 }
0x2e6b   :  { %v5004_v58 = vpop.xlane.xlu0 %5003 }
0x2e6c   :  { %v5008_v39 = vmul.f32 1.442695, %v5004_v58 }
0x2e6f   :  { %v5007_v44 = vpop.xlane.xlu1 %5006 }
0x2e70   :  { %v5010_v27 = vmul.f32 1.442695, %v5007_v44 }
0x2e72   :  { %13360 = vpow2.f32 %v5010_v27  ;;  %v5181_v27 = vrot.slane %v15024_v36, %v13931_v63 }
0x2e73   :  { %13362 = vpow2.f32 %v5008_v39  ;;  %v5152_v31 = vpop.permute.xlu1 %5151  ;;  %v5145_v60 = vpop.permute.xlu0 %5144 }
0x2e7c   :  { %v13361_v48 = vpop.eup %13360 }
0x2e7d   :  { %v13363_v42 = vpop.eup %13362  ;;  %v5022_v8 = vrot.slane %v13361_v48, %v13989_v28 }
0x2e7e   :  { %v5018_v61 = vrot.slane %v13363_v42, %v13989_v28 }
0x2e80   :  { %v5023_v11 = vsel %vm436_vm7, %v5022_v8, %v5018_v61 }
0x2e81   :  { %v5025_v55 = vmul.f32 %v5023_v11, %v5012_v2 }
0x2e83   :  { %v5147_v34 = vmul.f32 %v5145_v60, %v5025_v55 }
0x2ea4   :  { %v5139_v0 = vpop.xlane.xlu1 %5138 }
0x2ea5   :  { %13364 = vrcp.f32 %v5139_v0 }
0x2ea8   :  { %v5158_v57 = vpop.permute.xlu1 %5157 }
0x2eaf   :  { %v13365_v1 = vpop.eup %13364 }
0x2eb0   :  { %v5141_v45 = vmul.f32 %v13365_v1, %v13359_v19 }
0x2eb2   :  { %v5154_v7 = vmul.f32 %v5152_v31, %v5141_v45  ;;  %v5182_v31 = vcombine.high %v5181_v27, %v5181_v27 }
0x2eb4   :  { %v5155_v3 = vadd.f32 %v5154_v7, %v5147_v34  ;;  %v5196_v42 = vrot.slane %v5182_v31, %v13931_v63 }
0x2eb6   :  { %v15093_v54 = vmul.f32 %v5158_v57, %v5155_v3  ;;  %v5204_v60 = vrot.slane %v5196_v42, %v13936_v5 }
0x2eb8   :  { %v5164_v62 = vrot.slane %v15093_v54, %v13936_v5  ;;  %v5171_v12 = vrot.slane %v15093_v54, %v13969_v41  ;;  %v5242_v39 = vrot.slane %v15093_v54, %v13931_v63 }
0x2eba   :  { %5166 = vbcast.lane.b32.xlu0 %v5164_v62, 256  ;;  %v5243_v48 = vcombine.high %v5242_v39, %v5242_v39  ;;  %v5250_v0 = vrot.slane %v5242_v39, %v13931_v63 }
0x2ebc   :  { %v5257_v2 = vrot.slane %v5243_v48, %v13931_v63  ;;  %v5261_v55 = vrot.slane %v5250_v0, %v13936_v5 }
0x2ebe   :  { %5173 = vbcast.lane.b32.xlu0 %v5171_v12, 256  ;;  %v5265_v62 = vrot.slane %v5257_v2, %v13936_v5 }
0x2ec2   :  { %4784 = vrot.lane.b32.xlu0 %v15001_v46, %s13666_s6 }
0x2ed9   :  { %v3853_v17 = vpop.xlane.xlu1 %3852 }
0x2eda   :  { %v3854_v19 = vsub.f32 1.0, %v3853_v17 }
0x2edc   :  { %v3855_v4 = vmul.f32 %v3854_v19, %v14766_v43 }
0x2ede   :  { %v15103_v18 = vadd.f32 %v3855_v4, %v14756_v47  ;;  %v5189_v47 = vrot.slane %v5181_v27, %v13931_v63 }
0x2ee0   :  { %v5316_v44 = vrot.slane %v15103_v18, %v13936_v5  ;;  %v5323_v58 = vrot.slane %v15103_v18, %v13969_v41  ;;  %v5279_v43 = vrot.slane %v15103_v18, %v13931_v63  ;;  %v5200_v11 = vrot.slane %v5189_v47, %v13936_v5 }
0x2ee2   :  { %5318 = vbcast.lane.b32.xlu0 %v5316_v44, 256  ;;  %v5287_v8 = vrot.slane %v5279_v43, %v13931_v63  ;;  %v5280_v61 = vcombine.high %v5279_v43, %v5279_v43 }
0x2ee4   :  { %v5298_v7 = vrot.slane %v5287_v8, %v13936_v5  ;;  %v5294_v3 = vrot.slane %v5280_v61, %v13931_v63 }
0x2ee6   :  { %5325 = vbcast.lane.b32.xlu0 %v5323_v58, 256  ;;  %v5302_v27 = vrot.slane %v5294_v3, %v13936_v5 }
0x2f2c   :  { %v5167_v36 = vpop.permute.xlu0 %5166 }
0x2f2d   :  { %v5233_v1 = vsub.f32 1.0, %v5167_v36  ;;  %v5207_v45 = vmul.f32 %v5200_v11, %v5167_v36  ;;  %v5305_v17 = vmul.f32 %v5298_v7, %v5167_v36  ;;  %v5221_v42 = vmul.f32 %v5167_v36, %v15010_v35 }
0x2f2f   :  { %v5268_v34 = vsub.f32 %v5233_v1, %v5261_v55  ;;  %v5209_v57 = vsub.f32 1.0, %v5207_v45 }
0x2f30   :  { %v5174_v12 = vpop.permute.xlu0 %5173 }
0x2f31   :  { %v5234_v19 = vsub.f32 1.0, %v5174_v12  ;;  %5213 = vrot.lane.b32.xlu0 %v5209_v57, %s13667_s1  ;;  %v5208_v4 = vmul.f32 %v5204_v60, %v5174_v12  ;;  %v5270_v44 = vmul.f32 %v5268_v34, %v14794_v37  ;;  %v5306_v43 = vmul.f32 %v5302_v27, %v5174_v12 }
0x2f32   :  { %v5222_v61 = vmul.f32 %v5174_v12, %v15015_v29  ;;  %v5311_v11 = vmul.f32 %v5268_v34, %v14812_v49 }
0x2f33   :  { %v5269_v58 = vsub.f32 %v5234_v19, %v5265_v62  ;;  %v5210_v39 = vsub.f32 1.0, %v5208_v4  ;;  %v5307_v31 = vadd.f32 %v5305_v17, %v5270_v44 }
0x2f34   :  { %v4785_v8 = vpop.permute.xlu0 %4784 }
0x2f35   :  { %5215 = vrot.lane.b32.xlu0 %v5210_v39, %s13667_s1  ;;  %v15131_v47 = vmul.f32 %v14098_v38, %v5307_v31  ;;  %v5271_v48 = vmul.f32 %v5269_v58, %v14802_v25  ;;  %v5312_v1 = vmul.f32 %v5269_v58, %v14818_v32 }
0x2f37   :  { %5341 = vrot.lane.b32.xlu1 %v15131_v47, %s13656_s26  ;;  %v5308_v0 = vadd.f32 %v5306_v43, %v5271_v48 }
0x2f39   :  { %v15138_v37 = vmul.f32 %v14098_v38, %v5308_v0 }
0x2f3b   :  { %5225 = vrot.lane.b32.xlu1 %v5221_v42, %s13668_s30  ;;  %5343 = vrot.lane.b32.xlu0 %v15138_v37, %s13656_s26 }
0x2f3f   :  { %4786 = vrot.lane.b32.xlu0 %v4785_v8, %s13666_s6 }
0x2f43   :  { %5227 = vrot.lane.b32.xlu0 %v5222_v61, %s13668_s30 }
0x2f54   :  { %v5319_v25 = vpop.permute.xlu0 %5318 }
0x2f55   :  { %v5327_v2 = vmul.f32 %v5319_v25, %v5261_v55 }
0x2f57   :  { %v5329_v35 = vadd.f32 %v5327_v2, %v5311_v11 }
0x2f58   :  { %v5326_v36 = vpop.permute.xlu0 %5325 }
0x2f59   :  { %v5328_v45 = vmul.f32 %v5326_v36, %v5265_v62  ;;  %v15149_v3 = vmul.f32 %v14098_v38, %v5329_v35 }
0x2f5b   :  { %v5330_v60 = vadd.f32 %v5328_v45, %v5312_v1 }
0x2f5d   :  { %v15154_v12 = vmul.f32 %v14098_v38, %v5330_v60 }
0x2fa3   :  { %v5214_v7 = vpop.permute.xlu0 %5213 }
0x2fa4   :  { %v5219_v49 = vmul.f32 %v5214_v7, %v14820_v30 }
0x2fa7   :  { %v5216_v57 = vpop.permute.xlu0 %5215 }
0x2fa8   :  { %v5220_v19 = vmul.f32 %v5216_v57, %v14839_v51 }
0x2fa9   :  { %v5342_v17 = vpop.permute.xlu1 %5341 }
0x2faa   :  { %v5347_v29 = vsel %vm116_vm1, %v15149_v3, %v5342_v17 }
0x2fab   :  { %12662 = vmatpush3.msra.mxu0 %v5347_v29 }
0x2fac   :  { %12664 = vmatmul.mubr.msk.f32.vlgmr.msra.gmra.mrb[28].mxu0 %vm116_vm1, %v14929_v13  ;;  %12666 = vmatprep.subr.mxu0 %v13655_v21 }
0x2fad   :  { %v5226_v32 = vpop.permute.xlu1 %5225  ;;  %v5344_v55 = vpop.permute.xlu0 %5343  ;;  %12668 = vmatprep.mubr.msk.f32.mxu0 %vm13657_vm0, %v13655_v21 }
0x2fae   :  { %v15162_v34 = vadd.f32 %v5226_v32, %v5219_v49  ;;  %v5348_v62 = vsel %vm116_vm1, %v15154_v12, %v5344_v55 }
0x2faf   :  { %12667 = vmatpush3.msra.mxu0 %v5348_v62 }
0x2fb0   :  { %12669 = vmatmul.mubr.msk.f32.vlgmr.msra.gmra.mrb[30].mxu0 %vm116_vm1, %v14937_v56  ;;  %12672 = vmatpush3.xpose.msk.msra.mxu1 %vm116_vm1, %v15162_v34  ;;  %v5641_v48 = vmul.f32 %v15162_v34, %v15162_v34 }
0x2fb1   :  { %v4787_v30 = vpop.permute.xlu0 %4786  ;;  %12681 = vmatprep.subr.mxu1 %v13655_v21  ;;  %12676 = vmatprep.subr.mxu0 %v13655_v21 }
0x2fb2   :  { %v4790_v13 = vcombine.low %v4785_v8, %v4787_v30  ;;  %12678 = vmatprep.mubr.msk.f32.mxu0 %vm13657_vm0, %v13655_v21  ;;  %v5643_v42 = vsel %vm116_vm1, %v5641_v48, 0.0 }
0x2fb4   :  { %v4797_v4 = vrot.slane %v4790_v13, %v13837_v16 }
0x2fb5   :  { %v5228_v44 = vpop.permute.xlu0 %5227 }
0x2fb6   :  { %v15176_v58 = vadd.f32 %v5228_v44, %v5220_v19  ;;  %12674 = vmatmul.mubr.msk.f32.vlgmr.msra.gmra.mrb[30].mxu1 %vm116_vm1, %v4797_v4  ;;  %v5649_v56 = vmul.f32 %v4797_v4, %v4797_v4  ;;  %v4798_v27 = vcombine.high %v4797_v4, %v13655_v21 }
0x2fb7   :  { %12682 = vmatpush3.msra.mxu1 %v15162_v34  ;;  %12683 = vmatprep.mubr.msk.f32.mxu1 %vm13657_vm0, %v13655_v21 }
0x2fb8   :  { %12677 = vmatpush3.xpose.msk.msra.mxu0 %vm116_vm1, %v15176_v58  ;;  %v5651_v51 = vsel %vm632_vm5, %v5649_v56, 0.0  ;;  %v5650_v39 = vmul.f32 %v4798_v27, %v4798_v27  ;;  %v5642_v31 = vmul.f32 %v15176_v58, %v15176_v58  ;;  %13027 = vmatprep.subr.bf16.mxu1 %v13654_v14  ;;  %v5732_v56 = vrot.slane %v15039_v10, %v13936_v5 }
0x2fb9   :  { %5652 = vadd.xlane.f32.xlu1 %v5651_v51  ;;  %12686 = vmatprep.subr.mxu0 %v13655_v21  ;;  %v5740_v51 = vrot.slane %v15039_v10, %v13969_v41 }
0x2fba   :  { %v5654_v43 = vsel %vm632_vm5, %v5650_v39, 0.0  ;;  %v5646_v0 = vsel %vm116_vm1, %v5642_v31, 0.0 }
0x2fbb   :  { %5655 = vadd.xlane.f32.xlu0 %v5654_v43  ;;  %12679 = vmatmul.mubr.msk.f32.vlgmr.msra.gmra.mrb[32].mxu0 %vm116_vm1, %v4798_v27 }
0x2fbc   :  { %12687 = vmatpush3.msra.mxu0 %v15176_v58  ;;  %12688 = vmatprep.mubr.msk.f32.mxu0 %vm13657_vm0, %v13655_v21 }
0x2fbd   :  { %5647 = vadd.xlane.f32.xlu1 %v5646_v0  ;;  %13030 = vmatprep.subr.bf16.mxu0 %v13654_v14 }
0x2fbf   :  { %5644 = vadd.xlane.f32.xlu0 %v5643_v42 }
0x2fce   :  { %4825 = vrot.lane.b32.xlu1 %v15001_v46, %s13669_s15 }
0x2fd5   :  { %4821 = vrot.lane.b32.xlu0 %v15001_v46, %s16720_s29 }
0x3046   :  { %v5653_v8 = vpop.xlane.xlu1 %5652 }
0x3047   :  { %v5662_v2 = vrot.slane %v5653_v8, %v13936_v5  ;;  %v5666_v35 = vrot.slane %v5653_v8, %v13969_v41 }
0x3048   :  { %v5656_v61 = vpop.xlane.xlu0 %5655 }
0x3049   :  { %v5670_v25 = vrot.slane %v5656_v61, %v13936_v5  ;;  %v5674_v1 = vrot.slane %v5656_v61, %v13969_v41 }
0x304a   :  { %v15205_v11 = vpop.xlane.xlu1 %5647 }
0x304b   :  { %v5681_v45 = vmul.f32 %v5670_v25, %v15205_v11  ;;  %v5682_v49 = vmul.f32 %v5674_v1, %v15205_v11 }
0x304c   :  { %v15209_v36 = vpop.xlane.xlu0 %5644 }
0x304d   :  { %v5679_v60 = vmul.f32 %v5662_v2, %v15209_v36  ;;  %v5680_v7 = vmul.f32 %v5666_v35, %v15209_v36  ;;  %v5685_v32 = vadd.f32 1e-06, %v5681_v45  ;;  %v5686_v13 = vadd.f32 1e-06, %v5682_v49 }
0x304e   :  { %v4826_v62 = vpop.permute.xlu1 %4825 }
0x304f   :  { %v5683_v57 = vadd.f32 1e-06, %v5679_v60  ;;  %v5684_v17 = vadd.f32 1e-06, %v5680_v7 }
0x3050   :  { %v4822_v29 = vpop.permute.xlu0 %4821 }
0x3051   :  { %13366 = vrsqrt.f32 %v5683_v57  ;;  %v4824_v55 = vmax.f32 %v15001_v46, %v4822_v29 }
0x3052   :  { %13368 = vrsqrt.f32 %v5684_v17 }
0x3053   :  { %v4828_v30 = vmax.f32 %v4824_v55, %v4826_v62  ;;  %13370 = vrsqrt.f32 %v5685_v32 }
0x3054   :  { %13372 = vrsqrt.f32 %v5686_v13 }
0x3055   :  { %4839 = vrot.lane.b32.xlu0 %v4828_v30, %s16722_s4  ;;  %4833 = vrot.lane.b32.xlu1 %v4828_v30, %s16721_s8 }
0x305b   :  { %v13367_v19 = vpop.eup %13366 }
0x305c   :  { %v13369_v4 = vpop.eup %13368  ;;  %5696 = vperm.xlu1 %13148, %v13367_v19  }
0x305d   :  { %5699 = vperm.xlu0 %13149, %v13369_v4   ;;  %v13371_v44 = vpop.eup %13370 }
0x305e   :  { %v13373_v27 = vpop.eup %13372 }
0x3060   :  { %5702 = vperm.xlu1 %13148, %v13371_v44  }
0x3061   :  { %5735 = vbcast.lane.b32.xlu0 %v5732_v56, 312 }
0x3064   :  { %5705 = vperm.xlu1 %13148, %v13373_v27  }
0x3068   :  { %5743 = vbcast.lane.b32.xlu1 %v5740_v51, 312 }
0x307f   :  { %v15223_v39 = vpop.f32.mrb[28].mxu0 }
0x3080   :  { %v12665_v31 = vpop.f32.mrb[29].mxu0 }
0x3083   :  { %v15225_v43 = vpop.f32.mrb[30].mxu0 }
0x3084   :  { %v12670_v48 = vpop.f32.mrb[31].mxu0 }
0x3089   :  { %v5561_v0 = vpop.f32.mrb[30].mxu1 }
0x308a   :  { %v12675_v42 = vpop.f32.mrb[31].mxu1 }
0x308e   :  { %v5637_v8 = vpop.f32.mrb[32].mxu0 }
0x308f   :  { %v12680_v61 = vpop.f32.mrb[33].mxu0 }
0x30c7   :  { %v4840_v25 = vpop.permute.xlu0 %4839  ;;  %v4834_v2 = vpop.permute.xlu1 %4833 }
0x30c8   :  { %v4842_v35 = vsub.f32 %v15001_v46, %v4840_v25  ;;  %v4836_v1 = vsub.f32 %v15001_v46, %v4834_v2  ;;  %v4829_v25 = vsub.f32 %v15001_v46, %v4828_v30 }
0x30ca   :  { %v4843_v45 = vmul.f32 1.442695, %v4842_v35  ;;  %v4837_v60 = vmul.f32 1.442695, %v4836_v1  ;;  %v4830_v2 = vmul.f32 1.442695, %v4829_v25 }
0x30cc   :  { %13374 = vpow2.f32 %v4843_v45 }
0x30cd   :  { %13376 = vpow2.f32 %v4837_v60 }
0x30ce   :  { %13378 = vpow2.f32 %v4830_v2 }
0x30d6   :  { %v13375_v10 = vpop.eup %13374 }
0x30d7   :  { %v13377_v7 = vpop.eup %13376  ;;  %4851 = vrot.lane.b32.xlu1 %v13375_v10, %s13669_s15 }
0x30d8   :  { %4846 = vrot.lane.b32.xlu0 %v13377_v7, %s16720_s29  ;;  %v13379_v35 = vpop.eup %13378 }
0x30db   :  { %v5697_v57 = vpop.permute.xlu1 %5696 }
0x30dc   :  { %v5700_v29 = vpop.permute.xlu0 %5699  ;;  %v5710_v32 = vrot.slane %v5697_v57, %v13989_v28 }
0x30dd   :  { %v5714_v49 = vrot.slane %v5700_v29, %v13989_v28 }
0x30df   :  { %v5703_v17 = vpop.permute.xlu1 %5702  ;;  %v5723_v62 = vsel %vm436_vm7, %v5714_v49, %v5710_v32 }
0x30e0   :  { %v5718_v19 = vrot.slane %v5703_v17, %v13989_v28  ;;  %v5727_v4 = vmul.f32 %v5723_v62, %v5561_v0  ;;  %v5736_v44 = vpop.permute.xlu0 %5735 }
0x30e2   :  { %v5745_v27 = vmul.f32 %v5736_v44, %v5727_v4 }
0x30e3   :  { %v5706_v55 = vpop.permute.xlu1 %5705 }
0x30e4   :  { %v5722_v13 = vrot.slane %v5706_v55, %v13989_v28  ;;  %v5747_v42 = vsel %vm632_vm5, %v5745_v27, -inf }
0x30e6   :  { %v5724_v56 = vsel %vm436_vm7, %v5722_v13, %v5718_v19 }
0x30e7   :  { %v5728_v51 = vmul.f32 %v5724_v56, %v5637_v8  ;;  %v5744_v31 = vpop.permute.xlu1 %5743 }
0x30e9   :  { %v5746_v48 = vmul.f32 %v5744_v31, %v5728_v51 }
0x30eb   :  { %v5750_v61 = vsel %vm632_vm5, %v5746_v48, -inf }
0x30f7   :  { %5748 = vmax.xlane.f32.xlu0 %v5747_v42 }
0x30fb   :  { %5751 = vmax.xlane.f32.xlu1 %v5750_v61 }
0x3149   :  { %v4852_v45 = vpop.permute.xlu1 %4851 }
0x314a   :  { %v4847_v1 = vpop.permute.xlu0 %4846 }
0x314b   :  { %v4849_v0 = vadd.f32 %v13379_v35, %v4847_v1 }
0x314d   :  { %v4854_v60 = vadd.f32 %v4852_v45, %v4849_v0 }
0x314f   :  { %13380 = vrcp.f32 %v4854_v60 }
0x3159   :  { %v13381_v57 = vpop.eup %13380 }
0x315a   :  { %4858 = vrot.lane.b32.xlu0 %v13381_v57, %s16721_s8  ;;  %4862 = vrot.lane.b32.xlu1 %v13381_v57, %s16722_s4  ;;  %v4856_v8 = vmul.f32 %v13381_v57, %v13379_v35 }
0x315c   :  { %v5772_v25 = vrot.slane %v4856_v8, %v13936_v5 }
0x3184   :  { %v5749_v17 = vpop.xlane.xlu0 %5748 }
0x3185   :  { %v5753_v55 = vsub.f32 %v5745_v27, %v5749_v17 }
0x3187   :  { %v5755_v13 = vmul.f32 1.442695, %v5753_v55 }
0x3188   :  { %v5752_v62 = vpop.xlane.xlu1 %5751 }
0x3189   :  { %v5754_v19 = vsub.f32 %v5746_v48, %v5752_v62  ;;  %13382 = vpow2.f32 %v5755_v13  ;;  %v5780_v48 = vrot.slane %v4856_v8, %v13969_v41 }
0x318b   :  { %v5757_v4 = vmul.f32 1.442695, %v5754_v19 }
0x318d   :  { %13384 = vpow2.f32 %v5757_v4 }
0x3193   :  { %v13383_v44 = vpop.eup %13382 }
0x3194   :  { %v5759_v56 = vsel %vm632_vm5, %v13383_v44, 0.0 }
0x3197   :  { %v13385_v51 = vpop.eup %13384 }
0x31cc   :  { %v4859_v29 = vpop.permute.xlu0 %4858  ;;  %v4863_v31 = vpop.permute.xlu1 %4862 }
0x31cd   :  { %v4861_v49 = vmul.f32 %v13377_v7, %v4859_v29  ;;  %v5762_v7 = vsel %vm632_vm5, %v13385_v51, 0.0  ;;  %v4865_v42 = vmul.f32 %v13375_v10, %v4863_v31 }
0x31cf   :  { %v5790_v32 = vrot.slane %v4861_v49, %v13936_v5  ;;  %v5798_v30 = vrot.slane %v4861_v49, %v13969_v41  ;;  %v5818_v61 = vrot.slane %v4865_v42, %v13936_v5  ;;  %v5826_v27 = vrot.slane %v4865_v42, %v13969_v41 }
0x31d1   :  { %5793 = vbcast.lane.b32.xlu0 %v5790_v32, 322  ;;  %5801 = vbcast.lane.b32.xlu1 %v5798_v30, 322 }
0x31f0   :  { %5760 = vadd.xlane.f32.xlu0 %v5759_v56 }
0x31f5   :  { %5763 = vadd.xlane.f32.xlu1 %v5762_v7 }
0x3206   :  { %5829 = vbcast.lane.b32.xlu1 %v5826_v27, 324  ;;  %5821 = vbcast.lane.b32.xlu0 %v5818_v61, 324 }
0x320a   :  { %5783 = vbcast.lane.b32.xlu1 %v5780_v48, 320  ;;  %5775 = vbcast.lane.b32.xlu0 %v5772_v25, 320 }
0x3243   :  { %v5794_v2 = vpop.permute.xlu0 %5793  ;;  %v5802_v1 = vpop.permute.xlu1 %5801 }
0x327d   :  { %v5761_v35 = vpop.xlane.xlu0 %5760 }
0x327e   :  { %13386 = vrcp.f32 %v5761_v35 }
0x3281   :  { %v5822_v57 = vpop.permute.xlu0 %5821 }
0x3282   :  { %v5764_v0 = vpop.xlane.xlu1 %5763  ;;  %v5831_v49 = vmul.f32 %v5822_v57, %v15223_v39 }
0x3283   :  { %13388 = vrcp.f32 %v5764_v0 }
0x3285   :  { %v5776_v55 = vpop.permute.xlu0 %5775 }
0x3286   :  { %v5830_v8 = vpop.permute.xlu1 %5829  ;;  %v5785_v13 = vmul.f32 %v5776_v55, %v15223_v39 }
0x3287   :  { %v5832_v30 = vmul.f32 %v5830_v8, %v15225_v43 }
0x3288   :  { %v13387_v45 = vpop.eup %13386 }
0x3289   :  { %v5767_v10 = vmul.f32 %v13387_v45, %v13383_v44 }
0x328a   :  { %v5784_v19 = vpop.permute.xlu1 %5783 }
0x328b   :  { %v5803_v60 = vmul.f32 %v5794_v2, %v5767_v10  ;;  %v5786_v7 = vmul.f32 %v5784_v19, %v15225_v43  ;;  %v13616_v43 = vld [vmem:[%s16669_s10 + $0x30] sm:$0xff] }
0x328d   :  { %v13389_v17 = vpop.eup %13388  ;;  %5807 = vrot.lane.b32.xlu0 %v5803_v60, %s13656_s26 }
0x328e   :  { %v5768_v29 = vmul.f32 %v13389_v17, %v13385_v51 }
0x3290   :  { %v5804_v32 = vmul.f32 %v5802_v1, %v5768_v29 }
0x3291   :  { %5835 = vrot.lane.b32.xlu0 %v5831_v49, %s13656_s26 }
0x3292   :  { %5809 = vrot.lane.b32.xlu1 %v5804_v32, %s13656_s26 }
0x3296   :  { %5837 = vrot.lane.b32.xlu1 %v5832_v30, %s13656_s26 }
0x32ff   :  { %v5808_v62 = vpop.permute.xlu0 %5807 }
0x3300   :  { %v5813_v4 = vadd.f32 %v5808_v62, %v5785_v13  ;;  %v13617_v62 = vld [vmem:[%s16670_s11] ss:$0 sm:$0xff] }
0x3303   :  { %v5836_v44 = vpop.permute.xlu0 %5835 }
0x3304   :  { %v15257_v56 = vadd.f32 %v5836_v44, %v5813_v4  ;;  %v5810_v51 = vpop.permute.xlu1 %5809 }
0x3305   :  { %v5814_v31 = vadd.f32 %v5810_v51, %v5786_v7 }
0x3306   :  { %5844 = vrot.lane.b32.xlu0 %v15257_v56, %s13666_s6 }
0x3308   :  { %v5838_v42 = vpop.permute.xlu1 %5837 }
0x3309   :  { %v15262_v61 = vadd.f32 %v5838_v42, %v5814_v31 }
0x330b   :  { %5919 = vrot.lane.b32.xlu1 %v15262_v61, %s13666_s6 }
0x3378   :  { %v15266_v27 = vpop.permute.xlu0 %5844 }
0x3379   :  { %12684 = vmatmul.mubr.msk.f32.vlgmr.msra.gmra.mrb[32].mxu1 %vm116_vm1, %v15266_v27 }
0x337a   :  { %13029 = vmatpush3.bf16.msra.mxu1 %v14273_v40  ;;  %12695 = vmatprep.mubr.msk.f32.mxu1 %vm13657_vm0, %v13655_v21 }
0x337b   :  { %13039 = vmatprep.subr.bf16.mxu1 %v13654_v14 }
0x337d   :  { %v15274_v39 = vpop.permute.xlu1 %5919 }
0x337e   :  { %12689 = vmatmul.mubr.msk.f32.vlgmr.msra.gmra.mrb[34].mxu0 %vm116_vm1, %v15274_v39 }
0x337f   :  { %13032 = vmatpush3.bf16.msra.mxu0 %v13823_v9  ;;  %12712 = vmatprep.mubr.msk.f32.mxu0 %vm13657_vm0, %v13655_v21 }
0x3380   :  { %13033 = vmatprep.subr.bf16.mxu0 %v13654_v14 }
0x3383   :  { %13035 = vmatpush3.bf16.msra.mxu0 %v13834_v15 }
0x3384   :  { %13036 = vmatprep.subr.bf16.mxu0 %v13654_v14 }
0x3387   :  { %13038 = vmatpush3.bf16.msra.mxu0 %v13848_v20 }
0x3388   :  { %12710 = vmatprep.subr.mxu0 %v13655_v21 }
0x338b   :  { %12711 = vmatpush3.msra.mxu0 %v13616_v43 }
0x338c   :  { %12736 = vmatprep.subr.mxu0 %v13655_v21 }
0x344c   :  { %v5914_v48 = vpop.f32.mrb[32].mxu1 }
0x344d   :  { %v12685_v25 = vpop.f32.mrb[33].mxu1 }
0x3451   :  { %v5989_v2 = vpop.f32.mrb[34].mxu0 }
0x3452   :  { %v5993_v35 = vcombine.low %v5914_v48, %v5989_v2  ;;  %v12690_v1 = vpop.f32.mrb[35].mxu0 }
0x3454   :  { %v6000_v0 = vrot.slane %v5993_v35, %v13837_v16 }
0x3456   :  { %v6001_v45 = vcombine.high %v6000_v0, %v13655_v21 }
0x3458   :  { %6003 = vrot.lane.b32.xlu0 %v6001_v45, %s13656_s26  ;;  %v13618_v45 = vld [vmem:[%s16672_s13] ss:$0 sm:$0xff] }
0x345c   :  { %6088 = vrot.lane.b32.xlu0 %v14989_v22, %s13667_s1  ;;  %v12150_v22 = vld [vmem:[%s16711_s2 + $0x8] sm:$0x3] }
0x34ca   :  { %v6004_v10 = vpop.permute.xlu0 %6003 }
0x34cb   :  { %v6006_v60 = vsel %vm116_vm1, %v6000_v0, %v6004_v10 }
0x34cc   :  { %6085 = vrot.lane.b32.xlu1 %v6006_v60, %s13656_s26  ;;  %12696 = vmatmul.mubr.msk.f32.vlgmr.msra.gmra.mrb[34].mxu1 %vm1561_vm10, %v6006_v60 }
0x34cd   :  { %13041 = vmatpush3.bf16.msra.mxu1 %v13894_v50  ;;  %12723 = vmatprep.mubr.msk.f32.mxu1 %vm13657_vm0, %v13655_v21 }
0x34ce   :  { %13042 = vmatprep.subr.bf16.mxu1 %v13654_v14  ;;  %v6089_v17 = vpop.permute.xlu0 %6088 }
0x34d1   :  { %13044 = vmatpush3.bf16.msra.mxu1 %v13900_v52 }
0x34d2   :  { %12726 = vmatprep.subr.mxu1 %v13655_v21 }
0x353e   :  { %v6086_v57 = vpop.permute.xlu1 %6085 }
0x353f   :  { %v6091_v29 = vsel %vm116_vm1, %v12150_v22, %v6086_v57 }
0x3540   :  { %v6092_v49 = vsel %vm127_vm2, %v6091_v29, %v6089_v17 }
0x3541   :  { %12713 = vmatmul.mubr.msk.f32.vlgmr.msra.gmra.mrb[36].mxu0 %vm135_vm3, %v6092_v49 }
0x3542   :  { %12738 = vmatprep.mubr.msk.f32.mxu0 %vm13657_vm0, %v13655_v21 }
0x359f   :  { %v6076_v32 = vpop.f32.mrb[34].mxu1 }
0x35a0   :  { %v6080_v8 = vadd.f32 %v6076_v32, %v15001_v46  ;;  %v12697_v30 = vpop.f32.mrb[35].mxu1 }
0x35a2   :  { %6082 = vst.msk [vmem:[#allocation2 + $0x6] sm:$0x3] %vm632_vm5, %v6080_v8 }
0x3614   :  { %v6162_v55 = vpop.f32.mrb[36].mxu0 }
0x3615   :  { %v6163_v13 = vadd.f32 %v13617_v62, %v6162_v55  ;;  %v12714_v19 = vpop.f32.mrb[37].mxu0 }
0x3617   :  { %13390 = vtanh.f32 %v6163_v13  ;;  %v12152_v44 = vmul.f32 -1.442695, %v6163_v13 }
0x3619   :  { %13392 = vpow2.f32 %v12152_v44 }
0x3621   :  { %v13391_v4 = vpop.eup %13390 }
0x3622   :  { %6175 = vrot.lane.b32.xlu1 %v13391_v4, %s13658_s5 }
0x3623   :  { %v13393_v51 = vpop.eup %13392 }
0x3624   :  { %v6169_v7 = vadd.f32 1.0, %v13393_v51 }
0x3626   :  { %13394 = vrcp.f32 %v6169_v7 }
0x3630   :  { %v13395_v46 = vpop.eup %13394 }
0x3631   :  { %v6173_v43 = vmul.f32 %v13395_v46, %v14983_v59 }
0x3694   :  { %v6176_v31 = vpop.permute.xlu1 %6175 }
0x3695   :  { %v6178_v42 = vmul.f32 %v13395_v46, %v6176_v31 }
0x3697   :  { %6180 = vrot.lane.b32.xlu0 %v6178_v42, %s13658_s5 }
0x3709   :  { %v6181_v48 = vpop.permute.xlu0 %6180 }
0x370a   :  { %v15320_v25 = vadd.f32 %v6181_v48, %v6173_v43 }
0x370c   :  { %13396 = vtanh.f32 %v15320_v25 }
0x3716   :  { %v13397_v2 = vpop.eup %13396 }
0x3717   :  { %6186 = vrot.lane.b32.xlu1 %v13397_v2, %s13658_s5 }
0x371b   :  { %6540 = vrot.lane.b32.xlu1 %v15162_v34, %s13653_s9 }
0x3789   :  { %v6187_v35 = vpop.permute.xlu1 %6186 }
0x378a   :  { %v15326_v1 = vmul.f32 %v13395_v46, %v6187_v35 }
0x378c   :  { %6191 = vrot.lane.b32.xlu0 %v15326_v1, %s13659_s12 }
0x378d   :  { %v6541_v8 = vpop.permute.xlu1 %6540 }
0x3790   :  { %6542 = vrot.lane.b32.xlu0 %v15176_v58, %s13653_s9 }
0x37fe   :  { %v6192_v59 = vpop.permute.xlu0 %6191 }
0x37ff   :  { %12724 = vmatmul.mubr.msk.f32.vlgmr.msra.gmra.mrb[36].mxu1 %vm16725_vm15, %v6192_v59 }
0x3800   :  { %12728 = vmatprep.mubr.msk.f32.mxu1 %vm13657_vm0, %v13655_v21 }
0x3802   :  { %v6543_v62 = vpop.permute.xlu0 %6542 }
0x38d2   :  { %v6261_v0 = vpop.f32.mrb[36].mxu1 }
0x38d3   :  { %v15338_v10 = vadd.f32 %v13618_v45, %v6261_v0  ;;  %v12725_v60 = vpop.f32.mrb[37].mxu1 }
0x38d5   :  { %v6562_v22 = vmul.f32 %v15338_v10, %v15338_v10  ;;  %v6514_v57 = vrot.slane %v15338_v10, %v13931_v63  ;;  %v12154_v19 = vmul.f32 -1.442695, %v15338_v10  ;;  %v6288_v59 = vand.u32 2147483647, %v15338_v10 }
0x38d7   :  { %6564 = vrot.lane.b32.xlu1 %v6562_v22, %s13661_s27  ;;  %v6522_v17 = vrot.slane %v6514_v57, %v13931_v63  ;;  %v6515_v29 = vcombine.high %v6514_v57, %v6514_v57  ;;  %13398 = vpow2.f32 %v12154_v19  ;;  %v6289_v0 = vsub.f32 0.0, %v6288_v59 }
0x38d9   :  { %v15347_v49 = vrot.slane %v6522_v17, %v13936_v5  ;;  %v6529_v32 = vrot.slane %v6515_v29, %v13931_v63  ;;  %v6290_v45 = vmul.f32 1.442695, %v6289_v0 }
0x38db   :  { %v6546_v30 = vmul.f32 %v6541_v8, %v15347_v49  ;;  %v15352_v55 = vrot.slane %v6529_v32, %v13936_v5 }
0x38dd   :  { %6550 = vrot.lane.b32.xlu0 %v6546_v30, %s13661_s27  ;;  %v6547_v13 = vmul.f32 %v6543_v62, %v15352_v55 }
0x38df   :  { %6552 = vrot.lane.b32.xlu1 %v6547_v13, %s13661_s27 }
0x38e1   :  { %v13399_v51 = vpop.eup %13398 }
0x38e2   :  { %v6284_v7 = vadd.f32 1.0, %v13399_v51 }
0x38e4   :  { %13400 = vrcp.f32 %v6284_v7 }
0x38e5   :  { %13402 = vpow2.f32 %v6290_v45 }
0x38ee   :  { %v15361_v48 = vpop.eup %13400 }
0x38ef   :  { %v6351_v2 = vrot.slane %v15361_v48, %v13936_v5  ;;  %v6359_v35 = vrot.slane %v15361_v48, %v13969_v41  ;;  %v13403_v60 = vpop.eup %13402 }
0x38f0   :  { %v6292_v22 = vadd.f32 1.0, %v13403_v60  ;;  %v6295_v19 = vmul.f32 -0.5, %v13403_v60 }
0x38f2   :  { %13404 = vlog2.f32 %v6292_v22  ;;  %v6296_v7 = vadd.f32 1.0, %v6295_v19  ;;  %v6376_v19 = vadd.f32 %v15093_v54, %v15053_v23 }
0x3949   :  { %v6565_v4 = vpop.permute.xlu1 %6564 }
0x394a   :  { %v6567_v44 = vsel %vm632_vm5, %v6565_v4, 0.0 }
0x394b   :  { %6568 = vadd.xlane.f32.xlu0 %v6567_v44  ;;  %v13405_v44 = vpop.eup %13404 }
0x394f   :  { %v6551_v46 = vpop.permute.xlu0 %6550 }
0x3950   :  { %v6556_v31 = vsel %vm116_vm1, %v6551_v46, 0.0 }
0x3951   :  { %6557 = vadd.xlane.f32.xlu1 %v6556_v31  ;;  %v6553_v42 = vpop.permute.xlu1 %6552  ;;  %v6298_v31 = vand.u32 2147483647, %v13403_v60 }
0x3952   :  { %v6559_v43 = vsel %vm116_vm1, %v6553_v42, 0.0 }
0x3953   :  { %6560 = vadd.xlane.f32.xlu0 %v6559_v43  ;;  %v6294_v43 = vmul.f32 0.6931472, %v13405_v44  ;;  %vm6299_vm6 = vcmp.lt.f32.partialorder %v6298_v31, 0.0004427343 }
0x3962   :  { %6354 = vbcast.lane.b32.xlu1 %v6351_v2, 304 }
0x3969   :  { %6362 = vbcast.lane.b32.xlu0 %v6359_v35, 304  ;;  %v6297_v35 = vmul.f32 %v13403_v60, %v6296_v7 }
0x396b   :  { %v6300_v59 = vsel %vm6299_vm6, %v6297_v35, %v6294_v43 }
0x39d8   :  { %v6569_v57 = vpop.xlane.xlu0 %6568 }
0x39d9   :  { %v6574_v17 = vrot.slane %v6569_v57, %v13936_v5  ;;  %v6578_v29 = vrot.slane %v6569_v57, %v13969_v41  ;;  %v6287_v57 = vmax.f32 %v15338_v10, 0.0 }
0x39db   :  { %v6581_v32 = vmul.f32 %v6574_v17, %v15209_v36  ;;  %v6582_v8 = vmul.f32 %v6578_v29, %v15205_v11 }
0x39dd   :  { %v6583_v30 = vadd.f32 1e-06, %v6581_v32  ;;  %v6584_v62 = vadd.f32 1e-06, %v6582_v8 }
0x39de   :  { %v6558_v13 = vpop.xlane.xlu1 %6557 }
0x39df   :  { %13406 = vrsqrt.f32 %v6583_v30 }
0x39e0   :  { %13408 = vrsqrt.f32 %v6584_v62  ;;  %v6561_v4 = vpop.xlane.xlu0 %6560 }
0x39e2   :  { %v6355_v51 = vpop.permute.xlu1 %6354 }
0x39e3   :  { %v6364_v46 = vmul.f32 %v6355_v51, %v15257_v56  ;;  %v6301_v56 = vadd.f32 %v6300_v59, %v6287_v57 }
0x39e4   :  { %v6363_v42 = vpop.permute.xlu0 %6362 }
0x39e5   :  { %v6366_v2 = vsub.f32 1.0, %v6364_v46  ;;  %v6365_v36 = vmul.f32 %v6363_v42, %v15262_v61  ;;  %v15376_v60 = vadd.f32 1.0, %v6301_v56 }
0x39e7   :  { %v6367_v11 = vsub.f32 1.0, %v6365_v36  ;;  %v6370_v45 = vrot.slane %v6366_v2, 1 }
0x39e9   :  { %v13407_v0 = vpop.eup %13406  ;;  %v6371_v22 = vrot.slane %v6367_v11, 1  ;;  %v6374_v30 = vmul.f32 %v6370_v45, %v6366_v2 }
0x39ea   :  { %v13409_v17 = vpop.eup %13408  ;;  %v6587_v29 = vmul.f32 %v13407_v0, %v6558_v13 }
0x39eb   :  { %v6588_v32 = vmul.f32 %v13409_v17, %v6561_v4  ;;  %v6375_v8 = vmul.f32 %v6371_v22, %v6367_v11  ;;  %v6377_v4 = vmul.f32 %v15093_v54, %v15053_v23 }
0x39ec   :  { %6597 = vperm.xlu1 %13148, %v6587_v29  }
0x39ed   :  { %v6381_v62 = vrot.slane %v6375_v8, 7  ;;  %6600 = vperm.xlu0 %13149, %v6588_v32   ;;  %v6378_v46 = vsub.f32 %v6376_v19, %v6377_v4 }
0x39ef   :  { %v6382_v61 = vsel %vm436_vm7, %v6381_v62, %v6374_v30 }
0x39f0   :  { %13150 = vset.pattern.permute.xlu1 %v13663_v24 }
0x39f1   :  { %6383 = vrot.lane.b32.xlu0 %v6382_v61, %s13666_s6  ;;  %6591 = vperm.xlu1 %13150, %v15376_v60  }
0x39f2   :  { %13151 = vset.pattern.permute.xlu0 %v13664_v6 }
0x39f5   :  { %13152 = vset.pattern.permute.xlu1 %v13664_v6 }
0x3a6b   :  { %v6598_v13 = vpop.permute.xlu1 %6597 }
0x3a6c   :  { %v6601_v44 = vpop.permute.xlu0 %6600  ;;  %v6605_v51 = vrot.slane %v6598_v13, %v13989_v28 }
0x3a6d   :  { %v6609_v7 = vrot.slane %v6601_v44, %v13989_v28 }
0x3a6f   :  { %v6610_v42 = vsel %vm436_vm7, %v6609_v7, %v6605_v51 }
0x3a70   :  { %v6384_v31 = vpop.permute.xlu0 %6383  ;;  %v6592_v43 = vpop.permute.xlu1 %6591 }
0x3a71   :  { %v15390_v2 = vmul.f32 %v6384_v31, %v6378_v46  ;;  %v6612_v36 = vmul.f32 %v6610_v42, %v6592_v43 }
0x3a73   :  { %v6390_v35 = vrot.slane %v15390_v2, %v13936_v5  ;;  %v6613_v11 = vsel %vm632_vm5, %v6612_v36, -inf  ;;  %v6397_v23 = vrot.slane %v15390_v2, %v13969_v41  ;;  %v6446_v59 = vmax.f32 %v15390_v2, 1e-30 }
0x3a74   :  { %6614 = vmax.xlane.f32.xlu1 %v6613_v11  ;;  %v6408_v45 = vrot.slane %v15390_v2, %v13931_v63 }
0x3a75   :  { %6392 = vbcast.lane.b32.xlu0 %v6390_v35, 256  ;;  %13410 = vlog2.f32 %v6446_v59  ;;  %v6630_v35 = vsub.f32 1.0, %v15361_v48 }
0x3a76   :  { %v6416_v57 = vrot.slane %v6408_v45, %v13931_v63  ;;  %v6409_v17 = vcombine.high %v6408_v45, %v6408_v45 }
0x3a78   :  { %v6427_v32 = vrot.slane %v6416_v57, %v13936_v5  ;;  %v6423_v8 = vrot.slane %v6409_v17, %v13931_v63 }
0x3a79   :  { %6399 = vbcast.lane.b32.xlu0 %v6397_v23, 256 }
0x3a7a   :  { %v6431_v61 = vrot.slane %v6423_v8, %v13936_v5 }
0x3a7f   :  { %v13411_v0 = vpop.eup %13410 }
0x3a80   :  { %v6448_v22 = vmul.f32 0.6931472, %v13411_v0 }
0x3a82   :  { %v6456_v29 = vrot.slane %v6448_v22, %v13931_v63  ;;  %v5333_v22 = vsel %vm632_vm5, %v15093_v54, 0.0 }
0x3a84   :  { %v6464_v56 = vrot.slane %v6456_v29, %v13931_v63  ;;  %v6457_v30 = vcombine.high %v6456_v29, %v6456_v29 }
0x3a86   :  { %v6475_v13 = vrot.slane %v6464_v56, %v13936_v5  ;;  %v6471_v19 = vrot.slane %v6457_v30, %v13931_v63 }
0x3a88   :  { %v6479_v46 = vrot.slane %v6471_v19, %v13936_v5  ;;  %v6494_v19 = vsub.f32 1.0, %v15390_v2 }
0x3ae7   :  { %v6393_v62 = vpop.permute.xlu0 %6392 }
0x3ae8   :  { %vm6434_vm9 = vcmp.lt.f32.partialorder %v6427_v32, %v6393_v62  ;;  %vm6436_vm11 = vcmp.eq.f32.partialorder %v6427_v32, %v6393_v62 }
0x3ae9   :  { %vm6438_vm4 = vmand %vm6436_vm11, %vm14032_vm8 }
0x3aea   :  { %vm6440_vm12 = vmor %vm6434_vm9, %vm6438_vm4  ;;  %vm16726_vm9 = vcmask 261120  }
0x3aeb   :  { %v6400_v4 = vpop.permute.xlu0 %6399  ;;  %v12155_v44 = vsel %vm6440_vm12, 1.0, %v13655_v21 }
0x3aec   :  { %vm6435_vm13 = vcmp.lt.f32.partialorder %v6431_v61, %v6400_v4  ;;  %vm6437_vm14 = vcmp.eq.f32.partialorder %v6431_v61, %v6400_v4  ;;  %v6482_v51 = vmul.f32 %v12155_v44, %v6475_v13 }
0x3aed   :  { %vm6439_vm15 = vmand %vm6437_vm14, %vm14032_vm8 }
0x3aee   :  { %vm6441_vm6 = vmor %vm6435_vm13, %vm6439_vm15  ;;  %v6484_v7 = vsel %vm116_vm1, %v6482_v51, 0.0 }
0x3aef   :  { %6485 = vadd.xlane.f32.xlu0 %v6484_v7  ;;  %v12156_v31 = vsel %vm6441_vm6, 1.0, %v13655_v21 }
0x3af0   :  { %v6483_v42 = vmul.f32 %v12156_v31, %v6479_v46 }
0x3af2   :  { %v6487_v43 = vsel %vm116_vm1, %v6483_v42, 0.0 }
0x3af3   :  { %6488 = vadd.xlane.f32.xlu1 %v6487_v43 }
0x3b01   :  { %v6615_v11 = vpop.xlane.xlu1 %6614 }
0x3b02   :  { %v6616_v23 = vsub.f32 %v6612_v36, %v6615_v11 }
0x3b04   :  { %6633 = vperm.xlu1 %13152, %v6630_v35   ;;  %v6617_v59 = vmul.f32 1.442695, %v6616_v23 }
0x3b05   :  { %6626 = vperm.xlu0 %13151, %v15361_v48  }
0x3b06   :  { %13412 = vpow2.f32 %v6617_v59 }
0x3b08   :  { %13153 = vset.pattern.permute.xlu1 %v13665_v53 }
0x3b09   :  { %13155 = vset.pattern.permute.xlu0 %v13662_v33 }
0x3b10   :  { %v13413_v0 = vpop.eup %13412 }
0x3b11   :  { %v6619_v45 = vsel %vm632_vm5, %v13413_v0, 0.0 }
0x3b28   :  { %6620 = vadd.xlane.f32.xlu1 %v6619_v45 }
0x3b39   :  { %6639 = vperm.xlu1 %13153, %v15361_v48  }
0x3b3d   :  { %13154 = vset.pattern.permute.xlu1 %v13662_v33 }
0x3b5d   :  { %5334 = vadd.xlane.f32.xlu1 %v5333_v22 }
0x3b7c   :  { %v6486_v17 = vpop.xlane.xlu0 %6485 }
0x3b7d   :  { %v6490_v32 = vmul.f32 1.442695, %v6486_v17 }
0x3b80   :  { %v6489_v57 = vpop.xlane.xlu1 %6488 }
0x3b81   :  { %v6492_v29 = vmul.f32 1.442695, %v6489_v57 }
0x3b83   :  { %13414 = vpow2.f32 %v6492_v29  ;;  %v6663_v29 = vrot.slane %v15361_v48, %v13931_v63 }
0x3b84   :  { %13416 = vpow2.f32 %v6490_v32  ;;  %v6634_v36 = vpop.permute.xlu1 %6633  ;;  %v6627_v7 = vpop.permute.xlu0 %6626 }
0x3b8d   :  { %v13415_v8 = vpop.eup %13414 }
0x3b8e   :  { %v13417_v30 = vpop.eup %13416  ;;  %v6504_v62 = vrot.slane %v13415_v8, %v13989_v28 }
0x3b8f   :  { %v6500_v61 = vrot.slane %v13417_v30, %v13989_v28 }
0x3b91   :  { %v6505_v13 = vsel %vm436_vm7, %v6504_v62, %v6500_v61 }
0x3b92   :  { %v6507_v4 = vmul.f32 %v6505_v13, %v6494_v19 }
0x3b94   :  { %v6629_v46 = vmul.f32 %v6627_v7, %v6507_v4 }
0x3bb5   :  { %v6621_v56 = vpop.xlane.xlu1 %6620 }
0x3bb6   :  { %13418 = vrcp.f32 %v6621_v56 }
0x3bb9   :  { %v6640_v43 = vpop.permute.xlu1 %6639 }
0x3bc0   :  { %v13419_v44 = vpop.eup %13418 }
0x3bc1   :  { %v6623_v51 = vmul.f32 %v13419_v44, %v13413_v0 }
0x3bc3   :  { %v6636_v31 = vmul.f32 %v6634_v36, %v6623_v51  ;;  %v6664_v36 = vcombine.high %v6663_v29, %v6663_v29 }
0x3bc5   :  { %v6637_v42 = vadd.f32 %v6636_v31, %v6629_v46  ;;  %v6678_v30 = vrot.slane %v6664_v36, %v13931_v63 }
0x3bc7   :  { %v15430_v35 = vmul.f32 %v6640_v43, %v6637_v42  ;;  %v6686_v46 = vrot.slane %v6678_v30, %v13936_v5 }
0x3bc9   :  { %v6646_v11 = vrot.slane %v15430_v35, %v13936_v5  ;;  %v6653_v23 = vrot.slane %v15430_v35, %v13969_v41  ;;  %v6724_v32 = vrot.slane %v15430_v35, %v13931_v63 }
0x3bcb   :  { %6648 = vbcast.lane.b32.xlu0 %v6646_v11, 256  ;;  %v6725_v8 = vcombine.high %v6724_v32, %v6724_v32  ;;  %v6732_v56 = vrot.slane %v6724_v32, %v13931_v63 }
0x3bcd   :  { %v6739_v19 = vrot.slane %v6725_v8, %v13931_v63  ;;  %v6743_v4 = vrot.slane %v6732_v56, %v13936_v5 }
0x3bcf   :  { %6655 = vbcast.lane.b32.xlu0 %v6653_v23, 256  ;;  %v6747_v23 = vrot.slane %v6739_v19, %v13936_v5 }
0x3bd3   :  { %6266 = vrot.lane.b32.xlu0 %v15338_v10, %s13666_s6 }
0x3bea   :  { %v5335_v59 = vpop.xlane.xlu1 %5334 }
0x3beb   :  { %v5336_v0 = vsub.f32 1.0, %v5335_v59 }
0x3bed   :  { %v5337_v45 = vmul.f32 %v5336_v0, %v15103_v18 }
0x3bef   :  { %v15440_v22 = vadd.f32 %v5337_v45, %v15093_v54  ;;  %v6671_v54 = vrot.slane %v6663_v29, %v13931_v63 }
0x3bf1   :  { %v6805_v57 = vrot.slane %v15440_v22, %v13969_v41  ;;  %v6798_v17 = vrot.slane %v15440_v22, %v13936_v5  ;;  %v6761_v18 = vrot.slane %v15440_v22, %v13931_v63  ;;  %v6682_v13 = vrot.slane %v6671_v54, %v13936_v5 }
0x3bf3   :  { %6807 = vbcast.lane.b32.xlu1 %v6805_v57, 256  ;;  %6800 = vbcast.lane.b32.xlu0 %v6798_v17, 256  ;;  %v6769_v62 = vrot.slane %v6761_v18, %v13931_v63  ;;  %v6762_v61 = vcombine.high %v6761_v18, %v6761_v18 }
0x3bf5   :  { %v6780_v42 = vrot.slane %v6769_v62, %v13936_v5  ;;  %v6776_v43 = vrot.slane %v6762_v61, %v13931_v63 }
0x3bf7   :  { %v6784_v29 = vrot.slane %v6776_v43, %v13936_v5 }
0x3c3d   :  { %v6649_v48 = vpop.permute.xlu0 %6648 }
0x3c3e   :  { %v6715_v44 = vsub.f32 1.0, %v6649_v48  ;;  %v6703_v51 = vmul.f32 %v6649_v48, %v15347_v49  ;;  %v6689_v7 = vmul.f32 %v6682_v13, %v6649_v48  ;;  %v6787_v0 = vmul.f32 %v6780_v42, %v6649_v48 }
0x3c40   :  { %v6750_v31 = vsub.f32 %v6715_v44, %v6743_v4  ;;  %6707 = vrot.lane.b32.xlu1 %v6703_v51, %s13668_s30  ;;  %v6691_v11 = vsub.f32 1.0, %v6689_v7 }
0x3c41   :  { %v6656_v59 = vpop.permute.xlu0 %6655 }
0x3c42   :  { %v6716_v45 = vsub.f32 1.0, %v6656_v59  ;;  %6695 = vrot.lane.b32.xlu0 %v6691_v11, %s13667_s1  ;;  %v6690_v57 = vmul.f32 %v6686_v46, %v6656_v59  ;;  %v6752_v49 = vmul.f32 %v6750_v31, %v15131_v47  ;;  %v6788_v18 = vmul.f32 %v6784_v29, %v6656_v59 }
0x3c43   :  { %v6704_v62 = vmul.f32 %v6656_v59, %v15352_v55  ;;  %v6793_v19 = vmul.f32 %v6750_v31, %v15149_v3 }
0x3c44   :  { %v6751_v17 = vsub.f32 %v6716_v45, %v6747_v23  ;;  %v6692_v32 = vsub.f32 1.0, %v6690_v57  ;;  %v6789_v36 = vadd.f32 %v6787_v0, %v6752_v49 }
0x3c45   :  { %v6267_v47 = vpop.permute.xlu0 %6266 }
0x3c46   :  { %6697 = vrot.lane.b32.xlu0 %v6692_v32, %s13667_s1  ;;  %v6753_v54 = vmul.f32 %v6751_v17, %v15138_v37  ;;  %v15471_v8 = vmul.f32 %v14098_v38, %v6789_v36  ;;  %v6794_v13 = vmul.f32 %v6751_v17, %v15154_v12 }
0x3c48   :  { %v6790_v56 = vadd.f32 %v6788_v18, %v6753_v54 }
0x3c4a   :  { %6823 = vrot.lane.b32.xlu0 %v15471_v8, %s13656_s26  ;;  %v15476_v30 = vmul.f32 %v14098_v38, %v6790_v56 }
0x3c4e   :  { %6825 = vrot.lane.b32.xlu0 %v15476_v30, %s13656_s26 }
0x3c52   :  { %6268 = vrot.lane.b32.xlu0 %v6267_v47, %s13666_s6 }
0x3c56   :  { %6709 = vrot.lane.b32.xlu0 %v6704_v62, %s13668_s30 }
0x3c65   :  { %v6808_v37 = vpop.permute.xlu1 %6807  ;;  %v6801_v61 = vpop.permute.xlu0 %6800 }
0x3c66   :  { %v6810_v48 = vmul.f32 %v6808_v37, %v6747_v23  ;;  %v6809_v44 = vmul.f32 %v6801_v61, %v6743_v4 }
0x3c68   :  { %v6812_v51 = vadd.f32 %v6810_v48, %v6794_v13  ;;  %v6811_v7 = vadd.f32 %v6809_v44, %v6793_v19 }
0x3c6a   :  { %v15492_v12 = vmul.f32 %v14098_v38, %v6811_v7  ;;  %v15497_v4 = vmul.f32 %v14098_v38, %v6812_v51 }
0x3cb2   :  { %v6708_v43 = vpop.permute.xlu1 %6707 }
0x3cb4   :  { %v6696_v46 = vpop.permute.xlu0 %6695 }
0x3cb5   :  { %v6701_v42 = vmul.f32 %v6696_v46, %v15162_v34 }
0x3cb7   :  { %v15486_v11 = vadd.f32 %v6708_v43, %v6701_v42 }
0x3cb8   :  { %v6698_v0 = vpop.permute.xlu0 %6697 }
0x3cb9   :  { %12737 = vmatpush3.xpose.msk.msra.mxu0 %vm116_vm1, %v15486_v11  ;;  %v6702_v59 = vmul.f32 %v6698_v0, %v15176_v58  ;;  %v7123_v18 = vmul.f32 %v15486_v11, %v15486_v11 }
0x3cba   :  { %12746 = vmatprep.subr.mxu0 %v13655_v21 }
0x3cbb   :  { %v7125_v56 = vsel %vm116_vm1, %v7123_v18, 0.0 }
0x3cbc   :  { %v6824_v55 = vpop.permute.xlu0 %6823 }
0x3cbd   :  { %v6829_v3 = vsel %vm116_vm1, %v15492_v12, %v6824_v55 }
0x3cbe   :  { %12727 = vmatpush3.msra.mxu1 %v6829_v3 }
0x3cbf   :  { %12729 = vmatmul.mubr.msk.f32.vlgmr.msra.gmra.mrb[38].mxu1 %vm116_vm1, %v15266_v27  ;;  %12731 = vmatprep.subr.mxu1 %v13655_v21 }
0x3cc0   :  { %v6826_v34 = vpop.permute.xlu0 %6825  ;;  %12733 = vmatprep.mubr.msk.f32.mxu1 %vm13657_vm0, %v13655_v21 }
0x3cc1   :  { %v6830_v31 = vsel %vm116_vm1, %v15497_v4, %v6826_v34 }
0x3cc2   :  { %12732 = vmatpush3.msra.mxu1 %v6830_v31 }
0x3cc3   :  { %12734 = vmatmul.mubr.msk.f32.vlgmr.msra.gmra.mrb[40].mxu1 %vm116_vm1, %v15274_v39  ;;  %12741 = vmatprep.subr.mxu1 %v13655_v21 }
0x3cc4   :  { %v6269_v23 = vpop.permute.xlu0 %6268  ;;  %12743 = vmatprep.mubr.msk.f32.mxu1 %vm13657_vm0, %v13655_v21 }
0x3cc5   :  { %v6272_v27 = vcombine.low %v6267_v47, %v6269_v23 }
0x3cc7   :  { %v6279_v45 = vrot.slane %v6272_v27, %v13837_v16 }
0x3cc8   :  { %v6710_v57 = vpop.permute.xlu0 %6709 }
0x3cc9   :  { %v15513_v49 = vadd.f32 %v6710_v57, %v6702_v59  ;;  %12739 = vmatmul.mubr.msk.f32.vlgmr.msra.gmra.mrb[38].mxu0 %vm116_vm1, %v6279_v45  ;;  %v7131_v17 = vmul.f32 %v6279_v45, %v6279_v45  ;;  %v6280_v29 = vcombine.high %v6279_v45, %v13655_v21 }
0x3cca   :  { %12747 = vmatpush3.msra.mxu0 %v15486_v11  ;;  %12748 = vmatprep.mubr.msk.f32.mxu0 %vm13657_vm0, %v13655_v21 }
0x3ccb   :  { %12742 = vmatpush3.xpose.msk.msra.mxu1 %vm116_vm1, %v15513_v49  ;;  %v7133_v58 = vsel %vm632_vm5, %v7131_v17, 0.0  ;;  %v7132_v39 = vmul.f32 %v6280_v29, %v6280_v29  ;;  %v7124_v32 = vmul.f32 %v15513_v49, %v15513_v49  ;;  %13045 = vmatprep.subr.bf16.mxu0 %v13654_v14  ;;  %v7214_v17 = vrot.slane %v15376_v60, %v13936_v5 }
0x3ccc   :  { %7134 = vadd.xlane.f32.xlu1 %v7133_v58  ;;  %12751 = vmatprep.subr.mxu1 %v13655_v21  ;;  %v7222_v58 = vrot.slane %v15376_v60, %v13969_v41 }
0x3ccd   :  { %v7136_v36 = vsel %vm632_vm5, %v7132_v39, 0.0  ;;  %v7128_v54 = vsel %vm116_vm1, %v7124_v32, 0.0 }
0x3cce   :  { %7137 = vadd.xlane.f32.xlu0 %v7136_v36  ;;  %12744 = vmatmul.mubr.msk.f32.vlgmr.msra.gmra.mrb[42].mxu1 %vm116_vm1, %v6280_v29 }
0x3ccf   :  { %12752 = vmatpush3.msra.mxu1 %v15513_v49  ;;  %12753 = vmatprep.mubr.msk.f32.mxu1 %vm13657_vm0, %v13655_v21 }
0x3cd0   :  { %7129 = vadd.xlane.f32.xlu1 %v7128_v54  ;;  %13048 = vmatprep.subr.bf16.mxu1 %v13654_v14 }
0x3cd2   :  { %7126 = vadd.xlane.f32.xlu0 %v7125_v56 }
0x3ce1   :  { %6307 = vrot.lane.b32.xlu1 %v15338_v10, %s13669_s15 }
0x3ce8   :  { %6303 = vrot.lane.b32.xlu0 %v15338_v10, %s16720_s29 }
0x3d59   :  { %v7135_v47 = vpop.xlane.xlu1 %7134 }
0x3d5a   :  { %v7144_v13 = vrot.slane %v7135_v47, %v13936_v5  ;;  %v7148_v48 = vrot.slane %v7135_v47, %v13969_v41 }
0x3d5b   :  { %v7138_v62 = vpop.xlane.xlu0 %7137 }
0x3d5c   :  { %v7152_v37 = vrot.slane %v7138_v62, %v13936_v5  ;;  %v7156_v44 = vrot.slane %v7138_v62, %v13969_v41 }
0x3d5d   :  { %v15542_v61 = vpop.xlane.xlu1 %7129 }
0x3d5e   :  { %v7163_v51 = vmul.f32 %v7152_v37, %v15542_v61  ;;  %v7164_v55 = vmul.f32 %v7156_v44, %v15542_v61 }
0x3d5f   :  { %v15546_v19 = vpop.xlane.xlu0 %7126 }
0x3d60   :  { %v7161_v7 = vmul.f32 %v7144_v13, %v15546_v19  ;;  %v7162_v46 = vmul.f32 %v7148_v48, %v15546_v19  ;;  %v7167_v3 = vadd.f32 1e-06, %v7163_v51  ;;  %v7168_v27 = vadd.f32 1e-06, %v7164_v55 }
0x3d61   :  { %v6308_v31 = vpop.permute.xlu1 %6307 }
0x3d62   :  { %v7165_v42 = vadd.f32 1e-06, %v7161_v7  ;;  %v7166_v43 = vadd.f32 1e-06, %v7162_v46 }
0x3d63   :  { %v6304_v0 = vpop.permute.xlu0 %6303 }
0x3d64   :  { %13420 = vrsqrt.f32 %v7165_v42  ;;  %v6306_v34 = vmax.f32 %v15338_v10, %v6304_v0 }
0x3d65   :  { %13422 = vrsqrt.f32 %v7166_v43 }
0x3d66   :  { %v6310_v23 = vmax.f32 %v6306_v34, %v6308_v31  ;;  %13424 = vrsqrt.f32 %v7167_v3 }
0x3d67   :  { %13426 = vrsqrt.f32 %v7168_v27 }
0x3d68   :  { %6321 = vrot.lane.b32.xlu0 %v6310_v23, %s16722_s4  ;;  %6315 = vrot.lane.b32.xlu1 %v6310_v23, %s16721_s8 }
0x3d6e   :  { %v13421_v59 = vpop.eup %13420 }
0x3d6f   :  { %v13423_v45 = vpop.eup %13422  ;;  %7178 = vperm.xlu1 %13154, %v13421_v59  }
0x3d70   :  { %7181 = vperm.xlu0 %13155, %v13423_v45   ;;  %v13425_v57 = vpop.eup %13424 }
0x3d71   :  { %v13427_v29 = vpop.eup %13426 }
0x3d73   :  { %7184 = vperm.xlu1 %13154, %v13425_v57  }
0x3d74   :  { %7217 = vbcast.lane.b32.xlu0 %v7214_v17, 312 }
0x3d77   :  { %7187 = vperm.xlu1 %13154, %v13427_v29  }
0x3d7b   :  { %7225 = vbcast.lane.b32.xlu1 %v7222_v58, 312 }
0x3d92   :  { %v15560_v39 = vpop.f32.mrb[38].mxu1 }
0x3d93   :  { %v12730_v32 = vpop.f32.mrb[39].mxu1 }
0x3d96   :  { %v15562_v36 = vpop.f32.mrb[40].mxu1 }
0x3d97   :  { %v12735_v18 = vpop.f32.mrb[41].mxu1 }
0x3d9c   :  { %v7043_v54 = vpop.f32.mrb[38].mxu0 }
0x3d9d   :  { %v12740_v56 = vpop.f32.mrb[39].mxu0 }
0x3da1   :  { %v7119_v47 = vpop.f32.mrb[42].mxu1 }
0x3da2   :  { %v12745_v62 = vpop.f32.mrb[43].mxu1 }
0x3dda   :  { %v6322_v37 = vpop.permute.xlu0 %6321  ;;  %v6316_v13 = vpop.permute.xlu1 %6315 }
0x3ddb   :  { %v6324_v48 = vsub.f32 %v15338_v10, %v6322_v37  ;;  %v6318_v44 = vsub.f32 %v15338_v10, %v6316_v13  ;;  %v6311_v37 = vsub.f32 %v15338_v10, %v6310_v23 }
0x3ddd   :  { %v6325_v51 = vmul.f32 1.442695, %v6324_v48  ;;  %v6319_v7 = vmul.f32 1.442695, %v6318_v44  ;;  %v6312_v13 = vmul.f32 1.442695, %v6311_v37 }
0x3ddf   :  { %13428 = vpow2.f32 %v6325_v51 }
0x3de0   :  { %13430 = vpow2.f32 %v6319_v7 }
0x3de1   :  { %13432 = vpow2.f32 %v6312_v13 }
0x3de9   :  { %v13429_v60 = vpop.eup %13428 }
0x3dea   :  { %v13431_v46 = vpop.eup %13430  ;;  %6333 = vrot.lane.b32.xlu1 %v13429_v60, %s13669_s15 }
0x3deb   :  { %6328 = vrot.lane.b32.xlu0 %v13431_v46, %s16720_s29  ;;  %v13433_v48 = vpop.eup %13432 }
0x3dee   :  { %v7179_v42 = vpop.permute.xlu1 %7178 }
0x3def   :  { %v7182_v0 = vpop.permute.xlu0 %7181  ;;  %v7192_v3 = vrot.slane %v7179_v42, %v13989_v28 }
0x3df0   :  { %v7196_v55 = vrot.slane %v7182_v0, %v13989_v28 }
0x3df2   :  { %v7185_v43 = vpop.permute.xlu1 %7184  ;;  %v7205_v31 = vsel %vm436_vm7, %v7196_v55, %v7192_v3 }
0x3df3   :  { %v7200_v59 = vrot.slane %v7185_v43, %v13989_v28  ;;  %v7209_v45 = vmul.f32 %v7205_v31, %v7043_v54  ;;  %v7218_v57 = vpop.permute.xlu0 %7217 }
0x3df5   :  { %v7227_v29 = vmul.f32 %v7218_v57, %v7209_v45 }
0x3df6   :  { %v7188_v34 = vpop.permute.xlu1 %7187 }
0x3df7   :  { %v7204_v27 = vrot.slane %v7188_v34, %v13989_v28  ;;  %v7229_v56 = vsel %vm632_vm5, %v7227_v29, -inf }
0x3df9   :  { %v7206_v17 = vsel %vm436_vm7, %v7204_v27, %v7200_v59 }
0x3dfa   :  { %v7210_v58 = vmul.f32 %v7206_v17, %v7119_v47  ;;  %v7226_v32 = vpop.permute.xlu1 %7225 }
0x3dfc   :  { %v7228_v18 = vmul.f32 %v7226_v32, %v7210_v58 }
0x3dfe   :  { %v7232_v62 = vsel %vm632_vm5, %v7228_v18, -inf }
0x3e0a   :  { %7230 = vmax.xlane.f32.xlu0 %v7229_v56 }
0x3e0e   :  { %7233 = vmax.xlane.f32.xlu1 %v7232_v62 }
0x3e5c   :  { %v6334_v51 = vpop.permute.xlu1 %6333 }
0x3e5d   :  { %v6329_v44 = vpop.permute.xlu0 %6328 }
0x3e5e   :  { %v6331_v54 = vadd.f32 %v13433_v48, %v6329_v44 }
0x3e60   :  { %v6336_v7 = vadd.f32 %v6334_v51, %v6331_v54 }
0x3e62   :  { %13434 = vrcp.f32 %v6336_v7 }
0x3e6c   :  { %v13435_v42 = vpop.eup %13434 }
0x3e6d   :  { %6344 = vrot.lane.b32.xlu1 %v13435_v42, %s16722_s4  ;;  %6340 = vrot.lane.b32.xlu0 %v13435_v42, %s16721_s8  ;;  %v6338_v47 = vmul.f32 %v13435_v42, %v13433_v48 }
0x3e6f   :  { %v7254_v37 = vrot.slane %v6338_v47, %v13936_v5 }
0x3e97   :  { %v7231_v43 = vpop.xlane.xlu0 %7230 }
0x3e98   :  { %v7235_v34 = vsub.f32 %v7227_v29, %v7231_v43 }
0x3e9a   :  { %v7237_v27 = vmul.f32 1.442695, %v7235_v34 }
0x3e9b   :  { %v7234_v31 = vpop.xlane.xlu1 %7233 }
0x3e9c   :  { %v7236_v59 = vsub.f32 %v7228_v18, %v7234_v31  ;;  %13436 = vpow2.f32 %v7237_v27  ;;  %v7262_v18 = vrot.slane %v6338_v47, %v13969_v41 }
0x3e9e   :  { %v7239_v45 = vmul.f32 1.442695, %v7236_v59 }
0x3ea0   :  { %13438 = vpow2.f32 %v7239_v45 }
0x3ea6   :  { %v13437_v57 = vpop.eup %13436 }
0x3ea7   :  { %v7241_v17 = vsel %vm632_vm5, %v13437_v57, 0.0 }
0x3eaa   :  { %v13439_v58 = vpop.eup %13438 }
0x3edf   :  { %v6341_v0 = vpop.permute.xlu0 %6340  ;;  %v6345_v32 = vpop.permute.xlu1 %6344 }
0x3ee0   :  { %v6343_v55 = vmul.f32 %v13431_v46, %v6341_v0  ;;  %v7244_v46 = vsel %vm632_vm5, %v13439_v58, 0.0  ;;  %v6347_v56 = vmul.f32 %v13429_v60, %v6345_v32 }
0x3ee2   :  { %v7272_v3 = vrot.slane %v6343_v55, %v13936_v5  ;;  %v7280_v23 = vrot.slane %v6343_v55, %v13969_v41  ;;  %v7300_v62 = vrot.slane %v6347_v56, %v13936_v5  ;;  %v7308_v29 = vrot.slane %v6347_v56, %v13969_v41 }
0x3ee4   :  { %7283 = vbcast.lane.b32.xlu1 %v7280_v23, 322  ;;  %7275 = vbcast.lane.b32.xlu0 %v7272_v3, 322 }
0x3f03   :  { %7242 = vadd.xlane.f32.xlu0 %v7241_v17 }
0x3f08   :  { %7245 = vadd.xlane.f32.xlu1 %v7244_v46 }
0x3f19   :  { %7311 = vbcast.lane.b32.xlu1 %v7308_v29, 324  ;;  %7303 = vbcast.lane.b32.xlu0 %v7300_v62, 324 }
0x3f1d   :  { %7265 = vbcast.lane.b32.xlu1 %v7262_v18, 320  ;;  %7257 = vbcast.lane.b32.xlu0 %v7254_v37, 320 }
0x3f56   :  { %v7276_v13 = vpop.permute.xlu0 %7275  ;;  %v7284_v44 = vpop.permute.xlu1 %7283 }
0x3f90   :  { %v7243_v48 = vpop.xlane.xlu0 %7242 }
0x3f91   :  { %13440 = vrcp.f32 %v7243_v48 }
0x3f94   :  { %v7304_v42 = vpop.permute.xlu0 %7303 }
0x3f95   :  { %v7246_v54 = vpop.xlane.xlu1 %7245  ;;  %v7313_v55 = vmul.f32 %v7304_v42, %v15560_v39 }
0x3f96   :  { %13442 = vrcp.f32 %v7246_v54 }
0x3f98   :  { %v7258_v34 = vpop.permute.xlu0 %7257 }
0x3f99   :  { %v7312_v47 = vpop.permute.xlu1 %7311  ;;  %v7267_v27 = vmul.f32 %v7258_v34, %v15560_v39 }
0x3f9a   :  { %v7314_v23 = vmul.f32 %v7312_v47, %v15562_v36 }
0x3f9b   :  { %v13441_v51 = vpop.eup %13440 }
0x3f9c   :  { %v7249_v60 = vmul.f32 %v13441_v51, %v13437_v57 }
0x3f9d   :  { %v7266_v59 = vpop.permute.xlu1 %7265 }
0x3f9e   :  { %v7285_v7 = vmul.f32 %v7276_v13, %v7249_v60  ;;  %v7268_v46 = vmul.f32 %v7266_v59, %v15562_v36  ;;  %v13619_v36 = vld [vmem:[%s16669_s10 + $0x30] sm:$0xff] }
0x3fa0   :  { %v13443_v43 = vpop.eup %13442  ;;  %7289 = vrot.lane.b32.xlu0 %v7285_v7, %s13656_s26 }
0x3fa1   :  { %v7250_v0 = vmul.f32 %v13443_v43, %v13439_v58 }
0x3fa3   :  { %v7286_v3 = vmul.f32 %v7284_v44, %v7250_v0 }
0x3fa4   :  { %7317 = vrot.lane.b32.xlu0 %v7313_v55, %s13656_s26 }
0x3fa5   :  { %7291 = vrot.lane.b32.xlu1 %v7286_v3, %s13656_s26 }
0x3fa9   :  { %7319 = vrot.lane.b32.xlu1 %v7314_v23, %s13656_s26 }
0x4012   :  { %v7290_v31 = vpop.permute.xlu0 %7289 }
0x4013   :  { %v7295_v45 = vadd.f32 %v7290_v31, %v7267_v27  ;;  %v13620_v31 = vld [vmem:[%s16670_s11] ss:$0 sm:$0xff] }
0x4016   :  { %v7318_v57 = vpop.permute.xlu0 %7317 }
0x4017   :  { %v15594_v17 = vadd.f32 %v7318_v57, %v7295_v45  ;;  %v7292_v58 = vpop.permute.xlu1 %7291 }
0x4018   :  { %v7296_v32 = vadd.f32 %v7292_v58, %v7268_v46 }
0x4019   :  { %7326 = vrot.lane.b32.xlu0 %v15594_v17, %s13666_s6 }
0x401b   :  { %v7320_v56 = vpop.permute.xlu1 %7319 }
0x401c   :  { %v15599_v62 = vadd.f32 %v7320_v56, %v7296_v32 }
0x401e   :  { %7401 = vrot.lane.b32.xlu1 %v15599_v62, %s13666_s6 }
0x408b   :  { %v15603_v29 = vpop.permute.xlu0 %7326 }
0x408c   :  { %12749 = vmatmul.mubr.msk.f32.vlgmr.msra.gmra.mrb[40].mxu0 %vm116_vm1, %v15603_v29 }
0x408d   :  { %13047 = vmatpush3.bf16.msra.mxu0 %v14273_v40  ;;  %12760 = vmatprep.mubr.msk.f32.mxu0 %vm13657_vm0, %v13655_v21 }
0x408e   :  { %13057 = vmatprep.subr.bf16.mxu0 %v13654_v14 }
0x4090   :  { %v15611_v39 = vpop.permute.xlu1 %7401 }
0x4091   :  { %12754 = vmatmul.mubr.msk.f32.vlgmr.msra.gmra.mrb[44].mxu1 %vm116_vm1, %v15611_v39 }
0x4092   :  { %13050 = vmatpush3.bf16.msra.mxu1 %v13823_v9  ;;  %12777 = vmatprep.mubr.msk.f32.mxu1 %vm13657_vm0, %v13655_v21 }
0x4093   :  { %13051 = vmatprep.subr.bf16.mxu1 %v13654_v14 }
0x4096   :  { %13053 = vmatpush3.bf16.msra.mxu1 %v13834_v15 }
0x4097   :  { %13054 = vmatprep.subr.bf16.mxu1 %v13654_v14 }
0x409a   :  { %13056 = vmatpush3.bf16.msra.mxu1 %v13848_v20 }
0x409b   :  { %12775 = vmatprep.subr.mxu1 %v13655_v21 }
0x409e   :  { %12776 = vmatpush3.msra.mxu1 %v13619_v36 }
0x409f   :  { %12801 = vmatprep.subr.mxu1 %v13655_v21 }
0x415f   :  { %v7396_v18 = vpop.f32.mrb[40].mxu0 }
0x4160   :  { %v12750_v37 = vpop.f32.mrb[41].mxu0 }
0x4164   :  { %v7471_v13 = vpop.f32.mrb[44].mxu1 }
0x4165   :  { %v7475_v48 = vcombine.low %v7396_v18, %v7471_v13  ;;  %v12755_v44 = vpop.f32.mrb[45].mxu1 }
0x4167   :  { %v7482_v54 = vrot.slane %v7475_v48, %v13837_v16 }
0x4169   :  { %v7483_v51 = vcombine.high %v7482_v54, %v13655_v21 }
0x416b   :  { %7485 = vrot.lane.b32.xlu0 %v7483_v51, %s13656_s26  ;;  %v13621_v51 = vld [vmem:[%s16672_s13] ss:$0 sm:$0xff] }
0x416f   :  { %7570 = vrot.lane.b32.xlu0 %v15326_v1, %s13667_s1  ;;  %v12166_v1 = vld [vmem:[%s16711_s2 + $0xa] sm:$0x3] }
0x41dd   :  { %v7486_v60 = vpop.permute.xlu0 %7485 }
0x41de   :  { %v7488_v7 = vsel %vm116_vm1, %v7482_v54, %v7486_v60 }
0x41df   :  { %7567 = vrot.lane.b32.xlu1 %v7488_v7, %s13656_s26  ;;  %12761 = vmatmul.mubr.msk.f32.vlgmr.msra.gmra.mrb[42].mxu0 %vm1561_vm10, %v7488_v7 }
0x41e0   :  { %13059 = vmatpush3.bf16.msra.mxu0 %v13894_v50  ;;  %12788 = vmatprep.mubr.msk.f32.mxu0 %vm13657_vm0, %v13655_v21 }
0x41e1   :  { %13060 = vmatprep.subr.bf16.mxu0 %v13654_v14  ;;  %v7571_v43 = vpop.permute.xlu0 %7570 }
0x41e4   :  { %13062 = vmatpush3.bf16.msra.mxu0 %v13900_v52 }
0x41e5   :  { %12791 = vmatprep.subr.mxu0 %v13655_v21 }
0x4251   :  { %v7568_v42 = vpop.permute.xlu1 %7567 }
0x4252   :  { %v7573_v0 = vsel %vm116_vm1, %v12166_v1, %v7568_v42 }
0x4253   :  { %v7574_v55 = vsel %vm127_vm2, %v7573_v0, %v7571_v43 }
0x4254   :  { %12778 = vmatmul.mubr.msk.f32.vlgmr.msra.gmra.mrb[46].mxu1 %vm135_vm3, %v7574_v55 }
0x4255   :  { %12803 = vmatprep.mubr.msk.f32.mxu1 %vm13657_vm0, %v13655_v21 }
0x42b2   :  { %v7558_v3 = vpop.f32.mrb[42].mxu0 }
0x42b3   :  { %v7562_v47 = vadd.f32 %v7558_v3, %v15338_v10  ;;  %v12762_v23 = vpop.f32.mrb[43].mxu0 }
0x42b5   :  { %7564 = vst.msk [vmem:[#allocation2 + $0x8] sm:$0x3] %vm632_vm5, %v7562_v47 }
0x4327   :  { %v7644_v34 = vpop.f32.mrb[46].mxu1 }
0x4328   :  { %v7645_v27 = vadd.f32 %v13620_v31, %v7644_v34  ;;  %v12779_v59 = vpop.f32.mrb[47].mxu1 }
0x432a   :  { %13444 = vtanh.f32 %v7645_v27  ;;  %v12168_v57 = vmul.f32 -1.442695, %v7645_v27 }
0x432c   :  { %13446 = vpow2.f32 %v12168_v57 }
0x4334   :  { %v13445_v45 = vpop.eup %13444 }
0x4335   :  { %7657 = vrot.lane.b32.xlu1 %v13445_v45, %s13658_s5 }
0x4336   :  { %v13447_v58 = vpop.eup %13446 }
0x4337   :  { %v7651_v46 = vadd.f32 1.0, %v13447_v58 }
0x4339   :  { %13448 = vrcp.f32 %v7651_v46 }
0x4343   :  { %v13449_v10 = vpop.eup %13448 }
0x4344   :  { %v7655_v36 = vmul.f32 %v13449_v10, %v15320_v25 }
0x43a7   :  { %v7658_v32 = vpop.permute.xlu1 %7657 }
0x43a8   :  { %v7660_v56 = vmul.f32 %v13449_v10, %v7658_v32 }
0x43aa   :  { %7662 = vrot.lane.b32.xlu0 %v7660_v56, %s13658_s5 }
0x441c   :  { %v7663_v18 = vpop.permute.xlu0 %7662 }
0x441d   :  { %v15657_v37 = vadd.f32 %v7663_v18, %v7655_v36 }
0x441f   :  { %13450 = vtanh.f32 %v15657_v37 }
0x4429   :  { %v13451_v13 = vpop.eup %13450 }
0x442a   :  { %7668 = vrot.lane.b32.xlu1 %v13451_v13, %s13658_s5 }
0x442e   :  { %8022 = vrot.lane.b32.xlu1 %v15486_v11, %s13653_s9 }
0x449c   :  { %v7669_v48 = vpop.permute.xlu1 %7668 }
0x449d   :  { %v15663_v44 = vmul.f32 %v13449_v10, %v7669_v48 }
0x449f   :  { %7673 = vrot.lane.b32.xlu0 %v15663_v44, %s13659_s12 }
0x44a0   :  { %v8023_v47 = vpop.permute.xlu1 %8022 }
0x44a3   :  { %8024 = vrot.lane.b32.xlu0 %v15513_v49, %s13653_s9 }
0x4511   :  { %v7674_v25 = vpop.permute.xlu0 %7673 }
0x4512   :  { %12789 = vmatmul.mubr.msk.f32.vlgmr.msra.gmra.mrb[44].mxu0 %vm16726_vm9, %v7674_v25 }
0x4513   :  { %12793 = vmatprep.mubr.msk.f32.mxu0 %vm13657_vm0, %v13655_v21 }
0x4515   :  { %v8025_v31 = vpop.permute.xlu0 %8024 }
0x45e5   :  { %v7743_v54 = vpop.f32.mrb[44].mxu0 }
0x45e6   :  { %v15675_v60 = vadd.f32 %v13621_v51, %v7743_v54  ;;  %v12790_v7 = vpop.f32.mrb[45].mxu0 }
0x45e8   :  { %v8044_v1 = vmul.f32 %v15675_v60, %v15675_v60  ;;  %v7996_v42 = vrot.slane %v15675_v60, %v13931_v63  ;;  %v12170_v59 = vmul.f32 -1.442695, %v15675_v60  ;;  %v7770_v25 = vand.u32 2147483647, %v15675_v60 }
0x45ea   :  { %8046 = vrot.lane.b32.xlu1 %v8044_v1, %s13661_s27  ;;  %v8004_v43 = vrot.slane %v7996_v42, %v13931_v63  ;;  %v7997_v0 = vcombine.high %v7996_v42, %v7996_v42  ;;  %13452 = vpow2.f32 %v12170_v59  ;;  %v7771_v54 = vsub.f32 0.0, %v7770_v25 }
0x45ec   :  { %v15684_v55 = vrot.slane %v8004_v43, %v13936_v5  ;;  %v8011_v3 = vrot.slane %v7997_v0, %v13931_v63  ;;  %v7772_v51 = vmul.f32 1.442695, %v7771_v54 }
0x45ee   :  { %v8028_v23 = vmul.f32 %v8023_v47, %v15684_v55  ;;  %v15689_v34 = vrot.slane %v8011_v3, %v13936_v5 }
0x45f0   :  { %8032 = vrot.lane.b32.xlu0 %v8028_v23, %s13661_s27  ;;  %v8029_v27 = vmul.f32 %v8025_v31, %v15689_v34 }
0x45f2   :  { %8034 = vrot.lane.b32.xlu1 %v8029_v27, %s13661_s27 }
0x45f4   :  { %v13453_v58 = vpop.eup %13452 }
0x45f5   :  { %v7766_v46 = vadd.f32 1.0, %v13453_v58 }
0x45f7   :  { %13454 = vrcp.f32 %v7766_v46 }
0x45f8   :  { %13456 = vpow2.f32 %v7772_v51 }
0x4601   :  { %v15698_v18 = vpop.eup %13454 }
0x4602   :  { %v7833_v13 = vrot.slane %v15698_v18, %v13936_v5  ;;  %v7841_v48 = vrot.slane %v15698_v18, %v13969_v41  ;;  %v13457_v7 = vpop.eup %13456 }
0x4603   :  { %v7774_v1 = vadd.f32 1.0, %v13457_v7  ;;  %v7777_v59 = vmul.f32 -0.5, %v13457_v7 }
0x4605   :  { %13458 = vlog2.f32 %v7774_v1  ;;  %v7778_v46 = vadd.f32 1.0, %v7777_v59  ;;  %v7858_v59 = vadd.f32 %v15430_v35, %v15390_v2 }
0x465c   :  { %v8047_v45 = vpop.permute.xlu1 %8046 }
0x465d   :  { %v8049_v57 = vsel %vm632_vm5, %v8047_v45, 0.0 }
0x465e   :  { %8050 = vadd.xlane.f32.xlu0 %v8049_v57  ;;  %v13459_v57 = vpop.eup %13458 }
0x4662   :  { %v8033_v10 = vpop.permute.xlu0 %8032 }
0x4663   :  { %v8038_v32 = vsel %vm116_vm1, %v8033_v10, 0.0 }
0x4664   :  { %8039 = vadd.xlane.f32.xlu1 %v8038_v32  ;;  %v8035_v56 = vpop.permute.xlu1 %8034  ;;  %v7780_v32 = vand.u32 2147483647, %v13457_v7 }
0x4665   :  { %v8041_v36 = vsel %vm116_vm1, %v8035_v56, 0.0 }
0x4666   :  { %8042 = vadd.xlane.f32.xlu0 %v8041_v36  ;;  %v7776_v36 = vmul.f32 0.6931472, %v13459_v57  ;;  %vm7781_vm11 = vcmp.lt.f32.partialorder %v7780_v32, 0.0004427343 }
0x4675   :  { %7836 = vbcast.lane.b32.xlu1 %v7833_v13, 304 }
0x467c   :  { %7844 = vbcast.lane.b32.xlu0 %v7841_v48, 304  ;;  %v7779_v48 = vmul.f32 %v13457_v7, %v7778_v46 }
0x467e   :  { %v7782_v25 = vsel %vm7781_vm11, %v7779_v48, %v7776_v36 }
0x46eb   :  { %v8051_v42 = vpop.xlane.xlu0 %8050 }
0x46ec   :  { %v8056_v43 = vrot.slane %v8051_v42, %v13936_v5  ;;  %v8060_v0 = vrot.slane %v8051_v42, %v13969_v41  ;;  %v7769_v42 = vmax.f32 %v15675_v60, 0.0 }
0x46ee   :  { %v8063_v3 = vmul.f32 %v8056_v43, %v15546_v19  ;;  %v8064_v47 = vmul.f32 %v8060_v0, %v15542_v61 }
0x46f0   :  { %v8065_v23 = vadd.f32 1e-06, %v8063_v3  ;;  %v8066_v31 = vadd.f32 1e-06, %v8064_v47 }
0x46f1   :  { %v8040_v27 = vpop.xlane.xlu1 %8039 }
0x46f2   :  { %13460 = vrsqrt.f32 %v8065_v23 }
0x46f3   :  { %13462 = vrsqrt.f32 %v8066_v31  ;;  %v8043_v45 = vpop.xlane.xlu0 %8042 }
0x46f5   :  { %v7837_v58 = vpop.permute.xlu1 %7836 }
0x46f6   :  { %v7846_v10 = vmul.f32 %v7837_v58, %v15594_v17  ;;  %v7783_v17 = vadd.f32 %v7782_v25, %v7769_v42 }
0x46f7   :  { %v7845_v56 = vpop.permute.xlu0 %7844 }
0x46f8   :  { %v7848_v13 = vsub.f32 1.0, %v7846_v10  ;;  %v7847_v19 = vmul.f32 %v7845_v56, %v15599_v62  ;;  %v15713_v7 = vadd.f32 1.0, %v7783_v17 }
0x46fa   :  { %v7849_v61 = vsub.f32 1.0, %v7847_v19  ;;  %v7852_v51 = vrot.slane %v7848_v13, 1 }
0x46fc   :  { %v13461_v54 = vpop.eup %13460  ;;  %v7853_v1 = vrot.slane %v7849_v61, 1  ;;  %v7856_v23 = vmul.f32 %v7852_v51, %v7848_v13 }
0x46fd   :  { %v13463_v43 = vpop.eup %13462  ;;  %v8069_v0 = vmul.f32 %v13461_v54, %v8040_v27 }
0x46fe   :  { %v8070_v3 = vmul.f32 %v13463_v43, %v8043_v45  ;;  %v7857_v47 = vmul.f32 %v7853_v1, %v7849_v61  ;;  %v7859_v45 = vmul.f32 %v15430_v35, %v15390_v2 }
0x46ff   :  { %8079 = vperm.xlu1 %13154, %v8069_v0  }
0x4700   :  { %v7863_v31 = vrot.slane %v7857_v47, 7  ;;  %8082 = vperm.xlu0 %13155, %v8070_v3   ;;  %v7860_v10 = vsub.f32 %v7858_v59, %v7859_v45 }
0x4702   :  { %v7864_v62 = vsel %vm436_vm7, %v7863_v31, %v7856_v23 }
0x4703   :  { %13156 = vset.pattern.permute.xlu1 %v13663_v24 }
0x4704   :  { %7865 = vrot.lane.b32.xlu0 %v7864_v62, %s13666_s6  ;;  %8073 = vperm.xlu1 %13156, %v15713_v7  }
0x4705   :  { %13157 = vset.pattern.permute.xlu0 %v13664_v6 }
0x4708   :  { %13158 = vset.pattern.permute.xlu1 %v13664_v6 }
0x477e   :  { %v8080_v27 = vpop.permute.xlu1 %8079 }
0x477f   :  { %v8083_v57 = vpop.permute.xlu0 %8082  ;;  %v8087_v58 = vrot.slane %v8080_v27, %v13989_v28 }
0x4780   :  { %v8091_v46 = vrot.slane %v8083_v57, %v13989_v28 }
0x4782   :  { %v8092_v56 = vsel %vm436_vm7, %v8091_v46, %v8087_v58 }
0x4783   :  { %v7866_v32 = vpop.permute.xlu0 %7865  ;;  %v8074_v36 = vpop.permute.xlu1 %8073 }
0x4784   :  { %v15727_v13 = vmul.f32 %v7866_v32, %v7860_v10  ;;  %v8094_v19 = vmul.f32 %v8092_v56, %v8074_v36 }
0x4786   :  { %v7872_v48 = vrot.slane %v15727_v13, %v13936_v5  ;;  %v8095_v61 = vsel %vm632_vm5, %v8094_v19, -inf  ;;  %v7879_v2 = vrot.slane %v15727_v13, %v13969_v41  ;;  %v7928_v25 = vmax.f32 %v15727_v13, 1e-30 }
0x4787   :  { %8096 = vmax.xlane.f32.xlu1 %v8095_v61  ;;  %v7890_v51 = vrot.slane %v15727_v13, %v13931_v63 }
0x4788   :  { %7874 = vbcast.lane.b32.xlu0 %v7872_v48, 256  ;;  %13464 = vlog2.f32 %v7928_v25  ;;  %v8112_v48 = vsub.f32 1.0, %v15698_v18 }
0x4789   :  { %v7898_v42 = vrot.slane %v7890_v51, %v13931_v63  ;;  %v7891_v43 = vcombine.high %v7890_v51, %v7890_v51 }
0x478b   :  { %v7909_v3 = vrot.slane %v7898_v42, %v13936_v5  ;;  %v7905_v47 = vrot.slane %v7891_v43, %v13931_v63 }
0x478c   :  { %7881 = vbcast.lane.b32.xlu0 %v7879_v2, 256 }
0x478d   :  { %v7913_v62 = vrot.slane %v7905_v47, %v13936_v5 }
0x4792   :  { %v13465_v54 = vpop.eup %13464 }
0x4793   :  { %v7930_v1 = vmul.f32 0.6931472, %v13465_v54 }
0x4795   :  { %v7938_v0 = vrot.slane %v7930_v1, %v13931_v63  ;;  %v6815_v1 = vsel %vm632_vm5, %v15430_v35, 0.0 }
0x4797   :  { %v7946_v17 = vrot.slane %v7938_v0, %v13931_v63  ;;  %v7939_v23 = vcombine.high %v7938_v0, %v7938_v0 }
0x4799   :  { %v7957_v27 = vrot.slane %v7946_v17, %v13936_v5  ;;  %v7953_v59 = vrot.slane %v7939_v23, %v13931_v63 }
0x479b   :  { %v7961_v10 = vrot.slane %v7953_v59, %v13936_v5  ;;  %v7976_v59 = vsub.f32 1.0, %v15727_v13 }
0x47fa   :  { %v7875_v31 = vpop.permute.xlu0 %7874 }
0x47fb   :  { %vm7916_vm4 = vcmp.lt.f32.partialorder %v7909_v3, %v7875_v31  ;;  %vm7918_vm12 = vcmp.eq.f32.partialorder %v7909_v3, %v7875_v31 }
0x47fc   :  { %vm7920_vm13 = vmand %vm7918_vm12, %vm14032_vm8 }
0x47fd   :  { %vm7922_vm14 = vmor %vm7916_vm4, %vm7920_vm13  ;;  %vm16727_vm4 = vcmask 261120  }
0x47fe   :  { %v7882_v45 = vpop.permute.xlu0 %7881  ;;  %v12171_v57 = vsel %vm7922_vm14, 1.0, %v13655_v21 }
0x47ff   :  { %vm7917_vm15 = vcmp.lt.f32.partialorder %v7913_v62, %v7882_v45  ;;  %vm7919_vm6 = vcmp.eq.f32.partialorder %v7913_v62, %v7882_v45  ;;  %v7964_v58 = vmul.f32 %v12171_v57, %v7957_v27 }
0x4800   :  { %vm7921_vm9 = vmand %vm7919_vm6, %vm14032_vm8 }
0x4801   :  { %vm7923_vm11 = vmor %vm7917_vm15, %vm7921_vm9  ;;  %v7966_v46 = vsel %vm116_vm1, %v7964_v58, 0.0 }
0x4802   :  { %7967 = vadd.xlane.f32.xlu0 %v7966_v46  ;;  %v12172_v32 = vsel %vm7923_vm11, 1.0, %v13655_v21 }
0x4803   :  { %v7965_v56 = vmul.f32 %v12172_v32, %v7961_v10 }
0x4805   :  { %v7969_v36 = vsel %vm116_vm1, %v7965_v56, 0.0 }
0x4806   :  { %7970 = vadd.xlane.f32.xlu1 %v7969_v36 }
0x4814   :  { %v8097_v61 = vpop.xlane.xlu1 %8096 }
0x4815   :  { %v8098_v2 = vsub.f32 %v8094_v19, %v8097_v61 }
0x4817   :  { %8115 = vperm.xlu1 %13158, %v8112_v48   ;;  %v8099_v25 = vmul.f32 1.442695, %v8098_v2 }
0x4818   :  { %8108 = vperm.xlu0 %13157, %v15698_v18  }
0x4819   :  { %13466 = vpow2.f32 %v8099_v25 }
0x481b   :  { %13159 = vset.pattern.permute.xlu1 %v13665_v53 }
0x481c   :  { %13160 = vset.pattern.permute.xlu0 %v13662_v33 }
0x4823   :  { %v13467_v54 = vpop.eup %13466 }
0x4824   :  { %v8101_v51 = vsel %vm632_vm5, %v13467_v54, 0.0 }
0x483b   :  { %8102 = vadd.xlane.f32.xlu1 %v8101_v51 }
0x484c   :  { %8121 = vperm.xlu1 %13159, %v15698_v18  }
0x4850   :  { %13161 = vset.pattern.permute.xlu1 %v13662_v33 }
0x4870   :  { %6816 = vadd.xlane.f32.xlu1 %v6815_v1 }
0x488f   :  { %v7968_v43 = vpop.xlane.xlu0 %7967 }
0x4890   :  { %v7972_v3 = vmul.f32 1.442695, %v7968_v43 }
0x4893   :  { %v7971_v42 = vpop.xlane.xlu1 %7970 }
0x4894   :  { %v7974_v0 = vmul.f32 1.442695, %v7971_v42 }
0x4896   :  { %13468 = vpow2.f32 %v7974_v0  ;;  %v8145_v0 = vrot.slane %v15698_v18, %v13931_v63 }
0x4897   :  { %13470 = vpow2.f32 %v7972_v3  ;;  %v8116_v19 = vpop.permute.xlu1 %8115  ;;  %v8109_v46 = vpop.permute.xlu0 %8108 }
0x48a0   :  { %v13469_v47 = vpop.eup %13468 }
0x48a1   :  { %v13471_v23 = vpop.eup %13470  ;;  %v7986_v31 = vrot.slane %v13469_v47, %v13989_v28 }
0x48a2   :  { %v7982_v62 = vrot.slane %v13471_v23, %v13989_v28 }
0x48a4   :  { %v7987_v27 = vsel %vm436_vm7, %v7986_v31, %v7982_v62 }
0x48a5   :  { %v7989_v45 = vmul.f32 %v7987_v27, %v7976_v59 }
0x48a7   :  { %v8111_v10 = vmul.f32 %v8109_v46, %v7989_v45 }
0x48c8   :  { %v8103_v17 = vpop.xlane.xlu1 %8102 }
0x48c9   :  { %13472 = vrcp.f32 %v8103_v17 }
0x48cc   :  { %v8122_v36 = vpop.permute.xlu1 %8121 }
0x48d3   :  { %v13473_v57 = vpop.eup %13472 }
0x48d4   :  { %v8105_v58 = vmul.f32 %v13473_v57, %v13467_v54  ;;  %v8146_v57 = vcombine.high %v8145_v0, %v8145_v0 }
0x48d6   :  { %v8118_v32 = vmul.f32 %v8116_v19, %v8105_v58 }
0x48d8   :  { %v8119_v56 = vadd.f32 %v8118_v32, %v8111_v10 }
0x48da   :  { %v15767_v48 = vmul.f32 %v8122_v36, %v8119_v56 }
0x48dc   :  { %v8128_v61 = vrot.slane %v15767_v48, %v13936_v5  ;;  %v8135_v2 = vrot.slane %v15767_v48, %v13969_v41  ;;  %v8206_v3 = vrot.slane %v15767_v48, %v13931_v63 }
0x48de   :  { %8130 = vbcast.lane.b32.xlu0 %v8128_v61, 256  ;;  %v8214_v19 = vrot.slane %v8206_v3, %v13931_v63  ;;  %v8207_v47 = vcombine.high %v8206_v3, %v8206_v3 }
0x48e0   :  { %v8225_v27 = vrot.slane %v8214_v19, %v13936_v5  ;;  %v8221_v59 = vrot.slane %v8207_v47, %v13931_v63 }
0x48e2   :  { %8137 = vbcast.lane.b32.xlu0 %v8135_v2, 256  ;;  %v8229_v61 = vrot.slane %v8221_v59, %v13936_v5 }
0x48e6   :  { %7748 = vrot.lane.b32.xlu0 %v15675_v60, %s13666_s6 }
0x48fd   :  { %v6817_v25 = vpop.xlane.xlu1 %6816 }
0x48fe   :  { %v6818_v54 = vsub.f32 1.0, %v6817_v25 }
0x4900   :  { %v6819_v51 = vmul.f32 %v6818_v54, %v15440_v22 }
0x4902   :  { %v15777_v1 = vadd.f32 %v6819_v51, %v15430_v35  ;;  %v8153_v35 = vrot.slane %v8145_v0, %v13931_v63 }
0x4904   :  { %v8287_v42 = vrot.slane %v15777_v1, %v13969_v41  ;;  %v8280_v43 = vrot.slane %v15777_v1, %v13936_v5  ;;  %v8243_v22 = vrot.slane %v15777_v1, %v13931_v63  ;;  %v8164_v31 = vrot.slane %v8153_v35, %v13936_v5 }
0x4906   :  { %8289 = vbcast.lane.b32.xlu1 %v8287_v42, 256  ;;  %8282 = vbcast.lane.b32.xlu0 %v8280_v43, 256  ;;  %v8251_v17 = vrot.slane %v8243_v22, %v13931_v63  ;;  %v8244_v23 = vcombine.high %v8243_v22, %v8243_v22  ;;  %v8160_v43 = vrot.slane %v8146_v57, %v13931_v63 }
0x4908   :  { %v8262_v46 = vrot.slane %v8251_v17, %v13936_v5  ;;  %v8258_v10 = vrot.slane %v8244_v23, %v13931_v63  ;;  %v8168_v47 = vrot.slane %v8160_v43, %v13936_v5 }
0x490a   :  { %v8266_v51 = vrot.slane %v8258_v10, %v13936_v5 }
0x4950   :  { %v8131_v62 = vpop.permute.xlu0 %8130 }
0x4951   :  { %v8197_v18 = vsub.f32 1.0, %v8131_v62  ;;  %v8171_v45 = vmul.f32 %v8164_v31, %v8131_v62  ;;  %v8269_v36 = vmul.f32 %v8262_v46, %v8131_v62 }
0x4953   :  { %v8232_v58 = vsub.f32 %v8197_v18, %v8225_v27  ;;  %v8173_v32 = vsub.f32 1.0, %v8171_v45 }
0x4954   :  { %v8138_v56 = vpop.permute.xlu0 %8137 }
0x4955   :  { %v8198_v2 = vsub.f32 1.0, %v8138_v56  ;;  %8177 = vrot.lane.b32.xlu0 %v8173_v32, %s13667_s1  ;;  %v8234_v25 = vmul.f32 %v8232_v58, %v15471_v8  ;;  %v8270_v3 = vmul.f32 %v8266_v51, %v8138_v56  ;;  %v8186_v8 = vmul.f32 %v8138_v56, %v15689_v34 }
0x4956   :  { %v8172_v23 = vmul.f32 %v8168_v47, %v8138_v56  ;;  %v8275_v57 = vmul.f32 %v8232_v58, %v15492_v12 }
0x4957   :  { %v8233_v54 = vsub.f32 %v8198_v2, %v8229_v61  ;;  %v8271_v42 = vadd.f32 %v8269_v36, %v8234_v25 }
0x4958   :  { %v7749_v0 = vpop.permute.xlu0 %7748  ;;  %v8174_v31 = vsub.f32 1.0, %v8172_v23 }
0x4959   :  { %7750 = vrot.lane.b32.xlu1 %v7749_v0, %s13666_s6  ;;  %v15804_v22 = vmul.f32 %v14098_v38, %v8271_v42  ;;  %v8235_v35 = vmul.f32 %v8233_v54, %v15476_v30  ;;  %v8185_v30 = vmul.f32 %v8131_v62, %v15684_v55  ;;  %v8276_v59 = vmul.f32 %v8233_v54, %v15497_v4 }
0x495b   :  { %8305 = vrot.lane.b32.xlu0 %v15804_v22, %s13656_s26  ;;  %v8272_v19 = vadd.f32 %v8270_v3, %v8235_v35 }
0x495d   :  { %8191 = vrot.lane.b32.xlu1 %v8186_v8, %s13668_s30  ;;  %v15813_v17 = vmul.f32 %v14098_v38, %v8272_v19 }
0x495f   :  { %8307 = vrot.lane.b32.xlu0 %v15813_v17, %s13656_s26 }
0x4963   :  { %8179 = vrot.lane.b32.xlu0 %v8174_v31, %s13667_s1 }
0x4967   :  { %8189 = vrot.lane.b32.xlu0 %v8185_v30, %s13668_s30 }
0x4978   :  { %v8290_v34 = vpop.permute.xlu1 %8289  ;;  %v8283_v18 = vpop.permute.xlu0 %8282 }
0x4979   :  { %v8292_v45 = vmul.f32 %v8290_v34, %v8229_v61  ;;  %v8291_v46 = vmul.f32 %v8283_v18, %v8225_v27 }
0x497b   :  { %v8294_v10 = vadd.f32 %v8292_v45, %v8276_v59  ;;  %v8293_v32 = vadd.f32 %v8291_v46, %v8275_v57 }
0x497d   :  { %v15823_v2 = vmul.f32 %v14098_v38, %v8293_v32  ;;  %v15829_v4 = vmul.f32 %v14098_v38, %v8294_v10 }
0x49c7   :  { %v8178_v56 = vpop.permute.xlu0 %8177 }
0x49c8   :  { %v8183_v35 = vmul.f32 %v8178_v56, %v15486_v11 }
0x49cb   :  { %v7751_v36 = vpop.permute.xlu1 %7750 }
0x49cc   :  { %v7754_v25 = vcombine.low %v7749_v0, %v7751_v36 }
0x49cd   :  { %v8306_v51 = vpop.permute.xlu0 %8305 }
0x49ce   :  { %v7761_v55 = vrot.slane %v7754_v25, %v13837_v16  ;;  %v8311_v62 = vsel %vm116_vm1, %v15823_v2, %v8306_v51 }
0x49cf   :  { %12792 = vmatpush3.msra.mxu0 %v8311_v62  ;;  %v8192_v3 = vpop.permute.xlu1 %8191 }
0x49d0   :  { %12794 = vmatmul.mubr.msk.f32.vlgmr.msra.gmra.mrb[46].mxu0 %vm116_vm1, %v15603_v29  ;;  %12796 = vmatprep.subr.mxu0 %v13655_v21  ;;  %v8613_v12 = vmul.f32 %v7761_v55, %v7761_v55  ;;  %v7762_v27 = vcombine.high %v7761_v55, %v13655_v21 }
0x49d1   :  { %v8308_v58 = vpop.permute.xlu0 %8307  ;;  %12798 = vmatprep.mubr.msk.f32.mxu0 %vm13657_vm0, %v13655_v21 }
0x49d2   :  { %v8312_v61 = vsel %vm116_vm1, %v15829_v4, %v8308_v58  ;;  %v8615_v54 = vsel %vm632_vm5, %v8613_v12, 0.0  ;;  %v8614_v42 = vmul.f32 %v7762_v27, %v7762_v27 }
0x49d3   :  { %8616 = vadd.xlane.f32.xlu0 %v8615_v54  ;;  %12797 = vmatpush3.msra.mxu0 %v8312_v61 }
0x49d4   :  { %12799 = vmatmul.mubr.msk.f32.vlgmr.msra.gmra.mrb[48].mxu0 %vm116_vm1, %v15611_v39  ;;  %v8618_v29 = vsel %vm632_vm5, %v8614_v42, 0.0  ;;  %12806 = vmatprep.subr.mxu0 %v13655_v21 }
0x49d5   :  { %8619 = vadd.xlane.f32.xlu1 %v8618_v29  ;;  %v8180_v43 = vpop.permute.xlu0 %8179  ;;  %12808 = vmatprep.mubr.msk.f32.mxu0 %vm13657_vm0, %v13655_v21 }
0x49d6   :  { %v8184_v0 = vmul.f32 %v8180_v43, %v15513_v49  ;;  %v8704_v43 = vrot.slane %v15713_v7, %v13969_v41 }
0x49d8   :  { %v15848_v8 = vadd.f32 %v8192_v3, %v8184_v0  ;;  %v8696_v3 = vrot.slane %v15713_v7, %v13936_v5 }
0x49d9   :  { %v8190_v19 = vpop.permute.xlu0 %8189 }
0x49da   :  { %v15850_v47 = vadd.f32 %v8190_v19, %v8183_v35  ;;  %12807 = vmatpush3.xpose.msk.msra.mxu0 %vm116_vm1, %v15848_v8  ;;  %v8606_v49 = vmul.f32 %v15848_v8, %v15848_v8 }
0x49db   :  { %12816 = vmatprep.subr.mxu0 %v13655_v21 }
0x49dc   :  { %12802 = vmatpush3.xpose.msk.msra.mxu1 %vm116_vm1, %v15850_v47  ;;  %v8605_v39 = vmul.f32 %v15850_v47, %v15850_v47  ;;  %v8610_v23 = vsel %vm116_vm1, %v8606_v49, 0.0 }
0x49dd   :  { %12809 = vmatmul.mubr.msk.f32.vlgmr.msra.gmra.mrb[50].mxu0 %vm116_vm1, %v7762_v27  ;;  %12811 = vmatprep.subr.mxu1 %v13655_v21 }
0x49de   :  { %12817 = vmatpush3.msra.mxu0 %v15848_v8  ;;  %v8607_v11 = vsel %vm116_vm1, %v8605_v39, 0.0  ;;  %12818 = vmatprep.mubr.msk.f32.mxu0 %vm13657_vm0, %v13655_v21 }
0x49df   :  { %8608 = vadd.xlane.f32.xlu0 %v8607_v11  ;;  %12804 = vmatmul.mubr.msk.f32.vlgmr.msra.gmra.mrb[48].mxu1 %vm116_vm1, %v7761_v55 }
0x49e0   :  { %12812 = vmatpush3.msra.mxu1 %v15850_v47  ;;  %12813 = vmatprep.mubr.msk.f32.mxu1 %vm13657_vm0, %v13655_v21 }
0x49e1   :  { %13063 = vmatprep.subr.bf16.mxu1 %v13654_v14  ;;  %13066 = vmatprep.subr.bf16.mxu0 %v13654_v14 }
0x49e3   :  { %8611 = vadd.xlane.f32.xlu0 %v8610_v23 }
0x49e6   :  { %7789 = vrot.lane.b32.xlu1 %v15675_v60, %s13669_s15 }
0x49f9   :  { %7785 = vrot.lane.b32.xlu0 %v15675_v60, %s16720_s29 }
0x4a60   :  { %v8617_v31 = vpop.xlane.xlu0 %8616 }
0x4a61   :  { %v8626_v30 = vrot.slane %v8617_v31, %v13936_v5  ;;  %v8630_v34 = vrot.slane %v8617_v31, %v13969_v41 }
0x4a62   :  { %v8620_v18 = vpop.xlane.xlu1 %8619 }
0x4a63   :  { %v8638_v46 = vrot.slane %v8620_v18, %v13969_v41  ;;  %v8634_v32 = vrot.slane %v8620_v18, %v13936_v5 }
0x4a66   :  { %v7790_v27 = vpop.permute.xlu1 %7789 }
0x4a6c   :  { %v15880_v59 = vpop.xlane.xlu0 %8608 }
0x4a6d   :  { %v8643_v45 = vmul.f32 %v8626_v30, %v15880_v59  ;;  %v8644_v57 = vmul.f32 %v8630_v34, %v15880_v59 }
0x4a6f   :  { %v8647_v10 = vadd.f32 1e-06, %v8643_v45  ;;  %v8648_v36 = vadd.f32 1e-06, %v8644_v57 }
0x4a70   :  { %v15886_v56 = vpop.xlane.xlu0 %8611 }
0x4a71   :  { %13474 = vrsqrt.f32 %v8647_v10  ;;  %v8646_v25 = vmul.f32 %v8638_v46, %v15886_v56  ;;  %v8645_v51 = vmul.f32 %v8634_v32, %v15886_v56 }
0x4a72   :  { %13476 = vrsqrt.f32 %v8648_v36 }
0x4a73   :  { %v8650_v55 = vadd.f32 1e-06, %v8646_v25  ;;  %v8649_v58 = vadd.f32 1e-06, %v8645_v51 }
0x4a74   :  { %v7786_v62 = vpop.permute.xlu0 %7785 }
0x4a75   :  { %v7788_v12 = vmax.f32 %v15675_v60, %v7786_v62  ;;  %13478 = vrsqrt.f32 %v8650_v55 }
0x4a76   :  { %13480 = vrsqrt.f32 %v8649_v58 }
0x4a77   :  { %v7792_v61 = vmax.f32 %v7788_v12, %v7790_v27 }
0x4a79   :  { %7797 = vrot.lane.b32.xlu1 %v7792_v61, %s16721_s8 }
0x4a7b   :  { %v13475_v54 = vpop.eup %13474 }
0x4a7c   :  { %8660 = vperm.xlu0 %13160, %v13475_v54   ;;  %v13477_v42 = vpop.eup %13476 }
0x4a7d   :  { %7803 = vrot.lane.b32.xlu1 %v7792_v61, %s16722_s4 }
0x4a7f   :  { %v13479_v29 = vpop.eup %13478 }
0x4a80   :  { %8669 = vperm.xlu0 %13160, %v13479_v29   ;;  %v13481_v0 = vpop.eup %13480 }
0x4a81   :  { %8663 = vperm.xlu1 %13161, %v13477_v42  }
0x4a84   :  { %8707 = vbcast.lane.b32.xlu0 %v8704_v43, 312 }
0x4a85   :  { %8666 = vperm.xlu1 %13161, %v13481_v0   ;;  %13162 = vset.pattern.permute.xlu0 %v13663_v24 }
0x4a89   :  { %8699 = vbcast.lane.b32.xlu1 %v8696_v3, 312 }
0x4aa3   :  { %v15898_v35 = vpop.f32.mrb[46].mxu0 }
0x4aa4   :  { %v12795_v19 = vpop.f32.mrb[47].mxu0 }
0x4aa7   :  { %v15900_v39 = vpop.f32.mrb[48].mxu0 }
0x4aa8   :  { %v12800_v11 = vpop.f32.mrb[49].mxu0 }
0x4ab0   :  { %v8601_v49 = vpop.f32.mrb[50].mxu0 }
0x4ab1   :  { %v12810_v23 = vpop.f32.mrb[51].mxu0 }
0x4ab2   :  { %v8525_v31 = vpop.f32.mrb[48].mxu1 }
0x4ab3   :  { %v12805_v30 = vpop.f32.mrb[49].mxu1 }
0x4aeb   :  { %v7798_v34 = vpop.permute.xlu1 %7797 }
0x4aec   :  { %v7800_v18 = vsub.f32 %v15675_v60, %v7798_v34  ;;  %v7793_v34 = vsub.f32 %v15675_v60, %v7792_v61 }
0x4aee   :  { %v7801_v45 = vmul.f32 1.442695, %v7800_v18  ;;  %v7794_v18 = vmul.f32 1.442695, %v7793_v34 }
0x4aef   :  { %v7804_v57 = vpop.permute.xlu1 %7803 }
0x4af0   :  { %13482 = vpow2.f32 %v7801_v45  ;;  %v7806_v46 = vsub.f32 %v15675_v60, %v7804_v57 }
0x4af2   :  { %v7807_v7 = vmul.f32 1.442695, %v7806_v46 }
0x4af4   :  { %13484 = vpow2.f32 %v7807_v7 }
0x4af5   :  { %13486 = vpow2.f32 %v7794_v18 }
0x4afa   :  { %v13483_v10 = vpop.eup %13482 }
0x4afb   :  { %7810 = vrot.lane.b32.xlu1 %v13483_v10, %s16720_s29  ;;  %v8661_v25 = vpop.permute.xlu0 %8660 }
0x4afc   :  { %v8674_v54 = vrot.slane %v8661_v25, %v13989_v28 }
0x4afe   :  { %v13485_v32 = vpop.eup %13484 }
0x4aff   :  { %7815 = vrot.lane.b32.xlu0 %v13485_v32, %s13669_s15  ;;  %v8670_v55 = vpop.permute.xlu0 %8669  ;;  %v13487_v57 = vpop.eup %13486 }
0x4b00   :  { %v8664_v36 = vpop.permute.xlu1 %8663  ;;  %v8686_v12 = vrot.slane %v8670_v55, %v13989_v28 }
0x4b01   :  { %v8678_v27 = vrot.slane %v8664_v36, %v13989_v28 }
0x4b03   :  { %v8687_v42 = vsel %vm436_vm7, %v8678_v27, %v8674_v54  ;;  %v8708_v0 = vpop.permute.xlu0 %8707 }
0x4b04   :  { %v8667_v51 = vpop.permute.xlu1 %8666  ;;  %v8691_v3 = vmul.f32 %v8687_v42, %v8525_v31 }
0x4b05   :  { %v8682_v62 = vrot.slane %v8667_v51, %v13989_v28 }
0x4b07   :  { %v8688_v58 = vsel %vm436_vm7, %v8686_v12, %v8682_v62 }
0x4b08   :  { %v8692_v29 = vmul.f32 %v8688_v58, %v8601_v49  ;;  %v8700_v43 = vpop.permute.xlu1 %8699 }
0x4b09   :  { %v8709_v11 = vmul.f32 %v8700_v43, %v8691_v3 }
0x4b0a   :  { %v8710_v19 = vmul.f32 %v8708_v0, %v8692_v29 }
0x4b0b   :  { %v8711_v30 = vsel %vm632_vm5, %v8709_v11, -inf }
0x4b0c   :  { %v8714_v23 = vsel %vm632_vm5, %v8710_v19, -inf }
0x4b1e   :  { %8715 = vmax.xlane.f32.xlu0 %v8714_v23 }
0x4b1f   :  { %8712 = vmax.xlane.f32.xlu1 %v8711_v30 }
0x4b6d   :  { %v7811_v45 = vpop.permute.xlu1 %7810 }
0x4b6e   :  { %v7813_v46 = vadd.f32 %v13487_v57, %v7811_v45 }
0x4b71   :  { %v7816_v7 = vpop.permute.xlu0 %7815 }
0x4b72   :  { %v7818_v49 = vadd.f32 %v7816_v7, %v7813_v46 }
0x4b74   :  { %13488 = vrcp.f32 %v7818_v49 }
0x4b7e   :  { %v13489_v36 = vpop.eup %13488 }
0x4b7f   :  { %7826 = vrot.lane.b32.xlu1 %v13489_v36, %s16722_s4  ;;  %7822 = vrot.lane.b32.xlu0 %v13489_v36, %s16721_s8  ;;  %v7820_v31 = vmul.f32 %v13489_v36, %v13487_v57 }
0x4b81   :  { %v8744_v34 = vrot.slane %v7820_v31, %v13969_v41 }
0x4bab   :  { %v8716_v25 = vpop.xlane.xlu0 %8715 }
0x4bac   :  { %v8718_v12 = vsub.f32 %v8710_v19, %v8716_v25  ;;  %v8713_v27 = vpop.xlane.xlu1 %8712 }
0x4bad   :  { %v8717_v54 = vsub.f32 %v8709_v11, %v8713_v27  ;;  %v8736_v11 = vrot.slane %v7820_v31, %v13936_v5 }
0x4bae   :  { %v8721_v58 = vmul.f32 1.442695, %v8718_v12 }
0x4baf   :  { %v8719_v42 = vmul.f32 1.442695, %v8717_v54 }
0x4bb0   :  { %13490 = vpow2.f32 %v8721_v58 }
0x4bb1   :  { %13492 = vpow2.f32 %v8719_v42 }
0x4bba   :  { %v13491_v29 = vpop.eup %13490 }
0x4bbb   :  { %v8726_v43 = vsel %vm632_vm5, %v13491_v29, 0.0  ;;  %v13493_v0 = vpop.eup %13492 }
0x4bf1   :  { %v7823_v51 = vpop.permute.xlu0 %7822  ;;  %v7827_v3 = vpop.permute.xlu1 %7826 }
0x4bf2   :  { %v7825_v55 = vmul.f32 %v13483_v10, %v7823_v51  ;;  %v8723_v10 = vsel %vm632_vm5, %v13493_v0, 0.0  ;;  %v7829_v23 = vmul.f32 %v13485_v32, %v7827_v3 }
0x4bf4   :  { %v8754_v62 = vrot.slane %v7825_v55, %v13936_v5  ;;  %v8762_v61 = vrot.slane %v7825_v55, %v13969_v41  ;;  %v8782_v30 = vrot.slane %v7829_v23, %v13936_v5  ;;  %v8790_v19 = vrot.slane %v7829_v23, %v13969_v41 }
0x4bf6   :  { %8765 = vbcast.lane.b32.xlu1 %v8762_v61, 322  ;;  %8757 = vbcast.lane.b32.xlu0 %v8754_v62, 322 }
0x4c15   :  { %8727 = vadd.xlane.f32.xlu0 %v8726_v43 }
0x4c1a   :  { %8724 = vadd.xlane.f32.xlu1 %v8723_v10 }
0x4c2b   :  { %8785 = vbcast.lane.b32.xlu1 %v8782_v30, 324  ;;  %8793 = vbcast.lane.b32.xlu0 %v8790_v19, 324 }
0x4c2f   :  { %8739 = vbcast.lane.b32.xlu1 %v8736_v11, 320  ;;  %8747 = vbcast.lane.b32.xlu0 %v8744_v34, 320 }
0x4c68   :  { %v8758_v18 = vpop.permute.xlu0 %8757  ;;  %v8766_v57 = vpop.permute.xlu1 %8765 }
0x4ca2   :  { %v8728_v45 = vpop.xlane.xlu0 %8727 }
0x4ca3   :  { %13494 = vrcp.f32 %v8728_v45 }
0x4ca6   :  { %v8794_v36 = vpop.permute.xlu0 %8793 }
0x4ca7   :  { %v8725_v46 = vpop.xlane.xlu1 %8724  ;;  %v8796_v55 = vmul.f32 %v8794_v36, %v15900_v39 }
0x4ca8   :  { %13496 = vrcp.f32 %v8725_v46 }
0x4caa   :  { %v8748_v12 = vpop.permute.xlu0 %8747 }
0x4cab   :  { %v8786_v31 = vpop.permute.xlu1 %8785  ;;  %v8750_v58 = vmul.f32 %v8748_v12, %v15900_v39  ;;  %v13622_v39 = vld [vmem:[%s16669_s10 + $0x30] sm:$0xff] }
0x4cac   :  { %v8795_v61 = vmul.f32 %v8786_v31, %v15898_v35 }
0x4cad   :  { %v13495_v7 = vpop.eup %13494 }
0x4cae   :  { %v8732_v32 = vmul.f32 %v13495_v7, %v13491_v29 }
0x4caf   :  { %v8740_v54 = vpop.permute.xlu1 %8739 }
0x4cb0   :  { %v8768_v49 = vmul.f32 %v8766_v57, %v8732_v32  ;;  %v8749_v10 = vmul.f32 %v8740_v54, %v15898_v35 }
0x4cb2   :  { %v13497_v25 = vpop.eup %13496  ;;  %8773 = vrot.lane.b32.xlu0 %v8768_v49, %s13656_s26 }
0x4cb3   :  { %v8731_v51 = vmul.f32 %v13497_v25, %v13493_v0 }
0x4cb5   :  { %v8767_v62 = vmul.f32 %v8758_v18, %v8731_v51 }
0x4cb6   :  { %8801 = vrot.lane.b32.xlu0 %v8796_v55, %s13656_s26 }
0x4cb7   :  { %8771 = vrot.lane.b32.xlu1 %v8767_v62, %s13656_s26 }
0x4cbb   :  { %8799 = vrot.lane.b32.xlu1 %v8795_v61, %s13656_s26 }
0x4d24   :  { %v8774_v27 = vpop.permute.xlu0 %8773 }
0x4d25   :  { %v8778_v42 = vadd.f32 %v8774_v27, %v8750_v58  ;;  %v13623_v27 = vld [vmem:[%s16670_s11] ss:$0 sm:$0xff] }
0x4d28   :  { %v8802_v29 = vpop.permute.xlu0 %8801 }
0x4d29   :  { %v15932_v43 = vadd.f32 %v8802_v29, %v8778_v42  ;;  %v8772_v0 = vpop.permute.xlu1 %8771 }
0x4d2a   :  { %v8777_v3 = vadd.f32 %v8772_v0, %v8749_v10 }
0x4d2b   :  { %8883 = vrot.lane.b32.xlu0 %v15932_v43, %s13666_s6 }
0x4d2d   :  { %v8800_v23 = vpop.permute.xlu1 %8799 }
0x4d2e   :  { %v15937_v30 = vadd.f32 %v8800_v23, %v8777_v3 }
0x4d30   :  { %8808 = vrot.lane.b32.xlu1 %v15937_v30, %s13666_s6 }
0x4d9d   :  { %v15941_v19 = vpop.permute.xlu0 %8883 }
0x4d9e   :  { %12819 = vmatmul.mubr.msk.f32.vlgmr.msra.gmra.mrb[52].mxu0 %vm116_vm1, %v15941_v19 }
0x4d9f   :  { %13068 = vmatpush3.bf16.msra.mxu0 %v13823_v9  ;;  %12842 = vmatprep.mubr.msk.f32.mxu0 %vm13657_vm0, %v13655_v21 }
0x4da0   :  { %13069 = vmatprep.subr.bf16.mxu0 %v13654_v14 }
0x4da2   :  { %v15949_v35 = vpop.permute.xlu1 %8808 }
0x4da3   :  { %12814 = vmatmul.mubr.msk.f32.vlgmr.msra.gmra.mrb[50].mxu1 %vm116_vm1, %v15949_v35  ;;  %13071 = vmatpush3.bf16.msra.mxu0 %v13834_v15 }
0x4da4   :  { %13065 = vmatpush3.bf16.msra.mxu1 %v14273_v40  ;;  %12825 = vmatprep.mubr.msk.f32.mxu1 %vm13657_vm0, %v13655_v21 }
0x4da5   :  { %13072 = vmatprep.subr.bf16.mxu0 %v13654_v14  ;;  %13075 = vmatprep.subr.bf16.mxu1 %v13654_v14 }
0x4da7   :  { %13074 = vmatpush3.bf16.msra.mxu0 %v13848_v20 }
0x4da8   :  { %12840 = vmatprep.subr.mxu0 %v13655_v21 }
0x4dab   :  { %12841 = vmatpush3.msra.mxu0 %v13622_v39 }
0x4dac   :  { %12866 = vmatprep.subr.mxu0 %v13655_v21 }
0x4e71   :  { %v8953_v11 = vpop.f32.mrb[52].mxu0 }
0x4e72   :  { %v12820_v34 = vpop.f32.mrb[53].mxu0 }
0x4e76   :  { %v8878_v18 = vpop.f32.mrb[50].mxu1 }
0x4e77   :  { %v8957_v45 = vcombine.low %v8878_v18, %v8953_v11  ;;  %v12815_v57 = vpop.f32.mrb[51].mxu1 }
0x4e79   :  { %v8964_v46 = vrot.slane %v8957_v45, %v13837_v16 }
0x4e7b   :  { %v8965_v7 = vcombine.high %v8964_v46, %v13655_v21 }
0x4e7d   :  { %8967 = vrot.lane.b32.xlu1 %v8965_v7, %s13656_s26  ;;  %v13624_v7 = vld [vmem:[%s16672_s13] ss:$0 sm:$0xff] }
0x4e81   :  { %9052 = vrot.lane.b32.xlu1 %v15663_v44, %s13667_s1  ;;  %v12182_v44 = vld [vmem:[%s16711_s2 + $0xc] sm:$0x3] }
0x4eef   :  { %v8968_v32 = vpop.permute.xlu1 %8967 }
0x4ef0   :  { %v8970_v49 = vsel %vm116_vm1, %v8964_v46, %v8968_v32 }
0x4ef1   :  { %9049 = vrot.lane.b32.xlu0 %v8970_v49, %s13656_s26  ;;  %12826 = vmatmul.mubr.msk.f32.vlgmr.msra.gmra.mrb[52].mxu1 %vm1561_vm10, %v8970_v49 }
0x4ef2   :  { %13077 = vmatpush3.bf16.msra.mxu1 %v13894_v50  ;;  %12853 = vmatprep.mubr.msk.f32.mxu1 %vm13657_vm0, %v13655_v21 }
0x4ef3   :  { %13078 = vmatprep.subr.bf16.mxu1 %v13654_v14  ;;  %v9053_v25 = vpop.permute.xlu1 %9052 }
0x4ef6   :  { %13080 = vmatpush3.bf16.msra.mxu1 %v13900_v52 }
0x4ef7   :  { %12856 = vmatprep.subr.mxu1 %v13655_v21 }
0x4f63   :  { %v9050_v36 = vpop.permute.xlu0 %9049 }
0x4f64   :  { %v9055_v51 = vsel %vm116_vm1, %v12182_v44, %v9050_v36 }
0x4f65   :  { %v9056_v55 = vsel %vm127_vm2, %v9055_v51, %v9053_v25 }
0x4f66   :  { %12843 = vmatmul.mubr.msk.f32.vlgmr.msra.gmra.mrb[54].mxu0 %vm135_vm3, %v9056_v55 }
0x4f67   :  { %12868 = vmatprep.mubr.msk.f32.mxu0 %vm13657_vm0, %v13655_v21 }
0x4fc4   :  { %v9040_v62 = vpop.f32.mrb[52].mxu1 }
0x4fc5   :  { %v9044_v31 = vadd.f32 %v9040_v62, %v15675_v60  ;;  %v12827_v61 = vpop.f32.mrb[53].mxu1 }
0x4fc7   :  { %9046 = vst.msk [vmem:[#allocation2 + $0xa] sm:$0x3] %vm632_vm5, %v9044_v31 }
0x5039   :  { %v9126_v12 = vpop.f32.mrb[54].mxu0 }
0x503a   :  { %v9127_v58 = vadd.f32 %v13623_v27, %v9126_v12  ;;  %v12844_v54 = vpop.f32.mrb[55].mxu0 }
0x503c   :  { %13498 = vtanh.f32 %v9127_v58  ;;  %v12184_v29 = vmul.f32 -1.442695, %v9127_v58 }
0x503e   :  { %13500 = vpow2.f32 %v12184_v29 }
0x5046   :  { %v13499_v42 = vpop.eup %13498 }
0x5047   :  { %9139 = vrot.lane.b32.xlu0 %v13499_v42, %s13658_s5 }
0x5048   :  { %v13501_v0 = vpop.eup %13500 }
0x5049   :  { %v9133_v10 = vadd.f32 1.0, %v13501_v0 }
0x504b   :  { %13502 = vrcp.f32 %v9133_v10 }
0x5055   :  { %v13503_v60 = vpop.eup %13502 }
0x5056   :  { %v9137_v39 = vmul.f32 %v13503_v60, %v15657_v37 }
0x50b9   :  { %v9140_v3 = vpop.permute.xlu0 %9139 }
0x50ba   :  { %v9142_v23 = vmul.f32 %v13503_v60, %v9140_v3 }
0x50bc   :  { %9144 = vrot.lane.b32.xlu1 %v9142_v23, %s13658_s5 }
0x512e   :  { %v9145_v11 = vpop.permute.xlu1 %9144 }
0x512f   :  { %v15995_v34 = vadd.f32 %v9145_v11, %v9137_v39 }
0x5131   :  { %13504 = vtanh.f32 %v15995_v34 }
0x513b   :  { %v13505_v18 = vpop.eup %13504 }
0x513c   :  { %9150 = vrot.lane.b32.xlu0 %v13505_v18, %s13658_s5 }
0x5140   :  { %9504 = vrot.lane.b32.xlu0 %v15850_v47, %s13653_s9 }
0x51ae   :  { %v9151_v45 = vpop.permute.xlu0 %9150 }
0x51af   :  { %v16001_v57 = vmul.f32 %v13503_v60, %v9151_v45 }
0x51b1   :  { %9155 = vrot.lane.b32.xlu1 %v16001_v57, %s13659_s12 }
0x51b2   :  { %v9505_v31 = vpop.permute.xlu0 %9504 }
0x51b5   :  { %9506 = vrot.lane.b32.xlu1 %v15848_v8, %s13653_s9 }
0x5223   :  { %v9156_v37 = vpop.permute.xlu1 %9155 }
0x5224   :  { %12854 = vmatmul.mubr.msk.f32.vlgmr.msra.gmra.mrb[54].mxu1 %vm16727_vm4, %v9156_v37 }
0x5225   :  { %12858 = vmatprep.mubr.msk.f32.mxu1 %vm13657_vm0, %v13655_v21 }
0x5227   :  { %v9507_v27 = vpop.permute.xlu1 %9506 }
0x52f7   :  { %v9225_v46 = vpop.f32.mrb[54].mxu1 }
0x52f8   :  { %v16013_v32 = vadd.f32 %v13624_v7, %v9225_v46  ;;  %v12855_v49 = vpop.f32.mrb[55].mxu1 }
0x52fa   :  { %v9526_v44 = vmul.f32 %v16013_v32, %v16013_v32  ;;  %v9478_v36 = vrot.slane %v16013_v32, %v13931_v63  ;;  %v12186_v54 = vmul.f32 -1.442695, %v16013_v32  ;;  %v9252_v42 = vand.u32 2147483647, %v16013_v32 }
0x52fc   :  { %9528 = vrot.lane.b32.xlu0 %v9526_v44, %s13661_s27  ;;  %v9486_v25 = vrot.slane %v9478_v36, %v13931_v63  ;;  %v9479_v51 = vcombine.high %v9478_v36, %v9478_v36  ;;  %13506 = vpow2.f32 %v12186_v54  ;;  %v9253_v29 = vsub.f32 0.0, %v9252_v42 }
0x52fe   :  { %v16022_v55 = vrot.slane %v9486_v25, %v13936_v5  ;;  %v9493_v62 = vrot.slane %v9479_v51, %v13931_v63  ;;  %v9254_v0 = vmul.f32 1.442695, %v9253_v29 }
0x5300   :  { %v9510_v61 = vmul.f32 %v9505_v31, %v16022_v55  ;;  %v16027_v12 = vrot.slane %v9493_v62, %v13936_v5  ;;  %13508 = vpow2.f32 %v9254_v0 }
0x5302   :  { %9514 = vrot.lane.b32.xlu1 %v9510_v61, %s13661_s27  ;;  %v9511_v58 = vmul.f32 %v9507_v27, %v16027_v12  ;;  %v9251_v27 = vmax.f32 %v16013_v32, 0.0 }
0x5304   :  { %9516 = vrot.lane.b32.xlu0 %v9511_v58, %s13661_s27 }
0x5306   :  { %v13507_v10 = vpop.eup %13506 }
0x5307   :  { %v9248_v60 = vadd.f32 1.0, %v13507_v10 }
0x5309   :  { %13510 = vrcp.f32 %v9248_v60 }
0x530a   :  { %v13509_v39 = vpop.eup %13508 }
0x530b   :  { %v9256_v37 = vadd.f32 1.0, %v13509_v39  ;;  %v9259_v44 = vmul.f32 -0.5, %v13509_v39  ;;  %v9262_v51 = vand.u32 2147483647, %v13509_v39 }
0x530d   :  { %13512 = vlog2.f32 %v9256_v37  ;;  %v9260_v25 = vadd.f32 1.0, %v9259_v44  ;;  %vm9263_vm12 = vcmp.lt.f32.partialorder %v9262_v51, 0.0004427343 }
0x530f   :  { %v9261_v31 = vmul.f32 %v13509_v39, %v9260_v25 }
0x5313   :  { %v16037_v7 = vpop.eup %13510 }
0x5314   :  { %v9315_v49 = vrot.slane %v16037_v7, %v13936_v5  ;;  %v9323_v58 = vrot.slane %v16037_v7, %v13969_v41 }
0x5317   :  { %v13513_v36 = vpop.eup %13512 }
0x5318   :  { %v9258_v62 = vmul.f32 0.6931472, %v13513_v36 }
0x531a   :  { %v9264_v61 = vsel %vm9263_vm12, %v9261_v31, %v9258_v62 }
0x531b   :  { %v9265_v54 = vadd.f32 %v9264_v61, %v9251_v27 }
0x531d   :  { %v16044_v42 = vadd.f32 1.0, %v9265_v54 }
0x536e   :  { %v9529_v3 = vpop.permute.xlu0 %9528 }
0x536f   :  { %v9531_v23 = vsel %vm632_vm5, %v9529_v3, 0.0 }
0x5370   :  { %9532 = vadd.xlane.f32.xlu1 %v9531_v23 }
0x5374   :  { %v9515_v11 = vpop.permute.xlu1 %9514 }
0x5375   :  { %v9520_v18 = vsel %vm116_vm1, %v9515_v11, 0.0 }
0x5376   :  { %9521 = vadd.xlane.f32.xlu0 %v9520_v18  ;;  %v9517_v45 = vpop.permute.xlu0 %9516 }
0x5377   :  { %v9523_v46 = vsel %vm116_vm1, %v9517_v45, 0.0 }
0x537a   :  { %9524 = vadd.xlane.f32.xlu0 %v9523_v46 }
0x5381   :  { %9318 = vbcast.lane.b32.xlu1 %v9315_v49, 304 }
0x5390   :  { %9326 = vbcast.lane.b32.xlu0 %v9323_v58, 304 }
0x5394   :  { %9555 = vperm.xlu0 %13162, %v16044_v42  }
0x5398   :  { %13164 = vset.pattern.permute.xlu0 %v13664_v6 }
0x53fd   :  { %v9533_v29 = vpop.xlane.xlu1 %9532 }
0x53fe   :  { %v9538_v0 = vrot.slane %v9533_v29, %v13936_v5  ;;  %v9542_v10 = vrot.slane %v9533_v29, %v13969_v41  ;;  %v9341_v29 = vmul.f32 %v15767_v48, %v15727_v13 }
0x5400   :  { %v9545_v60 = vmul.f32 %v9538_v0, %v15880_v59  ;;  %v9546_v3 = vmul.f32 %v9542_v10, %v15886_v56 }
0x5401   :  { %v9319_v18 = vpop.permute.xlu1 %9318 }
0x5402   :  { %v9547_v23 = vadd.f32 1e-06, %v9545_v60  ;;  %v9548_v39 = vadd.f32 1e-06, %v9546_v3  ;;  %v9328_v37 = vmul.f32 %v9319_v18, %v15937_v30  ;;  %v9340_v30 = vadd.f32 %v15767_v48, %v15727_v13 }
0x5403   :  { %v9522_v11 = vpop.xlane.xlu0 %9521 }
0x5404   :  { %13514 = vrsqrt.f32 %v9547_v23  ;;  %v9330_v36 = vsub.f32 1.0, %v9328_v37  ;;  %v9342_v23 = vsub.f32 %v9340_v30, %v9341_v29 }
0x5405   :  { %13516 = vrsqrt.f32 %v9548_v39 }
0x5406   :  { %v9334_v56 = vrot.slane %v9330_v36, 1 }
0x5407   :  { %v9525_v45 = vpop.xlane.xlu0 %9524 }
0x5408   :  { %v9338_v58 = vmul.f32 %v9334_v56, %v9330_v36 }
0x540b   :  { %v9327_v46 = vpop.permute.xlu0 %9326 }
0x540c   :  { %v9329_v49 = vmul.f32 %v9327_v46, %v15932_v43 }
0x540e   :  { %v13515_v44 = vpop.eup %13514  ;;  %v9331_v25 = vsub.f32 1.0, %v9329_v49 }
0x540f   :  { %v9551_v51 = vmul.f32 %v13515_v44, %v9522_v11  ;;  %v13517_v62 = vpop.eup %13516 }
0x5410   :  { %v9335_v59 = vrot.slane %v9331_v25, 1  ;;  %v9552_v61 = vmul.f32 %v13517_v62, %v9525_v45 }
0x5411   :  { %9561 = vperm.xlu1 %13161, %v9551_v51  }
0x5412   :  { %v9339_v31 = vmul.f32 %v9335_v59, %v9331_v25 }
0x5413   :  { %v9556_v3 = vpop.permute.xlu0 %9555 }
0x5414   :  { %v9345_v27 = vrot.slane %v9339_v31, 7 }
0x5415   :  { %9564 = vperm.xlu1 %13161, %v9552_v61  }
0x5416   :  { %v9346_v54 = vsel %vm436_vm7, %v9345_v27, %v9338_v58 }
0x5419   :  { %9347 = vrot.lane.b32.xlu1 %v9346_v54, %s13666_s6 }
0x541a   :  { %13163 = vset.pattern.permute.xlu1 %v13664_v6 }
0x5490   :  { %v9562_v43 = vpop.permute.xlu1 %9561 }
0x5491   :  { %v9569_v10 = vrot.slane %v9562_v43, %v13989_v28 }
0x5494   :  { %v9565_v0 = vpop.permute.xlu1 %9564 }
0x5495   :  { %v9573_v60 = vrot.slane %v9565_v0, %v13989_v28 }
0x5497   :  { %v9574_v39 = vsel %vm436_vm7, %v9573_v60, %v9569_v10 }
0x5498   :  { %v9348_v11 = vpop.permute.xlu1 %9347  ;;  %v9576_v18 = vmul.f32 %v9574_v39, %v9556_v3 }
0x5499   :  { %v16064_v45 = vmul.f32 %v9348_v11, %v9342_v23 }
0x549a   :  { %v9577_v37 = vsel %vm632_vm5, %v9576_v18, -inf }
0x549b   :  { %9578 = vmax.xlane.f32.xlu1 %v9577_v37  ;;  %v9354_v46 = vrot.slane %v16064_v45, %v13936_v5  ;;  %v9361_v13 = vrot.slane %v16064_v45, %v13969_v41  ;;  %v9410_v49 = vmax.f32 %v16064_v45, 1e-30  ;;  %v9372_v36 = vrot.slane %v16064_v45, %v13931_v63 }
0x549d   :  { %9356 = vbcast.lane.b32.xlu0 %v9354_v46, 256  ;;  %13518 = vlog2.f32 %v9410_v49  ;;  %v9380_v51 = vrot.slane %v9372_v36, %v13931_v63  ;;  %v9373_v62 = vcombine.high %v9372_v36, %v9372_v36  ;;  %v9594_v36 = vsub.f32 1.0, %v16037_v7 }
0x549f   :  { %v9391_v56 = vrot.slane %v9380_v51, %v13936_v5  ;;  %v9387_v31 = vrot.slane %v9373_v62, %v13931_v63 }
0x54a1   :  { %9363 = vbcast.lane.b32.xlu0 %v9361_v13, 256  ;;  %v9395_v54 = vrot.slane %v9387_v31, %v13936_v5 }
0x54a7   :  { %v13519_v44 = vpop.eup %13518 }
0x54a8   :  { %v9412_v25 = vmul.f32 0.6931472, %v13519_v44 }
0x54aa   :  { %v9420_v59 = vrot.slane %v9412_v25, %v13931_v63 }
0x54ac   :  { %v9428_v61 = vrot.slane %v9420_v59, %v13931_v63  ;;  %v9421_v27 = vcombine.high %v9420_v59, %v9420_v59 }
0x54ae   :  { %v9439_v43 = vrot.slane %v9428_v61, %v13936_v5  ;;  %v9435_v30 = vrot.slane %v9421_v27, %v13931_v63 }
0x54b0   :  { %v9443_v3 = vrot.slane %v9435_v30, %v13936_v5 }
0x550f   :  { %v9357_v58 = vpop.permute.xlu0 %9356 }
0x5510   :  { %vm9398_vm13 = vcmp.lt.f32.partialorder %v9391_v56, %v9357_v58  ;;  %vm9400_vm14 = vcmp.eq.f32.partialorder %v9391_v56, %v9357_v58 }
0x5511   :  { %vm9402_vm15 = vmand %vm9400_vm14, %vm14032_vm8 }
0x5512   :  { %vm9404_vm6 = vmor %vm9398_vm13, %vm9402_vm15 }
0x5513   :  { %v9364_v29 = vpop.permute.xlu0 %9363  ;;  %v12187_v0 = vsel %vm9404_vm6, 1.0, %v13655_v21 }
0x5514   :  { %vm9399_vm9 = vcmp.lt.f32.partialorder %v9395_v54, %v9364_v29  ;;  %vm9401_vm11 = vcmp.eq.f32.partialorder %v9395_v54, %v9364_v29  ;;  %v9446_v10 = vmul.f32 %v12187_v0, %v9439_v43  ;;  %v9458_v43 = vsub.f32 1.0, %v16064_v45 }
0x5515   :  { %vm9403_vm4 = vmand %vm9401_vm11, %vm14032_vm8 }
0x5516   :  { %vm9405_vm12 = vmor %vm9399_vm9, %vm9403_vm4  ;;  %v9448_v60 = vsel %vm116_vm1, %v9446_v10, 0.0 }
0x5517   :  { %9449 = vadd.xlane.f32.xlu0 %v9448_v60  ;;  %v12188_v23 = vsel %vm9405_vm12, 1.0, %v13655_v21 }
0x5518   :  { %v9447_v39 = vmul.f32 %v12188_v23, %v9443_v3 }
0x551a   :  { %v9451_v11 = vsel %vm116_vm1, %v9447_v39, 0.0 }
0x551b   :  { %9452 = vadd.xlane.f32.xlu1 %v9451_v11 }
0x5528   :  { %v9579_v37 = vpop.xlane.xlu1 %9578 }
0x5529   :  { %v9580_v46 = vsub.f32 %v9576_v18, %v9579_v37  ;;  %v8297_v18 = vsel %vm632_vm5, %v15767_v48, 0.0 }
0x552b   :  { %v9581_v13 = vmul.f32 1.442695, %v9580_v46 }
0x552c   :  { %9590 = vperm.xlu1 %13163, %v16037_v7  }
0x552d   :  { %13520 = vpow2.f32 %v9581_v13 }
0x5530   :  { %13165 = vset.pattern.permute.xlu1 %v13665_v53 }
0x5531   :  { %9603 = vperm.xlu1 %13165, %v16037_v7  }
0x5535   :  { %13166 = vset.pattern.permute.xlu1 %v13662_v33 }
0x5537   :  { %v13521_v49 = vpop.eup %13520 }
0x5538   :  { %v9583_v44 = vsel %vm632_vm5, %v13521_v49, 0.0 }
0x5539   :  { %9584 = vadd.xlane.f32.xlu0 %v9583_v44 }
0x554f   :  { %9597 = vperm.xlu0 %13164, %v9594_v36  }
0x5553   :  { %13167 = vset.pattern.permute.xlu0 %v13662_v33 }
0x5555   :  { %8298 = vadd.xlane.f32.xlu1 %v8297_v18 }
0x55a4   :  { %v9450_v51 = vpop.xlane.xlu0 %9449 }
0x55a5   :  { %v9454_v59 = vmul.f32 1.442695, %v9450_v51 }
0x55a8   :  { %v9453_v25 = vpop.xlane.xlu1 %9452 }
0x55a9   :  { %v9456_v62 = vmul.f32 1.442695, %v9453_v25 }
0x55ab   :  { %13522 = vpow2.f32 %v9456_v62  ;;  %v9627_v62 = vrot.slane %v16037_v7, %v13931_v63 }
0x55ac   :  { %13524 = vpow2.f32 %v9454_v59  ;;  %v9591_v0 = vpop.permute.xlu1 %9590 }
0x55b0   :  { %v9604_v11 = vpop.permute.xlu1 %9603 }
0x55b5   :  { %v13523_v56 = vpop.eup %13522 }
0x55b6   :  { %v13525_v61 = vpop.eup %13524  ;;  %v9468_v27 = vrot.slane %v13523_v56, %v13989_v28  ;;  %v9628_v56 = vcombine.high %v9627_v62, %v9627_v62 }
0x55b7   :  { %v9464_v58 = vrot.slane %v13525_v61, %v13989_v28 }
0x55b9   :  { %v9469_v54 = vsel %vm436_vm7, %v9468_v27, %v9464_v58  ;;  %v9642_v27 = vrot.slane %v9628_v56, %v13931_v63 }
0x55ba   :  { %v9471_v30 = vmul.f32 %v9469_v54, %v9458_v43 }
0x55bc   :  { %v9593_v3 = vmul.f32 %v9591_v0, %v9471_v30 }
0x55c6   :  { %v9585_v31 = vpop.xlane.xlu0 %9584 }
0x55c7   :  { %13526 = vrcp.f32 %v9585_v31 }
0x55ce   :  { %v9598_v60 = vpop.permute.xlu0 %9597 }
0x55d1   :  { %v13527_v29 = vpop.eup %13526 }
0x55d2   :  { %v9587_v10 = vmul.f32 %v13527_v29, %v13521_v49 }
0x55d4   :  { %v9600_v23 = vmul.f32 %v9598_v60, %v9587_v10  ;;  %v9650_v60 = vrot.slane %v9642_v27, %v13936_v5 }
0x55d6   :  { %v9601_v39 = vadd.f32 %v9600_v23, %v9593_v3 }
0x55d8   :  { %v16104_v37 = vmul.f32 %v9604_v11, %v9601_v39 }
0x55da   :  { %v9610_v46 = vrot.slane %v16104_v37, %v13936_v5  ;;  %v9617_v13 = vrot.slane %v16104_v37, %v13969_v41  ;;  %v9688_v59 = vrot.slane %v16104_v37, %v13931_v63 }
0x55dc   :  { %9612 = vbcast.lane.b32.xlu0 %v9610_v46, 256  ;;  %v9689_v31 = vcombine.high %v9688_v59, %v9688_v59  ;;  %v9696_v61 = vrot.slane %v9688_v59, %v13931_v63 }
0x55de   :  { %v9703_v30 = vrot.slane %v9689_v31, %v13931_v63  ;;  %v9707_v29 = vrot.slane %v9696_v61, %v13936_v5 }
0x55e0   :  { %9619 = vbcast.lane.b32.xlu0 %v9617_v13, 256  ;;  %v9711_v46 = vrot.slane %v9703_v30, %v13936_v5 }
0x55e2   :  { %v8299_v44 = vpop.xlane.xlu1 %8298 }
0x55e3   :  { %v8300_v36 = vsub.f32 1.0, %v8299_v44 }
0x55e4   :  { %9230 = vrot.lane.b32.xlu0 %v16013_v32, %s13666_s6 }
0x55e5   :  { %v8301_v49 = vmul.f32 %v8300_v36, %v15777_v1 }
0x55e7   :  { %v16114_v18 = vadd.f32 %v8301_v49, %v15767_v48  ;;  %v9635_v48 = vrot.slane %v9627_v62, %v13931_v63 }
0x55e9   :  { %v9762_v25 = vrot.slane %v16114_v18, %v13936_v5  ;;  %v9769_v51 = vrot.slane %v16114_v18, %v13969_v41  ;;  %v9725_v1 = vrot.slane %v16114_v18, %v13931_v63  ;;  %v9646_v43 = vrot.slane %v9635_v48, %v13936_v5 }
0x55eb   :  { %9764 = vbcast.lane.b32.xlu1 %v9762_v25, 256  ;;  %9771 = vbcast.lane.b32.xlu0 %v9769_v51, 256  ;;  %v9733_v58 = vrot.slane %v9725_v1, %v13931_v63  ;;  %v9726_v54 = vcombine.high %v9725_v1, %v9725_v1 }
0x55ed   :  { %v9744_v3 = vrot.slane %v9733_v58, %v13936_v5  ;;  %v9740_v39 = vrot.slane %v9726_v54, %v13931_v63 }
0x55ef   :  { %v9748_v51 = vrot.slane %v9740_v39, %v13936_v5 }
0x564e   :  { %v9613_v7 = vpop.permute.xlu0 %9612 }
0x564f   :  { %v9679_v0 = vsub.f32 1.0, %v9613_v7  ;;  %v9653_v10 = vmul.f32 %v9646_v43, %v9613_v7  ;;  %v9751_v44 = vmul.f32 %v9744_v3, %v9613_v7  ;;  %v9667_v27 = vmul.f32 %v9613_v7, %v16022_v55 }
0x5651   :  { %v9714_v23 = vsub.f32 %v9679_v0, %v9707_v29  ;;  %v9655_v11 = vsub.f32 1.0, %v9653_v10 }
0x5652   :  { %v9620_v13 = vpop.permute.xlu0 %9619 }
0x5653   :  { %v9680_v36 = vsub.f32 1.0, %v9620_v13  ;;  %9659 = vrot.lane.b32.xlu0 %v9655_v11, %s13667_s1  ;;  %v9654_v49 = vmul.f32 %v9650_v60, %v9620_v13  ;;  %v9716_v25 = vmul.f32 %v9714_v23, %v15804_v22  ;;  %v9752_v1 = vmul.f32 %v9748_v51, %v9620_v13 }
0x5654   :  { %v9757_v30 = vmul.f32 %v9714_v23, %v15823_v2  ;;  %v9668_v55 = vmul.f32 %v9620_v13, %v16027_v12 }
0x5655   :  { %v9715_v62 = vsub.f32 %v9680_v36, %v9711_v46  ;;  %v9656_v59 = vsub.f32 1.0, %v9654_v49  ;;  %v9753_v56 = vadd.f32 %v9751_v44, %v9716_v25 }
0x5656   :  { %v9231_v61 = vpop.permute.xlu0 %9230 }
0x5657   :  { %9661 = vrot.lane.b32.xlu1 %v9656_v59, %s13667_s1  ;;  %v16142_v48 = vmul.f32 %v14098_v38, %v9753_v56  ;;  %v9717_v31 = vmul.f32 %v9715_v62, %v15813_v17  ;;  %v9758_v0 = vmul.f32 %v9715_v62, %v15829_v4 }
0x5659   :  { %9787 = vrot.lane.b32.xlu0 %v16142_v48, %s13656_s26  ;;  %v9754_v22 = vadd.f32 %v9752_v1, %v9717_v31 }
0x565b   :  { %9671 = vrot.lane.b32.xlu1 %v9667_v27, %s13668_s30  ;;  %v16150_v58 = vmul.f32 %v14098_v38, %v9754_v22 }
0x565d   :  { %v9765_v54 = vpop.permute.xlu1 %9764  ;;  %9789 = vrot.lane.b32.xlu0 %v16150_v58, %s13656_s26  ;;  %v9772_v43 = vpop.permute.xlu0 %9771 }
0x565e   :  { %v9773_v17 = vmul.f32 %v9765_v54, %v9707_v29  ;;  %v9774_v10 = vmul.f32 %v9772_v43, %v9711_v46 }
0x5660   :  { %v9775_v60 = vadd.f32 %v9773_v17, %v9757_v30  ;;  %v9776_v3 = vadd.f32 %v9774_v10, %v9758_v0 }
0x5661   :  { %9232 = vrot.lane.b32.xlu0 %v9231_v61, %s13666_s6 }
0x5662   :  { %v16160_v11 = vmul.f32 %v14098_v38, %v9775_v60  ;;  %v16166_v23 = vmul.f32 %v14098_v38, %v9776_v3 }
0x5665   :  { %9673 = vrot.lane.b32.xlu0 %v9668_v55, %s13668_s30 }
0x56c5   :  { %v9660_v7 = vpop.permute.xlu0 %9659 }
0x56c6   :  { %v9665_v2 = vmul.f32 %v9660_v7, %v15850_v47 }
0x56c9   :  { %v9662_v39 = vpop.permute.xlu1 %9661 }
0x56ca   :  { %v9666_v36 = vmul.f32 %v9662_v39, %v15848_v8 }
0x56cb   :  { %v9788_v44 = vpop.permute.xlu0 %9787 }
0x56cc   :  { %v9793_v4 = vsel %vm116_vm1, %v16160_v11, %v9788_v44 }
0x56cd   :  { %v9672_v29 = vpop.permute.xlu1 %9671  ;;  %12857 = vmatpush3.msra.mxu1 %v9793_v4 }
0x56ce   :  { %v16168_v46 = vadd.f32 %v9672_v29, %v9665_v2  ;;  %12859 = vmatmul.mubr.msk.f32.vlgmr.msra.gmra.mrb[56].mxu1 %vm116_vm1, %v15949_v35  ;;  %12861 = vmatprep.subr.mxu1 %v13655_v21 }
0x56cf   :  { %v9790_v12 = vpop.permute.xlu0 %9789  ;;  %12863 = vmatprep.mubr.msk.f32.mxu1 %vm13657_vm0, %v13655_v21 }
0x56d0   :  { %v9794_v47 = vsel %vm116_vm1, %v16166_v23, %v9790_v12  ;;  %12867 = vmatpush3.xpose.msk.msra.mxu0 %vm116_vm1, %v16168_v46  ;;  %v10087_v31 = vmul.f32 %v16168_v46, %v16168_v46 }
0x56d1   :  { %12862 = vmatpush3.msra.mxu1 %v9794_v47  ;;  %12876 = vmatprep.subr.mxu0 %v13655_v21 }
0x56d2   :  { %12864 = vmatmul.mubr.msk.f32.vlgmr.msra.gmra.mrb[58].mxu1 %vm116_vm1, %v15941_v19  ;;  %12871 = vmatprep.subr.mxu1 %v13655_v21  ;;  %v10089_v27 = vsel %vm116_vm1, %v10087_v31, 0.0 }
0x56d3   :  { %v9233_v35 = vpop.permute.xlu0 %9232  ;;  %12873 = vmatprep.mubr.msk.f32.mxu1 %vm13657_vm0, %v13655_v21 }
0x56d4   :  { %v9236_v13 = vcombine.low %v9231_v61, %v9233_v35 }
0x56d6   :  { %v9243_v49 = vrot.slane %v9236_v13, %v13837_v16 }
0x56d7   :  { %v9674_v25 = vpop.permute.xlu0 %9673 }
0x56d8   :  { %v16187_v51 = vadd.f32 %v9674_v25, %v9666_v36  ;;  %12869 = vmatmul.mubr.msk.f32.vlgmr.msra.gmra.mrb[56].mxu0 %vm116_vm1, %v9243_v49  ;;  %v10095_v62 = vmul.f32 %v9243_v49, %v9243_v49  ;;  %v9244_v59 = vcombine.high %v9243_v49, %v13655_v21 }
0x56d9   :  { %12877 = vmatpush3.msra.mxu0 %v16168_v46  ;;  %12878 = vmatprep.mubr.msk.f32.mxu0 %vm13657_vm0, %v13655_v21 }
0x56da   :  { %12872 = vmatpush3.xpose.msk.msra.mxu1 %vm116_vm1, %v16187_v51  ;;  %v10097_v8 = vsel %vm632_vm5, %v10095_v62, 0.0  ;;  %v10096_v19 = vmul.f32 %v9244_v59, %v9244_v59  ;;  %v10088_v56 = vmul.f32 %v16187_v51, %v16187_v51  ;;  %13081 = vmatprep.subr.bf16.mxu0 %v13654_v14  ;;  %v10178_v62 = vrot.slane %v16044_v42, %v13936_v5 }
0x56db   :  { %10098 = vadd.xlane.f32.xlu1 %v10097_v8  ;;  %12881 = vmatprep.subr.mxu1 %v13655_v21  ;;  %v10186_v8 = vrot.slane %v16044_v42, %v13969_v41 }
0x56dc   :  { %v10100_v1 = vsel %vm632_vm5, %v10096_v19, 0.0  ;;  %v10092_v61 = vsel %vm116_vm1, %v10088_v56, 0.0 }
0x56dd   :  { %10101 = vadd.xlane.f32.xlu0 %v10100_v1  ;;  %12874 = vmatmul.mubr.msk.f32.vlgmr.msra.gmra.mrb[60].mxu1 %vm116_vm1, %v9244_v59 }
0x56de   :  { %12882 = vmatpush3.msra.mxu1 %v16187_v51  ;;  %12883 = vmatprep.mubr.msk.f32.mxu1 %vm13657_vm0, %v13655_v21 }
0x56df   :  { %10093 = vadd.xlane.f32.xlu1 %v10092_v61  ;;  %13084 = vmatprep.subr.bf16.mxu1 %v13654_v14 }
0x56e1   :  { %10090 = vadd.xlane.f32.xlu0 %v10089_v27 }
0x56f0   :  { %9271 = vrot.lane.b32.xlu1 %v16013_v32, %s13669_s15 }
0x56f7   :  { %9267 = vrot.lane.b32.xlu0 %v16013_v32, %s16720_s29 }
0x5768   :  { %v10099_v22 = vpop.xlane.xlu1 %10098 }
0x5769   :  { %v10108_v17 = vrot.slane %v10099_v22, %v13936_v5  ;;  %v10112_v0 = vrot.slane %v10099_v22, %v13969_v41 }
0x576a   :  { %v10102_v54 = vpop.xlane.xlu0 %10101 }
0x576b   :  { %v10116_v43 = vrot.slane %v10102_v54, %v13936_v5  ;;  %v10120_v60 = vrot.slane %v10102_v54, %v13969_v41 }
0x576c   :  { %v16216_v30 = vpop.xlane.xlu1 %10093 }
0x576d   :  { %v10127_v3 = vmul.f32 %v10116_v43, %v16216_v30  ;;  %v10128_v4 = vmul.f32 %v10120_v60, %v16216_v30 }
0x576e   :  { %v16220_v10 = vpop.xlane.xlu0 %10090 }
0x576f   :  { %v10125_v55 = vmul.f32 %v10108_v17, %v16220_v10  ;;  %v10126_v7 = vmul.f32 %v10112_v0, %v16220_v10  ;;  %v10131_v29 = vadd.f32 1e-06, %v10127_v3  ;;  %v10132_v13 = vadd.f32 1e-06, %v10128_v4 }
0x5770   :  { %v9272_v47 = vpop.permute.xlu1 %9271 }
0x5771   :  { %v10129_v39 = vadd.f32 1e-06, %v10125_v55  ;;  %v10130_v44 = vadd.f32 1e-06, %v10126_v7 }
0x5772   :  { %v9268_v2 = vpop.permute.xlu0 %9267 }
0x5773   :  { %13528 = vrsqrt.f32 %v10129_v39  ;;  %v9270_v12 = vmax.f32 %v16013_v32, %v9268_v2 }
0x5774   :  { %13530 = vrsqrt.f32 %v10130_v44 }
0x5775   :  { %v9274_v35 = vmax.f32 %v9270_v12, %v9272_v47  ;;  %13532 = vrsqrt.f32 %v10131_v29 }
0x5776   :  { %13534 = vrsqrt.f32 %v10132_v13 }
0x5777   :  { %9285 = vrot.lane.b32.xlu0 %v9274_v35, %s16722_s4  ;;  %9279 = vrot.lane.b32.xlu1 %v9274_v35, %s16721_s8 }
0x577d   :  { %v13529_v36 = vpop.eup %13528 }
0x577e   :  { %v13531_v49 = vpop.eup %13530  ;;  %10142 = vperm.xlu1 %13166, %v13529_v36  }
0x577f   :  { %10145 = vperm.xlu0 %13167, %v13531_v49   ;;  %v13533_v25 = vpop.eup %13532 }
0x5780   :  { %v13535_v59 = vpop.eup %13534 }
0x5782   :  { %10148 = vperm.xlu1 %13166, %v13533_v25  }
0x5783   :  { %10181 = vbcast.lane.b32.xlu0 %v10178_v62, 312 }
0x5786   :  { %10151 = vperm.xlu1 %13166, %v13535_v59  }
0x578a   :  { %10189 = vbcast.lane.b32.xlu1 %v10186_v8, 312 }
0x57a1   :  { %v16234_v19 = vpop.f32.mrb[56].mxu1 }
0x57a2   :  { %v12860_v56 = vpop.f32.mrb[57].mxu1 }
0x57a5   :  { %v16236_v1 = vpop.f32.mrb[58].mxu1 }
0x57a6   :  { %v12865_v31 = vpop.f32.mrb[59].mxu1 }
0x57ab   :  { %v10007_v61 = vpop.f32.mrb[56].mxu0 }
0x57ac   :  { %v12870_v27 = vpop.f32.mrb[57].mxu0 }
0x57b0   :  { %v10083_v22 = vpop.f32.mrb[60].mxu1 }
0x57b1   :  { %v12875_v54 = vpop.f32.mrb[61].mxu1 }
0x57e9   :  { %v9286_v43 = vpop.permute.xlu0 %9285  ;;  %v9280_v17 = vpop.permute.xlu1 %9279 }
0x57ea   :  { %v9288_v0 = vsub.f32 %v16013_v32, %v9286_v43  ;;  %v9282_v60 = vsub.f32 %v16013_v32, %v9280_v17  ;;  %v9275_v43 = vsub.f32 %v16013_v32, %v9274_v35 }
0x57ec   :  { %v9289_v3 = vmul.f32 1.442695, %v9288_v0  ;;  %v9283_v55 = vmul.f32 1.442695, %v9282_v60  ;;  %v9276_v17 = vmul.f32 1.442695, %v9275_v43 }
0x57ee   :  { %13536 = vpow2.f32 %v9289_v3 }
0x57ef   :  { %13538 = vpow2.f32 %v9283_v55 }
0x57f0   :  { %13540 = vpow2.f32 %v9276_v17 }
0x57f8   :  { %v13537_v42 = vpop.eup %13536 }
0x57f9   :  { %v13539_v7 = vpop.eup %13538  ;;  %9297 = vrot.lane.b32.xlu1 %v13537_v42, %s13669_s15 }
0x57fa   :  { %9292 = vrot.lane.b32.xlu0 %v13539_v7, %s16720_s29  ;;  %v13541_v0 = vpop.eup %13540 }
0x57fd   :  { %v10143_v39 = vpop.permute.xlu1 %10142 }
0x57fe   :  { %v10146_v2 = vpop.permute.xlu0 %10145  ;;  %v10156_v29 = vrot.slane %v10143_v39, %v13989_v28 }
0x57ff   :  { %v10160_v4 = vrot.slane %v10146_v2, %v13989_v28 }
0x5801   :  { %v10149_v44 = vpop.permute.xlu1 %10148  ;;  %v10169_v47 = vsel %vm436_vm7, %v10160_v4, %v10156_v29 }
0x5802   :  { %v10164_v36 = vrot.slane %v10149_v44, %v13989_v28  ;;  %v10173_v49 = vmul.f32 %v10169_v47, %v10007_v61  ;;  %v10182_v25 = vpop.permute.xlu0 %10181 }
0x5804   :  { %v10191_v59 = vmul.f32 %v10182_v25, %v10173_v49 }
0x5805   :  { %v10152_v12 = vpop.permute.xlu1 %10151 }
0x5806   :  { %v10168_v13 = vrot.slane %v10152_v12, %v13989_v28  ;;  %v10193_v27 = vsel %vm632_vm5, %v10191_v59, -inf }
0x5808   :  { %v10170_v62 = vsel %vm436_vm7, %v10168_v13, %v10164_v36 }
0x5809   :  { %v10174_v8 = vmul.f32 %v10170_v62, %v10083_v22  ;;  %v10190_v56 = vpop.permute.xlu1 %10189 }
0x580b   :  { %v10192_v31 = vmul.f32 %v10190_v56, %v10174_v8 }
0x580d   :  { %v10196_v54 = vsel %vm632_vm5, %v10192_v31, -inf }
0x5819   :  { %10194 = vmax.xlane.f32.xlu0 %v10193_v27 }
0x581d   :  { %10197 = vmax.xlane.f32.xlu1 %v10196_v54 }
0x586b   :  { %v9298_v3 = vpop.permute.xlu1 %9297 }
0x586c   :  { %v9293_v60 = vpop.permute.xlu0 %9292 }
0x586d   :  { %v9295_v61 = vadd.f32 %v13541_v0, %v9293_v60 }
0x586f   :  { %v9300_v55 = vadd.f32 %v9298_v3, %v9295_v61 }
0x5871   :  { %13542 = vrcp.f32 %v9300_v55 }
0x587b   :  { %v13543_v39 = vpop.eup %13542 }
0x587c   :  { %9308 = vrot.lane.b32.xlu1 %v13543_v39, %s16722_s4  ;;  %9304 = vrot.lane.b32.xlu0 %v13543_v39, %s16721_s8  ;;  %v9302_v22 = vmul.f32 %v13543_v39, %v13541_v0 }
0x587e   :  { %v10218_v43 = vrot.slane %v9302_v22, %v13936_v5 }
0x58a6   :  { %v10195_v44 = vpop.xlane.xlu0 %10194 }
0x58a7   :  { %v10199_v12 = vsub.f32 %v10191_v59, %v10195_v44 }
0x58a9   :  { %v10201_v13 = vmul.f32 1.442695, %v10199_v12 }
0x58aa   :  { %v10198_v47 = vpop.xlane.xlu1 %10197 }
0x58ab   :  { %v10200_v36 = vsub.f32 %v10192_v31, %v10198_v47  ;;  %13544 = vpow2.f32 %v10201_v13  ;;  %v10226_v31 = vrot.slane %v9302_v22, %v13969_v41 }
0x58ad   :  { %v10203_v49 = vmul.f32 1.442695, %v10200_v36 }
0x58af   :  { %13546 = vpow2.f32 %v10203_v49 }
0x58b5   :  { %v13545_v25 = vpop.eup %13544 }
0x58b6   :  { %v10205_v62 = vsel %vm632_vm5, %v13545_v25, 0.0 }
0x58b9   :  { %v13547_v8 = vpop.eup %13546 }
0x58ee   :  { %v9305_v2 = vpop.permute.xlu0 %9304  ;;  %v9309_v56 = vpop.permute.xlu1 %9308 }
0x58ef   :  { %v9307_v4 = vmul.f32 %v13539_v7, %v9305_v2  ;;  %v10208_v7 = vsel %vm632_vm5, %v13547_v8, 0.0  ;;  %v9311_v27 = vmul.f32 %v13537_v42, %v9309_v56 }
0x58f1   :  { %v10236_v29 = vrot.slane %v9307_v4, %v13936_v5  ;;  %v10244_v35 = vrot.slane %v9307_v4, %v13969_v41  ;;  %v10264_v54 = vrot.slane %v9311_v27, %v13936_v5  ;;  %v10272_v59 = vrot.slane %v9311_v27, %v13969_v41 }
0x58f3   :  { %10247 = vbcast.lane.b32.xlu1 %v10244_v35, 322  ;;  %10239 = vbcast.lane.b32.xlu0 %v10236_v29, 322 }
0x5912   :  { %10206 = vadd.xlane.f32.xlu0 %v10205_v62 }
0x5917   :  { %10209 = vadd.xlane.f32.xlu1 %v10208_v7 }
0x5928   :  { %10275 = vbcast.lane.b32.xlu1 %v10272_v59, 324  ;;  %10267 = vbcast.lane.b32.xlu0 %v10264_v54, 324 }
0x592c   :  { %10229 = vbcast.lane.b32.xlu1 %v10226_v31, 320  ;;  %10221 = vbcast.lane.b32.xlu0 %v10218_v43, 320 }
0x5965   :  { %v10240_v17 = vpop.permute.xlu0 %10239  ;;  %v10248_v60 = vpop.permute.xlu1 %10247 }
0x599f   :  { %v10207_v0 = vpop.xlane.xlu0 %10206 }
0x59a0   :  { %13548 = vrcp.f32 %v10207_v0 }
0x59a3   :  { %v10268_v39 = vpop.permute.xlu0 %10267 }
0x59a4   :  { %v10210_v61 = vpop.xlane.xlu1 %10209  ;;  %v10277_v4 = vmul.f32 %v10268_v39, %v16234_v19 }
0x59a5   :  { %13550 = vrcp.f32 %v10210_v61 }
0x59a7   :  { %v10222_v12 = vpop.permute.xlu0 %10221 }
0x59a8   :  { %v10276_v22 = vpop.permute.xlu1 %10275  ;;  %v10231_v13 = vmul.f32 %v10222_v12, %v16234_v19 }
0x59a9   :  { %v10278_v35 = vmul.f32 %v10276_v22, %v16236_v1 }
0x59aa   :  { %v13549_v3 = vpop.eup %13548 }
0x59ab   :  { %v10213_v42 = vmul.f32 %v13549_v3, %v13545_v25 }
0x59ac   :  { %v10230_v36 = vpop.permute.xlu1 %10229 }
0x59ad   :  { %v10249_v55 = vmul.f32 %v10240_v17, %v10213_v42  ;;  %v10232_v7 = vmul.f32 %v10230_v36, %v16236_v1  ;;  %v13625_v1 = vld [vmem:[%s16669_s10 + $0x30] sm:$0xff] }
0x59af   :  { %v13551_v44 = vpop.eup %13550  ;;  %10253 = vrot.lane.b32.xlu0 %v10249_v55, %s13656_s26 }
0x59b0   :  { %v10214_v2 = vmul.f32 %v13551_v44, %v13547_v8 }
0x59b2   :  { %v10250_v29 = vmul.f32 %v10248_v60, %v10214_v2 }
0x59b3   :  { %10281 = vrot.lane.b32.xlu0 %v10277_v4, %s13656_s26  ;;  %v13626_v4 = vld [vmem:[%s16670_s11] ss:$0 sm:$0xff] }
0x59b4   :  { %10255 = vrot.lane.b32.xlu1 %v10250_v29, %s13656_s26 }
0x59b8   :  { %10283 = vrot.lane.b32.xlu1 %v10278_v35, %s13656_s26 }
0x5a21   :  { %v10254_v47 = vpop.permute.xlu0 %10253 }
0x5a22   :  { %v10259_v49 = vadd.f32 %v10254_v47, %v10231_v13 }
0x5a25   :  { %v10282_v25 = vpop.permute.xlu0 %10281 }
0x5a26   :  { %v16268_v62 = vadd.f32 %v10282_v25, %v10259_v49  ;;  %v10256_v8 = vpop.permute.xlu1 %10255 }
0x5a27   :  { %v10260_v56 = vadd.f32 %v10256_v8, %v10232_v7 }
0x5a28   :  { %10290 = vrot.lane.b32.xlu0 %v16268_v62, %s13666_s6 }
0x5a2a   :  { %v10284_v27 = vpop.permute.xlu1 %10283 }
0x5a2b   :  { %v16273_v54 = vadd.f32 %v10284_v27, %v10260_v56 }
0x5a2d   :  { %10365 = vrot.lane.b32.xlu1 %v16273_v54, %s13666_s6 }
0x5a9a   :  { %v16277_v59 = vpop.permute.xlu0 %10290 }
0x5a9b   :  { %12879 = vmatmul.mubr.msk.f32.vlgmr.msra.gmra.mrb[58].mxu0 %vm116_vm1, %v16277_v59 }
0x5a9c   :  { %13083 = vmatpush3.bf16.msra.mxu0 %v14273_v40  ;;  %12890 = vmatprep.mubr.msk.f32.mxu0 %vm13657_vm0, %v13655_v21 }
0x5a9d   :  { %13093 = vmatprep.subr.bf16.mxu0 %v13654_v14 }
0x5a9f   :  { %v16285_v19 = vpop.permute.xlu1 %10365 }
0x5aa0   :  { %12884 = vmatmul.mubr.msk.f32.vlgmr.msra.gmra.mrb[62].mxu1 %vm116_vm1, %v16285_v19 }
0x5aa1   :  { %13086 = vmatpush3.bf16.msra.mxu1 %v13823_v9  ;;  %12907 = vmatprep.mubr.msk.f32.mxu1 %vm13657_vm0, %v13655_v21 }
0x5aa2   :  { %13087 = vmatprep.subr.bf16.mxu1 %v13654_v14 }
0x5aa5   :  { %13089 = vmatpush3.bf16.msra.mxu1 %v13834_v15 }
0x5aa6   :  { %13090 = vmatprep.subr.bf16.mxu1 %v13654_v14 }
0x5aa9   :  { %13092 = vmatpush3.bf16.msra.mxu1 %v13848_v20 }
0x5aaa   :  { %12905 = vmatprep.subr.mxu1 %v13655_v21 }
0x5aad   :  { %12906 = vmatpush3.msra.mxu1 %v13625_v1 }
0x5aae   :  { %12931 = vmatprep.subr.mxu1 %v13655_v21 }
0x5b6e   :  { %v10360_v9 = vpop.f32.mrb[58].mxu0 }
0x5b6f   :  { %v12880_v31 = vpop.f32.mrb[59].mxu0 }
0x5b70   :  { %v13627_v31 = vld [vmem:[%s16672_s13] ss:$0 sm:$0xff] }
0x5b73   :  { %v10435_v43 = vpop.f32.mrb[62].mxu1 }
0x5b74   :  { %v10439_v17 = vcombine.low %v10360_v9, %v10435_v43  ;;  %v12885_v0 = vpop.f32.mrb[63].mxu1 }
0x5b76   :  { %v10446_v15 = vrot.slane %v10439_v17, %v13837_v16 }
0x5b78   :  { %v10447_v60 = vcombine.high %v10446_v15, %v13655_v21 }
0x5b7a   :  { %10449 = vrot.lane.b32.xlu0 %v10447_v60, %s13656_s26 }
0x5b7e   :  { %10534 = vrot.lane.b32.xlu0 %v16001_v57, %s13667_s1  ;;  %v12198_v57 = vld [vmem:[%s16711_s2 + $0xe] sm:$0x3] }
0x5bec   :  { %v10450_v20 = vpop.permute.xlu0 %10449 }
0x5bed   :  { %v10452_v61 = vsel %vm116_vm1, %v10446_v15, %v10450_v20 }
0x5bee   :  { %10531 = vrot.lane.b32.xlu1 %v10452_v61, %s13656_s26  ;;  %12891 = vmatmul.mubr.msk.f32.vlgmr.msra.gmra.mrb[60].mxu0 %vm1561_vm10, %v10452_v61 }
0x5bef   :  { %13095 = vmatpush3.bf16.msra.mxu0 %v13894_v50  ;;  %12918 = vmatprep.mubr.msk.f32.mxu0 %vm13657_vm0, %v13655_v21 }
0x5bf0   :  { %13096 = vmatprep.subr.bf16.mxu0 %v13654_v14  ;;  %v10535_v42 = vpop.permute.xlu0 %10534 }
0x5bf3   :  { %13098 = vmatpush3.bf16.msra.mxu0 %v13900_v52 }
0x5bf4   :  { %12921 = vmatprep.subr.mxu0 %v13655_v21 }
0x5c60   :  { %v10532_v3 = vpop.permute.xlu1 %10531 }
0x5c61   :  { %v10537_v55 = vsel %vm116_vm1, %v12198_v57, %v10532_v3 }
0x5c62   :  { %v10538_v39 = vsel %vm127_vm2, %v10537_v55, %v10535_v42  ;;  %vm12012_vm2 = vcmask 254976  }
0x5c63   :  { %12908 = vmatmul.mubr.msk.f32.vlgmr.msra.gmra.mrb[64].mxu1 %vm135_vm3, %v10538_v39  ;;  %vm16728_vm3 = vcmask 261120  }
0x5c64   :  { %12933 = vmatprep.mubr.msk.f32.mxu1 %vm13657_vm0, %v13655_v21 }
0x5cc1   :  { %v10522_v50 = vpop.f32.mrb[60].mxu0 }
0x5cc2   :  { %v10526_v52 = vadd.f32 %v10522_v50, %v16013_v32  ;;  %v12892_v44 = vpop.f32.mrb[61].mxu0 }
0x5cc4   :  { %10528 = vst.msk [vmem:[#allocation2 + $0xc] sm:$0x3] %vm632_vm5, %v10526_v52 }
0x5d36   :  { %v10608_v2 = vpop.f32.mrb[64].mxu1 }
0x5d37   :  { %v10609_v29 = vadd.f32 %v13626_v4, %v10608_v2  ;;  %v12909_v22 = vpop.f32.mrb[65].mxu1 }
0x5d39   :  { %13552 = vtanh.f32 %v10609_v29  ;;  %v12200_v12 = vmul.f32 -1.442695, %v10609_v29 }
0x5d3b   :  { %13554 = vpow2.f32 %v12200_v12 }
0x5d43   :  { %v13553_v35 = vpop.eup %13552 }
0x5d44   :  { %10621 = vrot.lane.b32.xlu1 %v13553_v35, %s13658_s5 }
0x5d45   :  { %v13555_v47 = vpop.eup %13554 }
0x5d46   :  { %v10615_v13 = vadd.f32 1.0, %v13555_v47 }
0x5d48   :  { %13556 = vrcp.f32 %v10615_v13 }
0x5d52   :  { %v13557_v32 = vpop.eup %13556 }
0x5d53   :  { %v10619_v25 = vmul.f32 %v13557_v32, %v15995_v34 }
0x5db6   :  { %v10622_v36 = vpop.permute.xlu1 %10621 }
0x5db7   :  { %v10624_v49 = vmul.f32 %v13557_v32, %v10622_v36 }
0x5db9   :  { %10626 = vrot.lane.b32.xlu0 %v10624_v49, %s13658_s5 }
0x5e2b   :  { %v10627_v8 = vpop.permute.xlu0 %10626 }
0x5e2c   :  { %v16331_v7 = vadd.f32 %v10627_v8, %v10619_v25 }
0x5e2e   :  { %13558 = vtanh.f32 %v16331_v7 }
0x5e38   :  { %v13559_v56 = vpop.eup %13558 }
0x5e39   :  { %10632 = vrot.lane.b32.xlu1 %v13559_v56, %s13658_s5 }
0x5e3d   :  { %10986 = vrot.lane.b32.xlu1 %v16168_v46, %s13653_s9 }
0x5eab   :  { %v10633_v27 = vpop.permute.xlu1 %10632 }
0x5eac   :  { %v10635_v1 = vmul.f32 %v13557_v32, %v10633_v27 }
0x5eae   :  { %10637 = vrot.lane.b32.xlu0 %v10635_v1, %s13659_s12 }
0x5eaf   :  { %v10987_v3 = vpop.permute.xlu1 %10986 }
0x5eb2   :  { %10988 = vrot.lane.b32.xlu0 %v16187_v51, %s13653_s9 }
0x5f20   :  { %v10638_v34 = vpop.permute.xlu0 %10637 }
0x5f21   :  { %12013 = vst.msk [vmem:[%s16676_s17] sm:$0x3] %vm12012_vm2, %v10638_v34  ;;  %12919 = vmatmul.mubr.msk.f32.vlgmr.msra.gmra.mrb[62].mxu0 %vm16728_vm3, %v10638_v34 }
0x5f22   :  { %12923 = vmatprep.mubr.msk.f32.mxu0 %vm13657_vm0, %v13655_v21 }
0x5f24   :  { %v10989_v39 = vpop.permute.xlu0 %10988 }
0x5ff4   :  { %v10707_v9 = vpop.f32.mrb[62].mxu0 }
0x5ff5   :  { %v16350_v43 = vadd.f32 %v13627_v31, %v10707_v9  ;;  %v12920_v17 = vpop.f32.mrb[63].mxu0 }
0x5ff7   :  { %v11008_v0 = vmul.f32 %v16350_v43, %v16350_v43  ;;  %v10960_v15 = vrot.slane %v16350_v43, %v13931_v63  ;;  %v12202_v52 = vmul.f32 -1.442695, %v16350_v43  ;;  %v10734_v49 = vand.u32 2147483647, %v16350_v43 }
0x5ff9   :  { %11010 = vrot.lane.b32.xlu1 %v11008_v0, %s13661_s27  ;;  %v10968_v60 = vrot.slane %v10960_v15, %v13931_v63  ;;  %v10961_v20 = vcombine.high %v10960_v15, %v10960_v15  ;;  %13560 = vpow2.f32 %v12202_v52  ;;  %v10735_v25 = vsub.f32 0.0, %v10734_v49 }
0x5ffb   :  { %v16359_v61 = vrot.slane %v10968_v60, %v13936_v5  ;;  %v10975_v57 = vrot.slane %v10961_v20, %v13931_v63  ;;  %v10736_v8 = vmul.f32 1.442695, %v10735_v25 }
0x5ffd   :  { %v10992_v42 = vmul.f32 %v10987_v3, %v16359_v61  ;;  %v16364_v55 = vrot.slane %v10975_v57, %v13936_v5 }
0x5fff   :  { %10996 = vrot.lane.b32.xlu0 %v10992_v42, %s13661_s27  ;;  %v10993_v50 = vmul.f32 %v10989_v39, %v16364_v55 }
0x6001   :  { %10998 = vrot.lane.b32.xlu1 %v10993_v50, %s13661_s27 }
0x6003   :  { %v13561_v4 = vpop.eup %13560 }
0x6004   :  { %v10730_v29 = vadd.f32 1.0, %v13561_v4 }
0x6006   :  { %13562 = vrcp.f32 %v10730_v29 }
0x6007   :  { %13564 = vpow2.f32 %v10736_v8 }
0x6010   :  { %v16373_v13 = vpop.eup %13562 }
0x6011   :  { %v10797_v32 = vrot.slane %v16373_v13, %v13936_v5  ;;  %v10805_v36 = vrot.slane %v16373_v13, %v13969_v41  ;;  %v13565_v56 = vpop.eup %13564 }
0x6012   :  { %v10738_v27 = vadd.f32 1.0, %v13565_v56  ;;  %v10741_v20 = vmul.f32 -0.5, %v13565_v56  ;;  %v10744_v52 = vand.u32 2147483647, %v13565_v56 }
0x6014   :  { %13566 = vlog2.f32 %v10738_v27  ;;  %v10742_v39 = vadd.f32 1.0, %v10741_v20  ;;  %vm10745_vm13 = vcmp.lt.f32.partialorder %v10744_v52, 0.0004427343 }
0x6016   :  { %v10743_v29 = vmul.f32 %v13565_v56, %v10742_v39 }
0x601e   :  { %v13567_v3 = vpop.eup %13566 }
0x606b   :  { %v11011_v44 = vpop.permute.xlu1 %11010 }
0x606c   :  { %v11013_v2 = vsel %vm632_vm5, %v11011_v44, 0.0 }
0x606d   :  { %11014 = vadd.xlane.f32.xlu0 %v11013_v2  ;;  %v10740_v2 = vmul.f32 0.6931472, %v13567_v3 }
0x6071   :  { %v10997_v22 = vpop.permute.xlu0 %10996 }
0x6072   :  { %v11002_v35 = vsel %vm116_vm1, %v10997_v22, 0.0  ;;  %v10746_v22 = vsel %vm10745_vm13, %v10743_v29, %v10740_v2 }
0x6073   :  { %11003 = vadd.xlane.f32.xlu1 %v11002_v35  ;;  %v10999_v12 = vpop.permute.xlu1 %10998 }
0x6074   :  { %v11005_v47 = vsel %vm116_vm1, %v10999_v12, 0.0 }
0x6075   :  { %11006 = vadd.xlane.f32.xlu0 %v11005_v47 }
0x6084   :  { %10800 = vbcast.lane.b32.xlu1 %v10797_v32, 304  ;;  %v10733_v32 = vmax.f32 %v16350_v43, 0.0 }
0x608b   :  { %10808 = vbcast.lane.b32.xlu0 %v10805_v36, 304 }
0x60fa   :  { %v11015_v1 = vpop.xlane.xlu0 %11014 }
0x60fb   :  { %v11020_v34 = vrot.slane %v11015_v1, %v13936_v5  ;;  %v11024_v9 = vrot.slane %v11015_v1, %v13969_v41 }
0x60fd   :  { %v11027_v31 = vmul.f32 %v11020_v34, %v16220_v10  ;;  %v11028_v17 = vmul.f32 %v11024_v9, %v16216_v30  ;;  %v10822_v9 = vadd.f32 %v16104_v37, %v16064_v45 }
0x60ff   :  { %v11029_v0 = vadd.f32 1e-06, %v11027_v31  ;;  %v11030_v15 = vadd.f32 1e-06, %v11028_v17  ;;  %v10823_v31 = vmul.f32 %v16104_v37, %v16064_v45 }
0x6100   :  { %v11004_v60 = vpop.xlane.xlu1 %11003 }
0x6101   :  { %13568 = vrsqrt.f32 %v11029_v0 }
0x6102   :  { %13570 = vrsqrt.f32 %v11030_v15  ;;  %v11007_v57 = vpop.xlane.xlu0 %11006  ;;  %v10824_v15 = vsub.f32 %v10822_v9, %v10823_v31  ;;  %v11076_v31 = vsub.f32 1.0, %v16373_v13 }
0x6104   :  { %v10801_v42 = vpop.permute.xlu1 %10800 }
0x6105   :  { %v10810_v50 = vmul.f32 %v10801_v42, %v16268_v62  ;;  %v10747_v62 = vadd.f32 %v10746_v22, %v10733_v32 }
0x6106   :  { %v10809_v44 = vpop.permute.xlu0 %10808 }
0x6107   :  { %v10812_v4 = vsub.f32 1.0, %v10810_v50  ;;  %v10811_v10 = vmul.f32 %v10809_v44, %v16273_v54  ;;  %v16388_v56 = vadd.f32 1.0, %v10747_v62 }
0x6109   :  { %v10813_v30 = vsub.f32 1.0, %v10811_v10  ;;  %v10816_v12 = vrot.slane %v10812_v4, 1 }
0x610b   :  { %v13569_v35 = vpop.eup %13568  ;;  %v10817_v47 = vrot.slane %v10813_v30, 1  ;;  %v10820_v27 = vmul.f32 %v10816_v12, %v10812_v4 }
0x610c   :  { %v13571_v36 = vpop.eup %13570  ;;  %v11033_v49 = vmul.f32 %v13569_v35, %v11004_v60 }
0x610d   :  { %v11034_v25 = vmul.f32 %v13571_v36, %v11007_v57  ;;  %v10821_v8 = vmul.f32 %v10817_v47, %v10813_v30 }
0x610e   :  { %11043 = vperm.xlu1 %13166, %v11033_v49  }
0x610f   :  { %v10827_v1 = vrot.slane %v10821_v8, 7  ;;  %11046 = vperm.xlu0 %13167, %v11034_v25  }
0x6111   :  { %v10828_v54 = vsel %vm436_vm7, %v10827_v1, %v10820_v27 }
0x6112   :  { %13168 = vset.pattern.permute.xlu1 %v13663_v24 }
0x6113   :  { %10829 = vrot.lane.b32.xlu0 %v10828_v54, %s13666_s6  ;;  %11037 = vperm.xlu1 %13168, %v16388_v56  }
0x6114   :  { %13169 = vset.pattern.permute.xlu0 %v13664_v6 }
0x6117   :  { %13170 = vset.pattern.permute.xlu1 %v13664_v6 }
0x618d   :  { %v11044_v34 = vpop.permute.xlu1 %11043 }
0x618e   :  { %v11047_v17 = vpop.permute.xlu0 %11046  ;;  %v11051_v0 = vrot.slane %v11044_v34, %v13989_v28 }
0x618f   :  { %v11055_v24 = vrot.slane %v11047_v17, %v13989_v28 }
0x6191   :  { %v11056_v20 = vsel %vm436_vm7, %v11055_v24, %v11051_v0 }
0x6192   :  { %v10830_v60 = vpop.permute.xlu0 %10829  ;;  %v11038_v57 = vpop.permute.xlu1 %11037 }
0x6193   :  { %v16402_v3 = vmul.f32 %v10830_v60, %v10824_v15  ;;  %v11058_v6 = vmul.f32 %v11056_v20, %v11038_v57  ;;  %v9779_v60 = vsel %vm632_vm5, %v16104_v37, 0.0 }
0x6195   :  { %12023 = vst.msk [vmem:[%s16680_s21] sm:$0x3] %vm632_vm5, %v16402_v3  ;;  %v10836_v45 = vrot.slane %v16402_v3, %v13936_v5  ;;  %v11059_v42 = vsel %vm632_vm5, %v11058_v6, -inf  ;;  %v10843_v39 = vrot.slane %v16402_v3, %v13969_v41  ;;  %v10892_v50 = vmax.f32 %v16402_v3, 1e-30 }
0x6196   :  { %11060 = vmax.xlane.f32.xlu1 %v11059_v42  ;;  %v10854_v44 = vrot.slane %v16402_v3, %v13931_v63 }
0x6197   :  { %10838 = vbcast.lane.b32.xlu0 %v10836_v45, 256  ;;  %13572 = vlog2.f32 %v10892_v50 }
0x6198   :  { %v10862_v4 = vrot.slane %v10854_v44, %v13931_v63  ;;  %v10855_v10 = vcombine.high %v10854_v44, %v10854_v44 }
0x619a   :  { %v10873_v30 = vrot.slane %v10862_v4, %v13936_v5  ;;  %v10869_v22 = vrot.slane %v10855_v10, %v13931_v63 }
0x619b   :  { %10845 = vbcast.lane.b32.xlu0 %v10843_v39, 256 }
0x619c   :  { %v10877_v32 = vrot.slane %v10869_v22, %v13936_v5 }
0x61a1   :  { %v13573_v52 = vpop.eup %13572 }
0x61a2   :  { %v10894_v2 = vmul.f32 0.6931472, %v13573_v52 }
0x61a4   :  { %v10902_v29 = vrot.slane %v10894_v2, %v13931_v63  ;;  %v10940_v2 = vsub.f32 1.0, %v16402_v3 }
0x61a6   :  { %v10910_v35 = vrot.slane %v10902_v29, %v13931_v63  ;;  %v10903_v12 = vcombine.high %v10902_v29, %v10902_v29 }
0x61a8   :  { %v10921_v36 = vrot.slane %v10910_v35, %v13936_v5  ;;  %v10917_v49 = vrot.slane %v10903_v12, %v13931_v63 }
0x61aa   :  { %v10925_v1 = vrot.slane %v10917_v49, %v13936_v5 }
0x6209   :  { %v10839_v47 = vpop.permute.xlu0 %10838 }
0x620a   :  { %vm10880_vm14 = vcmp.lt.f32.partialorder %v10873_v30, %v10839_v47  ;;  %vm10882_vm15 = vcmp.eq.f32.partialorder %v10873_v30, %v10839_v47 }
0x620b   :  { %vm10884_vm6 = vmand %vm10882_vm15, %vm14032_vm8 }
0x620c   :  { %vm10886_vm9 = vmor %vm10880_vm14, %vm10884_vm6 }
0x620d   :  { %v12203_v25 = vsel %vm10886_vm9, 1.0, %v13655_v21  ;;  %v10846_v8 = vpop.permute.xlu0 %10845 }
0x620e   :  { %vm10881_vm11 = vcmp.lt.f32.partialorder %v10877_v32, %v10846_v8  ;;  %vm10883_vm4 = vcmp.eq.f32.partialorder %v10877_v32, %v10846_v8  ;;  %v10928_v62 = vmul.f32 %v12203_v25, %v10921_v36 }
0x620f   :  { %vm10885_vm12 = vmand %vm10883_vm4, %vm14032_vm8 }
0x6210   :  { %vm10887_vm3 = vmor %vm10881_vm11, %vm10885_vm12  ;;  %v10930_v27 = vsel %vm116_vm1, %v10928_v62, 0.0 }
0x6211   :  { %v12204_v54 = vsel %vm10887_vm3, 1.0, %v13655_v21  ;;  %10931 = vadd.xlane.f32.xlu0 %v10930_v27 }
0x6212   :  { %v10929_v34 = vmul.f32 %v12204_v54, %v10925_v1  ;;  %v11109_v54 = vrot.slane %v16373_v13, %v13931_v63 }
0x6214   :  { %v10933_v9 = vsel %vm116_vm1, %v10929_v34, 0.0 }
0x6215   :  { %10934 = vadd.xlane.f32.xlu1 %v10933_v9  ;;  %v11110_v9 = vcombine.high %v11109_v54, %v11109_v54 }
0x6223   :  { %v11061_v26 = vpop.xlane.xlu1 %11060 }
0x6224   :  { %v11062_v17 = vsub.f32 %v11058_v6, %v11061_v26 }
0x6226   :  { %11079 = vperm.xlu1 %13170, %v11076_v31   ;;  %v11063_v0 = vmul.f32 1.442695, %v11062_v17  ;;  %v11124_v17 = vrot.slane %v11110_v9, %v13931_v63 }
0x6227   :  { %11072 = vperm.xlu0 %13169, %v16373_v13  }
0x6228   :  { %13574 = vpow2.f32 %v11063_v0 }
0x622a   :  { %13171 = vset.pattern.permute.xlu1 %v13665_v53 }
0x622b   :  { %13173 = vset.pattern.permute.xlu0 %v13662_v33 }
0x6232   :  { %v13575_v24 = vpop.eup %13574 }
0x6233   :  { %v11065_v15 = vsel %vm632_vm5, %v13575_v24, 0.0 }
0x624a   :  { %11066 = vadd.xlane.f32.xlu1 %v11065_v15 }
0x625b   :  { %11085 = vperm.xlu1 %13171, %v16373_v13  }
0x625f   :  { %13172 = vset.pattern.permute.xlu1 %v13662_v33 }
0x627f   :  { %9780 = vadd.xlane.f32.xlu1 %v9779_v60 }
0x629e   :  { %v10932_v53 = vpop.xlane.xlu0 %10931 }
0x629f   :  { %v10936_v45 = vmul.f32 1.442695, %v10932_v53 }
0x62a2   :  { %v10935_v20 = vpop.xlane.xlu1 %10934 }
0x62a3   :  { %v10938_v57 = vmul.f32 1.442695, %v10935_v20 }
0x62a5   :  { %13576 = vpow2.f32 %v10938_v57 }
0x62a6   :  { %13578 = vpow2.f32 %v10936_v45  ;;  %v11080_v6 = vpop.permute.xlu1 %11079  ;;  %v11073_v30 = vpop.permute.xlu0 %11072  ;;  %v11132_v45 = vrot.slane %v11124_v17, %v13936_v5 }
0x62af   :  { %v13577_v42 = vpop.eup %13576 }
0x62b0   :  { %v13579_v50 = vpop.eup %13578  ;;  %v10950_v52 = vrot.slane %v13577_v42, %v13989_v28 }
0x62b1   :  { %v10946_v44 = vrot.slane %v13579_v50, %v13989_v28 }
0x62b3   :  { %v10951_v33 = vsel %vm436_vm7, %v10950_v52, %v10946_v44 }
0x62b4   :  { %v10953_v4 = vmul.f32 %v10951_v33, %v10940_v2 }
0x62b6   :  { %v11075_v22 = vmul.f32 %v11073_v30, %v10953_v4 }
0x62d7   :  { %v11067_v39 = vpop.xlane.xlu1 %11066 }
0x62d8   :  { %13580 = vrcp.f32 %v11067_v39 }
0x62db   :  { %v11086_v47 = vpop.permute.xlu1 %11085 }
0x62e2   :  { %v13581_v10 = vpop.eup %13580 }
0x62e3   :  { %v11069_v29 = vmul.f32 %v13581_v10, %v13575_v24 }
0x62e5   :  { %v11082_v35 = vmul.f32 %v11080_v6, %v11069_v29 }
0x62e7   :  { %v11083_v12 = vadd.f32 %v11082_v35, %v11075_v22 }
0x62e9   :  { %v16447_v32 = vmul.f32 %v11086_v47, %v11083_v12 }
0x62eb   :  { %12027 = vst.msk [vmem:[%s16683_s24] sm:$0x3] %vm632_vm5, %v16447_v32  ;;  %v11092_v36 = vrot.slane %v16447_v32, %v13936_v5  ;;  %v11099_v3 = vrot.slane %v16447_v32, %v13969_v41  ;;  %v11170_v34 = vrot.slane %v16447_v32, %v13931_v63 }
0x62ed   :  { %11094 = vbcast.lane.b32.xlu0 %v11092_v36, 256  ;;  %v11171_v31 = vcombine.high %v11170_v34, %v11170_v34  ;;  %v11178_v26 = vrot.slane %v11170_v34, %v13931_v63 }
0x62ef   :  { %v11185_v60 = vrot.slane %v11171_v31, %v13931_v63  ;;  %v11189_v20 = vrot.slane %v11178_v26, %v13936_v5 }
0x62f1   :  { %11101 = vbcast.lane.b32.xlu0 %v11099_v3, 256  ;;  %v11193_v52 = vrot.slane %v11185_v60, %v13936_v5 }
0x62f5   :  { %10712 = vrot.lane.b32.xlu0 %v16350_v43, %s13666_s6 }
0x630c   :  { %v9781_v49 = vpop.xlane.xlu1 %9780 }
0x630d   :  { %v9782_v25 = vsub.f32 1.0, %v9781_v49 }
0x630f   :  { %v9783_v8 = vmul.f32 %v9782_v25, %v16114_v18  ;;  %v11117_v18 = vrot.slane %v11109_v54, %v13931_v63 }
0x6311   :  { %v16462_v62 = vadd.f32 %v9783_v8, %v16104_v37  ;;  %v11128_v0 = vrot.slane %v11117_v18, %v13936_v5 }
0x6313   :  { %v11244_v27 = vrot.slane %v16462_v62, %v13936_v5  ;;  %v11251_v1 = vrot.slane %v16462_v62, %v13969_v41  ;;  %v11207_v37 = vrot.slane %v16462_v62, %v13931_v63 }
0x6315   :  { %11246 = vbcast.lane.b32.xlu0 %v11244_v27, 256  ;;  %v11215_v24 = vrot.slane %v11207_v37, %v13931_v63  ;;  %v11208_v15 = vcombine.high %v11207_v37, %v11207_v37 }
0x6317   :  { %v11226_v39 = vrot.slane %v11215_v24, %v13936_v5  ;;  %v11222_v50 = vrot.slane %v11208_v15, %v13931_v63 }
0x6319   :  { %11253 = vbcast.lane.b32.xlu0 %v11251_v1, 256  ;;  %v11230_v35 = vrot.slane %v11222_v50, %v13936_v5 }
0x635f   :  { %v11095_v13 = vpop.permute.xlu0 %11094 }
0x6360   :  { %v11135_v53 = vmul.f32 %v11128_v0, %v11095_v13  ;;  %v11161_v57 = vsub.f32 1.0, %v11095_v13  ;;  %v11233_v2 = vmul.f32 %v11226_v39, %v11095_v13 }
0x6362   :  { %v11137_v6 = vsub.f32 1.0, %v11135_v53  ;;  %v11196_v42 = vsub.f32 %v11161_v57, %v11189_v20 }
0x6363   :  { %v11102_v44 = vpop.permute.xlu0 %11101 }
0x6364   :  { %v11198_v33 = vmul.f32 %v11196_v42, %v16142_v48  ;;  %v11136_v4 = vmul.f32 %v11132_v45, %v11102_v44  ;;  %v11162_v10 = vsub.f32 1.0, %v11102_v44  ;;  %11141 = vrot.lane.b32.xlu0 %v11137_v6, %s13667_s1  ;;  %v11234_v47 = vmul.f32 %v11230_v35, %v11102_v44 }
0x6365   :  { %v11149_v48 = vmul.f32 %v11095_v13, %v16359_v61  ;;  %v11150_v49 = vmul.f32 %v11102_v44, %v16364_v55  ;;  %v11239_v61 = vmul.f32 %v11196_v42, %v16160_v11 }
0x6366   :  { %v11235_v29 = vadd.f32 %v11233_v2, %v11198_v33  ;;  %v11138_v30 = vsub.f32 1.0, %v11136_v4  ;;  %v11197_v22 = vsub.f32 %v11162_v10, %v11193_v52 }
0x6368   :  { %v11199_v12 = vmul.f32 %v11197_v22, %v16150_v58  ;;  %11143 = vrot.lane.b32.xlu0 %v11138_v30, %s13667_s1  ;;  %v11237_v63 = vmul.f32 %v14098_v38, %v11235_v29  ;;  %v10713_v58 = vpop.permute.xlu0 %10712  ;;  %v11240_v54 = vmul.f32 %v11197_v22, %v16166_v23 }
0x636a   :  { %v11236_v36 = vadd.f32 %v11234_v47, %v11199_v12  ;;  %11269 = vrot.lane.b32.xlu1 %v11237_v63, %s13656_s26  ;;  %12024 = vst.msk [vmem:[%s16681_s22] sm:$0xff] %vm116_vm1, %v11237_v63 }
0x636c   :  { %v11238_v3 = vmul.f32 %v14098_v38, %v11236_v36 }
0x636e   :  { %11153 = vrot.lane.b32.xlu1 %v11149_v48, %s13668_s30  ;;  %11271 = vrot.lane.b32.xlu0 %v11238_v3, %s13656_s26  ;;  %12025 = vst.msk [vmem:[%s16681_s22 + $0x8] sm:$0xff] %vm116_vm1, %v11238_v3 }
0x6372   :  { %10714 = vrot.lane.b32.xlu0 %v10713_v58, %s13666_s6 }
0x6376   :  { %11155 = vrot.lane.b32.xlu0 %v11150_v49, %s13668_s30 }
0x6387   :  { %v11247_v25 = vpop.permute.xlu0 %11246 }
0x6388   :  { %v11255_v8 = vmul.f32 %v11247_v25, %v11189_v20 }
0x638a   :  { %v11257_v27 = vadd.f32 %v11255_v8, %v11239_v61 }
0x638b   :  { %v11254_v1 = vpop.permute.xlu0 %11253 }
0x638c   :  { %v11256_v34 = vmul.f32 %v11254_v1, %v11193_v52  ;;  %v11259_v37 = vmul.f32 %v14098_v38, %v11257_v27  ;;  %v11660_v1 = vrot.slane %v16388_v56, %v13936_v5 }
0x638e   :  { %v11258_v9 = vadd.f32 %v11256_v34, %v11240_v54  ;;  %v11668_v34 = vrot.slane %v16388_v56, %v13969_v41 }
0x6390   :  { %v11260_v55 = vmul.f32 %v14098_v38, %v11258_v9 }
0x63d6   :  { %v11142_v18 = vpop.permute.xlu0 %11141 }
0x63d7   :  { %v11147_v0 = vmul.f32 %v11142_v18, %v16168_v46 }
0x63da   :  { %v11144_v31 = vpop.permute.xlu0 %11143 }
0x63dc   :  { %v11270_v26 = vpop.permute.xlu1 %11269 }
0x63dd   :  { %v11275_v17 = vsel %vm116_vm1, %v11259_v37, %v11270_v26 }
0x63de   :  { %12922 = vmatpush3.msra.mxu0 %v11275_v17 }
0x63df   :  { %12924 = vmatmul.mubr.msk.f32.vlgmr.msra.gmra.mrb[64].mxu0 %vm116_vm1, %v16277_v59  ;;  %12926 = vmatprep.subr.mxu0 %v13655_v21  ;;  %v11148_v59 = vmul.f32 %v11144_v31, %v16187_v51 }
0x63e0   :  { %v11154_v11 = vpop.permute.xlu1 %11153  ;;  %v11272_v23 = vpop.permute.xlu0 %11271  ;;  %12928 = vmatprep.mubr.msk.f32.mxu0 %vm13657_vm0, %v13655_v21 }
0x63e1   :  { %v11159_v24 = vadd.f32 %v11154_v11, %v11147_v0  ;;  %v11276_v15 = vsel %vm116_vm1, %v11260_v55, %v11272_v23 }
0x63e2   :  { %12927 = vmatpush3.msra.mxu0 %v11276_v15 }
0x63e3   :  { %12021 = vst.msk [vmem:[%s16679_s20] sm:$0xff] %vm116_vm1, %v11159_v24  ;;  %12929 = vmatmul.mubr.msk.f32.vlgmr.msra.gmra.mrb[66].mxu0 %vm116_vm1, %v16285_v19  ;;  %12932 = vmatpush3.xpose.msk.msra.mxu1 %vm116_vm1, %v11159_v24  ;;  %v11569_v42 = vmul.f32 %v11159_v24, %v11159_v24 }
0x63e4   :  { %v10715_v38 = vpop.permute.xlu0 %10714  ;;  %12941 = vmatprep.subr.mxu1 %v13655_v21  ;;  %12936 = vmatprep.subr.mxu0 %v13655_v21 }
0x63e5   :  { %v10718_v46 = vcombine.low %v10713_v58, %v10715_v38  ;;  %12938 = vmatprep.mubr.msk.f32.mxu0 %vm13657_vm0, %v13655_v21  ;;  %v11571_v50 = vsel %vm116_vm1, %v11569_v42, 0.0 }
0x63e7   :  { %v10725_v13 = vrot.slane %v10718_v46, %v13837_v16 }
0x63e8   :  { %v11156_v60 = vpop.permute.xlu0 %11155 }
0x63e9   :  { %v11160_v20 = vadd.f32 %v11156_v60, %v11148_v59  ;;  %12934 = vmatmul.mubr.msk.f32.vlgmr.msra.gmra.mrb[66].mxu1 %vm116_vm1, %v10725_v13  ;;  %v11577_v19 = vmul.f32 %v10725_v13, %v10725_v13  ;;  %v10726_v53 = vcombine.high %v10725_v13, %v13655_v21 }
0x63ea   :  { %12942 = vmatpush3.msra.mxu1 %v11159_v24  ;;  %12943 = vmatprep.mubr.msk.f32.mxu1 %vm13657_vm0, %v13655_v21 }
0x63eb   :  { %12022 = vst.msk [vmem:[%s16679_s20 + $0x8] sm:$0xff] %vm116_vm1, %v11160_v20  ;;  %12937 = vmatpush3.xpose.msk.msra.mxu0 %vm116_vm1, %v11160_v20  ;;  %v11579_v51 = vsel %vm632_vm5, %v11577_v19, 0.0  ;;  %v11578_v57 = vmul.f32 %v10726_v53, %v10726_v53  ;;  %v11570_v45 = vmul.f32 %v11160_v20, %v11160_v20  ;;  %13099 = vmatprep.subr.bf16.mxu1 %v13654_v14 }
0x63ec   :  { %11580 = vadd.xlane.f32.xlu1 %v11579_v51  ;;  %12946 = vmatprep.subr.mxu0 %v13655_v21 }
0x63ed   :  { %v11582_v6 = vsel %vm632_vm5, %v11578_v57, 0.0  ;;  %v11574_v39 = vsel %vm116_vm1, %v11570_v45, 0.0 }
0x63ee   :  { %11583 = vadd.xlane.f32.xlu0 %v11582_v6  ;;  %12939 = vmatmul.mubr.msk.f32.vlgmr.msra.gmra.mrb[68].mxu0 %vm116_vm1, %v10726_v53 }
0x63ef   :  { %12947 = vmatpush3.msra.mxu0 %v11160_v20  ;;  %12948 = vmatprep.mubr.msk.f32.mxu0 %vm13657_vm0, %v13655_v21 }
0x63f0   :  { %11575 = vadd.xlane.f32.xlu1 %v11574_v39 }
0x63f2   :  { %11572 = vadd.xlane.f32.xlu0 %v11571_v50 }
0x6401   :  { %10753 = vrot.lane.b32.xlu1 %v16350_v43, %s13669_s15 }
0x6408   :  { %10749 = vrot.lane.b32.xlu0 %v16350_v43, %s16720_s29 }
0x6479   :  { %v11581_v14 = vpop.xlane.xlu1 %11580 }
0x647a   :  { %v11590_v2 = vrot.slane %v11581_v14, %v13936_v5  ;;  %v11594_v4 = vrot.slane %v11581_v14, %v13969_v41 }
0x647b   :  { %v11584_v52 = vpop.xlane.xlu0 %11583 }
0x647c   :  { %v11598_v44 = vrot.slane %v11584_v52, %v13936_v5  ;;  %v11602_v29 = vrot.slane %v11584_v52, %v13969_v41 }
0x647d   :  { %v11576_v33 = vpop.xlane.xlu1 %11575 }
0x647e   :  { %v11609_v30 = vmul.f32 %v11598_v44, %v11576_v33  ;;  %v11610_v36 = vmul.f32 %v11602_v29, %v11576_v33 }
0x647f   :  { %v11573_v10 = vpop.xlane.xlu0 %11572 }
0x6480   :  { %v11607_v22 = vmul.f32 %v11590_v2, %v11573_v10  ;;  %v11608_v35 = vmul.f32 %v11594_v4, %v11573_v10  ;;  %v11613_v48 = vadd.f32 1e-06, %v11609_v30  ;;  %v11614_v25 = vadd.f32 1e-06, %v11610_v36 }
0x6481   :  { %v10754_v58 = vpop.permute.xlu1 %10753 }
0x6482   :  { %v11611_v12 = vadd.f32 1e-06, %v11607_v22  ;;  %v11612_v47 = vadd.f32 1e-06, %v11608_v35 }
0x6483   :  { %v10750_v63 = vpop.permute.xlu0 %10749 }
0x6484   :  { %13582 = vrsqrt.f32 %v11611_v12  ;;  %v10752_v3 = vmax.f32 %v16350_v43, %v10750_v63 }
0x6485   :  { %13584 = vrsqrt.f32 %v11612_v47 }
0x6486   :  { %v10756_v49 = vmax.f32 %v10752_v3, %v10754_v58  ;;  %13586 = vrsqrt.f32 %v11613_v48 }
0x6487   :  { %13588 = vrsqrt.f32 %v11614_v25 }
0x6488   :  { %10767 = vrot.lane.b32.xlu0 %v10756_v49, %s16722_s4  ;;  %10761 = vrot.lane.b32.xlu1 %v10756_v49, %s16721_s8  ;;  %v10757_v10 = vsub.f32 %v16350_v43, %v10756_v49 }
0x648a   :  { %v10758_v29 = vmul.f32 1.442695, %v10757_v10  ;;  %v11261_v10 = vsel %vm632_vm5, %v16447_v32, 0.0 }
0x648e   :  { %v13583_v61 = vpop.eup %13582 }
0x648f   :  { %v13585_v8 = vpop.eup %13584  ;;  %11624 = vperm.xlu1 %13172, %v13583_v61  }
0x6490   :  { %11627 = vperm.xlu0 %13173, %v13585_v8   ;;  %v13587_v27 = vpop.eup %13586 }
0x6491   :  { %v13589_v54 = vpop.eup %13588 }
0x6493   :  { %11630 = vperm.xlu1 %13172, %v13587_v27  }
0x6494   :  { %11663 = vbcast.lane.b32.xlu0 %v11660_v1, 312 }
0x6497   :  { %11633 = vperm.xlu1 %13172, %v13589_v54  }
0x649b   :  { %11671 = vbcast.lane.b32.xlu1 %v11668_v34, 312 }
0x64b2   :  { %v16565_v9 = vpop.f32.mrb[64].mxu0 }
0x64b3   :  { %v12925_v18 = vpop.f32.mrb[65].mxu0 }
0x64b6   :  { %v16567_v37 = vpop.f32.mrb[66].mxu0 }
0x64b7   :  { %v12930_v31 = vpop.f32.mrb[67].mxu0 }
0x64bc   :  { %v11489_v26 = vpop.f32.mrb[66].mxu1 }
0x64bd   :  { %v12935_v17 = vpop.f32.mrb[67].mxu1 }
0x64c1   :  { %v11565_v55 = vpop.f32.mrb[68].mxu0 }
0x64c2   :  { %v12940_v0 = vpop.f32.mrb[69].mxu0 }
0x64fa   :  { %v10768_v11 = vpop.permute.xlu0 %10767  ;;  %v10762_v23 = vpop.permute.xlu1 %10761 }
0x64fb   :  { %v10770_v24 = vsub.f32 %v16350_v43, %v10768_v11  ;;  %v10764_v15 = vsub.f32 %v16350_v43, %v10762_v23 }
0x64fd   :  { %v10771_v38 = vmul.f32 1.442695, %v10770_v24  ;;  %v10765_v46 = vmul.f32 1.442695, %v10764_v15 }
0x64ff   :  { %13590 = vpow2.f32 %v10771_v38 }
0x6500   :  { %13592 = vpow2.f32 %v10765_v46 }
0x6501   :  { %13594 = vpow2.f32 %v10758_v29 }
0x6509   :  { %v13591_v56 = vpop.eup %13590 }
0x650a   :  { %v13593_v59 = vpop.eup %13592  ;;  %10779 = vrot.lane.b32.xlu1 %v13591_v56, %s13669_s15 }
0x650b   :  { %10774 = vrot.lane.b32.xlu0 %v13593_v59, %s16720_s29  ;;  %v13595_v30 = vpop.eup %13594 }
0x650e   :  { %v11625_v13 = vpop.permute.xlu1 %11624 }
0x650f   :  { %v11628_v20 = vpop.permute.xlu0 %11627  ;;  %v11638_v53 = vrot.slane %v11625_v13, %v13989_v28 }
0x6510   :  { %v11642_v19 = vrot.slane %v11628_v20, %v13989_v28 }
0x6512   :  { %v11631_v60 = vpop.permute.xlu1 %11630  ;;  %v11651_v57 = vsel %vm436_vm7, %v11642_v19, %v11638_v53 }
0x6513   :  { %v11646_v6 = vrot.slane %v11631_v60, %v13989_v28  ;;  %v11655_v42 = vmul.f32 %v11651_v57, %v11489_v26  ;;  %v11664_v39 = vpop.permute.xlu0 %11663 }
0x6515   :  { %v11673_v14 = vmul.f32 %v11664_v39, %v11655_v42 }
0x6516   :  { %v11634_v51 = vpop.permute.xlu1 %11633 }
0x6517   :  { %v11650_v45 = vrot.slane %v11634_v51, %v13989_v28  ;;  %v11675_v2 = vsel %vm632_vm5, %v11673_v14, -inf }
0x6519   :  { %v11652_v50 = vsel %vm436_vm7, %v11650_v45, %v11646_v6 }
0x651a   :  { %v11656_v52 = vmul.f32 %v11652_v50, %v11565_v55  ;;  %v11672_v44 = vpop.permute.xlu1 %11671 }
0x651c   :  { %v11674_v33 = vmul.f32 %v11672_v44, %v11656_v52 }
0x651e   :  { %v11678_v4 = vsel %vm632_vm5, %v11674_v33, -inf }
0x652a   :  { %11676 = vmax.xlane.f32.xlu0 %v11675_v2 }
0x652e   :  { %11679 = vmax.xlane.f32.xlu1 %v11678_v4 }
0x657c   :  { %v10780_v35 = vpop.permute.xlu1 %10779 }
0x657d   :  { %v10775_v28 = vpop.permute.xlu0 %10774 }
0x657e   :  { %v10777_v22 = vadd.f32 %v13595_v30, %v10775_v28 }
0x6580   :  { %v10782_v12 = vadd.f32 %v10780_v35, %v10777_v22 }
0x6582   :  { %13596 = vrcp.f32 %v10782_v12 }
0x658c   :  { %v13597_v47 = vpop.eup %13596 }
0x658d   :  { %10786 = vrot.lane.b32.xlu0 %v13597_v47, %s16721_s8  ;;  %10790 = vrot.lane.b32.xlu1 %v13597_v47, %s16722_s4  ;;  %v10784_v63 = vmul.f32 %v13597_v47, %v13595_v30 }
0x658f   :  { %v11708_v11 = vrot.slane %v10784_v63, %v13969_v41  ;;  %v11700_v23 = vrot.slane %v10784_v63, %v13936_v5 }
0x65b7   :  { %v11677_v36 = vpop.xlane.xlu0 %11676 }
0x65b8   :  { %v11681_v25 = vsub.f32 %v11673_v14, %v11677_v36 }
0x65ba   :  { %v11683_v8 = vmul.f32 1.442695, %v11681_v25 }
0x65bb   :  { %v11680_v61 = vpop.xlane.xlu1 %11679 }
0x65bc   :  { %v11682_v27 = vsub.f32 %v11674_v33, %v11680_v61  ;;  %13598 = vpow2.f32 %v11683_v8 }
0x65be   :  { %v11685_v1 = vmul.f32 1.442695, %v11682_v27 }
0x65c0   :  { %13600 = vpow2.f32 %v11685_v1 }
0x65c6   :  { %v13599_v54 = vpop.eup %13598 }
0x65c7   :  { %v11687_v34 = vsel %vm632_vm5, %v13599_v54, 0.0 }
0x65ca   :  { %v13601_v18 = vpop.eup %13600 }
0x65cb   :  { %v11690_v31 = vsel %vm632_vm5, %v13601_v18, 0.0 }
0x65ff   :  { %v10787_v48 = vpop.permute.xlu0 %10786  ;;  %v10791_v26 = vpop.permute.xlu1 %10790 }
0x6600   :  { %v10789_v3 = vmul.f32 %v13593_v59, %v10787_v48  ;;  %v10793_v17 = vmul.f32 %v13591_v56, %v10791_v26 }
0x6602   :  { %v11718_v58 = vrot.slane %v10789_v3, %v13936_v5  ;;  %v11726_v49 = vrot.slane %v10789_v3, %v13969_v41  ;;  %v11746_v55 = vrot.slane %v10793_v17, %v13936_v5  ;;  %v11754_v0 = vrot.slane %v10793_v17, %v13969_v41 }
0x6604   :  { %11721 = vbcast.lane.b32.xlu0 %v11718_v58, 322  ;;  %11729 = vbcast.lane.b32.xlu1 %v11726_v49, 322 }
0x6623   :  { %11688 = vadd.xlane.f32.xlu0 %v11687_v34 }
0x6628   :  { %11691 = vadd.xlane.f32.xlu1 %v11690_v31 }
0x6639   :  { %11757 = vbcast.lane.b32.xlu1 %v11754_v0, 324  ;;  %11749 = vbcast.lane.b32.xlu0 %v11746_v55, 324 }
0x663d   :  { %11711 = vbcast.lane.b32.xlu1 %v11708_v11, 320  ;;  %11703 = vbcast.lane.b32.xlu0 %v11700_v23, 320 }
0x6676   :  { %v11722_v24 = vpop.permute.xlu0 %11721  ;;  %v11730_v38 = vpop.permute.xlu1 %11729 }
0x66b0   :  { %v11689_v15 = vpop.xlane.xlu0 %11688 }
0x66b1   :  { %13602 = vrcp.f32 %v11689_v15 }
0x66b4   :  { %v11750_v60 = vpop.permute.xlu0 %11749 }
0x66b5   :  { %v11692_v46 = vpop.xlane.xlu1 %11691  ;;  %v11759_v41 = vmul.f32 %v11750_v60, %v16565_v9 }
0x66b6   :  { %13604 = vrcp.f32 %v11692_v46 }
0x66b8   :  { %v11704_v57 = vpop.permute.xlu0 %11703 }
0x66b9   :  { %v11758_v5 = vpop.permute.xlu1 %11757  ;;  %v11713_v6 = vmul.f32 %v11704_v57, %v16565_v9 }
0x66ba   :  { %v11760_v51 = vmul.f32 %v11758_v5, %v16567_v37 }
0x66bb   :  { %v13603_v59 = vpop.eup %13602 }
0x66bc   :  { %v11695_v56 = vmul.f32 %v13603_v59, %v13599_v54 }
0x66bd   :  { %v11712_v42 = vpop.permute.xlu1 %11711 }
0x66be   :  { %v11731_v13 = vmul.f32 %v11722_v24, %v11695_v56  ;;  %v11714_v44 = vmul.f32 %v11712_v42, %v16567_v37 }
0x66c0   :  { %v13605_v20 = vpop.eup %13604  ;;  %11735 = vrot.lane.b32.xlu0 %v11731_v13, %s13656_s26 }
0x66c1   :  { %v11696_v19 = vmul.f32 %v13605_v20, %v13601_v18 }
0x66c3   :  { %v11732_v53 = vmul.f32 %v11730_v38, %v11696_v19 }
0x66c4   :  { %11763 = vrot.lane.b32.xlu0 %v11759_v41, %s13656_s26 }
0x66c5   :  { %11737 = vrot.lane.b32.xlu1 %v11732_v53, %s13656_s26 }
0x66c9   :  { %11765 = vrot.lane.b32.xlu1 %v11760_v51, %s13656_s26 }
0x6732   :  { %v11736_v45 = vpop.permute.xlu0 %11735 }
0x6733   :  { %v11741_v39 = vadd.f32 %v11736_v45, %v11713_v6 }
0x6736   :  { %v11764_v50 = vpop.permute.xlu0 %11763 }
0x6737   :  { %v11769_v14 = vadd.f32 %v11764_v50, %v11741_v39  ;;  %v11738_v52 = vpop.permute.xlu1 %11737 }
0x6738   :  { %v11742_v33 = vadd.f32 %v11738_v52, %v11714_v44 }
0x6739   :  { %11772 = vrot.lane.b32.xlu0 %v11769_v14, %s13666_s6 }
0x673b   :  { %v11766_v2 = vpop.permute.xlu1 %11765 }
0x673c   :  { %v11770_v4 = vadd.f32 %v11766_v2, %v11742_v33 }
0x673e   :  { %11847 = vrot.lane.b32.xlu1 %v11770_v4, %s13666_s6 }
0x6762   :  { %11262 = vadd.xlane.f32.xlu1 %v11261_v10 }
0x67ab   :  { %v11773_v29 = vpop.permute.xlu0 %11772 }
0x67ac   :  { %12030 = vst.msk [vmem:[%s16684_s25] sm:$0x3] %vm632_vm5, %v11773_v29  ;;  %12944 = vmatmul.mubr.msk.f32.vlgmr.msra.gmra.mrb[68].mxu1 %vm116_vm1, %v11773_v29 }
0x67ad   :  { %13101 = vmatpush3.bf16.msra.mxu1 %v14273_v40  ;;  %12955 = vmatprep.mubr.msk.f32.mxu1 %vm13657_vm0, %v13655_v21 }
0x67b0   :  { %v11848_v9 = vpop.permute.xlu1 %11847 }
0x67b1   :  { %12031 = vst.msk [vmem:[%s16684_s25 + $0x2] sm:$0x3] %vm632_vm5, %v11848_v9  ;;  %12949 = vmatmul.mubr.msk.f32.vlgmr.msra.gmra.mrb[70].mxu0 %vm116_vm1, %v11848_v9 }
0x67ef   :  { %v11263_v37 = vpop.xlane.xlu1 %11262 }
0x67f0   :  { %v11264_v30 = vsub.f32 1.0, %v11263_v37 }
0x67f2   :  { %v11265_v28 = vmul.f32 %v11264_v30, %v16462_v62 }
0x67f4   :  { %v11266_v22 = vadd.f32 %v11265_v28, %v16447_v32 }
0x67f6   :  { %12026 = vst.msk [vmem:[%s16682_s23] sm:$0x3] %vm632_vm5, %v11266_v22 }
0x687f   :  { %v11842_v40 = vpop.f32.mrb[68].mxu1 }
0x6880   :  { %12019 = vst.msk [vmem:[%s16678_s19] sm:$0x3] %vm632_vm5, %v11842_v40  ;;  %v12945_v35 = vpop.f32.mrb[69].mxu1 }
0x6884   :  { %v11917_v12 = vpop.f32.mrb[70].mxu0 }
0x6885   :  { %v11921_v47 = vcombine.low %v11842_v40, %v11917_v12  ;;  %12020 = vst.msk [vmem:[%s16678_s19 + $0x2] sm:$0x3] %vm632_vm5, %v11917_v12  ;;  %v12950_v32 = vpop.f32.mrb[71].mxu0  ;;  %s13673_s19 = smov [#allocation2]  }
0x6886   :  { %s12037_s13 = sshll.u32 %s13673_s19, 4  ;;  %s12038_s13 = int_to_ptr.vmem [resolvable:$true] %s12037_s13 }
0x6887   :  { %v11928_v62 = vrot.slane %v11921_v47, %v13837_v16  ;;  %p13633_p1 = scmp.lt.s32.totalorder %s12038_s13, %s12038_s13 }
0x6889   :  { %v11929_v63 = vcombine.high %v11928_v62, %v13655_v21 }
0x688b   :  { %11931 = vrot.lane.b32.xlu0 %v11929_v63, %s13656_s26  ;;  %s13628_s26 = scalar_lea.vmem %s12038_s13, 256 }
0x688c   :  { %p13629_p0 = scmp.ne.s32.totalorder %s12038_s13, %s13628_s26  ;;  %p13634_p2 = scmp.lt.s32.totalorder %s13628_s26, %s13628_s26 }
0x688e   :  { %p13635_p3 = por %p13634_p2, %p13633_p1 }
0x688f   :  { %12015 = vrot.lane.b32.xlu0 %v16331_v7, %s13668_s30 }
0x6890   :  { %p13636_p4 = pnand %p13635_p3, %p13629_p0 }
0x68fd   :  { %v11932_v36 = vpop.permute.xlu0 %11931 }
0x68fe   :  { %v11934_v48 = vsel %vm116_vm1, %v11928_v62, %v11932_v36 }
0x68ff   :  { %12956 = vmatmul.mubr.msk.f32.vlgmr.msra.gmra.mrb[70].mxu1 %vm1561_vm10, %v11934_v48 }
0x6901   :  { %v12016_v3 = vpop.permute.xlu0 %12015 }
0x6902   :  { %12018 = vst.msk [vmem:[%s16677_s18] sm:$0x3] %vm12012_vm2, %v12016_v3 }
0x69d2   :  { %v12004_v16 = vpop.f32.mrb[70].mxu1 }
0x69d3   :  { %v12008_v21 = vadd.f32 %v12004_v16, %v16350_v43  ;;  %v12957_v58 = vpop.f32.mrb[71].mxu1 }
0x69d5   :  { %12010 = vst.msk [vmem:[#allocation2 + $0xe] sm:$0x3] %vm632_vm5, %v12008_v21 }
0x69d6   :  { %13639 = shalt.err (!%p13636_p4)
}
0x69d7   :  { %s13640_s18 = scalar_lea.hbm %s16675_s16, 256 }
0x69d8   :  { %p13641_p5 = scmp.ne.s32.totalorder %s16675_s16, %s13640_s18  ;;  %p13644_p6 = scmp.lt.u32.totalorder %s13640_s18, %s16675_s16 }
0x69da   :  { %p13646_p7 = pnand %p13644_p6, %p13641_p5 }
0x69dc   :  { %13649 = shalt.err (!%p13646_p7)
}
0x69dd   :  { %12043 = dma.vmem_to_hbm [thread:$0]  %s12038_s13, 256, %s16675_s16, [#allocation3], %s13658_s5, %s13658_s5, %s16721_s8  }
0x69de   :  { %13650 = dma.done.wait [#allocation3], 256  }
0x69df   :  { %13651 = vsyncadd [#allocation3], 4294967040 }
0x69e0   :  { %12083 = vsyncpa [#allocation3], 1 }

</bundles_post_ra>
